<compile_context>
chip_gen: v7x
topology: tpu7x:2x2x1
jax: 0.10.0
libtpu: 0.0.40
codegen_flags: <defaults>
</compile_context>

<pallas_src>
import functools

import jax
import jax.numpy as jnp
from jax.experimental import pallas as pl
from jax.experimental.pallas import tpu as pltpu

LANE = 128        # TPU lane width: conv outputs are channel-padded to this.
FC_HIDDEN = 128
BN_EPS = 1e-5


@functools.lru_cache(maxsize=None)
def _vmem_limit_bytes():
    """~3/4 of physical VMEM (96 MiB on v5e/v6e, 48 MiB on v7x); safe fallback 48 MiB."""
    cap = 64 * 1024 * 1024
    try:
        info = pltpu.get_tpu_info()
        cap = int(getattr(info, "vmem_capacity_bytes", cap)) or cap
    except Exception:
        pass
    return max(32 * 1024 * 1024, min((cap * 3) // 4, 100 * 1024 * 1024))


def _pick_tile(lp):
    """Largest power-of-two tile (<=128) of pooled output rows that divides lp."""
    for cand in (128, 64, 32, 16, 8):
        if lp % cand == 0:
            return cand
    return lp


def _pick_nb(n, tlp, m_target=128):
    """Batch tile folded into the matmul M dimension so NB*tlp <= m_target."""
    nb = 1
    while (nb * 2) <= n and n % (nb * 2) == 0 and (nb * 2) * tlp <= m_target:
        nb *= 2
    return nb


# ----------------------- fused conv + BN + ReLU + pool kernel -----------------------

def _conv_bn_relu_pool_kernel(xb_ref, w_ref, scale_ref, shift_ref, o_ref,
                              *, ko, tlp, nb, cout, single_tile):
    if single_tile:
        p0 = 0                                              # static offset in-kernel
    else:
        p0 = pl.multiple_of(pl.program_id(1) * tlp, tlp)    # 8-aligned window start

    # One aligned window load per grid step (slab already bf16 -> no per-tap cast).
    win = xb_ref[:, pl.ds(p0, tlp + ko - 1), :]             # [nb, tlp+ko-1, cb] bf16
    cb = win.shape[-1]

    # Register accumulator; one 256-wide MXU matmul per tap (even|odd halves merged).
    acc = jnp.zeros((nb * tlp, 2 * cout), jnp.float32)
    for m in range(ko):                                     # statically unrolled
        xm = win[:, m:m + tlp, :].reshape(nb * tlp, cb)
        acc = acc + jnp.dot(xm, w_ref[m], preferred_element_type=jnp.float32)

    # BN affine (folded; duplicated across the even/odd halves), then MaxPool(2,2)+ReLU.
    y = acc * scale_ref[...] + shift_ref[...]
    pooled = jnp.maximum(jnp.maximum(y[:, :cout], y[:, cout:]), 0.0)
    o_ref[...] = pooled.reshape(nb, tlp, cout).astype(o_ref.dtype)


def conv_bn_relu_pool(xb, w_merged, scale2, shift2, *, lp, out_dtype=jnp.bfloat16):
    """Fused Conv1d + BatchNorm1d(eval) + ReLU + MaxPool1d(2,2).

    xb:       [N, J, Cb]        bf16  row-blocked, channels-last, zero-padded slab
    w_merged: [Ko, Cb, 2*128]   bf16  folded taps (even | odd conv positions)
    scale2/shift2: [1, 2*128]   f32   folded BN affine, duplicated over both halves
    returns   [N, lp, 128]      out_dtype  pooled activation (padded channels are 0)
    """
    n, jb, cb = xb.shape
    ko = w_merged.shape[0]
    cout = w_merged.shape[-1] // 2
    tlp = _pick_tile(lp)
    n_tiles = lp // tlp
    nb = _pick_nb(n, tlp)
    kernel = functools.partial(_conv_bn_relu_pool_kernel, ko=ko, tlp=tlp, nb=nb,
                               cout=cout, single_tile=(n_tiles == 1))
    return pl.pallas_call(
        kernel,
        out_shape=jax.ShapeDtypeStruct((n, lp, cout), out_dtype),
        grid_spec=pltpu.PrefetchScalarGridSpec(
            num_scalar_prefetch=0,
            grid=(n // nb, n_tiles),
            in_specs=[
                pl.BlockSpec((nb, jb, cb), lambda i, t: (i, 0, 0)),        # slab resident per batch tile
                pl.BlockSpec((ko, cb, 2 * cout), lambda i, t: (0, 0, 0)),  # merged weights resident
                pl.BlockSpec((1, 2 * cout), lambda i, t: (0, 0)),
                pl.BlockSpec((1, 2 * cout), lambda i, t: (0, 0)),
            ],
            out_specs=pl.BlockSpec((nb, tlp, cout), lambda i, t: (i, t, 0)),
        ),
        compiler_params=pltpu.CompilerParams(
            dimension_semantics=("parallel", "parallel"),
            vmem_limit_bytes=_vmem_limit_bytes(),
        ),
    )(xb, w_merged, scale2, shift2)


# ------------------------------ fused classifier head ------------------------------

def _mlp_kernel(x_ref, w1_ref, b1_ref, w2_ref, b2_ref, o_ref):
    # fc1 (bf16 MXU inputs, f32 accumulate) -> ReLU -> fc2 (kept f32 for fidelity).
    h = jnp.dot(x_ref[...], w1_ref[...], preferred_element_type=jnp.float32) + b1_ref[...]
    h = jnp.maximum(h, 0.0)
    # TODO(synk): Dropout(0.5) is identity in eval mode; training-mode dropout not implemented.
    o_ref[...] = jnp.dot(h, w2_ref[...], preferred_element_type=jnp.float32) + b2_ref[...]


def mlp_head(flat, w1, b1, w2, b2):
    n, f = flat.shape
    h = w1.shape[1]
    c = w2.shape[1]
    nb = n
    for cand in (256, 128, 64, 32, 16, 8):
        if n % cand == 0:
            nb = cand
            break
    return pl.pallas_call(
        _mlp_kernel,
        out_shape=jax.ShapeDtypeStruct((n, c), jnp.float32),
        grid_spec=pltpu.PrefetchScalarGridSpec(
            num_scalar_prefetch=0,
            grid=(n // nb,),
            in_specs=[
                pl.BlockSpec((nb, f), lambda i: (i, 0)),
                pl.BlockSpec((f, h), lambda i: (0, 0)),
                pl.BlockSpec((1, h), lambda i: (0, 0)),
                pl.BlockSpec((h, c), lambda i: (0, 0)),
                pl.BlockSpec((1, c), lambda i: (0, 0)),
            ],
            out_specs=pl.BlockSpec((nb, c), lambda i: (i, 0)),
        ),
        compiler_params=pltpu.CompilerParams(
            dimension_semantics=("parallel",),
            vmem_limit_bytes=_vmem_limit_bytes(),
        ),
    )(flat, w1, b1, w2, b2)


# --------------------------------- JAX-side glue ------------------------------------

def compute_shapes(signal_length):
    l1 = (signal_length + 2 * 24 - 64) // 16 + 1
    lp1 = l1 // 2
    l2 = (lp1 + 2 * 16 - 32) + 1
    lp2 = l2 // 2
    l3 = (lp2 + 2 * 8 - 16) + 1
    lp3 = l3 // 2
    return lp1, lp2, lp3


def _block_input_stride16(x, lp, ko):
    """[N, 1, L] raw signal -> row-blocked bf16 slab [N, lp+ko-1, 32] (32 samples/block)."""
    n, _, l = x.shape
    b = 32                                  # 2 * stride(=16) samples per block
    j = lp + ko - 1
    back = b * j - l - 24
    assert back >= 0
    xs = jnp.pad(x[:, 0, :], ((0, 0), (24, back)))
    return xs.reshape(n, j, b).astype(jnp.bfloat16)


def _pair_rows(y, pad, lp, ko):
    """bf16 activation [N, L, C] -> conv-padded, row-paired bf16 slab [N, lp+ko-1, 2C]."""
    n, l, c = y.shape
    j = lp + ko - 1
    back = 2 * j - l - pad
    assert back >= 0
    y = jnp.pad(y, ((0, 0), (pad, back), (0, 0)))
    return y.reshape(n, j, 2 * c)           # contiguous collapse: free reshape


def simple1dcnn_forward(x, prep, cfg):
    lp1, lp2, lp3 = cfg["lp1"], cfg["lp2"], cfg["lp3"]
    xb1 = _block_input_stride16(x, lp1, cfg["ko1"])
    y1 = conv_bn_relu_pool(xb1, prep["w1m"], prep["s1"], prep["t1"], lp=lp1)
    xb2 = _pair_rows(y1, 16, lp2, cfg["ko2"])
    y2 = conv_bn_relu_pool(xb2, prep["w2m"], prep["s2"], prep["t2"], lp=lp2)
    xb3 = _pair_rows(y2, 8, lp3, cfg["ko3"])
    y3 = conv_bn_relu_pool(xb3, prep["w3m"], prep["s3"], prep["t3"], lp=lp3)
    flat = y3.reshape(y3.shape[0], lp3 * LANE)   # channel-major flatten folded into fc1 weight
    logits = mlp_head(flat, prep["w_fc1"], prep["b_fc1"], prep["w_fc2"], prep["b_fc2"])
    return logits[:, :cfg["num_classes"]]


# --------------------------- one-time parameter folding -----------------------------

def _fold_conv_weight(w, stride, cin_pad, cb_pad):
    """Fold Conv1d weight [Cout, Cin, K] (given stride) + MaxPool1d(2,2) into ONE
    stride-1 block-conv weight stack over a row-blocked (B = 2*stride rows/block)
    channels-last input.  Even (pool-left) and odd (pool-right) conv positions are
    merged along the output-channel axis -> [Ko, cb_pad, 256] bf16."""
    cout, cin, k = w.shape
    b = 2 * stride
    ko = -(-(k + stride) // b)
    wk = jnp.transpose(w, (2, 1, 0)).astype(jnp.float32)            # [K, Cin, Cout]
    wk = jnp.pad(wk, ((0, 0), (0, cin_pad - cin), (0, LANE - cout)))
    zero_tap = jnp.zeros((cin_pad, LANE), jnp.float32)

    def build(offset):
        taps = []
        for m in range(ko):
            rows = []
            for o in range(b):
                kk = m * b + o - offset
                rows.append(wk[kk] if 0 <= kk < k else zero_tap)
            tap = jnp.concatenate(rows, axis=0)                     # [b*cin_pad, 128]
            if cb_pad > b * cin_pad:
                tap = jnp.pad(tap, ((0, cb_pad - b * cin_pad), (0, 0)))
            taps.append(tap)
        return jnp.stack(taps, axis=0)                              # [Ko, cb_pad, 128]

    merged = jnp.concatenate([build(0), build(stride)], axis=-1)    # [Ko, cb_pad, 256]
    return merged.astype(jnp.bfloat16), ko


def _fold_bn(gamma, beta, mean, var):
    scale = gamma / jnp.sqrt(var + BN_EPS)
    shift = beta - mean * scale
    scale = jnp.pad(scale, (0, LANE - scale.shape[0]))
    shift = jnp.pad(shift, (0, LANE - shift.shape[0]))   # padded channels: exactly 0
    scale2 = jnp.concatenate([scale, scale]).reshape(1, 2 * LANE).astype(jnp.float32)
    shift2 = jnp.concatenate([shift, shift]).reshape(1, 2 * LANE).astype(jnp.float32)
    return scale2, shift2


def prepare_params(p, signal_length, num_classes):
    assert num_classes <= LANE
    lp1, lp2, lp3 = compute_shapes(signal_length)
    c3 = p["w3"].shape[0]

    w1m, ko1 = _fold_conv_weight(p["w1"], 16, 1, 32)          # natural Cb = 32 (no 128-pad)
    w2m, ko2 = _fold_conv_weight(p["w2"], 1, LANE, 2 * LANE)  # Cb = 256
    w3m, ko3 = _fold_conv_weight(p["w3"], 1, LANE, 2 * LANE)  # Cb = 256
    s1, t1 = _fold_bn(p["g1"], p["b1"], p["rm1"], p["rv1"])
    s2, t2 = _fold_bn(p["g2"], p["b2"], p["rm2"], p["rv2"])
    s3, t3 = _fold_bn(p["g3"], p["b3"], p["rm3"], p["rv3"])

    # fc1: fold PyTorch's channel-major flatten of [N, 64, lp3] and the channel
    # padding (64 -> 128) into a one-time column permutation of the weight.
    w_fc1 = p["fc1_w"].reshape(FC_HIDDEN, c3, lp3)        # [out, c, l]
    w_fc1 = jnp.transpose(w_fc1, (2, 1, 0))               # [l, c, out]
    w_fc1 = jnp.pad(w_fc1, ((0, 0), (0, LANE - c3), (0, 0)))
    w_fc1 = w_fc1.reshape(lp3 * LANE, FC_HIDDEN).astype(jnp.bfloat16)
    b_fc1 = p["fc1_b"].reshape(1, FC_HIDDEN).astype(jnp.float32)

    # fc2: lane-dense 128-wide logits; kept f32 for final-logits fidelity.
    w_fc2 = jnp.pad(p["fc2_w"].T, ((0, 0), (0, LANE - num_classes))).astype(jnp.float32)
    b_fc2 = jnp.pad(p["fc2_b"], (0, LANE - num_classes)).reshape(1, LANE).astype(jnp.float32)

    prep = dict(w1m=w1m, s1=s1, t1=t1, w2m=w2m, s2=s2, t2=t2, w3m=w3m, s3=s3, t3=t3,
                w_fc1=w_fc1, b_fc1=b_fc1, w_fc2=w_fc2, b_fc2=b_fc2)
    cfg = dict(lp1=lp1, lp2=lp2, lp3=lp3, ko1=ko1, ko2=ko2, ko3=ko3,
               num_classes=num_classes)
    return prep, cfg


# -------------------------- reference / params / main --------------------------------

def reference_forward(x, p):
    """Pure-JAX (XLA) eval-mode reference of the PyTorch module, for validation."""
    def conv1d(y, w, stride, pad):
        return jax.lax.conv_general_dilated(
            y, w, window_strides=(stride,), padding=[(pad, pad)],
            dimension_numbers=("NCH", "OIH", "NCH"),
            precision=jax.lax.Precision.HIGHEST)

    def bn(y, g, b, m, v):
        inv = g / jnp.sqrt(v + BN_EPS)
        return y * inv[None, :, None] + (b - m * inv)[None, :, None]

    def pool(y):
        lp = y.shape[-1] // 2
        return jnp.maximum(y[..., 0:2 * lp:2], y[..., 1:2 * lp:2])

    y = pool(jnp.maximum(bn(conv1d(x, p["w1"], 16, 24),
                            p["g1"], p["b1"], p["rm1"], p["rv1"]), 0.0))
    y = pool(jnp.maximum(bn(conv1d(y, p["w2"], 1, 16),
                            p["g2"], p["b2"], p["rm2"], p["rv2"]), 0.0))
    y = pool(jnp.maximum(bn(conv1d(y, p["w3"], 1, 8),
                            p["g3"], p["b3"], p["rm3"], p["rv3"]), 0.0))
    flat = y.reshape(y.shape[0], -1)
    h = jnp.maximum(jnp.dot(flat, p["fc1_w"].T, precision="highest") + p["fc1_b"], 0.0)
    return jnp.dot(h, p["fc2_w"].T, precision="highest") + p["fc2_b"]


def init_params(key, num_classes, n_features):
    ks = jax.random.split(key, 16)
    f32 = jnp.float32

    def nrm(k, shape, s=0.05):
        return (s * jax.random.normal(k, shape)).astype(f32)

    return {
        # Conv1d(1, 16, k=64, stride=16, pad=24) + BatchNorm1d(16)
        "w1": nrm(ks[0], (16, 1, 64)),
        "g1": 1.0 + nrm(ks[7], (16,), 0.1), "b1": nrm(ks[8], (16,), 0.1),
        "rm1": nrm(ks[9], (16,), 0.1), "rv1": 1.0 + jnp.abs(nrm(ks[10], (16,), 0.1)),
        # Conv1d(16, 32, k=32, pad=16) + BatchNorm1d(32)
        "w2": nrm(ks[1], (32, 16, 32)),
        "g2": 1.0 + nrm(ks[11], (32,), 0.1), "b2": nrm(ks[12], (32,), 0.1),
        "rm2": nrm(ks[13], (32,), 0.1), "rv2": 1.0 + jnp.abs(nrm(ks[14], (32,), 0.1)),
        # Conv1d(32, 64, k=16, pad=8) + BatchNorm1d(64)
        "w3": nrm(ks[2], (64, 32, 16)),
        "g3": jnp.ones((64,), f32), "b3": nrm(ks[15], (64,), 0.1),
        "rm3": jnp.zeros((64,), f32), "rv3": jnp.ones((64,), f32),
        # Linear(n_features, 128), Linear(128, num_classes)  (PyTorch [out, in] layout)
        "fc1_w": nrm(ks[3], (128, n_features)), "fc1_b": nrm(ks[4], (128,)),
        "fc2_w": nrm(ks[5], (num_classes, 128)), "fc2_b": nrm(ks[6], (num_classes,)),
    }


if __name__ == "__main__":
    batch = 2
    num_classes = 5
    signal_length = 2048   # small test size, consistent with the module's shape arithmetic

    # shape trace: 2048 -conv(k64,s16,p24)-> 128 -pool-> 64 -conv(k32,p16)-> 65 -pool-> 32
    #              -conv(k16,p8)-> 33 -pool-> 16  => n_features = 64*16 = 1024
    lp1, lp2, lp3 = compute_shapes(signal_length)
    n_features = 64 * lp3

    key = jax.random.PRNGKey(0)
    kx, kp = jax.random.split(key)
    x = jax.random.normal(kx, (batch, 1, signal_length), dtype=jnp.float32)
    params = init_params(kp, num_classes, n_features)
    prep, cfg = prepare_params(params, signal_length, num_classes)

    fwd = jax.jit(lambda xx, pp: simple1dcnn_forward(xx, pp, cfg))
    logits = jax.block_until_ready(fwd(x, prep))
    assert logits.shape == (batch, num_classes), logits.shape

    # Validate against a pure-JAX f32 reference (bf16 MXU inputs -> loose tolerance).
    ref = reference_forward(x, params)
    max_err = float(jnp.max(jnp.abs(logits - ref)))
    tol = 5e-2 * max(1.0, float(jnp.max(jnp.abs(ref))))
    assert max_err < tol, f"mismatch vs reference: max abs err = {max_err} (tol {tol})"

    print("KERNEL_OK")
</pallas_src>

<mosaic_0001>
module attributes {stable_mosaic.version = 11 : i64} {
  func.func @_conv_bn_relu_pool_kernel(%arg0: i32, %arg1: i32, %arg2: memref<2x66x32xbf16, #tpu.memory_space<vmem>>, %arg3: memref<3x32x256xbf16, #tpu.memory_space<vmem>>, %arg4: memref<1x256xf32, #tpu.memory_space<vmem>>, %arg5: memref<1x256xf32, #tpu.memory_space<vmem>>, %arg6: memref<2x64x128xbf16, #tpu.memory_space<vmem>>) attributes {dimension_semantics = [#tpu.dimension_semantics<parallel>, #tpu.dimension_semantics<parallel>], iteration_bounds = array<i64: 1, 1>, scalar_prefetch = 0 : i64, scratch_operands = 0 : i64, tpu.core_type = #tpu.core_type<tc>, window_params = [{transform_indices = @transform_0, window_bounds = array<i64: 2, 66, 32>}, {pipeline_mode = #tpu.pipeline_mode<synchronous>, transform_indices = @transform_1, window_bounds = array<i64: 3, 32, 256>}, {pipeline_mode = #tpu.pipeline_mode<synchronous>, transform_indices = @transform_2, window_bounds = array<i64: 1, 256>}, {pipeline_mode = #tpu.pipeline_mode<synchronous>, transform_indices = @transform_3, window_bounds = array<i64: 1, 256>}, {transform_indices = @transform_4, window_bounds = array<i64: 2, 64, 128>}]} {
    %c0 = arith.constant 0 : index
    %c0_0 = arith.constant 0 : index
    %c0_1 = arith.constant 0 : index
    %0 = vector.load %arg2[%c0, %c0_0, %c0_1] : memref<2x66x32xbf16, #tpu.memory_space<vmem>>, vector<2x66x32xbf16>
    %cst = arith.constant 0.000000e+00 : f32
    %1 = vector.broadcast %cst : f32 to vector<128x256xf32>
    %2 = vector.extract_strided_slice %0 {offsets = [0, 0, 0], sizes = [2, 64, 32], strides = [1, 1, 1]} : vector<2x66x32xbf16> to vector<2x64x32xbf16>
    %3 = vector.shape_cast %2 : vector<2x64x32xbf16> to vector<128x32xbf16>
    %c0_2 = arith.constant 0 : index
    %c0_3 = arith.constant 0 : index
    %c0_4 = arith.constant 0 : index
    %4 = vector.load %arg3[%c0_2, %c0_3, %c0_4] : memref<3x32x256xbf16, #tpu.memory_space<vmem>>, vector<1x32x256xbf16>
    %5 = vector.shape_cast %4 : vector<1x32x256xbf16> to vector<32x256xbf16>
    %cst_5 = arith.constant dense<0.000000e+00> : vector<128x256xf32>
    %6 = tpu.matmul %3, %5, %cst_5 {dimension_numbers = #tpu.dot_dimension_numbers<[1], [0], [0], [1], [0, 0, 1, 1], [], []>} : vector<128x32xbf16>, vector<32x256xbf16>, vector<128x256xf32> -> vector<128x256xf32>
    %7 = arith.addf %1, %6 : vector<128x256xf32>
    %8 = vector.extract_strided_slice %0 {offsets = [0, 1, 0], sizes = [2, 64, 32], strides = [1, 1, 1]} : vector<2x66x32xbf16> to vector<2x64x32xbf16>
    %9 = vector.shape_cast %8 : vector<2x64x32xbf16> to vector<128x32xbf16>
    %c1 = arith.constant 1 : index
    %c0_6 = arith.constant 0 : index
    %c0_7 = arith.constant 0 : index
    %10 = vector.load %arg3[%c1, %c0_6, %c0_7] : memref<3x32x256xbf16, #tpu.memory_space<vmem>>, vector<1x32x256xbf16>
    %11 = vector.shape_cast %10 : vector<1x32x256xbf16> to vector<32x256xbf16>
    %cst_8 = arith.constant dense<0.000000e+00> : vector<128x256xf32>
    %12 = tpu.matmul %9, %11, %cst_8 {dimension_numbers = #tpu.dot_dimension_numbers<[1], [0], [0], [1], [0, 0, 1, 1], [], []>} : vector<128x32xbf16>, vector<32x256xbf16>, vector<128x256xf32> -> vector<128x256xf32>
    %13 = arith.addf %7, %12 : vector<128x256xf32>
    %14 = vector.extract_strided_slice %0 {offsets = [0, 2, 0], sizes = [2, 64, 32], strides = [1, 1, 1]} : vector<2x66x32xbf16> to vector<2x64x32xbf16>
    %15 = vector.shape_cast %14 : vector<2x64x32xbf16> to vector<128x32xbf16>
    %c2 = arith.constant 2 : index
    %c0_9 = arith.constant 0 : index
    %c0_10 = arith.constant 0 : index
    %16 = vector.load %arg3[%c2, %c0_9, %c0_10] : memref<3x32x256xbf16, #tpu.memory_space<vmem>>, vector<1x32x256xbf16>
    %17 = vector.shape_cast %16 : vector<1x32x256xbf16> to vector<32x256xbf16>
    %cst_11 = arith.constant dense<0.000000e+00> : vector<128x256xf32>
    %18 = tpu.matmul %15, %17, %cst_11 {dimension_numbers = #tpu.dot_dimension_numbers<[1], [0], [0], [1], [0, 0, 1, 1], [], []>} : vector<128x32xbf16>, vector<32x256xbf16>, vector<128x256xf32> -> vector<128x256xf32>
    %19 = arith.addf %13, %18 : vector<128x256xf32>
    %c0_12 = arith.constant 0 : index
    %c0_13 = arith.constant 0 : index
    %20 = vector.load %arg4[%c0_12, %c0_13] : memref<1x256xf32, #tpu.memory_space<vmem>>, vector<1x256xf32>
    %21 = vector.broadcast %20 : vector<1x256xf32> to vector<128x256xf32>
    %22 = arith.mulf %19, %21 : vector<128x256xf32>
    %c0_14 = arith.constant 0 : index
    %c0_15 = arith.constant 0 : index
    %23 = vector.load %arg5[%c0_14, %c0_15] : memref<1x256xf32, #tpu.memory_space<vmem>>, vector<1x256xf32>
    %24 = vector.broadcast %23 : vector<1x256xf32> to vector<128x256xf32>
    %25 = arith.addf %22, %24 : vector<128x256xf32>
    %26 = vector.extract_strided_slice %25 {offsets = [0, 0], sizes = [128, 128], strides = [1, 1]} : vector<128x256xf32> to vector<128x128xf32>
    %27 = vector.extract_strided_slice %25 {offsets = [0, 128], sizes = [128, 128], strides = [1, 1]} : vector<128x256xf32> to vector<128x128xf32>
    %28 = arith.maximumf %26, %27 : vector<128x128xf32>
    %cst_16 = arith.constant 0.000000e+00 : f32
    %29 = vector.broadcast %cst_16 : f32 to vector<128x128xf32>
    %30 = arith.maximumf %28, %29 : vector<128x128xf32>
    %31 = vector.shape_cast %30 : vector<128x128xf32> to vector<2x64x128xf32>
    %32 = arith.truncf %31 : vector<2x64x128xf32> to vector<2x64x128xbf16>
    %c0_17 = arith.constant 0 : index
    %c0_18 = arith.constant 0 : index
    %c0_19 = arith.constant 0 : index
    %33 = vector.load %arg6[%c0_17, %c0_18, %c0_19] : memref<2x64x128xbf16, #tpu.memory_space<vmem>>, vector<2x64x128xbf16>
    tpu.vector_store %arg6[%c0_17, %c0_18, %c0_19], %32 {strides = array<i32>} : memref<2x64x128xbf16, #tpu.memory_space<vmem>>, vector<2x64x128xbf16>,
    return
  }
  func.func @transform_0(%arg0: i32, %arg1: i32) -> (i32, i32, i32) {
    %c0_i32 = arith.constant 0 : i32
    %c0_i32_0 = arith.constant 0 : i32
    %c0_i32_1 = arith.constant 0 : i32
    return %arg0, %c0_i32, %c0_i32_0 : i32, i32, i32
  }
  func.func @transform_1(%arg0: i32, %arg1: i32) -> (i32, i32, i32) {
    %c0_i32 = arith.constant 0 : i32
    %c0_i32_0 = arith.constant 0 : i32
    %c0_i32_1 = arith.constant 0 : i32
    %c0_i32_2 = arith.constant 0 : i32
    return %c0_i32, %c0_i32_0, %c0_i32_1 : i32, i32, i32
  }
  func.func @transform_2(%arg0: i32, %arg1: i32) -> (i32, i32) {
    %c0_i32 = arith.constant 0 : i32
    %c0_i32_0 = arith.constant 0 : i32
    %c0_i32_1 = arith.constant 0 : i32
    return %c0_i32, %c0_i32_0 : i32, i32
  }
  func.func @transform_3(%arg0: i32, %arg1: i32) -> (i32, i32) {
    %c0_i32 = arith.constant 0 : i32
    %c0_i32_0 = arith.constant 0 : i32
    %c0_i32_1 = arith.constant 0 : i32
    return %c0_i32, %c0_i32_0 : i32, i32
  }
  func.func @transform_4(%arg0: i32, %arg1: i32) -> (i32, i32, i32) {
    %c0_i32 = arith.constant 0 : i32
    %c0_i32_0 = arith.constant 0 : i32
    return %arg0, %arg1, %c0_i32 : i32, i32, i32
  }
}

module attributes {stable_mosaic.version = 11 : i64} {
  func.func @_conv_bn_relu_pool_kernel(%arg0: i32, %arg1: i32, %arg2: memref<2x48x256xbf16, #tpu.memory_space<vmem>>, %arg3: memref<17x256x256xbf16, #tpu.memory_space<vmem>>, %arg4: memref<1x256xf32, #tpu.memory_space<vmem>>, %arg5: memref<1x256xf32, #tpu.memory_space<vmem>>, %arg6: memref<2x32x128xbf16, #tpu.memory_space<vmem>>) attributes {dimension_semantics = [#tpu.dimension_semantics<parallel>, #tpu.dimension_semantics<parallel>], iteration_bounds = array<i64: 1, 1>, scalar_prefetch = 0 : i64, scratch_operands = 0 : i64, tpu.core_type = #tpu.core_type<tc>, window_params = [{transform_indices = @transform_0, window_bounds = array<i64: 2, 48, 256>}, {pipeline_mode = #tpu.pipeline_mode<synchronous>, transform_indices = @transform_1, window_bounds = array<i64: 17, 256, 256>}, {pipeline_mode = #tpu.pipeline_mode<synchronous>, transform_indices = @transform_2, window_bounds = array<i64: 1, 256>}, {pipeline_mode = #tpu.pipeline_mode<synchronous>, transform_indices = @transform_3, window_bounds = array<i64: 1, 256>}, {transform_indices = @transform_4, window_bounds = array<i64: 2, 32, 128>}]} {
    %c0 = arith.constant 0 : index
    %c0_0 = arith.constant 0 : index
    %c0_1 = arith.constant 0 : index
    %0 = vector.load %arg2[%c0, %c0_0, %c0_1] : memref<2x48x256xbf16, #tpu.memory_space<vmem>>, vector<2x48x256xbf16>
    %cst = arith.constant 0.000000e+00 : f32
    %1 = vector.broadcast %cst : f32 to vector<64x256xf32>
    %2 = vector.extract_strided_slice %0 {offsets = [0, 0, 0], sizes = [2, 32, 256], strides = [1, 1, 1]} : vector<2x48x256xbf16> to vector<2x32x256xbf16>
    %3 = vector.shape_cast %2 : vector<2x32x256xbf16> to vector<64x256xbf16>
    %c0_2 = arith.constant 0 : index
    %c0_3 = arith.constant 0 : index
    %c0_4 = arith.constant 0 : index
    %4 = vector.load %arg3[%c0_2, %c0_3, %c0_4] : memref<17x256x256xbf16, #tpu.memory_space<vmem>>, vector<1x256x256xbf16>
    %5 = vector.shape_cast %4 : vector<1x256x256xbf16> to vector<256x256xbf16>
    %cst_5 = arith.constant dense<0.000000e+00> : vector<64x256xf32>
    %6 = tpu.matmul %3, %5, %cst_5 {dimension_numbers = #tpu.dot_dimension_numbers<[1], [0], [0], [1], [0, 0, 1, 1], [], []>} : vector<64x256xbf16>, vector<256x256xbf16>, vector<64x256xf32> -> vector<64x256xf32>
    %7 = arith.addf %1, %6 : vector<64x256xf32>
    %8 = vector.extract_strided_slice %0 {offsets = [0, 1, 0], sizes = [2, 32, 256], strides = [1, 1, 1]} : vector<2x48x256xbf16> to vector<2x32x256xbf16>
    %9 = vector.shape_cast %8 : vector<2x32x256xbf16> to vector<64x256xbf16>
    %c1 = arith.constant 1 : index
    %c0_6 = arith.constant 0 : index
    %c0_7 = arith.constant 0 : index
    %10 = vector.load %arg3[%c1, %c0_6, %c0_7] : memref<17x256x256xbf16, #tpu.memory_space<vmem>>, vector<1x256x256xbf16>
    %11 = vector.shape_cast %10 : vector<1x256x256xbf16> to vector<256x256xbf16>
    %cst_8 = arith.constant dense<0.000000e+00> : vector<64x256xf32>
    %12 = tpu.matmul %9, %11, %cst_8 {dimension_numbers = #tpu.dot_dimension_numbers<[1], [0], [0], [1], [0, 0, 1, 1], [], []>} : vector<64x256xbf16>, vector<256x256xbf16>, vector<64x256xf32> -> vector<64x256xf32>
    %13 = arith.addf %7, %12 : vector<64x256xf32>
    %14 = vector.extract_strided_slice %0 {offsets = [0, 2, 0], sizes = [2, 32, 256], strides = [1, 1, 1]} : vector<2x48x256xbf16> to vector<2x32x256xbf16>
    %15 = vector.shape_cast %14 : vector<2x32x256xbf16> to vector<64x256xbf16>
    %c2 = arith.constant 2 : index
    %c0_9 = arith.constant 0 : index
    %c0_10 = arith.constant 0 : index
    %16 = vector.load %arg3[%c2, %c0_9, %c0_10] : memref<17x256x256xbf16, #tpu.memory_space<vmem>>, vector<1x256x256xbf16>
    %17 = vector.shape_cast %16 : vector<1x256x256xbf16> to vector<256x256xbf16>
    %cst_11 = arith.constant dense<0.000000e+00> : vector<64x256xf32>
    %18 = tpu.matmul %15, %17, %cst_11 {dimension_numbers = #tpu.dot_dimension_numbers<[1], [0], [0], [1], [0, 0, 1, 1], [], []>} : vector<64x256xbf16>, vector<256x256xbf16>, vector<64x256xf32> -> vector<64x256xf32>
    %19 = arith.addf %13, %18 : vector<64x256xf32>
    %20 = vector.extract_strided_slice %0 {offsets = [0, 3, 0], sizes = [2, 32, 256], strides = [1, 1, 1]} : vector<2x48x256xbf16> to vector<2x32x256xbf16>
    %21 = vector.shape_cast %20 : vector<2x32x256xbf16> to vector<64x256xbf16>
    %c3 = arith.constant 3 : index
    %c0_12 = arith.constant 0 : index
    %c0_13 = arith.constant 0 : index
    %22 = vector.load %arg3[%c3, %c0_12, %c0_13] : memref<17x256x256xbf16, #tpu.memory_space<vmem>>, vector<1x256x256xbf16>
    %23 = vector.shape_cast %22 : vector<1x256x256xbf16> to vector<256x256xbf16>
    %cst_14 = arith.constant dense<0.000000e+00> : vector<64x256xf32>
    %24 = tpu.matmul %21, %23, %cst_14 {dimension_numbers = #tpu.dot_dimension_numbers<[1], [0], [0], [1], [0, 0, 1, 1], [], []>} : vector<64x256xbf16>, vector<256x256xbf16>, vector<64x256xf32> -> vector<64x256xf32>
    %25 = arith.addf %19, %24 : vector<64x256xf32>
    %26 = vector.extract_strided_slice %0 {offsets = [0, 4, 0], sizes = [2, 32, 256], strides = [1, 1, 1]} : vector<2x48x256xbf16> to vector<2x32x256xbf16>
    %27 = vector.shape_cast %26 : vector<2x32x256xbf16> to vector<64x256xbf16>
    %c4 = arith.constant 4 : index
    %c0_15 = arith.constant 0 : index
    %c0_16 = arith.constant 0 : index
    %28 = vector.load %arg3[%c4, %c0_15, %c0_16] : memref<17x256x256xbf16, #tpu.memory_space<vmem>>, vector<1x256x256xbf16>
    %29 = vector.shape_cast %28 : vector<1x256x256xbf16> to vector<256x256xbf16>
    %cst_17 = arith.constant dense<0.000000e+00> : vector<64x256xf32>
    %30 = tpu.matmul %27, %29, %cst_17 {dimension_numbers = #tpu.dot_dimension_numbers<[1], [0], [0], [1], [0, 0, 1, 1], [], []>} : vector<64x256xbf16>, vector<256x256xbf16>, vector<64x256xf32> -> vector<64x256xf32>
    %31 = arith.addf %25, %30 : vector<64x256xf32>
    %32 = vector.extract_strided_slice %0 {offsets = [0, 5, 0], sizes = [2, 32, 256], strides = [1, 1, 1]} : vector<2x48x256xbf16> to vector<2x32x256xbf16>
    %33 = vector.shape_cast %32 : vector<2x32x256xbf16> to vector<64x256xbf16>
    %c5 = arith.constant 5 : index
    %c0_18 = arith.constant 0 : index
    %c0_19 = arith.constant 0 : index
    %34 = vector.load %arg3[%c5, %c0_18, %c0_19] : memref<17x256x256xbf16, #tpu.memory_space<vmem>>, vector<1x256x256xbf16>
    %35 = vector.shape_cast %34 : vector<1x256x256xbf16> to vector<256x256xbf16>
    %cst_20 = arith.constant dense<0.000000e+00> : vector<64x256xf32>
    %36 = tpu.matmul %33, %35, %cst_20 {dimension_numbers = #tpu.dot_dimension_numbers<[1], [0], [0], [1], [0, 0, 1, 1], [], []>} : vector<64x256xbf16>, vector<256x256xbf16>, vector<64x256xf32> -> vector<64x256xf32>
    %37 = arith.addf %31, %36 : vector<64x256xf32>
    %38 = vector.extract_strided_slice %0 {offsets = [0, 6, 0], sizes = [2, 32, 256], strides = [1, 1, 1]} : vector<2x48x256xbf16> to vector<2x32x256xbf16>
    %39 = vector.shape_cast %38 : vector<2x32x256xbf16> to vector<64x256xbf16>
    %c6 = arith.constant 6 : index
    %c0_21 = arith.constant 0 : index
    %c0_22 = arith.constant 0 : index
    %40 = vector.load %arg3[%c6, %c0_21, %c0_22] : memref<17x256x256xbf16, #tpu.memory_space<vmem>>, vector<1x256x256xbf16>
    %41 = vector.shape_cast %40 : vector<1x256x256xbf16> to vector<256x256xbf16>
    %cst_23 = arith.constant dense<0.000000e+00> : vector<64x256xf32>
    %42 = tpu.matmul %39, %41, %cst_23 {dimension_numbers = #tpu.dot_dimension_numbers<[1], [0], [0], [1], [0, 0, 1, 1], [], []>} : vector<64x256xbf16>, vector<256x256xbf16>, vector<64x256xf32> -> vector<64x256xf32>
    %43 = arith.addf %37, %42 : vector<64x256xf32>
    %44 = vector.extract_strided_slice %0 {offsets = [0, 7, 0], sizes = [2, 32, 256], strides = [1, 1, 1]} : vector<2x48x256xbf16> to vector<2x32x256xbf16>
    %45 = vector.shape_cast %44 : vector<2x32x256xbf16> to vector<64x256xbf16>
    %c7 = arith.constant 7 : index
    %c0_24 = arith.constant 0 : index
    %c0_25 = arith.constant 0 : index
    %46 = vector.load %arg3[%c7, %c0_24, %c0_25] : memref<17x256x256xbf16, #tpu.memory_space<vmem>>, vector<1x256x256xbf16>
    %47 = vector.shape_cast %46 : vector<1x256x256xbf16> to vector<256x256xbf16>
    %cst_26 = arith.constant dense<0.000000e+00> : vector<64x256xf32>
    %48 = tpu.matmul %45, %47, %cst_26 {dimension_numbers = #tpu.dot_dimension_numbers<[1], [0], [0], [1], [0, 0, 1, 1], [], []>} : vector<64x256xbf16>, vector<256x256xbf16>, vector<64x256xf32> -> vector<64x256xf32>
    %49 = arith.addf %43, %48 : vector<64x256xf32>
    %50 = vector.extract_strided_slice %0 {offsets = [0, 8, 0], sizes = [2, 32, 256], strides = [1, 1, 1]} : vector<2x48x256xbf16> to vector<2x32x256xbf16>
    %51 = vector.shape_cast %50 : vector<2x32x256xbf16> to vector<64x256xbf16>
    %c8 = arith.constant 8 : index
    %c0_27 = arith.constant 0 : index
    %c0_28 = arith.constant 0 : index
    %52 = vector.load %arg3[%c8, %c0_27, %c0_28] : memref<17x256x256xbf16, #tpu.memory_space<vmem>>, vector<1x256x256xbf16>
    %53 = vector.shape_cast %52 : vector<1x256x256xbf16> to vector<256x256xbf16>
    %cst_29 = arith.constant dense<0.000000e+00> : vector<64x256xf32>
    %54 = tpu.matmul %51, %53, %cst_29 {dimension_numbers = #tpu.dot_dimension_numbers<[1], [0], [0], [1], [0, 0, 1, 1], [], []>} : vector<64x256xbf16>, vector<256x256xbf16>, vector<64x256xf32> -> vector<64x256xf32>
    %55 = arith.addf %49, %54 : vector<64x256xf32>
    %56 = vector.extract_strided_slice %0 {offsets = [0, 9, 0], sizes = [2, 32, 256], strides = [1, 1, 1]} : vector<2x48x256xbf16> to vector<2x32x256xbf16>
    %57 = vector.shape_cast %56 : vector<2x32x256xbf16> to vector<64x256xbf16>
    %c9 = arith.constant 9 : index
    %c0_30 = arith.constant 0 : index
    %c0_31 = arith.constant 0 : index
    %58 = vector.load %arg3[%c9, %c0_30, %c0_31] : memref<17x256x256xbf16, #tpu.memory_space<vmem>>, vector<1x256x256xbf16>
    %59 = vector.shape_cast %58 : vector<1x256x256xbf16> to vector<256x256xbf16>
    %cst_32 = arith.constant dense<0.000000e+00> : vector<64x256xf32>
    %60 = tpu.matmul %57, %59, %cst_32 {dimension_numbers = #tpu.dot_dimension_numbers<[1], [0], [0], [1], [0, 0, 1, 1], [], []>} : vector<64x256xbf16>, vector<256x256xbf16>, vector<64x256xf32> -> vector<64x256xf32>
    %61 = arith.addf %55, %60 : vector<64x256xf32>
    %62 = vector.extract_strided_slice %0 {offsets = [0, 10, 0], sizes = [2, 32, 256], strides = [1, 1, 1]} : vector<2x48x256xbf16> to vector<2x32x256xbf16>
    %63 = vector.shape_cast %62 : vector<2x32x256xbf16> to vector<64x256xbf16>
    %c10 = arith.constant 10 : index
    %c0_33 = arith.constant 0 : index
    %c0_34 = arith.constant 0 : index
    %64 = vector.load %arg3[%c10, %c0_33, %c0_34] : memref<17x256x256xbf16, #tpu.memory_space<vmem>>, vector<1x256x256xbf16>
    %65 = vector.shape_cast %64 : vector<1x256x256xbf16> to vector<256x256xbf16>
    %cst_35 = arith.constant dense<0.000000e+00> : vector<64x256xf32>
    %66 = tpu.matmul %63, %65, %cst_35 {dimension_numbers = #tpu.dot_dimension_numbers<[1], [0], [0], [1], [0, 0, 1, 1], [], []>} : vector<64x256xbf16>, vector<256x256xbf16>, vector<64x256xf32> -> vector<64x256xf32>
    %67 = arith.addf %61, %66 : vector<64x256xf32>
    %68 = vector.extract_strided_slice %0 {offsets = [0, 11, 0], sizes = [2, 32, 256], strides = [1, 1, 1]} : vector<2x48x256xbf16> to vector<2x32x256xbf16>
    %69 = vector.shape_cast %68 : vector<2x32x256xbf16> to vector<64x256xbf16>
    %c11 = arith.constant 11 : index
    %c0_36 = arith.constant 0 : index
    %c0_37 = arith.constant 0 : index
    %70 = vector.load %arg3[%c11, %c0_36, %c0_37] : memref<17x256x256xbf16, #tpu.memory_space<vmem>>, vector<1x256x256xbf16>
    %71 = vector.shape_cast %70 : vector<1x256x256xbf16> to vector<256x256xbf16>
    %cst_38 = arith.constant dense<0.000000e+00> : vector<64x256xf32>
    %72 = tpu.matmul %69, %71, %cst_38 {dimension_numbers = #tpu.dot_dimension_numbers<[1], [0], [0], [1], [0, 0, 1, 1], [], []>} : vector<64x256xbf16>, vector<256x256xbf16>, vector<64x256xf32> -> vector<64x256xf32>
    %73 = arith.addf %67, %72 : vector<64x256xf32>
    %74 = vector.extract_strided_slice %0 {offsets = [0, 12, 0], sizes = [2, 32, 256], strides = [1, 1, 1]} : vector<2x48x256xbf16> to vector<2x32x256xbf16>
    %75 = vector.shape_cast %74 : vector<2x32x256xbf16> to vector<64x256xbf16>
    %c12 = arith.constant 12 : index
    %c0_39 = arith.constant 0 : index
    %c0_40 = arith.constant 0 : index
    %76 = vector.load %arg3[%c12, %c0_39, %c0_40] : memref<17x256x256xbf16, #tpu.memory_space<vmem>>, vector<1x256x256xbf16>
    %77 = vector.shape_cast %76 : vector<1x256x256xbf16> to vector<256x256xbf16>
    %cst_41 = arith.constant dense<0.000000e+00> : vector<64x256xf32>
    %78 = tpu.matmul %75, %77, %cst_41 {dimension_numbers = #tpu.dot_dimension_numbers<[1], [0], [0], [1], [0, 0, 1, 1], [], []>} : vector<64x256xbf16>, vector<256x256xbf16>, vector<64x256xf32> -> vector<64x256xf32>
    %79 = arith.addf %73, %78 : vector<64x256xf32>
    %80 = vector.extract_strided_slice %0 {offsets = [0, 13, 0], sizes = [2, 32, 256], strides = [1, 1, 1]} : vector<2x48x256xbf16> to vector<2x32x256xbf16>
    %81 = vector.shape_cast %80 : vector<2x32x256xbf16> to vector<64x256xbf16>
    %c13 = arith.constant 13 : index
    %c0_42 = arith.constant 0 : index
    %c0_43 = arith.constant 0 : index
    %82 = vector.load %arg3[%c13, %c0_42, %c0_43] : memref<17x256x256xbf16, #tpu.memory_space<vmem>>, vector<1x256x256xbf16>
    %83 = vector.shape_cast %82 : vector<1x256x256xbf16> to vector<256x256xbf16>
    %cst_44 = arith.constant dense<0.000000e+00> : vector<64x256xf32>
    %84 = tpu.matmul %81, %83, %cst_44 {dimension_numbers = #tpu.dot_dimension_numbers<[1], [0], [0], [1], [0, 0, 1, 1], [], []>} : vector<64x256xbf16>, vector<256x256xbf16>, vector<64x256xf32> -> vector<64x256xf32>
    %85 = arith.addf %79, %84 : vector<64x256xf32>
    %86 = vector.extract_strided_slice %0 {offsets = [0, 14, 0], sizes = [2, 32, 256], strides = [1, 1, 1]} : vector<2x48x256xbf16> to vector<2x32x256xbf16>
    %87 = vector.shape_cast %86 : vector<2x32x256xbf16> to vector<64x256xbf16>
    %c14 = arith.constant 14 : index
    %c0_45 = arith.constant 0 : index
    %c0_46 = arith.constant 0 : index
    %88 = vector.load %arg3[%c14, %c0_45, %c0_46] : memref<17x256x256xbf16, #tpu.memory_space<vmem>>, vector<1x256x256xbf16>
    %89 = vector.shape_cast %88 : vector<1x256x256xbf16> to vector<256x256xbf16>
    %cst_47 = arith.constant dense<0.000000e+00> : vector<64x256xf32>
    %90 = tpu.matmul %87, %89, %cst_47 {dimension_numbers = #tpu.dot_dimension_numbers<[1], [0], [0], [1], [0, 0, 1, 1], [], []>} : vector<64x256xbf16>, vector<256x256xbf16>, vector<64x256xf32> -> vector<64x256xf32>
    %91 = arith.addf %85, %90 : vector<64x256xf32>
    %92 = vector.extract_strided_slice %0 {offsets = [0, 15, 0], sizes = [2, 32, 256], strides = [1, 1, 1]} : vector<2x48x256xbf16> to vector<2x32x256xbf16>
    %93 = vector.shape_cast %92 : vector<2x32x256xbf16> to vector<64x256xbf16>
    %c15 = arith.constant 15 : index
    %c0_48 = arith.constant 0 : index
    %c0_49 = arith.constant 0 : index
    %94 = vector.load %arg3[%c15, %c0_48, %c0_49] : memref<17x256x256xbf16, #tpu.memory_space<vmem>>, vector<1x256x256xbf16>
    %95 = vector.shape_cast %94 : vector<1x256x256xbf16> to vector<256x256xbf16>
    %cst_50 = arith.constant dense<0.000000e+00> : vector<64x256xf32>
    %96 = tpu.matmul %93, %95, %cst_50 {dimension_numbers = #tpu.dot_dimension_numbers<[1], [0], [0], [1], [0, 0, 1, 1], [], []>} : vector<64x256xbf16>, vector<256x256xbf16>, vector<64x256xf32> -> vector<64x256xf32>
    %97 = arith.addf %91, %96 : vector<64x256xf32>
    %98 = vector.extract_strided_slice %0 {offsets = [0, 16, 0], sizes = [2, 32, 256], strides = [1, 1, 1]} : vector<2x48x256xbf16> to vector<2x32x256xbf16>
    %99 = vector.shape_cast %98 : vector<2x32x256xbf16> to vector<64x256xbf16>
    %c16 = arith.constant 16 : index
    %c0_51 = arith.constant 0 : index
    %c0_52 = arith.constant 0 : index
    %100 = vector.load %arg3[%c16, %c0_51, %c0_52] : memref<17x256x256xbf16, #tpu.memory_space<vmem>>, vector<1x256x256xbf16>
    %101 = vector.shape_cast %100 : vector<1x256x256xbf16> to vector<256x256xbf16>
    %cst_53 = arith.constant dense<0.000000e+00> : vector<64x256xf32>
    %102 = tpu.matmul %99, %101, %cst_53 {dimension_numbers = #tpu.dot_dimension_numbers<[1], [0], [0], [1], [0, 0, 1, 1], [], []>} : vector<64x256xbf16>, vector<256x256xbf16>, vector<64x256xf32> -> vector<64x256xf32>
    %103 = arith.addf %97, %102 : vector<64x256xf32>
    %c0_54 = arith.constant 0 : index
    %c0_55 = arith.constant 0 : index
    %104 = vector.load %arg4[%c0_54, %c0_55] : memref<1x256xf32, #tpu.memory_space<vmem>>, vector<1x256xf32>
    %105 = vector.broadcast %104 : vector<1x256xf32> to vector<64x256xf32>
    %106 = arith.mulf %103, %105 : vector<64x256xf32>
    %c0_56 = arith.constant 0 : index
    %c0_57 = arith.constant 0 : index
    %107 = vector.load %arg5[%c0_56, %c0_57] : memref<1x256xf32, #tpu.memory_space<vmem>>, vector<1x256xf32>
    %108 = vector.broadcast %107 : vector<1x256xf32> to vector<64x256xf32>
    %109 = arith.addf %106, %108 : vector<64x256xf32>
    %110 = vector.extract_strided_slice %109 {offsets = [0, 0], sizes = [64, 128], strides = [1, 1]} : vector<64x256xf32> to vector<64x128xf32>
    %111 = vector.extract_strided_slice %109 {offsets = [0, 128], sizes = [64, 128], strides = [1, 1]} : vector<64x256xf32> to vector<64x128xf32>
    %112 = arith.maximumf %110, %111 : vector<64x128xf32>
    %cst_58 = arith.constant 0.000000e+00 : f32
    %113 = vector.broadcast %cst_58 : f32 to vector<64x128xf32>
    %114 = arith.maximumf %112, %113 : vector<64x128xf32>
    %115 = vector.shape_cast %114 : vector<64x128xf32> to vector<2x32x128xf32>
    %116 = arith.truncf %115 : vector<2x32x128xf32> to vector<2x32x128xbf16>
    %c0_59 = arith.constant 0 : index
    %c0_60 = arith.constant 0 : index
    %c0_61 = arith.constant 0 : index
    %117 = vector.load %arg6[%c0_59, %c0_60, %c0_61] : memref<2x32x128xbf16, #tpu.memory_space<vmem>>, vector<2x32x128xbf16>
    tpu.vector_store %arg6[%c0_59, %c0_60, %c0_61], %116 {strides = array<i32>} : memref<2x32x128xbf16, #tpu.memory_space<vmem>>, vector<2x32x128xbf16>,
    return
  }
  func.func @transform_0(%arg0: i32, %arg1: i32) -> (i32, i32, i32) {
    %c0_i32 = arith.constant 0 : i32
    %c0_i32_0 = arith.constant 0 : i32
    %c0_i32_1 = arith.constant 0 : i32
    return %arg0, %c0_i32, %c0_i32_0 : i32, i32, i32
  }
  func.func @transform_1(%arg0: i32, %arg1: i32) -> (i32, i32, i32) {
    %c0_i32 = arith.constant 0 : i32
    %c0_i32_0 = arith.constant 0 : i32
    %c0_i32_1 = arith.constant 0 : i32
    %c0_i32_2 = arith.constant 0 : i32
    return %c0_i32, %c0_i32_0, %c0_i32_1 : i32, i32, i32
  }
  func.func @transform_2(%arg0: i32, %arg1: i32) -> (i32, i32) {
    %c0_i32 = arith.constant 0 : i32
    %c0_i32_0 = arith.constant 0 : i32
    %c0_i32_1 = arith.constant 0 : i32
    return %c0_i32, %c0_i32_0 : i32, i32
  }
  func.func @transform_3(%arg0: i32, %arg1: i32) -> (i32, i32) {
    %c0_i32 = arith.constant 0 : i32
    %c0_i32_0 = arith.constant 0 : i32
    %c0_i32_1 = arith.constant 0 : i32
    return %c0_i32, %c0_i32_0 : i32, i32
  }
  func.func @transform_4(%arg0: i32, %arg1: i32) -> (i32, i32, i32) {
    %c0_i32 = arith.constant 0 : i32
    %c0_i32_0 = arith.constant 0 : i32
    return %arg0, %arg1, %c0_i32 : i32, i32, i32
  }
}

module attributes {stable_mosaic.version = 11 : i64} {
  func.func @_conv_bn_relu_pool_kernel(%arg0: i32, %arg1: i32, %arg2: memref<2x24x256xbf16, #tpu.memory_space<vmem>>, %arg3: memref<9x256x256xbf16, #tpu.memory_space<vmem>>, %arg4: memref<1x256xf32, #tpu.memory_space<vmem>>, %arg5: memref<1x256xf32, #tpu.memory_space<vmem>>, %arg6: memref<2x16x128xbf16, #tpu.memory_space<vmem>>) attributes {dimension_semantics = [#tpu.dimension_semantics<parallel>, #tpu.dimension_semantics<parallel>], iteration_bounds = array<i64: 1, 1>, scalar_prefetch = 0 : i64, scratch_operands = 0 : i64, tpu.core_type = #tpu.core_type<tc>, window_params = [{transform_indices = @transform_0, window_bounds = array<i64: 2, 24, 256>}, {pipeline_mode = #tpu.pipeline_mode<synchronous>, transform_indices = @transform_1, window_bounds = array<i64: 9, 256, 256>}, {pipeline_mode = #tpu.pipeline_mode<synchronous>, transform_indices = @transform_2, window_bounds = array<i64: 1, 256>}, {pipeline_mode = #tpu.pipeline_mode<synchronous>, transform_indices = @transform_3, window_bounds = array<i64: 1, 256>}, {transform_indices = @transform_4, window_bounds = array<i64: 2, 16, 128>}]} {
    %c0 = arith.constant 0 : index
    %c0_0 = arith.constant 0 : index
    %c0_1 = arith.constant 0 : index
    %0 = vector.load %arg2[%c0, %c0_0, %c0_1] : memref<2x24x256xbf16, #tpu.memory_space<vmem>>, vector<2x24x256xbf16>
    %cst = arith.constant 0.000000e+00 : f32
    %1 = vector.broadcast %cst : f32 to vector<32x256xf32>
    %2 = vector.extract_strided_slice %0 {offsets = [0, 0, 0], sizes = [2, 16, 256], strides = [1, 1, 1]} : vector<2x24x256xbf16> to vector<2x16x256xbf16>
    %3 = vector.shape_cast %2 : vector<2x16x256xbf16> to vector<32x256xbf16>
    %c0_2 = arith.constant 0 : index
    %c0_3 = arith.constant 0 : index
    %c0_4 = arith.constant 0 : index
    %4 = vector.load %arg3[%c0_2, %c0_3, %c0_4] : memref<9x256x256xbf16, #tpu.memory_space<vmem>>, vector<1x256x256xbf16>
    %5 = vector.shape_cast %4 : vector<1x256x256xbf16> to vector<256x256xbf16>
    %cst_5 = arith.constant dense<0.000000e+00> : vector<32x256xf32>
    %6 = tpu.matmul %3, %5, %cst_5 {dimension_numbers = #tpu.dot_dimension_numbers<[1], [0], [0], [1], [0, 0, 1, 1], [], []>} : vector<32x256xbf16>, vector<256x256xbf16>, vector<32x256xf32> -> vector<32x256xf32>
    %7 = arith.addf %1, %6 : vector<32x256xf32>
    %8 = vector.extract_strided_slice %0 {offsets = [0, 1, 0], sizes = [2, 16, 256], strides = [1, 1, 1]} : vector<2x24x256xbf16> to vector<2x16x256xbf16>
    %9 = vector.shape_cast %8 : vector<2x16x256xbf16> to vector<32x256xbf16>
    %c1 = arith.constant 1 : index
    %c0_6 = arith.constant 0 : index
    %c0_7 = arith.constant 0 : index
    %10 = vector.load %arg3[%c1, %c0_6, %c0_7] : memref<9x256x256xbf16, #tpu.memory_space<vmem>>, vector<1x256x256xbf16>
    %11 = vector.shape_cast %10 : vector<1x256x256xbf16> to vector<256x256xbf16>
    %cst_8 = arith.constant dense<0.000000e+00> : vector<32x256xf32>
    %12 = tpu.matmul %9, %11, %cst_8 {dimension_numbers = #tpu.dot_dimension_numbers<[1], [0], [0], [1], [0, 0, 1, 1], [], []>} : vector<32x256xbf16>, vector<256x256xbf16>, vector<32x256xf32> -> vector<32x256xf32>
    %13 = arith.addf %7, %12 : vector<32x256xf32>
    %14 = vector.extract_strided_slice %0 {offsets = [0, 2, 0], sizes = [2, 16, 256], strides = [1, 1, 1]} : vector<2x24x256xbf16> to vector<2x16x256xbf16>
    %15 = vector.shape_cast %14 : vector<2x16x256xbf16> to vector<32x256xbf16>
    %c2 = arith.constant 2 : index
    %c0_9 = arith.constant 0 : index
    %c0_10 = arith.constant 0 : index
    %16 = vector.load %arg3[%c2, %c0_9, %c0_10] : memref<9x256x256xbf16, #tpu.memory_space<vmem>>, vector<1x256x256xbf16>
    %17 = vector.shape_cast %16 : vector<1x256x256xbf16> to vector<256x256xbf16>
    %cst_11 = arith.constant dense<0.000000e+00> : vector<32x256xf32>
    %18 = tpu.matmul %15, %17, %cst_11 {dimension_numbers = #tpu.dot_dimension_numbers<[1], [0], [0], [1], [0, 0, 1, 1], [], []>} : vector<32x256xbf16>, vector<256x256xbf16>, vector<32x256xf32> -> vector<32x256xf32>
    %19 = arith.addf %13, %18 : vector<32x256xf32>
    %20 = vector.extract_strided_slice %0 {offsets = [0, 3, 0], sizes = [2, 16, 256], strides = [1, 1, 1]} : vector<2x24x256xbf16> to vector<2x16x256xbf16>
    %21 = vector.shape_cast %20 : vector<2x16x256xbf16> to vector<32x256xbf16>
    %c3 = arith.constant 3 : index
    %c0_12 = arith.constant 0 : index
    %c0_13 = arith.constant 0 : index
    %22 = vector.load %arg3[%c3, %c0_12, %c0_13] : memref<9x256x256xbf16, #tpu.memory_space<vmem>>, vector<1x256x256xbf16>
    %23 = vector.shape_cast %22 : vector<1x256x256xbf16> to vector<256x256xbf16>
    %cst_14 = arith.constant dense<0.000000e+00> : vector<32x256xf32>
    %24 = tpu.matmul %21, %23, %cst_14 {dimension_numbers = #tpu.dot_dimension_numbers<[1], [0], [0], [1], [0, 0, 1, 1], [], []>} : vector<32x256xbf16>, vector<256x256xbf16>, vector<32x256xf32> -> vector<32x256xf32>
    %25 = arith.addf %19, %24 : vector<32x256xf32>
    %26 = vector.extract_strided_slice %0 {offsets = [0, 4, 0], sizes = [2, 16, 256], strides = [1, 1, 1]} : vector<2x24x256xbf16> to vector<2x16x256xbf16>
    %27 = vector.shape_cast %26 : vector<2x16x256xbf16> to vector<32x256xbf16>
    %c4 = arith.constant 4 : index
    %c0_15 = arith.constant 0 : index
    %c0_16 = arith.constant 0 : index
    %28 = vector.load %arg3[%c4, %c0_15, %c0_16] : memref<9x256x256xbf16, #tpu.memory_space<vmem>>, vector<1x256x256xbf16>
    %29 = vector.shape_cast %28 : vector<1x256x256xbf16> to vector<256x256xbf16>
    %cst_17 = arith.constant dense<0.000000e+00> : vector<32x256xf32>
    %30 = tpu.matmul %27, %29, %cst_17 {dimension_numbers = #tpu.dot_dimension_numbers<[1], [0], [0], [1], [0, 0, 1, 1], [], []>} : vector<32x256xbf16>, vector<256x256xbf16>, vector<32x256xf32> -> vector<32x256xf32>
    %31 = arith.addf %25, %30 : vector<32x256xf32>
    %32 = vector.extract_strided_slice %0 {offsets = [0, 5, 0], sizes = [2, 16, 256], strides = [1, 1, 1]} : vector<2x24x256xbf16> to vector<2x16x256xbf16>
    %33 = vector.shape_cast %32 : vector<2x16x256xbf16> to vector<32x256xbf16>
    %c5 = arith.constant 5 : index
    %c0_18 = arith.constant 0 : index
    %c0_19 = arith.constant 0 : index
    %34 = vector.load %arg3[%c5, %c0_18, %c0_19] : memref<9x256x256xbf16, #tpu.memory_space<vmem>>, vector<1x256x256xbf16>
    %35 = vector.shape_cast %34 : vector<1x256x256xbf16> to vector<256x256xbf16>
    %cst_20 = arith.constant dense<0.000000e+00> : vector<32x256xf32>
    %36 = tpu.matmul %33, %35, %cst_20 {dimension_numbers = #tpu.dot_dimension_numbers<[1], [0], [0], [1], [0, 0, 1, 1], [], []>} : vector<32x256xbf16>, vector<256x256xbf16>, vector<32x256xf32> -> vector<32x256xf32>
    %37 = arith.addf %31, %36 : vector<32x256xf32>
    %38 = vector.extract_strided_slice %0 {offsets = [0, 6, 0], sizes = [2, 16, 256], strides = [1, 1, 1]} : vector<2x24x256xbf16> to vector<2x16x256xbf16>
    %39 = vector.shape_cast %38 : vector<2x16x256xbf16> to vector<32x256xbf16>
    %c6 = arith.constant 6 : index
    %c0_21 = arith.constant 0 : index
    %c0_22 = arith.constant 0 : index
    %40 = vector.load %arg3[%c6, %c0_21, %c0_22] : memref<9x256x256xbf16, #tpu.memory_space<vmem>>, vector<1x256x256xbf16>
    %41 = vector.shape_cast %40 : vector<1x256x256xbf16> to vector<256x256xbf16>
    %cst_23 = arith.constant dense<0.000000e+00> : vector<32x256xf32>
    %42 = tpu.matmul %39, %41, %cst_23 {dimension_numbers = #tpu.dot_dimension_numbers<[1], [0], [0], [1], [0, 0, 1, 1], [], []>} : vector<32x256xbf16>, vector<256x256xbf16>, vector<32x256xf32> -> vector<32x256xf32>
    %43 = arith.addf %37, %42 : vector<32x256xf32>
    %44 = vector.extract_strided_slice %0 {offsets = [0, 7, 0], sizes = [2, 16, 256], strides = [1, 1, 1]} : vector<2x24x256xbf16> to vector<2x16x256xbf16>
    %45 = vector.shape_cast %44 : vector<2x16x256xbf16> to vector<32x256xbf16>
    %c7 = arith.constant 7 : index
    %c0_24 = arith.constant 0 : index
    %c0_25 = arith.constant 0 : index
    %46 = vector.load %arg3[%c7, %c0_24, %c0_25] : memref<9x256x256xbf16, #tpu.memory_space<vmem>>, vector<1x256x256xbf16>
    %47 = vector.shape_cast %46 : vector<1x256x256xbf16> to vector<256x256xbf16>
    %cst_26 = arith.constant dense<0.000000e+00> : vector<32x256xf32>
    %48 = tpu.matmul %45, %47, %cst_26 {dimension_numbers = #tpu.dot_dimension_numbers<[1], [0], [0], [1], [0, 0, 1, 1], [], []>} : vector<32x256xbf16>, vector<256x256xbf16>, vector<32x256xf32> -> vector<32x256xf32>
    %49 = arith.addf %43, %48 : vector<32x256xf32>
    %50 = vector.extract_strided_slice %0 {offsets = [0, 8, 0], sizes = [2, 16, 256], strides = [1, 1, 1]} : vector<2x24x256xbf16> to vector<2x16x256xbf16>
    %51 = vector.shape_cast %50 : vector<2x16x256xbf16> to vector<32x256xbf16>
    %c8 = arith.constant 8 : index
    %c0_27 = arith.constant 0 : index
    %c0_28 = arith.constant 0 : index
    %52 = vector.load %arg3[%c8, %c0_27, %c0_28] : memref<9x256x256xbf16, #tpu.memory_space<vmem>>, vector<1x256x256xbf16>
    %53 = vector.shape_cast %52 : vector<1x256x256xbf16> to vector<256x256xbf16>
    %cst_29 = arith.constant dense<0.000000e+00> : vector<32x256xf32>
    %54 = tpu.matmul %51, %53, %cst_29 {dimension_numbers = #tpu.dot_dimension_numbers<[1], [0], [0], [1], [0, 0, 1, 1], [], []>} : vector<32x256xbf16>, vector<256x256xbf16>, vector<32x256xf32> -> vector<32x256xf32>
    %55 = arith.addf %49, %54 : vector<32x256xf32>
    %c0_30 = arith.constant 0 : index
    %c0_31 = arith.constant 0 : index
    %56 = vector.load %arg4[%c0_30, %c0_31] : memref<1x256xf32, #tpu.memory_space<vmem>>, vector<1x256xf32>
    %57 = vector.broadcast %56 : vector<1x256xf32> to vector<32x256xf32>
    %58 = arith.mulf %55, %57 : vector<32x256xf32>
    %c0_32 = arith.constant 0 : index
    %c0_33 = arith.constant 0 : index
    %59 = vector.load %arg5[%c0_32, %c0_33] : memref<1x256xf32, #tpu.memory_space<vmem>>, vector<1x256xf32>
    %60 = vector.broadcast %59 : vector<1x256xf32> to vector<32x256xf32>
    %61 = arith.addf %58, %60 : vector<32x256xf32>
    %62 = vector.extract_strided_slice %61 {offsets = [0, 0], sizes = [32, 128], strides = [1, 1]} : vector<32x256xf32> to vector<32x128xf32>
    %63 = vector.extract_strided_slice %61 {offsets = [0, 128], sizes = [32, 128], strides = [1, 1]} : vector<32x256xf32> to vector<32x128xf32>
    %64 = arith.maximumf %62, %63 : vector<32x128xf32>
    %cst_34 = arith.constant 0.000000e+00 : f32
    %65 = vector.broadcast %cst_34 : f32 to vector<32x128xf32>
    %66 = arith.maximumf %64, %65 : vector<32x128xf32>
    %67 = vector.shape_cast %66 : vector<32x128xf32> to vector<2x16x128xf32>
    %68 = arith.truncf %67 : vector<2x16x128xf32> to vector<2x16x128xbf16>
    %c0_35 = arith.constant 0 : index
    %c0_36 = arith.constant 0 : index
    %c0_37 = arith.constant 0 : index
    %69 = vector.load %arg6[%c0_35, %c0_36, %c0_37] : memref<2x16x128xbf16, #tpu.memory_space<vmem>>, vector<2x16x128xbf16>
    tpu.vector_store %arg6[%c0_35, %c0_36, %c0_37], %68 {strides = array<i32>} : memref<2x16x128xbf16, #tpu.memory_space<vmem>>, vector<2x16x128xbf16>,
    return
  }
  func.func @transform_0(%arg0: i32, %arg1: i32) -> (i32, i32, i32) {
    %c0_i32 = arith.constant 0 : i32
    %c0_i32_0 = arith.constant 0 : i32
    %c0_i32_1 = arith.constant 0 : i32
    return %arg0, %c0_i32, %c0_i32_0 : i32, i32, i32
  }
  func.func @transform_1(%arg0: i32, %arg1: i32) -> (i32, i32, i32) {
    %c0_i32 = arith.constant 0 : i32
    %c0_i32_0 = arith.constant 0 : i32
    %c0_i32_1 = arith.constant 0 : i32
    %c0_i32_2 = arith.constant 0 : i32
    return %c0_i32, %c0_i32_0, %c0_i32_1 : i32, i32, i32
  }
  func.func @transform_2(%arg0: i32, %arg1: i32) -> (i32, i32) {
    %c0_i32 = arith.constant 0 : i32
    %c0_i32_0 = arith.constant 0 : i32
    %c0_i32_1 = arith.constant 0 : i32
    return %c0_i32, %c0_i32_0 : i32, i32
  }
  func.func @transform_3(%arg0: i32, %arg1: i32) -> (i32, i32) {
    %c0_i32 = arith.constant 0 : i32
    %c0_i32_0 = arith.constant 0 : i32
    %c0_i32_1 = arith.constant 0 : i32
    return %c0_i32, %c0_i32_0 : i32, i32
  }
  func.func @transform_4(%arg0: i32, %arg1: i32) -> (i32, i32, i32) {
    %c0_i32 = arith.constant 0 : i32
    %c0_i32_0 = arith.constant 0 : i32
    return %arg0, %arg1, %c0_i32 : i32, i32, i32
  }
}

module attributes {stable_mosaic.version = 11 : i64} {
  func.func @_mlp_kernel(%arg0: i32, %arg1: memref<2x2048xbf16, #tpu.memory_space<vmem>>, %arg2: memref<2048x128xbf16, #tpu.memory_space<vmem>>, %arg3: memref<1x128xf32, #tpu.memory_space<vmem>>, %arg4: memref<128x128xf32, #tpu.memory_space<vmem>>, %arg5: memref<1x128xf32, #tpu.memory_space<vmem>>, %arg6: memref<2x128xf32, #tpu.memory_space<vmem>>) attributes {dimension_semantics = [#tpu.dimension_semantics<parallel>], iteration_bounds = array<i64: 1>, scalar_prefetch = 0 : i64, scratch_operands = 0 : i64, tpu.core_type = #tpu.core_type<tc>, window_params = [{transform_indices = @transform_0, window_bounds = array<i64: 2, 2048>}, {pipeline_mode = #tpu.pipeline_mode<synchronous>, transform_indices = @transform_1, window_bounds = array<i64: 2048, 128>}, {pipeline_mode = #tpu.pipeline_mode<synchronous>, transform_indices = @transform_2, window_bounds = array<i64: 1, 128>}, {pipeline_mode = #tpu.pipeline_mode<synchronous>, transform_indices = @transform_3, window_bounds = array<i64: 128, 128>}, {pipeline_mode = #tpu.pipeline_mode<synchronous>, transform_indices = @transform_4, window_bounds = array<i64: 1, 128>}, {transform_indices = @transform_5, window_bounds = array<i64: 2, 128>}]} {
    %c0 = arith.constant 0 : index
    %c0_0 = arith.constant 0 : index
    %0 = vector.load %arg1[%c0, %c0_0] : memref<2x2048xbf16, #tpu.memory_space<vmem>>, vector<2x2048xbf16>
    %c0_1 = arith.constant 0 : index
    %c0_2 = arith.constant 0 : index
    %1 = vector.load %arg2[%c0_1, %c0_2] : memref<2048x128xbf16, #tpu.memory_space<vmem>>, vector<2048x128xbf16>
    %cst = arith.constant dense<0.000000e+00> : vector<2x128xf32>
    %2 = tpu.matmul %0, %1, %cst {dimension_numbers = #tpu.dot_dimension_numbers<[1], [0], [0], [1], [0, 0, 1, 1], [], []>} : vector<2x2048xbf16>, vector<2048x128xbf16>, vector<2x128xf32> -> vector<2x128xf32>
    %c0_3 = arith.constant 0 : index
    %c0_4 = arith.constant 0 : index
    %3 = vector.load %arg3[%c0_3, %c0_4] : memref<1x128xf32, #tpu.memory_space<vmem>>, vector<1x128xf32>
    %4 = vector.broadcast %3 : vector<1x128xf32> to vector<2x128xf32>
    %5 = arith.addf %2, %4 : vector<2x128xf32>
    %cst_5 = arith.constant 0.000000e+00 : f32
    %6 = vector.broadcast %cst_5 : f32 to vector<2x128xf32>
    %7 = arith.maximumf %5, %6 : vector<2x128xf32>
    %c0_6 = arith.constant 0 : index
    %c0_7 = arith.constant 0 : index
    %8 = vector.load %arg4[%c0_6, %c0_7] : memref<128x128xf32, #tpu.memory_space<vmem>>, vector<128x128xf32>
    %cst_8 = arith.constant dense<0.000000e+00> : vector<2x128xf32>
    %9 = tpu.matmul %7, %8, %cst_8 {dimension_numbers = #tpu.dot_dimension_numbers<[1], [0], [0], [1], [0, 0, 1, 1], [], []>} : vector<2x128xf32>, vector<128x128xf32>, vector<2x128xf32> -> vector<2x128xf32>
    %c0_9 = arith.constant 0 : index
    %c0_10 = arith.constant 0 : index
    %10 = vector.load %arg5[%c0_9, %c0_10] : memref<1x128xf32, #tpu.memory_space<vmem>>, vector<1x128xf32>
    %11 = vector.broadcast %10 : vector<1x128xf32> to vector<2x128xf32>
    %12 = arith.addf %9, %11 : vector<2x128xf32>
    %c0_11 = arith.constant 0 : index
    %c0_12 = arith.constant 0 : index
    %13 = vector.load %arg6[%c0_11, %c0_12] : memref<2x128xf32, #tpu.memory_space<vmem>>, vector<2x128xf32>
    tpu.vector_store %arg6[%c0_11, %c0_12], %12 {strides = array<i32>} : memref<2x128xf32, #tpu.memory_space<vmem>>, vector<2x128xf32>,
    return
  }
  func.func @transform_0(%arg0: i32) -> (i32, i32) {
    %c0_i32 = arith.constant 0 : i32
    %c0_i32_0 = arith.constant 0 : i32
    return %arg0, %c0_i32 : i32, i32
  }
  func.func @transform_1(%arg0: i32) -> (i32, i32) {
    %c0_i32 = arith.constant 0 : i32
    %c0_i32_0 = arith.constant 0 : i32
    %c0_i32_1 = arith.constant 0 : i32
    return %c0_i32, %c0_i32_0 : i32, i32
  }
  func.func @transform_2(%arg0: i32) -> (i32, i32) {
    %c0_i32 = arith.constant 0 : i32
    %c0_i32_0 = arith.constant 0 : i32
    %c0_i32_1 = arith.constant 0 : i32
    return %c0_i32, %c0_i32_0 : i32, i32
  }
  func.func @transform_3(%arg0: i32) -> (i32, i32) {
    %c0_i32 = arith.constant 0 : i32
    %c0_i32_0 = arith.constant 0 : i32
    %c0_i32_1 = arith.constant 0 : i32
    return %c0_i32, %c0_i32_0 : i32, i32
  }
  func.func @transform_4(%arg0: i32) -> (i32, i32) {
    %c0_i32 = arith.constant 0 : i32
    %c0_i32_0 = arith.constant 0 : i32
    %c0_i32_1 = arith.constant 0 : i32
    return %c0_i32, %c0_i32_0 : i32, i32
  }
  func.func @transform_5(%arg0: i32) -> (i32, i32) {
    %c0_i32 = arith.constant 0 : i32
    %c0_i32_0 = arith.constant 0 : i32
    return %arg0, %c0_i32 : i32, i32
  }
}

</mosaic_0001>

<bundles_post_ra>
// kernel: _lambda_.4
= control target key start
LH: loop header
LB: loop body
LE: loop exit
PB: predicated region body
PF: predicated region fallthrough
CT: control target
= control target key end

     0   :  { %9 = vsyncpa [#allocation3], 0  ;;  %s1901_s0 = inlined_call_operand.vmem [shape: bf16[2,66,32], index: 0, kind: input, shape index: {}]   ;;  %s1902_s1 = inlined_call_operand.hbm [shape: bf16[3,32,256], index: 1, kind: input, shape index: {}]   ;;  %s1903_s2 = inlined_call_operand.hbm [shape: f32[1,256], index: 2, kind: input, shape index: {}]   ;;  %s1904_s3 = inlined_call_operand.hbm [shape: f32[1,256], index: 3, kind: input, shape index: {}]   ;;  %s1905_s4 = inlined_call_operand.vmem [shape: bf16[2,64,128], index: 4, kind: output, shape index: {}]  }
   0x1   :  { %10 = vsyncpa [#allocation5], 0  ;;  %s1422_s15 = smov [#allocation4]   ;;  %s1423_s17 = smov [#allocation2]  }
   0x2   :  { %s31_s16 = sshll.u32 %s1422_s15, 4  ;;  %s18_s18 = sshll.u32 %s1423_s17, 4  ;;  %s32_s16 = int_to_ptr.vmem [resolvable:$true] %s31_s16  ;;  %s1453_s18 = int_to_ptr.vmem [resolvable:$true] %s18_s18 }
   0x3   :  { %s1352_s21 = scalar_lea.hbm %s1903_s2, 32 }
   0x4   :  { %p1353_p0 = scmp.ne.s32.totalorder %s1903_s2, %s1352_s21  ;;  %p1356_p1 = scmp.lt.u32.totalorder %s1352_s21, %s1903_s2 }
   0x6   :  { %p1358_p2 = pnand %p1356_p1, %p1353_p0 }
   0x8   :  { %1361 = shalt.err (!%p1358_p2)
}
   0x9   :  { %s1362_s26 = scalar_lea.vmem %s32_s16, 32  ;;  %p1367_p4 = scmp.lt.s32.totalorder %s32_s16, %s32_s16 }
   0xa   :  { %p1363_p3 = scmp.ne.s32.totalorder %s32_s16, %s1362_s26  ;;  %p1368_p5 = scmp.lt.s32.totalorder %s1362_s26, %s1362_s26 }
   0xc   :  { %p1369_p6 = por %p1368_p5, %p1367_p4 }
   0xe   :  { %p1370_p7 = pnand %p1369_p6, %p1363_p3 }
  0x10   :  { %1373 = shalt.err (!%p1370_p7)
}
  0x11   :  { %34 = dma.hbm_to_vmem [thread:$0]  %s1903_s2, 32, %s32_s16, [#allocation5]  }
  0x12   :  { %s1374_s5 = scalar_lea.hbm %s1902_s1, 1536 }
  0x13   :  { %p1375_p8 = scmp.ne.s32.totalorder %s1902_s1, %s1374_s5  ;;  %p1378_p9 = scmp.lt.u32.totalorder %s1374_s5, %s1902_s1 }
  0x15   :  { %p1380_p10 = pnand %p1378_p9, %p1375_p8 }
  0x17   :  { %1383 = shalt.err (!%p1380_p10)
}
  0x18   :  { %s1384_s10 = scalar_lea.vmem %s1453_s18, 1536  ;;  %p1389_p12 = scmp.lt.s32.totalorder %s1453_s18, %s1453_s18 }
  0x19   :  { %p1385_p11 = scmp.ne.s32.totalorder %s1453_s18, %s1384_s10  ;;  %p1390_p13 = scmp.lt.s32.totalorder %s1384_s10, %s1384_s10 }
  0x1b   :  { %p1391_p0 = por %p1390_p13, %p1389_p12 }
  0x1d   :  { %p1392_p1 = pnand %p1391_p0, %p1385_p11 }
  0x1f   :  { %1395 = shalt.err (!%p1392_p1)
}
  0x20   :  { %s1424_s2 = smov 128   ;;  %s1425_s11 = smov 8  }
  0x21   :  { %24 = dma.hbm_to_vmem [thread:$0]  %s1902_s1, 1536, %s1453_s18, [#allocation3], %s1424_s2, %s1424_s2, %s1425_s11  }
  0x22   :  { %s1426_s14 = smov [#allocation6]   ;;  %s1396_s19 = scalar_lea.hbm %s1904_s3, 32 }
  0x23   :  { %s41_s15 = sshll.u32 %s1426_s14, 4  ;;  %p1397_p2 = scmp.ne.s32.totalorder %s1904_s3, %s1396_s19  ;;  %s42_s15 = int_to_ptr.vmem [resolvable:$true] %s41_s15 }
  0x24   :  { %p1400_p3 = scmp.lt.u32.totalorder %s1396_s19, %s1904_s3 }
  0x26   :  { %p1402_p4 = pnand %p1400_p3, %p1397_p2 }
  0x28   :  { %1405 = shalt.err (!%p1402_p4)
}
  0x29   :  { %s1406_s24 = scalar_lea.vmem %s42_s15, 32  ;;  %p1411_p6 = scmp.lt.s32.totalorder %s42_s15, %s42_s15 }
  0x2a   :  { %p1407_p5 = scmp.ne.s32.totalorder %s42_s15, %s1406_s24  ;;  %p1412_p7 = scmp.lt.s32.totalorder %s1406_s24, %s1406_s24 }
  0x2c   :  { %p1413_p8 = por %p1412_p7, %p1411_p6 }
  0x2e   :  { %p1414_p9 = pnand %p1413_p8, %p1407_p5 }
  0x30   :  { %1417 = shalt.err (!%p1414_p9)
}
  0x31   :  { %44 = dma.hbm_to_vmem [thread:$0]  %s1904_s3, 32, %s42_s15, [#allocation5]  }
  0x32   :  { %1418 = dma.done.wait [#allocation3], 1536  }
  0x33   :  { %1419 = vsyncadd [#allocation3], 4294965760 }
  0x34   :  { %1420 = dma.done.wait [#allocation5], 64  }
  0x35   :  { %1421 = vsyncadd [#allocation5], 4294967232  ;;  %v1427_v0 = vmov 0   ;;  %v1326_v1 = vld [vmem:[#allocation2 + $0x24] ss:$8 sps:$4 sm:$0xff]   ;;  %vm297_vm1 = vcmask 261120  }
  0x36   :  { %551 = vmatprep.mubr.bf16.mxu0 %v1427_v0  ;;  %354 = vmatprep.mubr.bf16.mxu1 %v1427_v0  ;;  %v1328_v2 = vld [vmem:[#allocation2 + $0x4] ss:$8 sps:$4 sm:$0xff]   ;;  %v1330_v3 = vld [vmem:[#allocation2 + $0x20] ss:$8 sps:$4 sm:$0xff]   ;;  %v1332_v5 = vld [vmem:[#allocation2 + $0x34] ss:$8 sps:$4 sm:$0xff]  }
  0x37   :  { %322 = vmatprep.subr.bf16.mxu1 %v1326_v1  ;;  %v1498_v4 = vld [vmem:[#allocation2] ss:$8 sps:$4 sm:$0xff]   ;;  %519 = vmatprep.subr.bf16.mxu0 %v1328_v2  ;;  %vm77_vm0 = vsmask.f32 3328  ;;  %v1501_v6 = vld [vmem:[#allocation2 + $0x14] ss:$8 sps:$4 sm:$0xff]  }
  0x38   :  { %323 = vmatpush1.bf16.msra.mxu1 %v1330_v3  ;;  %520 = vmatpush1.bf16.msra.mxu0 %v1498_v4  ;;  %v1336_v7 = vld [vmem:[#allocation2 + $0x30] ss:$8 sps:$4 sm:$0xff]   ;;  %v1508_v9 = vld [vmem:[%s1901_s0] sm:$0xf]  ;;  %v1513_v10 = vld [vmem:[%s1901_s0 + $0x4] sm:$0xf] }
  0x39   :  { %324 = vmatprep.subr.bf16.mxu1 %v1332_v5  ;;  %v1503_v8 = vld [vmem:[#allocation2 + $0x10] ss:$8 sps:$4 sm:$0xff]   ;;  %521 = vmatprep.subr.bf16.mxu0 %v1501_v6  ;;  %v81_v11 = vshrl.u32 %v1508_v9, 16  ;;  %v84_v12 = vshll.u32 %v1508_v9, 16  ;;  %v94_v13 = vshrl.u32 %v1513_v10, 16  ;;  %v1131_v14 = vcombine.low %v1508_v9, %v1513_v10 }
  0x3a   :  { %v1339_v15 = vld [vmem:[#allocation2 + $0x40] ss:$8 sps:$4 sm:$0xff]   ;;  %v1341_v16 = vld [vmem:[#allocation2 + $0x44] ss:$8 sps:$4 sm:$0xff]   ;;  %vm78_vm2 = vsmask.f32 7440 }
  0x3b   :  { %v1525_v17 = vld [vmem:[%s1901_s0 + $0x8] sm:$0xf]  ;;  %v83_v18 = vrot.slane %v81_v11, 4  ;;  %v86_v19 = vrot.slane %v84_v12, 5  ;;  %v90_v20 = vshll.u32 %v1513_v10, 16  ;;  %v96_v21 = vrot.slane %v94_v13, 4  ;;  %vm1549_vm3 = vmor %vm77_vm0, %vm78_vm2 }
  0x3c   :  { %325 = vmatpush1.bf16.msra.mxu1 %v1336_v7  ;;  %522 = vmatpush1.bf16.msra.mxu0 %v1503_v8  ;;  %v100_v22 = vshll.u32 %v1525_v17, 16  ;;  %v1532_v23 = vld [vmem:[%s1901_s0 + $0xc] sm:$0xf]  ;;  %v104_v24 = vshrl.u32 %v1525_v17, 16  ;;  %v1539_v28 = vld [vmem:[%s1901_s0 + $0x10] sm:$0xf] }
  0x3d   :  { %1252 = vmatprep.subr.bf16.mxu1 %v1328_v2  ;;  %760 = vmatprep.subr.bf16.mxu0 %v1341_v16  ;;  %v87_v25 = vor.u32 %v86_v19, %v83_v18  ;;  %v92_v26 = vrot.slane %v90_v20, 5  ;;  %v114_v27 = vshrl.u32 %v1532_v23, 16  ;;  %v1544_v29 = vld [vmem:[%s1901_s0 + $0x14] sm:$0xf]  ;;  %v110_v33 = vshll.u32 %v1532_v23, 16 }
  0x3e   :  { %v102_v31 = vrot.slane %v100_v22, 5  ;;  %v106_v32 = vrot.slane %v104_v24, 4  ;;  %v120_v34 = vshll.u32 %v1539_v28, 16  ;;  %v134_v38 = vshrl.u32 %v1544_v29, 16  ;;  %v1344_v39 = vld [vmem:[#allocation2 + $0x50] ss:$8 sps:$4 sm:$0xff]  }
  0x3f   :  { %1143 = vmatmul.mubr.msk.bf16.vlgmr.msra.gmra.mrb[0].mxu0 %vm297_vm1, %v1131_v14  ;;  %v88_v35 = vrot.slane %v87_v25, 4  ;;  %v97_v36 = vor.u32 %v96_v21, %v92_v26  ;;  %v116_v37 = vrot.slane %v114_v27, 4  ;;  %v112_v41 = vrot.slane %v110_v33, 5  ;;  %v1346_v42 = vld [vmem:[#allocation2 + $0x54] ss:$8 sps:$4 sm:$0xff]  }
  0x40   :  { %761 = vmatpush1.bf16.msra.mxu0 %v1339_v15  ;;  %561 = vmatprep.mubr.bf16.mxu0 %v1427_v0  ;;  %v107_v40 = vor.u32 %v106_v32, %v102_v31  ;;  %v124_v45 = vshrl.u32 %v1539_v28, 16  ;;  %v130_v46 = vshll.u32 %v1544_v29, 16  ;;  %v1132_v47 = vcombine.low %v1525_v17, %v1532_v23  ;;  %v1566_v51 = vld [vmem:[%s1901_s0 + $0x18] sm:$0xf]  ;;  %v1573_v56 = vld [vmem:[%s1901_s0 + $0x1c] sm:$0xf] }
  0x41   :  { %v93_v43 = vsel %vm1549_vm3, %v88_v35, %v92_v26  ;;  %v98_v44 = vrot.slane %v97_v36, 4  ;;  %v117_v49 = vor.u32 %v116_v37, %v112_v41  ;;  %v122_v50 = vrot.slane %v120_v34, 5  ;;  %762 = vmatprep.subr.bf16.mxu0 %v1346_v42  ;;  %v1592_v5 = vld [vmem:[%s1901_s0 + $0x24] sm:$0xf]  ;;  %v1599_v13 = vld [vmem:[%s1901_s0 + $0x28] sm:$0xf] }
  0x42   :  { %v108_v48 = vrot.slane %v107_v40, 4  ;;  %v126_v53 = vrot.slane %v124_v45, 4  ;;  %v132_v54 = vrot.slane %v130_v46, 5  ;;  %v136_v55 = vrot.slane %v134_v38, 4  ;;  %v1605_v18 = vld [vmem:[%s1901_s0 + $0x20] sm:$0x1] }
  0x43   :  { %v103_v52 = vsel %vm1549_vm3, %v98_v44, %v102_v31  ;;  %v118_v58 = vrot.slane %v117_v49, 4  ;;  %v140_v61 = vshll.u32 %v1566_v51, 16  ;;  %v154_v62 = vshrl.u32 %v1573_v56, 16  ;;  %v1624_v33 = vld [vmem:[%s1901_s0 + $0x2c] sm:$0xf] }
  0x44   :  { %763 = vmatpush1.bf16.msra.mxu0 %v1344_v39  ;;  %v1111_v57 = vcombine.low %v93_v43, %v103_v52  ;;  %v113_v59 = vsel %vm1549_vm3, %v108_v48, %v112_v41  ;;  %v127_v60 = vor.u32 %v126_v53, %v122_v50  ;;  %v137_v1 = vor.u32 %v136_v55, %v132_v54  ;;  %v1632_v40 = vld [vmem:[%s1901_s0 + $0x30] sm:$0xf] }
  0x45   :  { %v123_v63 = vsel %vm1549_vm3, %v118_v58, %v122_v50  ;;  %v144_v2 = vshrl.u32 %v1566_v51, 16  ;;  %v150_v3 = vshll.u32 %v1573_v56, 16  ;;  %v1133_v7 = vcombine.low %v1539_v28, %v1544_v29 }
  0x46   :  { %1123 = vmatmul.mubr.msk.bf16.vlgmr.msra.gmra.mrb[0].mxu1 %vm297_vm1, %v1111_v57  ;;  %v128_v11 = vrot.slane %v127_v60, 4  ;;  %v142_v12 = vrot.slane %v140_v61, 5  ;;  %v138_v14 = vrot.slane %v137_v1, 4  ;;  %v165_v19 = vshrl.u32 %v1592_v5, 16 }
  0x47   :  { %1144 = vmatmul.mubr.msk.bf16.gmra.mrb[4].mxu0 %vm297_vm1, %v1132_v47  ;;  %1254 = vmatpush1.bf16.msra.mxu1 %v1498_v4  ;;  %v1112_v4 = vcombine.low %v113_v59, %v123_v63  ;;  %v146_v15 = vrot.slane %v144_v2, 4  ;;  %v152_v16 = vrot.slane %v150_v3, 5  ;;  %v168_v20 = vshll.u32 %v1592_v5, 16 }
  0x48   :  { %364 = vmatprep.mubr.bf16.mxu1 %v1427_v0  ;;  %571 = vmatprep.mubr.bf16.mxu0 %v1427_v0  ;;  %v174_v21 = vshll.u32 %v1599_v13, 16  ;;  %v178_v22 = vshrl.u32 %v1599_v13, 16  ;;  %v639_v24 = vrot.slane %v1513_v10, 5  ;;  %v143_v25 = vsel %vm1549_vm3, %v138_v14, %v142_v12 }
  0x49   :  { %1253 = vmatprep.subr.bf16.mxu1 %v1501_v6  ;;  %v156_v6 = vrot.slane %v154_v62, 4  ;;  %v147_v26 = vor.u32 %v146_v15, %v142_v12  ;;  %v160_v31 = vshll.u32 %v1605_v18, 16  ;;  %vm634_vm4 = vcmask 1042432   ;;  %v1662_v62 = vld [vmem:[%s1901_s0 + $0x34] sm:$0xf] }
  0x4a   :  { %vm635_vm5 = vcmask 1046532   ;;  %v167_v10 = vrot.slane %v165_v19, 4  ;;  %v170_v32 = vrot.slane %v168_v20, 5  ;;  %v176_v34 = vrot.slane %v174_v21, 5 }
  0x4b   :  { %1255 = vmatpush1.bf16.msra.mxu1 %v1503_v8  ;;  %v133_v8 = vsel %vm1549_vm3, %v128_v11, %v132_v54  ;;  %v157_v27 = vor.u32 %v156_v6, %v152_v16  ;;  %v180_v35 = vrot.slane %v178_v22, 4  ;;  %v1151_v36 = vrot.slane %v1508_v9, 9  ;;  %vm1637_vm6 = vmor %vm634_vm4, %vm635_vm5 }
  0x4c   :  { %v641_v37 = vrot.slane %v639_v24, 4  ;;  %v1113_v38 = vcombine.low %v133_v8, %v143_v25  ;;  %v1134_v39 = vcombine.low %v1566_v51, %v1573_v56  ;;  %v642_v41 = vrot.slane %v1525_v17, 5 }
  0x4d   :  { %v148_v42 = vrot.slane %v147_v26, 4  ;;  %v158_v43 = vrot.slane %v157_v27, 4  ;;  %v162_v44 = vrot.slane %v160_v31, 5  ;;  %v171_v9 = vor.u32 %v170_v32, %v167_v10 }
  0x4e   :  { %1124 = vmatmul.mubr.msk.bf16.gmra.mrb[4].mxu1 %vm297_vm1, %v1112_v4  ;;  %v184_v46 = vshll.u32 %v1624_v33, 16  ;;  %v645_v47 = vrot.slane %v1532_v23, 5  ;;  %v181_v48 = vor.u32 %v180_v35, %v176_v34  ;;  %v188_v49 = vshrl.u32 %v1624_v33, 16 }
  0x4f   :  { %1145 = vmatmul.mubr.msk.bf16.gmra.mrb[8].mxu0 %vm297_vm1, %v1133_v7  ;;  %374 = vmatprep.mubr.bf16.mxu1 %v1427_v0  ;;  %v194_v50 = vshll.u32 %v1632_v40, 16  ;;  %v198_v17 = vshrl.u32 %v1632_v40, 16  ;;  %v640_v52 = vsel %vm1637_vm6, %v1151_v36, %v639_v24  ;;  %v153_v53 = vsel %vm1549_vm3, %v148_v42, %v152_v16  ;;  %v1667_v7 = vld [vmem:[%s1901_s0 + $0x38] sm:$0xf] }
  0x50   :  { %581 = vmatprep.mubr.bf16.mxu0 %v1427_v0  ;;  %v163_v23 = vsel %vm1549_vm3, %v158_v43, %v162_v44  ;;  %v643_v54 = vsel %vm1637_vm6, %v641_v37, %v642_v41  ;;  %v644_v55 = vrot.slane %v642_v41, 4  ;;  %v172_v57 = vrot.slane %v171_v9, 4  ;;  %v1695_v37 = vld [vmem:[%s1901_s0 + $0x40] sm:$0xf] }
  0x51   :  { %v186_v58 = vrot.slane %v184_v46, 5  ;;  %v647_v59 = vrot.slane %v645_v47, 4  ;;  %v648_v60 = vrot.slane %v1539_v28, 5  ;;  %v182_v61 = vrot.slane %v181_v48, 4 }
  0x52   :  { %v190_v63 = vrot.slane %v188_v49, 4  ;;  %v196_v1 = vrot.slane %v194_v50, 5  ;;  %v200_v2 = vrot.slane %v198_v17, 4  ;;  %v1114_v3 = vcombine.low %v153_v53, %v163_v23 }
  0x53   :  { %v1153_v4 = vcombine.low %v640_v52, %v643_v54  ;;  %v177_v11 = vsel %vm1549_vm3, %v172_v57, %v176_v34  ;;  %v646_v28 = vsel %vm1637_vm6, %v644_v55, %v645_v47  ;;  %v204_v12 = vshll.u32 %v1662_v62, 16  ;;  %v1718_v57 = vld [vmem:[%s1901_s0 + $0x44] sm:$0x1] }
  0x54   :  { %v187_v14 = vsel %vm1549_vm3, %v182_v61, %v186_v58  ;;  %v649_v15 = vsel %vm1637_vm6, %v647_v59, %v648_v60  ;;  %v191_v16 = vor.u32 %v190_v63, %v186_v58  ;;  %v201_v6 = vor.u32 %v200_v2, %v196_v1 }
  0x55   :  { %v651_v19 = vrot.slane %v1544_v29, 5  ;;  %v208_v20 = vshrl.u32 %v1662_v62, 16  ;;  %v214_v21 = vshll.u32 %v1667_v7, 16  ;;  %v218_v22 = vshrl.u32 %v1667_v7, 16  ;;  %v1690_v29 = vld [vmem:[%s1901_s0 + $0x3c] sm:$0xf] }
  0x56   :  { %1125 = vmatmul.mubr.msk.bf16.gmra.mrb[8].mxu1 %vm297_vm1, %v1113_v38  ;;  %v1154_v24 = vcombine.low %v646_v28, %v649_v15  ;;  %v206_v8 = vrot.slane %v204_v12, 5  ;;  %v650_v25 = vrot.slane %v648_v60, 4  ;;  %v1115_v26 = vcombine.low %v177_v11, %v187_v14 }
  0x57   :  { %1146 = vmatmul.mubr.msk.bf16.gmra.mrb[12].mxu0 %vm297_vm1, %v1134_v39  ;;  %384 = vmatprep.mubr.bf16.mxu1 %v1427_v0  ;;  %v192_v27 = vrot.slane %v191_v16, 4  ;;  %v202_v31 = vrot.slane %v201_v6, 4  ;;  %v654_v10 = vrot.slane %v1566_v51, 5  ;;  %v653_v32 = vrot.slane %v651_v19, 4 }
  0x58   :  { %792 = vmatprep.mubr.bf16.mxu0 %v1427_v0  ;;  %v210_v34 = vrot.slane %v208_v20, 4  ;;  %v216_v35 = vrot.slane %v214_v21, 5  ;;  %v220_v36 = vrot.slane %v218_v22, 4  ;;  %v652_v39 = vsel %vm1637_vm6, %v650_v25, %v651_v19 }
  0x59   :  { %v197_v38 = vsel %vm1549_vm3, %v192_v27, %v196_v1  ;;  %v207_v51 = vsel %vm1549_vm3, %v202_v31, %v206_v8  ;;  %v224_v41 = vshll.u32 %v1690_v29, 16  ;;  %v655_v42 = vsel %vm1637_vm6, %v653_v32, %v654_v10 }
  0x5a   :  { %v211_v43 = vor.u32 %v210_v34, %v206_v8  ;;  %v221_v44 = vor.u32 %v220_v36, %v216_v35  ;;  %v657_v9 = vrot.slane %v1573_v56, 5  ;;  %v228_v46 = vshrl.u32 %v1690_v29, 16 }
  0x5b   :  { %v234_v47 = vshll.u32 %v1695_v37, 16  ;;  %v238_v48 = vshrl.u32 %v1695_v37, 16  ;;  %v1116_v49 = vcombine.low %v197_v38, %v207_v51  ;;  %v226_v50 = vrot.slane %v224_v41, 5 }
  0x5c   :  { %v656_v17 = vrot.slane %v654_v10, 4  ;;  %v1155_v52 = vcombine.low %v652_v39, %v655_v42  ;;  %v212_v53 = vrot.slane %v211_v43, 4  ;;  %v222_v23 = vrot.slane %v221_v44, 4 }
  0x5d   :  { %v660_v54 = vrot.slane %v1605_v18, 5  ;;  %v659_v55 = vrot.slane %v657_v9, 4  ;;  %v230_v56 = vrot.slane %v228_v46, 4  ;;  %v236_v58 = vrot.slane %v234_v47, 5 }
  0x5e   :  { %1126 = vmatmul.mubr.msk.bf16.gmra.mrb[12].mxu1 %vm297_vm1, %v1114_v3  ;;  %v240_v59 = vrot.slane %v238_v48, 4  ;;  %v217_v60 = vsel %vm1549_vm3, %v212_v53, %v216_v35  ;;  %v227_v61 = vsel %vm1549_vm3, %v222_v23, %v226_v50  ;;  %v658_v18 = vsel %vm1637_vm6, %v656_v17, %v657_v9 }
  0x5f   :  { %1165 = vmatmul.mubr.msk.bf16.vlgmr.msra.gmra.mrb[0].mxu0 %vm297_vm1, %v1153_v4  ;;  %394 = vmatprep.mubr.bf16.mxu1 %v1427_v0  ;;  %v244_v63 = vshll.u32 %v1718_v57, 16  ;;  %v661_v1 = vsel %vm1637_vm6, %v659_v55, %v660_v54  ;;  %v231_v2 = vor.u32 %v230_v56, %v226_v50  ;;  %v664_v4 = vrot.slane %v1599_v13, 5 }
  0x60   :  { %802 = vmatprep.mubr.bf16.mxu0 %v1427_v0  ;;  %v241_v3 = vor.u32 %v240_v59, %v236_v58  ;;  %v1117_v11 = vcombine.low %v217_v60, %v227_v61  ;;  %v1156_v28 = vcombine.low %v658_v18, %v661_v1  ;;  %v1152_v14 = vrot.slane %v1592_v5, 9  ;;  %v905_v60 = vld [vmem:[#allocation4] sm:$0x3] }
  0x61   :  { %v246_v12 = vrot.slane %v244_v63, 5  ;;  %v232_v15 = vrot.slane %v231_v2, 4  ;;  %v666_v6 = vrot.slane %v664_v4, 4  ;;  %v667_v19 = vrot.slane %v1624_v33, 5 }
  0x62   :  { %v242_v16 = vrot.slane %v241_v3, 4  ;;  %v665_v20 = vsel %vm1637_vm6, %v1152_v14, %v664_v4  ;;  %v670_v8 = vrot.slane %v1632_v40, 5  ;;  %v673_v10 = vrot.slane %v1662_v62, 5 }
  0x63   :  { %v237_v21 = vsel %vm1549_vm3, %v232_v15, %v236_v58  ;;  %v669_v27 = vrot.slane %v667_v19, 4  ;;  %v676_v34 = vrot.slane %v1667_v7, 5  ;;  %v1135_v35 = vcombine.low %v1592_v5, %v1599_v13 }
  0x64   :  { %v247_v22 = vsel %vm1549_vm3, %v242_v16, %v246_v12  ;;  %v672_v31 = vrot.slane %v670_v8, 4  ;;  %v675_v38 = vrot.slane %v673_v10, 4  ;;  %v679_v39 = vrot.slane %v1690_v29, 5 }
  0x65   :  { %v1118_v25 = vcombine.low %v237_v21, %v247_v22  ;;  %v671_v30 = vsel %vm1637_vm6, %v669_v27, %v670_v8  ;;  %v678_v51 = vrot.slane %v676_v34, 4  ;;  %v682_v5 = vrot.slane %v1695_v37, 5 }
  0x66   :  { %1127 = vmatmul.mubr.msk.bf16.gmra.mrb[16].mxu1 %vm297_vm1, %v1115_v26  ;;  %v674_v32 = vsel %vm1637_vm6, %v672_v31, %v673_v10  ;;  %v677_v41 = vsel %vm1637_vm6, %v675_v38, %v676_v34  ;;  %v1136_v13 = vcombine.low %v1624_v33, %v1632_v40  ;;  %v681_v44 = vrot.slane %v679_v39, 4 }
  0x67   :  { %1166 = vmatmul.mubr.msk.bf16.gmra.mrb[4].mxu0 %vm297_vm1, %v1154_v24  ;;  %404 = vmatprep.mubr.bf16.mxu1 %v1427_v0  ;;  %v668_v24 = vsel %vm1637_vm6, %v666_v6, %v667_v19  ;;  %v1158_v36 = vcombine.low %v671_v30, %v674_v32  ;;  %v680_v42 = vsel %vm1637_vm6, %v678_v51, %v679_v39  ;;  %v684_v9 = vrot.slane %v682_v5, 4 }
  0x68   :  { %812 = vmatprep.mubr.bf16.mxu0 %v1427_v0  ;;  %v1157_v26 = vcombine.low %v665_v20, %v668_v24  ;;  %v1159_v43 = vcombine.low %v677_v41, %v680_v42  ;;  %v685_v46 = vrot.slane %v1718_v57, 5  ;;  %v683_v47 = vsel %vm1637_vm6, %v681_v44, %v682_v5 }
  0x69   :  { %v1137_v33 = vcombine.low %v1662_v62, %v1667_v7  ;;  %v907_v7 = vlaneseq }
  0x6a   :  { %v686_v48 = vsel %vm1637_vm6, %v684_v9, %v685_v46 }
  0x6b   :  { %v1160_v40 = vcombine.low %v683_v47, %v686_v48  ;;  %v908_v55 = vshrl.u32 %v907_v7, 7 }
  0x6e   :  { %1128 = vmatmul.mubr.msk.bf16.gmra.mrb[20].mxu1 %vm297_vm1, %v1116_v49  ;;  %v1138_v49 = vcombine.low %v1690_v29, %v1695_v37  ;;  %v913_v29 = vsub.s32 1, %v908_v55  ;;  %v949_v37 = vld [vmem:[#allocation6] sm:$0x3] }
  0x6f   :  { %1167 = vmatmul.mubr.msk.bf16.gmra.mrb[8].mxu0 %vm297_vm1, %v1155_v52  ;;  %414 = vmatprep.mubr.bf16.mxu1 %v1427_v0 }
  0x70   :  { %822 = vmatprep.mubr.bf16.mxu0 %v1427_v0  ;;  %v1796_v1 = vrot.slane %v905_v60, %v913_v29  ;;  %v1804_v14 = vrot.slane %v949_v37, %v913_v29 }
  0x76   :  { %1129 = vmatmul.mubr.msk.bf16.gmra.mrb[24].mxu1 %vm297_vm1, %v1117_v11 }
  0x77   :  { %1168 = vmatmul.mubr.msk.bf16.gmra.mrb[12].mxu0 %vm297_vm1, %v1156_v28  ;;  %424 = vmatprep.mubr.bf16.mxu1 %v1427_v0 }
  0x78   :  { %832 = vmatprep.mubr.bf16.mxu0 %v1427_v0 }
  0x7e   :  { %1130 = vmatmul.mubr.msk.bf16.gmra.mrb[28].mxu1 %vm297_vm1, %v1118_v25 }
  0x7f   :  { %1169 = vmatmul.mubr.msk.bf16.gmra.mrb[16].mxu0 %vm297_vm1, %v1157_v26  ;;  %591 = vmatprep.mubr.bf16.mxu1 %v1427_v0 }
  0x80   :  { %842 = vmatprep.mubr.bf16.mxu0 %v1427_v0 }
  0x86   :  { %1147 = vmatmul.mubr.msk.bf16.vlgmr.msra.gmra.mrb[16].mxu1 %vm297_vm1, %v1135_v35 }
  0x87   :  { %1170 = vmatmul.mubr.msk.bf16.gmra.mrb[20].mxu0 %vm297_vm1, %v1158_v36  ;;  %601 = vmatprep.mubr.bf16.mxu1 %v1427_v0 }
  0x88   :  { %852 = vmatprep.mubr.bf16.mxu0 %v1427_v0 }
  0x8e   :  { %1148 = vmatmul.mubr.msk.bf16.gmra.mrb[20].mxu1 %vm297_vm1, %v1136_v13 }
  0x8f   :  { %1171 = vmatmul.mubr.msk.bf16.gmra.mrb[24].mxu0 %vm297_vm1, %v1159_v43  ;;  %611 = vmatprep.mubr.bf16.mxu1 %v1427_v0 }
  0x90   :  { %862 = vmatprep.mubr.bf16.mxu0 %v1427_v0 }
  0x96   :  { %1149 = vmatmul.mubr.msk.bf16.gmra.mrb[24].mxu1 %vm297_vm1, %v1137_v33 }
  0x97   :  { %1172 = vmatmul.mubr.msk.bf16.gmra.mrb[28].mxu0 %vm297_vm1, %v1160_v40  ;;  %621 = vmatprep.mubr.bf16.mxu1 %v1427_v0  ;;  %v909_v0 = vsub.s32 0, %v908_v55 }
  0x99   :  { %v1792_v61 = vrot.slane %v905_v60, %v909_v0  ;;  %v1800_v4 = vrot.slane %v949_v37, %v909_v0 }
  0x9e   :  { %1150 = vmatmul.mubr.msk.bf16.gmra.mrb[28].mxu1 %vm297_vm1, %v1138_v49 }
 0x119   :  { %v356_v50 = vpop.f32.mrb[0].mxu1 }
 0x11a   :  { %v358_v17 = vpop.f32.mrb[1].mxu1 }
 0x11b   :  { %v360_v52 = vpop.f32.mrb[2].mxu1 }
 0x11c   :  { %v362_v45 = vpop.f32.mrb[3].mxu1 }
 0x121   :  { %v366_v53 = vpop.f32.mrb[4].mxu1 }
 0x122   :  { %v368_v23 = vpop.f32.mrb[5].mxu1 }
 0x123   :  { %v370_v54 = vpop.f32.mrb[6].mxu1 }
 0x124   :  { %v372_v62 = vpop.f32.mrb[7].mxu1 }
 0x129   :  { %v376_v57 = vpop.f32.mrb[8].mxu1 }
 0x12a   :  { %v378_v56 = vpop.f32.mrb[9].mxu1 }
 0x12b   :  { %v380_v58 = vpop.f32.mrb[10].mxu1 }
 0x12c   :  { %v1790_v59 = vpop.f32.mrb[11].mxu1 }
 0x131   :  { %v1794_v18 = vpop.f32.mrb[12].mxu1 }
 0x132   :  { %v794_v63 = vpop.f32.mrb[0].mxu0  ;;  %v1798_v2 = vpop.f32.mrb[13].mxu1 }
 0x133   :  { %v1256_v3 = vadd.f32 %v794_v63, %v356_v50  ;;  %v796_v11 = vpop.f32.mrb[1].mxu0  ;;  %v1802_v28 = vpop.f32.mrb[14].mxu1 }
 0x134   :  { %v1257_v12 = vadd.f32 %v796_v11, %v358_v17  ;;  %v798_v15 = vpop.f32.mrb[2].mxu0  ;;  %v1806_v16 = vpop.f32.mrb[15].mxu1 }
 0x135   :  { %v917_v6 = vmul.f32 %v1256_v3, %v1792_v61  ;;  %v1258_v19 = vadd.f32 %v798_v15, %v360_v52  ;;  %v800_v20 = vpop.f32.mrb[3].mxu0 }
 0x136   :  { %v918_v21 = vmul.f32 %v1257_v12, %v1796_v1  ;;  %v1259_v22 = vadd.f32 %v800_v20, %v362_v45 }
 0x137   :  { %v961_v24 = vadd.f32 %v1800_v4, %v917_v6  ;;  %v919_v8 = vmul.f32 %v1258_v19, %v1792_v61 }
 0x138   :  { %v962_v25 = vadd.f32 %v1804_v14, %v918_v21  ;;  %v920_v26 = vmul.f32 %v1259_v22, %v1796_v1 }
 0x139   :  { %v963_v27 = vadd.f32 %v1800_v4, %v919_v8 }
 0x13a   :  { %v993_v31 = vmax.f32 %v961_v24, %v962_v25  ;;  %v964_v10 = vadd.f32 %v1804_v14, %v920_v26  ;;  %v804_v30 = vpop.f32.mrb[4].mxu0 }
 0x13b   :  { %v1260_v32 = vadd.f32 %v804_v30, %v366_v53  ;;  %v806_v34 = vpop.f32.mrb[5].mxu0 }
 0x13c   :  { %v994_v35 = vmax.f32 %v963_v27, %v964_v10  ;;  %v1261_v36 = vadd.f32 %v806_v34, %v368_v23  ;;  %v808_v38 = vpop.f32.mrb[6].mxu0  ;;  %v1009_v42 = vmax.f32 %v993_v31, 0.0 }
 0x13d   :  { %v921_v51 = vmul.f32 %v1260_v32, %v1792_v61  ;;  %v1262_v39 = vadd.f32 %v808_v38, %v370_v54  ;;  %v810_v41 = vpop.f32.mrb[7].mxu0 }
 0x13e   :  { %v1010_v5 = vmax.f32 %v994_v35, 0.0  ;;  %v922_v13 = vmul.f32 %v1261_v36, %v1796_v1  ;;  %v1263_v43 = vadd.f32 %v810_v41, %v372_v62 }
 0x13f   :  { %v965_v44 = vadd.f32 %v1800_v4, %v921_v51  ;;  %v923_v9 = vmul.f32 %v1262_v39, %v1792_v61 }
 0x140   :  { %v1208_v46 = vpack.c.bf16 %v1010_v5, %v1009_v42  ;;  %v966_v47 = vadd.f32 %v1804_v14, %v922_v13  ;;  %v924_v48 = vmul.f32 %v1263_v43, %v1796_v1 }
 0x141   :  { %v967_v33 = vadd.f32 %v1800_v4, %v923_v9 }
 0x142   :  { %1209 = vst [vmem:[%s1905_s4] sm:$0xff] %v1208_v46   ;;  %v995_v40 = vmax.f32 %v965_v44, %v966_v47  ;;  %v968_v49 = vadd.f32 %v1804_v14, %v924_v48  ;;  %v814_v50 = vpop.f32.mrb[8].mxu0 }
 0x143   :  { %v1264_v17 = vadd.f32 %v814_v50, %v376_v57  ;;  %v816_v52 = vpop.f32.mrb[9].mxu0 }
 0x144   :  { %v996_v45 = vmax.f32 %v967_v33, %v968_v49  ;;  %v1265_v53 = vadd.f32 %v816_v52, %v378_v56  ;;  %v818_v23 = vpop.f32.mrb[10].mxu0  ;;  %v1011_v55 = vmax.f32 %v995_v40, 0.0 }
 0x145   :  { %v925_v54 = vmul.f32 %v1264_v17, %v1792_v61  ;;  %v1266_v62 = vadd.f32 %v818_v23, %v380_v58  ;;  %v820_v7 = vpop.f32.mrb[11].mxu0 }
 0x146   :  { %v1012_v0 = vmax.f32 %v996_v45, 0.0  ;;  %v926_v60 = vmul.f32 %v1265_v53, %v1796_v1  ;;  %v1267_v29 = vadd.f32 %v820_v7, %v1790_v59 }
 0x147   :  { %v969_v37 = vadd.f32 %v1800_v4, %v925_v54  ;;  %v927_v63 = vmul.f32 %v1266_v62, %v1792_v61 }
 0x148   :  { %v1213_v3 = vpack.c.bf16 %v1012_v0, %v1011_v55  ;;  %v970_v57 = vadd.f32 %v1804_v14, %v926_v60  ;;  %v928_v56 = vmul.f32 %v1267_v29, %v1796_v1 }
 0x149   :  { %v971_v11 = vadd.f32 %v1800_v4, %v927_v63 }
 0x14a   :  { %1245 = vst [vmem:[%s1905_s4 + $0x8] sm:$0xff] %v1213_v3   ;;  %v997_v58 = vmax.f32 %v969_v37, %v970_v57  ;;  %v972_v12 = vadd.f32 %v1804_v14, %v928_v56  ;;  %v824_v15 = vpop.f32.mrb[12].mxu0 }
 0x14b   :  { %v1268_v59 = vadd.f32 %v824_v15, %v1794_v18  ;;  %v826_v6 = vpop.f32.mrb[13].mxu0 }
 0x14c   :  { %v998_v19 = vmax.f32 %v971_v11, %v972_v12  ;;  %v1269_v20 = vadd.f32 %v826_v6, %v1798_v2  ;;  %v828_v21 = vpop.f32.mrb[14].mxu0  ;;  %v1013_v25 = vmax.f32 %v997_v58, 0.0 }
 0x14d   :  { %v929_v22 = vmul.f32 %v1268_v59, %v1792_v61  ;;  %v1270_v24 = vadd.f32 %v828_v21, %v1802_v28  ;;  %v830_v8 = vpop.f32.mrb[15].mxu0 }
 0x14e   :  { %v1014_v26 = vmax.f32 %v998_v19, 0.0  ;;  %v930_v27 = vmul.f32 %v1269_v20, %v1796_v1  ;;  %v1271_v31 = vadd.f32 %v830_v8, %v1806_v16 }
 0x14f   :  { %v973_v10 = vadd.f32 %v1800_v4, %v929_v22  ;;  %v931_v18 = vmul.f32 %v1270_v24, %v1792_v61 }
 0x150   :  { %v1218_v30 = vpack.c.bf16 %v1014_v26, %v1013_v25  ;;  %v974_v32 = vadd.f32 %v1804_v14, %v930_v27  ;;  %v932_v2 = vmul.f32 %v1271_v31, %v1796_v1 }
 0x151   :  { %v975_v34 = vadd.f32 %v1800_v4, %v931_v18 }
 0x152   :  { %1246 = vst [vmem:[%s1905_s4 + $0x10] sm:$0xff] %v1218_v30   ;;  %v999_v28 = vmax.f32 %v973_v10, %v974_v32  ;;  %v976_v35 = vadd.f32 %v1804_v14, %v932_v2  ;;  %v834_v36 = vpop.f32.mrb[16].mxu0 }
 0x153   :  { %v836_v16 = vpop.f32.mrb[17].mxu0 }
 0x154   :  { %v1000_v38 = vmax.f32 %v975_v34, %v976_v35  ;;  %v838_v51 = vpop.f32.mrb[18].mxu0  ;;  %v1015_v41 = vmax.f32 %v999_v28, 0.0 }
 0x155   :  { %v840_v39 = vpop.f32.mrb[19].mxu0 }
 0x156   :  { %v1016_v42 = vmax.f32 %v1000_v38, 0.0 }
 0x158   :  { %v1223_v5 = vpack.c.bf16 %v1016_v42, %v1015_v41 }
 0x159   :  { %v593_v13 = vpop.f32.mrb[16].mxu1 }
 0x15a   :  { %1247 = vst [vmem:[%s1905_s4 + $0x18] sm:$0xff] %v1223_v5   ;;  %v844_v43 = vpop.f32.mrb[20].mxu0  ;;  %v1272_v44 = vadd.f32 %v834_v36, %v593_v13  ;;  %v595_v9 = vpop.f32.mrb[17].mxu1 }
 0x15b   :  { %v846_v46 = vpop.f32.mrb[21].mxu0  ;;  %v1273_v47 = vadd.f32 %v836_v16, %v595_v9  ;;  %v597_v48 = vpop.f32.mrb[18].mxu1 }
 0x15c   :  { %v848_v33 = vpop.f32.mrb[22].mxu0  ;;  %v933_v40 = vmul.f32 %v1272_v44, %v1792_v61  ;;  %v1274_v49 = vadd.f32 %v838_v51, %v597_v48  ;;  %v599_v50 = vpop.f32.mrb[19].mxu1 }
 0x15d   :  { %v850_v17 = vpop.f32.mrb[23].mxu0  ;;  %v934_v52 = vmul.f32 %v1273_v47, %v1796_v1  ;;  %v1275_v45 = vadd.f32 %v840_v39, %v599_v50 }
 0x15e   :  { %v977_v53 = vadd.f32 %v1800_v4, %v933_v40  ;;  %v935_v23 = vmul.f32 %v1274_v49, %v1792_v61 }
 0x15f   :  { %v978_v54 = vadd.f32 %v1804_v14, %v934_v52  ;;  %v936_v62 = vmul.f32 %v1275_v45, %v1796_v1 }
 0x160   :  { %v979_v7 = vadd.f32 %v1800_v4, %v935_v23 }
 0x161   :  { %v1001_v55 = vmax.f32 %v977_v53, %v978_v54  ;;  %v980_v0 = vadd.f32 %v1804_v14, %v936_v62  ;;  %v603_v60 = vpop.f32.mrb[20].mxu1 }
 0x162   :  { %v854_v29 = vpop.f32.mrb[24].mxu0  ;;  %v1276_v37 = vadd.f32 %v844_v43, %v603_v60  ;;  %v605_v63 = vpop.f32.mrb[21].mxu1 }
 0x163   :  { %v856_v3 = vpop.f32.mrb[25].mxu0  ;;  %v1002_v57 = vmax.f32 %v979_v7, %v980_v0  ;;  %v1277_v56 = vadd.f32 %v846_v46, %v605_v63  ;;  %v607_v11 = vpop.f32.mrb[22].mxu1  ;;  %v1017_v19 = vmax.f32 %v1001_v55, 0.0 }
 0x164   :  { %v858_v58 = vpop.f32.mrb[26].mxu0  ;;  %v937_v12 = vmul.f32 %v1276_v37, %v1792_v61  ;;  %v1278_v15 = vadd.f32 %v848_v33, %v607_v11  ;;  %v609_v59 = vpop.f32.mrb[23].mxu1 }
 0x165   :  { %v860_v6 = vpop.f32.mrb[27].mxu0  ;;  %v1018_v20 = vmax.f32 %v1002_v57, 0.0  ;;  %v938_v21 = vmul.f32 %v1277_v56, %v1796_v1  ;;  %v1279_v22 = vadd.f32 %v850_v17, %v609_v59 }
 0x166   :  { %v981_v24 = vadd.f32 %v1800_v4, %v937_v12  ;;  %v939_v8 = vmul.f32 %v1278_v15, %v1792_v61 }
 0x167   :  { %v1228_v25 = vpack.c.bf16 %v1018_v20, %v1017_v19  ;;  %v982_v26 = vadd.f32 %v1804_v14, %v938_v21  ;;  %v940_v27 = vmul.f32 %v1279_v22, %v1796_v1 }
 0x168   :  { %v983_v31 = vadd.f32 %v1800_v4, %v939_v8 }
 0x169   :  { %1248 = vst [vmem:[%s1905_s4 + $0x20] sm:$0xff] %v1228_v25   ;;  %v1003_v10 = vmax.f32 %v981_v24, %v982_v26  ;;  %v984_v18 = vadd.f32 %v1804_v14, %v940_v27  ;;  %v613_v30 = vpop.f32.mrb[24].mxu1 }
 0x16a   :  { %v864_v32 = vpop.f32.mrb[28].mxu0  ;;  %v1280_v2 = vadd.f32 %v854_v29, %v613_v30  ;;  %v615_v34 = vpop.f32.mrb[25].mxu1 }
 0x16b   :  { %v866_v28 = vpop.f32.mrb[29].mxu0  ;;  %v1004_v35 = vmax.f32 %v983_v31, %v984_v18  ;;  %v1281_v36 = vadd.f32 %v856_v3, %v615_v34  ;;  %v617_v16 = vpop.f32.mrb[26].mxu1  ;;  %v1019_v5 = vmax.f32 %v1003_v10, 0.0 }
 0x16c   :  { %v868_v38 = vpop.f32.mrb[30].mxu0  ;;  %v941_v51 = vmul.f32 %v1280_v2, %v1792_v61  ;;  %v1282_v39 = vadd.f32 %v858_v58, %v617_v16  ;;  %v619_v41 = vpop.f32.mrb[27].mxu1 }
 0x16d   :  { %v870_v42 = vpop.f32.mrb[31].mxu0  ;;  %v1020_v13 = vmax.f32 %v1004_v35, 0.0  ;;  %v942_v43 = vmul.f32 %v1281_v36, %v1796_v1  ;;  %v1283_v44 = vadd.f32 %v860_v6, %v619_v41 }
 0x16e   :  { %v985_v9 = vadd.f32 %v1800_v4, %v941_v51  ;;  %v943_v46 = vmul.f32 %v1282_v39, %v1792_v61 }
 0x16f   :  { %v1233_v47 = vpack.c.bf16 %v1020_v13, %v1019_v5  ;;  %v986_v48 = vadd.f32 %v1804_v14, %v942_v43  ;;  %v944_v33 = vmul.f32 %v1283_v44, %v1796_v1 }
 0x170   :  { %v987_v40 = vadd.f32 %v1800_v4, %v943_v46 }
 0x171   :  { %1249 = vst [vmem:[%s1905_s4 + $0x28] sm:$0xff] %v1233_v47   ;;  %v1005_v49 = vmax.f32 %v985_v9, %v986_v48  ;;  %v988_v50 = vadd.f32 %v1804_v14, %v944_v33  ;;  %v623_v17 = vpop.f32.mrb[28].mxu1 }
 0x172   :  { %v1284_v52 = vadd.f32 %v864_v32, %v623_v17  ;;  %v625_v45 = vpop.f32.mrb[29].mxu1 }
 0x173   :  { %v1006_v53 = vmax.f32 %v987_v40, %v988_v50  ;;  %v1285_v23 = vadd.f32 %v866_v28, %v625_v45  ;;  %v627_v54 = vpop.f32.mrb[30].mxu1  ;;  %v1021_v0 = vmax.f32 %v1005_v49, 0.0 }
 0x174   :  { %v945_v62 = vmul.f32 %v1284_v52, %v1792_v61  ;;  %v1286_v7 = vadd.f32 %v868_v38, %v627_v54  ;;  %v629_v55 = vpop.f32.mrb[31].mxu1 }
 0x175   :  { %v1022_v60 = vmax.f32 %v1006_v53, 0.0  ;;  %v946_v29 = vmul.f32 %v1285_v23, %v1796_v1  ;;  %v1287_v37 = vadd.f32 %v870_v42, %v629_v55 }
 0x176   :  { %v989_v63 = vadd.f32 %v1800_v4, %v945_v62  ;;  %v947_v3 = vmul.f32 %v1286_v7, %v1792_v61 }
 0x177   :  { %v1238_v57 = vpack.c.bf16 %v1022_v60, %v1021_v0  ;;  %v990_v56 = vadd.f32 %v1804_v14, %v946_v29  ;;  %v948_v11 = vmul.f32 %v1287_v37, %v1796_v1 }
 0x178   :  { %v991_v58 = vadd.f32 %v1800_v4, %v947_v3 }
 0x179   :  { %1250 = vst [vmem:[%s1905_s4 + $0x30] sm:$0xff] %v1238_v57   ;;  %v1007_v12 = vmax.f32 %v989_v63, %v990_v56  ;;  %v992_v15 = vadd.f32 %v1804_v14, %v948_v11 }
 0x17b   :  { %v1008_v59 = vmax.f32 %v991_v58, %v992_v15  ;;  %v1023_v6 = vmax.f32 %v1007_v12, 0.0 }
 0x17d   :  { %v1024_v19 = vmax.f32 %v1008_v59, 0.0 }
 0x17f   :  { %v1243_v20 = vpack.c.bf16 %v1024_v19, %v1023_v6 }
 0x181   :  { %1251 = vst [vmem:[%s1905_s4 + $0x38] sm:$0xff] %v1243_v20  }
 0x182   :  { %1109 = vsyncpa [#allocation3], 1 }
 0x183   :  { %1110 = vsyncpa [#allocation5], 1 }

// kernel: _lambda_.7
= control target key start
LH: loop header
LB: loop body
LE: loop exit
PB: predicated region body
PF: predicated region fallthrough
CT: control target
= control target key end

     0   :  { %v293_v28 = vlaneseq  ;;  %v2141_v36 = vmov 1966171168   ;;  %s2656_s0 = inlined_call_operand.vmem [shape: bf16[2,2048], index: 0, kind: input, shape index: {}]   ;;  %s2657_s1 = inlined_call_operand.vmem [shape: bf16[2048,128], index: 1, kind: input, shape index: {}]   ;;  %s2658_s2 = inlined_call_operand.vmem [shape: f32[1,128], index: 2, kind: input, shape index: {}]   ;;  %s2659_s3 = inlined_call_operand.vmem [shape: f32[128,128], index: 3, kind: input, shape index: {}]   ;;  %s2660_s4 = inlined_call_operand.vmem [shape: f32[1,128], index: 4, kind: input, shape index: {}]   ;;  %s2661_s5 = inlined_call_operand.hbm [shape: f32[2,128], index: 5, kind: output, shape index: {}]  }
   0x1   :  { %v1987_v0 = vld [vmem:[%s2657_s1 + $0x40] sm:$0xff]   ;;  %v1991_v4 = vld [vmem:[%s2657_s1 + $0x48] sm:$0xff]   ;;  %v1995_v8 = vld [vmem:[%s2657_s1 + $0x50] sm:$0xff]   ;;  %v291_v37 = vunpack.c.l.s4 %v2141_v36 }
   0x2   :  { %v1988_v1 = vld [vmem:[%s2657_s1 + $0xc0] sm:$0xff]   ;;  %1730 = vmatprep.subr.bf16.mxu0 %v1987_v0  ;;  %v1992_v5 = vld [vmem:[%s2657_s1 + $0xc8] sm:$0xff]   ;;  %v1996_v9 = vld [vmem:[%s2657_s1 + $0xd0] sm:$0xff]   ;;  %v294_v33 = vshrl.u32 %v293_v28, 7 }
   0x3   :  { %v1989_v2 = vld [vmem:[%s2657_s1] sm:$0xff]   ;;  %1752 = vmatprep.subr.bf16.mxu1 %v1988_v1  ;;  %v1993_v6 = vld [vmem:[%s2657_s1 + $0x8] sm:$0xff]   ;;  %v1997_v10 = vld [vmem:[%s2657_s1 + $0x10] sm:$0xff]   ;;  %v292_v40 = vunpack.c.0.s8 %v291_v37 }
   0x4   :  { %v1990_v3 = vld [vmem:[%s2657_s1 + $0x80] sm:$0xff]   ;;  %1731 = vmatpush3.bf16.msra.mxu0 %v1989_v2  ;;  %v1994_v7 = vld [vmem:[%s2657_s1 + $0x88] sm:$0xff]   ;;  %v1998_v11 = vld [vmem:[%s2657_s1 + $0x90] sm:$0xff]  }
   0x5   :  { %1753 = vmatpush3.bf16.msra.mxu1 %v1990_v3  ;;  %1732 = vmatprep.subr.bf16.mxu0 %v1991_v4  ;;  %v1999_v12 = vld [vmem:[%s2657_s1 + $0x58] sm:$0xff]   ;;  %v2003_v16 = vld [vmem:[%s2657_s1 + $0x60] sm:$0xff]   ;;  %v2007_v20 = vld [vmem:[%s2657_s1 + $0x68] sm:$0xff]   ;;  %v2281_v41 = vsub.s32 %v292_v40, %v294_v33 }
   0x6   :  { %1754 = vmatprep.subr.bf16.mxu1 %v1992_v5  ;;  %v2000_v13 = vld [vmem:[%s2657_s1 + $0xd8] sm:$0xff]   ;;  %v2004_v17 = vld [vmem:[%s2657_s1 + $0xe0] sm:$0xff]   ;;  %v2008_v21 = vld [vmem:[%s2657_s1 + $0xe8] sm:$0xff]  }
   0x7   :  { %v2001_v14 = vld [vmem:[%s2657_s1 + $0x18] sm:$0xff]   ;;  %v2005_v18 = vld [vmem:[%s2657_s1 + $0x20] sm:$0xff]   ;;  %v2009_v22 = vld [vmem:[%s2657_s1 + $0x28] sm:$0xff]  }
   0x8   :  { %1733 = vmatpush3.bf16.msra.mxu0 %v1993_v6  ;;  %v2002_v15 = vld [vmem:[%s2657_s1 + $0x98] sm:$0xff]   ;;  %v2006_v19 = vld [vmem:[%s2657_s1 + $0xa0] sm:$0xff]   ;;  %v2010_v23 = vld [vmem:[%s2657_s1 + $0xa8] sm:$0xff]  }
   0x9   :  { %1755 = vmatpush3.bf16.msra.mxu1 %v1994_v7  ;;  %1734 = vmatprep.subr.bf16.mxu0 %v1995_v8  ;;  %v2011_v24 = vld [vmem:[%s2657_s1 + $0x70] sm:$0xff]   ;;  %v2015_v29 = vld [vmem:[%s2657_s1 + $0x78] sm:$0xff]   ;;  %v22_v34 = vld [vmem:[%s2656_s0] sm:$0xff] }
   0xa   :  { %1756 = vmatprep.subr.bf16.mxu1 %v1996_v9  ;;  %v2012_v25 = vld [vmem:[%s2657_s1 + $0xf0] sm:$0xff]   ;;  %v2016_v30 = vld [vmem:[%s2657_s1 + $0xf8] sm:$0xff]   ;;  %v2020_v35 = vld [vmem:[%s2657_s1 + $0x140] sm:$0xff]   ;;  %v289_v39 = vcombine.high %v22_v34, %v22_v34  ;;  %v296_v42 = vrot.slane %v22_v34, %v2281_v41 }
   0xb   :  { %v2013_v26 = vld [vmem:[%s2657_s1 + $0x30] sm:$0xff]   ;;  %v2017_v31 = vld [vmem:[%s2657_s1 + $0x38] sm:$0xff]   ;;  %v2021_v38 = vld [vmem:[%s2657_s1 + $0x1c0] sm:$0xff]  }
   0xc   :  { %1735 = vmatpush3.bf16.msra.mxu0 %v1997_v10  ;;  %v2014_v27 = vld [vmem:[%s2657_s1 + $0xb0] sm:$0xff]   ;;  %v2018_v32 = vld [vmem:[%s2657_s1 + $0xb8] sm:$0xff]   ;;  %v2285_v43 = vrot.slane %v289_v39, %v2281_v41  ;;  %v304_v44 = vcombine.high %v296_v42, %v296_v42  ;;  %v312_v45 = vrot.slane %v296_v42, %v2281_v41  ;;  %v2022_v48 = vld [vmem:[%s2657_s1 + $0x100] sm:$0xff]  }
   0xd   :  { %1757 = vmatpush3.bf16.msra.mxu1 %v1998_v11  ;;  %1736 = vmatprep.subr.bf16.mxu0 %v1999_v12  ;;  %v2024_v51 = vld [vmem:[%s2657_s1 + $0x148] sm:$0xff]   ;;  %v2023_v53 = vld [vmem:[%s2657_s1 + $0x180] sm:$0xff]   ;;  %v2028_v57 = vld [vmem:[%s2657_s1 + $0x150] sm:$0xff]  }
   0xe   :  { %1758 = vmatprep.subr.bf16.mxu1 %v2000_v13  ;;  %v305_v46 = vcombine.high %v2285_v43, %v2285_v43  ;;  %v326_v47 = vrot.slane %v304_v44, %v2281_v41  ;;  %v334_v50 = vcombine.high %v312_v45, %v312_v45  ;;  %v2025_v54 = vld [vmem:[%s2657_s1 + $0x1c8] sm:$0xff]   ;;  %v2029_v59 = vld [vmem:[%s2657_s1 + $0x1d0] sm:$0xff]   ;;  %v2032_v61 = vld [vmem:[%s2657_s1 + $0x158] sm:$0xff]  }
   0xf   :  { %v2026_v56 = vld [vmem:[%s2657_s1 + $0x108] sm:$0xff]   ;;  %v2030_v60 = vld [vmem:[%s2657_s1 + $0x110] sm:$0xff]   ;;  %v2033_v63 = vld [vmem:[%s2657_s1 + $0x1d8] sm:$0xff]  }
  0x10   :  { %1737 = vmatpush3.bf16.msra.mxu0 %v2001_v14  ;;  %v333_v49 = vrot.slane %v305_v46, %v2281_v41  ;;  %1203 = vmatprep.mubr.bf16.mxu0 %v326_v47  ;;  %v336_v52 = vcombine.high %v326_v47, %v326_v47  ;;  %v2027_v58 = vld [vmem:[%s2657_s1 + $0x188] sm:$0xff]   ;;  %v2031_v62 = vld [vmem:[%s2657_s1 + $0x190] sm:$0xff]   ;;  %v2034_v0 = vld [vmem:[%s2657_s1 + $0x118] sm:$0xff]  }
  0x11   :  { %1759 = vmatpush3.bf16.msra.mxu1 %v2002_v15  ;;  %1738 = vmatprep.subr.bf16.mxu0 %v2003_v16  ;;  %v2036_v1 = vld [vmem:[%s2657_s1 + $0x160] sm:$0xff]   ;;  %v2035_v2 = vld [vmem:[%s2657_s1 + $0x198] sm:$0xff]   ;;  %v2040_v5 = vld [vmem:[%s2657_s1 + $0x168] sm:$0xff]  }
  0x12   :  { %1760 = vmatprep.subr.bf16.mxu1 %v2004_v17  ;;  %v337_v55 = vcombine.high %v333_v49, %v333_v49  ;;  %1243 = vmatprep.mubr.bf16.mxu1 %v336_v52  ;;  %v2037_v3 = vld [vmem:[%s2657_s1 + $0x1e0] sm:$0xff]   ;;  %v2041_v7 = vld [vmem:[%s2657_s1 + $0x1e8] sm:$0xff]   ;;  %v2044_v9 = vld [vmem:[%s2657_s1 + $0x170] sm:$0xff]   ;;  %v319_v17 = vrot.slane %v2285_v43, %v2281_v41 }
  0x13   :  { %v2038_v4 = vld [vmem:[%s2657_s1 + $0x120] sm:$0xff]   ;;  %v2042_v8 = vld [vmem:[%s2657_s1 + $0x128] sm:$0xff]   ;;  %v2045_v11 = vld [vmem:[%s2657_s1 + $0x1f0] sm:$0xff]  }
  0x14   :  { %1739 = vmatpush3.bf16.msra.mxu0 %v2005_v18  ;;  %v2039_v6 = vld [vmem:[%s2657_s1 + $0x1a0] sm:$0xff]   ;;  %v2043_v10 = vld [vmem:[%s2657_s1 + $0x1a8] sm:$0xff]   ;;  %v2046_v12 = vld [vmem:[%s2657_s1 + $0x130] sm:$0xff]  }
  0x15   :  { %1761 = vmatpush3.bf16.msra.mxu1 %v2006_v19  ;;  %1740 = vmatprep.subr.bf16.mxu0 %v2007_v20  ;;  %v2048_v13 = vld [vmem:[%s2657_s1 + $0x178] sm:$0xff]   ;;  %v2047_v14 = vld [vmem:[%s2657_s1 + $0x1b0] sm:$0xff]   ;;  %v2052_v18 = vld [vmem:[%s2657_s1 + $0x240] sm:$0xff]  }
  0x16   :  { %1762 = vmatprep.subr.bf16.mxu1 %v2008_v21  ;;  %v2049_v15 = vld [vmem:[%s2657_s1 + $0x1f8] sm:$0xff]   ;;  %v2053_v20 = vld [vmem:[%s2657_s1 + $0x2c0] sm:$0xff]   ;;  %v2059_v28 = vld [vmem:[%s2657_s1 + $0x288] sm:$0xff]  }
  0x17   :  { %v2050_v16 = vld [vmem:[%s2657_s1 + $0x138] sm:$0xff]   ;;  %v2054_v21 = vld [vmem:[%s2657_s1 + $0x200] sm:$0xff]   ;;  %v2072_v39 = vld [vmem:[%s2657_s1 + $0x268] sm:$0xff]  }
  0x18   :  { %1741 = vmatpush3.bf16.msra.mxu0 %v2009_v22  ;;  %v2051_v19 = vld [vmem:[%s2657_s1 + $0x1b8] sm:$0xff]   ;;  %v335_v22 = vcombine.high %v319_v17, %v319_v17  ;;  %v2069_v37 = vld [vmem:[%s2657_s1 + $0x2e0] sm:$0xff]   ;;  %v2073_v42 = vld [vmem:[%s2657_s1 + $0x2e8] sm:$0xff]  }
  0x19   :  { %1763 = vmatpush3.bf16.msra.mxu1 %v2010_v23  ;;  %1742 = vmatprep.subr.bf16.mxu0 %v2011_v24  ;;  %v2056_v23 = vld [vmem:[%s2657_s1 + $0x248] sm:$0xff]   ;;  %v2055_v24 = vld [vmem:[%s2657_s1 + $0x280] sm:$0xff]   ;;  %v2065_v33 = vld [vmem:[%s2657_s1 + $0x2d8] sm:$0xff]  }
  0x1a   :  { %1764 = vmatprep.subr.bf16.mxu1 %v2012_v25  ;;  %v2057_v25 = vld [vmem:[%s2657_s1 + $0x2c8] sm:$0xff]   ;;  %v2066_v34 = vld [vmem:[%s2657_s1 + $0x218] sm:$0xff]   ;;  %v2071_v40 = vld [vmem:[%s2657_s1 + $0x2a0] sm:$0xff]  }
  0x1b   :  { %v2067_v36 = vld [vmem:[%s2657_s1 + $0x298] sm:$0xff]   ;;  %v2074_v43 = vld [vmem:[%s2657_s1 + $0x228] sm:$0xff]   ;;  %v2076_v44 = vld [vmem:[%s2657_s1 + $0x270] sm:$0xff]  }
  0x1c   :  { %1743 = vmatpush3.bf16.msra.mxu0 %v2013_v26  ;;  %v2058_v26 = vld [vmem:[%s2657_s1 + $0x208] sm:$0xff]  }
  0x1d   :  { %1765 = vmatpush3.bf16.msra.mxu1 %v2014_v27  ;;  %1744 = vmatprep.subr.bf16.mxu0 %v2015_v29  ;;  %v2060_v27 = vld [vmem:[%s2657_s1 + $0x250] sm:$0xff]   ;;  %v2075_v46 = vld [vmem:[%s2657_s1 + $0x2a8] sm:$0xff]  }
  0x1e   :  { %1766 = vmatprep.subr.bf16.mxu1 %v2016_v30  ;;  %v2061_v29 = vld [vmem:[%s2657_s1 + $0x2d0] sm:$0xff]  }
  0x1f   :  { %v2062_v30 = vld [vmem:[%s2657_s1 + $0x210] sm:$0xff]  }
  0x20   :  { %1745 = vmatpush3.bf16.msra.mxu0 %v2017_v31  ;;  %v2064_v31 = vld [vmem:[%s2657_s1 + $0x258] sm:$0xff]  }
  0x21   :  { %1767 = vmatpush3.bf16.msra.mxu1 %v2018_v32  ;;  %1774 = vmatprep.subr.bf16.mxu0 %v2020_v35  ;;  %v2063_v32 = vld [vmem:[%s2657_s1 + $0x290] sm:$0xff]   ;;  %v2068_v35 = vld [vmem:[%s2657_s1 + $0x260] sm:$0xff]  }
  0x22   :  { %1796 = vmatprep.subr.bf16.mxu1 %v2021_v38  ;;  %v2070_v38 = vld [vmem:[%s2657_s1 + $0x220] sm:$0xff]  }
  0x23   :  { %1204 = vmatmul.mubr.bf16.vlgmr.msra.gmra.mrb[0].mxu0 %v312_v45  ;;  %v23_v45 = vld [vmem:[%s2656_s0 + $0x8] sm:$0xff] }
  0x24   :  { %1775 = vmatpush3.bf16.msra.mxu0 %v2022_v48  ;;  %1244 = vmatmul.mubr.bf16.vlgmr.msra.gmra.mrb[0].mxu1 %v334_v50  ;;  %v345_v47 = vrot.slane %v23_v45, %v2281_v41  ;;  %v338_v48 = vcombine.high %v23_v45, %v23_v45  ;;  %v2078_v50 = vld [vmem:[%s2657_s1 + $0x230] sm:$0xff]  }
  0x25   :  { %1776 = vmatprep.subr.bf16.mxu0 %v2024_v51  ;;  %1797 = vmatpush3.bf16.msra.mxu1 %v2023_v53  ;;  %v2080_v53 = vld [vmem:[%s2657_s1 + $0x278] sm:$0xff]  }
  0x26   :  { %1283 = vmatprep.mubr.bf16.mxu0 %v333_v49  ;;  %1798 = vmatprep.subr.bf16.mxu1 %v2025_v54  ;;  %v2077_v49 = vld [vmem:[%s2657_s1 + $0x2f0] sm:$0xff]   ;;  %v353_v51 = vcombine.high %v345_v47, %v345_v47  ;;  %v2470_v52 = vrot.slane %v338_v48, %v2281_v41 }
  0x27   :  { %1323 = vmatprep.mubr.bf16.mxu1 %v337_v55  ;;  %v2079_v54 = vld [vmem:[%s2657_s1 + $0x2b0] sm:$0xff]  }
  0x28   :  { %1777 = vmatpush3.bf16.msra.mxu0 %v2026_v56  ;;  %v375_v55 = vrot.slane %v353_v51, %v2281_v41  ;;  %v354_v56 = vcombine.high %v2470_v52, %v2470_v52 }
  0x29   :  { %1778 = vmatprep.subr.bf16.mxu0 %v2028_v57  ;;  %1799 = vmatpush3.bf16.msra.mxu1 %v2027_v58  ;;  %v2081_v57 = vld [vmem:[%s2657_s1 + $0x2f8] sm:$0xff]  }
  0x2a   :  { %1800 = vmatprep.subr.bf16.mxu1 %v2029_v59  ;;  %v2082_v58 = vld [vmem:[%s2657_s1 + $0x238] sm:$0xff]   ;;  %v385_v59 = vcombine.high %v375_v55, %v375_v55 }
  0x2c   :  { %1779 = vmatpush3.bf16.msra.mxu0 %v2030_v60  ;;  %v361_v60 = vrot.slane %v345_v47, %v2281_v41 }
  0x2d   :  { %1780 = vmatprep.subr.bf16.mxu0 %v2032_v61  ;;  %1801 = vmatpush3.bf16.msra.mxu1 %v2031_v62  ;;  %v2084_v61 = vld [vmem:[%s2657_s1 + $0x340] sm:$0xff]   ;;  %v2083_v62 = vld [vmem:[%s2657_s1 + $0x2b8] sm:$0xff]  }
  0x2e   :  { %1802 = vmatprep.subr.bf16.mxu1 %v2033_v63  ;;  %v382_v63 = vrot.slane %v354_v56, %v2281_v41 }
  0x30   :  { %1781 = vmatpush3.bf16.msra.mxu0 %v2034_v0  ;;  %v2085_v0 = vld [vmem:[%s2657_s1 + $0x3c0] sm:$0xff]  }
  0x31   :  { %1782 = vmatprep.subr.bf16.mxu0 %v2036_v1  ;;  %1803 = vmatpush3.bf16.msra.mxu1 %v2035_v2  ;;  %v2086_v1 = vld [vmem:[%s2657_s1 + $0x300] sm:$0xff]   ;;  %v383_v2 = vcombine.high %v361_v60, %v361_v60 }
  0x32   :  { %1804 = vmatprep.subr.bf16.mxu1 %v2037_v3  ;;  %v2088_v3 = vld [vmem:[%s2657_s1 + $0x348] sm:$0xff]  }
  0x34   :  { %1783 = vmatpush3.bf16.msra.mxu0 %v2038_v4  ;;  %v2087_v4 = vld [vmem:[%s2657_s1 + $0x380] sm:$0xff]  }
  0x35   :  { %1784 = vmatprep.subr.bf16.mxu0 %v2040_v5  ;;  %1805 = vmatpush3.bf16.msra.mxu1 %v2039_v6  ;;  %v386_v5 = vcombine.high %v382_v63, %v382_v63  ;;  %v2089_v6 = vld [vmem:[%s2657_s1 + $0x3c8] sm:$0xff]  }
  0x36   :  { %1806 = vmatprep.subr.bf16.mxu1 %v2041_v7  ;;  %v2090_v7 = vld [vmem:[%s2657_s1 + $0x308] sm:$0xff]  }
  0x38   :  { %1785 = vmatpush3.bf16.msra.mxu0 %v2042_v8  ;;  %v2092_v8 = vld [vmem:[%s2657_s1 + $0x350] sm:$0xff]  }
  0x39   :  { %1786 = vmatprep.subr.bf16.mxu0 %v2044_v9  ;;  %1807 = vmatpush3.bf16.msra.mxu1 %v2043_v10  ;;  %v2091_v9 = vld [vmem:[%s2657_s1 + $0x388] sm:$0xff]   ;;  %v2093_v10 = vld [vmem:[%s2657_s1 + $0x3d0] sm:$0xff]  }
  0x3a   :  { %1808 = vmatprep.subr.bf16.mxu1 %v2045_v11  ;;  %v2094_v11 = vld [vmem:[%s2657_s1 + $0x310] sm:$0xff]  }
  0x3c   :  { %1787 = vmatpush3.bf16.msra.mxu0 %v2046_v12  ;;  %v2096_v12 = vld [vmem:[%s2657_s1 + $0x358] sm:$0xff]  }
  0x3d   :  { %1788 = vmatprep.subr.bf16.mxu0 %v2048_v13  ;;  %1809 = vmatpush3.bf16.msra.mxu1 %v2047_v14  ;;  %v2095_v13 = vld [vmem:[%s2657_s1 + $0x390] sm:$0xff]   ;;  %v2097_v14 = vld [vmem:[%s2657_s1 + $0x3d8] sm:$0xff]  }
  0x3e   :  { %1810 = vmatprep.subr.bf16.mxu1 %v2049_v15  ;;  %v2098_v15 = vld [vmem:[%s2657_s1 + $0x318] sm:$0xff]  }
  0x40   :  { %1789 = vmatpush3.bf16.msra.mxu0 %v2050_v16  ;;  %v2100_v16 = vld [vmem:[%s2657_s1 + $0x360] sm:$0xff]  }
  0x41   :  { %1818 = vmatprep.subr.bf16.mxu0 %v2052_v18  ;;  %1811 = vmatpush3.bf16.msra.mxu1 %v2051_v19  ;;  %v2101_v18 = vld [vmem:[%s2657_s1 + $0x3e0] sm:$0xff]  }
  0x42   :  { %1840 = vmatprep.subr.bf16.mxu1 %v2053_v20  ;;  %v2102_v19 = vld [vmem:[%s2657_s1 + $0x320] sm:$0xff]   ;;  %v2104_v20 = vld [vmem:[%s2657_s1 + $0x368] sm:$0xff]  }
  0x43   :  { %1284 = vmatmul.mubr.bf16.vlgmr.msra.gmra.mrb[4].mxu0 %v319_v17  ;;  %v2099_v17 = vld [vmem:[%s2657_s1 + $0x398] sm:$0xff]  }
  0x44   :  { %1819 = vmatpush3.bf16.msra.mxu0 %v2054_v21  ;;  %1324 = vmatmul.mubr.bf16.vlgmr.msra.gmra.mrb[4].mxu1 %v335_v22  ;;  %v2103_v21 = vld [vmem:[%s2657_s1 + $0x3a0] sm:$0xff]   ;;  %v2105_v22 = vld [vmem:[%s2657_s1 + $0x3e8] sm:$0xff]  }
  0x45   :  { %1820 = vmatprep.subr.bf16.mxu0 %v2056_v23  ;;  %1841 = vmatpush3.bf16.msra.mxu1 %v2055_v24  ;;  %v2106_v23 = vld [vmem:[%s2657_s1 + $0x328] sm:$0xff]   ;;  %v2108_v24 = vld [vmem:[%s2657_s1 + $0x370] sm:$0xff]  }
  0x46   :  { %1842 = vmatprep.subr.bf16.mxu1 %v2057_v25  ;;  %1363 = vmatprep.mubr.bf16.mxu0 %v375_v55 }
  0x47   :  { %1403 = vmatprep.mubr.bf16.mxu1 %v385_v59 }
  0x48   :  { %1821 = vmatpush3.bf16.msra.mxu0 %v2058_v26 }
  0x49   :  { %1822 = vmatprep.subr.bf16.mxu0 %v2060_v27  ;;  %1843 = vmatpush3.bf16.msra.mxu1 %v2059_v28 }
  0x4a   :  { %1844 = vmatprep.subr.bf16.mxu1 %v2061_v29 }
  0x4c   :  { %1823 = vmatpush3.bf16.msra.mxu0 %v2062_v30 }
  0x4d   :  { %1824 = vmatprep.subr.bf16.mxu0 %v2064_v31  ;;  %1845 = vmatpush3.bf16.msra.mxu1 %v2063_v32 }
  0x4e   :  { %1846 = vmatprep.subr.bf16.mxu1 %v2065_v33 }
  0x50   :  { %1825 = vmatpush3.bf16.msra.mxu0 %v2066_v34 }
  0x51   :  { %1826 = vmatprep.subr.bf16.mxu0 %v2068_v35  ;;  %1847 = vmatpush3.bf16.msra.mxu1 %v2067_v36 }
  0x52   :  { %1848 = vmatprep.subr.bf16.mxu1 %v2069_v37 }
  0x54   :  { %1827 = vmatpush3.bf16.msra.mxu0 %v2070_v38 }
  0x55   :  { %1828 = vmatprep.subr.bf16.mxu0 %v2072_v39  ;;  %1849 = vmatpush3.bf16.msra.mxu1 %v2071_v40 }
  0x56   :  { %1850 = vmatprep.subr.bf16.mxu1 %v2073_v42 }
  0x58   :  { %1829 = vmatpush3.bf16.msra.mxu0 %v2074_v43 }
  0x59   :  { %1830 = vmatprep.subr.bf16.mxu0 %v2076_v44  ;;  %1851 = vmatpush3.bf16.msra.mxu1 %v2075_v46 }
  0x5a   :  { %1852 = vmatprep.subr.bf16.mxu1 %v2077_v49 }
  0x5c   :  { %1831 = vmatpush3.bf16.msra.mxu0 %v2078_v50 }
  0x5d   :  { %1832 = vmatprep.subr.bf16.mxu0 %v2080_v53  ;;  %1853 = vmatpush3.bf16.msra.mxu1 %v2079_v54 }
  0x5e   :  { %1854 = vmatprep.subr.bf16.mxu1 %v2081_v57 }
  0x60   :  { %1833 = vmatpush3.bf16.msra.mxu0 %v2082_v58 }
  0x61   :  { %1862 = vmatprep.subr.bf16.mxu0 %v2084_v61  ;;  %1855 = vmatpush3.bf16.msra.mxu1 %v2083_v62 }
  0x62   :  { %1884 = vmatprep.subr.bf16.mxu1 %v2085_v0 }
  0x63   :  { %1364 = vmatmul.mubr.bf16.vlgmr.msra.gmra.mrb[8].mxu0 %v361_v60 }
  0x64   :  { %1863 = vmatpush3.bf16.msra.mxu0 %v2086_v1  ;;  %1443 = vmatprep.mubr.bf16.mxu0 %v382_v63 }
  0x65   :  { %1404 = vmatmul.mubr.bf16.vlgmr.msra.gmra.mrb[8].mxu1 %v383_v2  ;;  %1864 = vmatprep.subr.bf16.mxu0 %v2088_v3 }
  0x66   :  { %1885 = vmatpush3.bf16.msra.mxu1 %v2087_v4  ;;  %1483 = vmatprep.mubr.bf16.mxu1 %v386_v5 }
  0x67   :  { %1886 = vmatprep.subr.bf16.mxu1 %v2089_v6 }
  0x68   :  { %1865 = vmatpush3.bf16.msra.mxu0 %v2090_v7 }
  0x69   :  { %1866 = vmatprep.subr.bf16.mxu0 %v2092_v8 }
  0x6a   :  { %1887 = vmatpush3.bf16.msra.mxu1 %v2091_v9 }
  0x6b   :  { %1888 = vmatprep.subr.bf16.mxu1 %v2093_v10 }
  0x6c   :  { %1867 = vmatpush3.bf16.msra.mxu0 %v2094_v11 }
  0x6d   :  { %1868 = vmatprep.subr.bf16.mxu0 %v2096_v12 }
  0x6e   :  { %1889 = vmatpush3.bf16.msra.mxu1 %v2095_v13 }
  0x6f   :  { %1890 = vmatprep.subr.bf16.mxu1 %v2097_v14 }
  0x70   :  { %1869 = vmatpush3.bf16.msra.mxu0 %v2098_v15 }
  0x71   :  { %1870 = vmatprep.subr.bf16.mxu0 %v2100_v16 }
  0x72   :  { %1891 = vmatpush3.bf16.msra.mxu1 %v2099_v17 }
  0x73   :  { %1892 = vmatprep.subr.bf16.mxu1 %v2101_v18 }
  0x74   :  { %1871 = vmatpush3.bf16.msra.mxu0 %v2102_v19 }
  0x75   :  { %1872 = vmatprep.subr.bf16.mxu0 %v2104_v20 }
  0x76   :  { %10 = vsyncpa [#allocation3], 0  ;;  %1893 = vmatpush3.bf16.msra.mxu1 %v2103_v21  ;;  %v2107_v25 = vld [vmem:[%s2657_s1 + $0x3a8] sm:$0xff]   ;;  %v2109_v26 = vld [vmem:[%s2657_s1 + $0x3f0] sm:$0xff]   ;;  %v368_v32 = vrot.slane %v2470_v52, %v2281_v41  ;;  %v2142_v37 = vmov 0.0|0.0   ;;  %vm2143_vm0 = vmmov 0  }
  0x77   :  { %1894 = vmatprep.subr.bf16.mxu1 %v2105_v22  ;;  %v2110_v27 = vld [vmem:[%s2657_s1 + $0x330] sm:$0xff]   ;;  %v2112_v28 = vld [vmem:[%s2657_s1 + $0x378] sm:$0xff]   ;;  %v1492_v35 = vld [vmem:[%s2659_s3] sm:$0xff]  ;;  %v2144_v60 = vmov 0.0   ;;  %s2145_s30 = smov [#allocation2]  }
  0x78   :  { %1873 = vmatpush3.bf16.msra.mxu0 %v2106_v23  ;;  %v2111_v29 = vld [vmem:[%s2657_s1 + $0x3b0] sm:$0xff]   ;;  %v2113_v30 = vld [vmem:[%s2657_s1 + $0x3f8] sm:$0xff]   ;;  %v384_v34 = vcombine.high %v368_v32, %v368_v32  ;;  %v1493_v36 = vld [vmem:[%s2659_s3 + $0x8] sm:$0xff]  ;;  %s1592_s6 = sshll.u32 %s2145_s30, 4  ;;  %s1593_s6 = int_to_ptr.vmem [resolvable:$true] %s1592_s6 }
  0x79   :  { %1874 = vmatprep.subr.bf16.mxu0 %v2108_v24  ;;  %v2114_v31 = vld [vmem:[%s2657_s1 + $0x338] sm:$0xff]   ;;  %v1494_v41 = vld [vmem:[%s2659_s3 + $0x10] sm:$0xff]  ;;  %v1959_v38 = vpack.c.bf16 %v1493_v36, %v1492_v35  ;;  %v1496_v42 = vld [vmem:[%s2659_s3 + $0x20] sm:$0xff]  ;;  %s2117_s7 = scalar_lea.vmem %s1593_s6, 32  ;;  %p2122_p1 = scmp.lt.s32.totalorder %s1593_s6, %s1593_s6 }
  0x7a   :  { %1895 = vmatpush3.bf16.msra.mxu1 %v2107_v25  ;;  %v2115_v33 = vld [vmem:[%s2657_s1 + $0x3b8] sm:$0xff]   ;;  %v1497_v43 = vld [vmem:[%s2659_s3 + $0x28] sm:$0xff]  ;;  %v1498_v45 = vld [vmem:[%s2659_s3 + $0x30] sm:$0xff]  ;;  %p2118_p0 = scmp.ne.s32.totalorder %s1593_s6, %s2117_s7  ;;  %p2123_p2 = scmp.lt.s32.totalorder %s2117_s7, %s2117_s7 }
  0x7b   :  { %1896 = vmatprep.subr.bf16.mxu1 %v2109_v26  ;;  %v1495_v39 = vld [vmem:[%s2659_s3 + $0x18] sm:$0xff]  ;;  %v1965_v44 = vpack.c.bf16 %v1497_v43, %v1496_v42  ;;  %v1500_v48 = vld [vmem:[%s2659_s3 + $0x40] sm:$0xff]  ;;  %v1501_v49 = vld [vmem:[%s2659_s3 + $0x48] sm:$0xff] }
  0x7c   :  { %1875 = vmatpush3.bf16.msra.mxu0 %v2110_v27  ;;  %v1962_v40 = vpack.c.bf16 %v1495_v39, %v1494_v41  ;;  %v1499_v46 = vld [vmem:[%s2659_s3 + $0x38] sm:$0xff]  ;;  %v1971_v50 = vpack.c.bf16 %v1501_v49, %v1500_v48  ;;  %v1502_v51 = vld [vmem:[%s2659_s3 + $0x50] sm:$0xff]  ;;  %v1504_v54 = vld [vmem:[%s2659_s3 + $0x60] sm:$0xff]  ;;  %p2124_p3 = por %p2123_p2, %p2122_p1 }
  0x7d   :  { %1876 = vmatprep.subr.bf16.mxu0 %v2112_v28  ;;  %v1968_v47 = vpack.c.bf16 %v1499_v46, %v1498_v45  ;;  %v1503_v52 = vld [vmem:[%s2659_s3 + $0x58] sm:$0xff]  ;;  %v1505_v55 = vld [vmem:[%s2659_s3 + $0x68] sm:$0xff]  ;;  %v1506_v57 = vld [vmem:[%s2659_s3 + $0x70] sm:$0xff] }
  0x7e   :  { %1897 = vmatpush3.bf16.msra.mxu1 %v2111_v29  ;;  %v1974_v53 = vpack.c.bf16 %v1503_v52, %v1502_v51  ;;  %v1977_v56 = vpack.c.bf16 %v1505_v55, %v1504_v54  ;;  %v1507_v58 = vld [vmem:[%s2659_s3 + $0x78] sm:$0xff]  ;;  %v1600_v62 = vld [vmem:[%s2658_s2] ss:$0 sm:$0xff]  ;;  %p2125_p4 = pnand %p2124_p3, %p2118_p0 }
  0x7f   :  { %1898 = vmatprep.subr.bf16.mxu1 %v2113_v30  ;;  %v1980_v59 = vpack.c.bf16 %v1507_v58, %v1506_v57 }
  0x80   :  { %1877 = vmatpush3.bf16.msra.mxu0 %v2114_v31 }
  0x81   :  { %1958 = vmatprep.subr.bf16.mxu0 %v2142_v37 }
  0x82   :  { %1899 = vmatpush3.bf16.msra.mxu1 %v2115_v33 }
  0x83   :  { %1444 = vmatmul.mubr.bf16.vlgmr.msra.gmra.mrb[12].mxu0 %v368_v32 }
  0x84   :  { %1960 = vmatpush3.bf16.msra.mxu0 %v1959_v38  ;;  %1955 = vmatprep.mubr.msk.f32.mxu0 %vm2143_vm0, %v2144_v60 }
  0x85   :  { %1484 = vmatmul.mubr.bf16.vlgmr.msra.gmra.mrb[12].mxu1 %v384_v34  ;;  %1961 = vmatprep.subr.bf16.mxu0 %v2142_v37 }
  0x88   :  { %1963 = vmatpush3.bf16.msra.mxu0 %v1962_v40 }
  0x89   :  { %1964 = vmatprep.subr.bf16.mxu0 %v2142_v37 }
  0x8c   :  { %1966 = vmatpush3.bf16.msra.mxu0 %v1965_v44 }
  0x8d   :  { %1967 = vmatprep.subr.bf16.mxu0 %v2142_v37 }
  0x90   :  { %1969 = vmatpush3.bf16.msra.mxu0 %v1968_v47  ;;  %v1729_v47 = vld [vmem:[%s2660_s4] ss:$0 sm:$0xff] }
  0x91   :  { %1970 = vmatprep.subr.bf16.mxu0 %v2142_v37 }
  0x94   :  { %1972 = vmatpush3.bf16.msra.mxu0 %v1971_v50 }
  0x95   :  { %1973 = vmatprep.subr.bf16.mxu0 %v2142_v37 }
  0x98   :  { %1975 = vmatpush3.bf16.msra.mxu0 %v1974_v53 }
  0x99   :  { %1976 = vmatprep.subr.bf16.mxu0 %v2142_v37 }
  0x9c   :  { %1978 = vmatpush3.bf16.msra.mxu0 %v1977_v56 }
  0x9d   :  { %1979 = vmatprep.subr.bf16.mxu0 %v2142_v37 }
  0xa0   :  { %1981 = vmatpush3.bf16.msra.mxu0 %v1980_v59 }
  0xf6   :  { %v1746_v61 = vpop.f32.mrb[0].mxu0 }
  0xf7   :  { %v1747_v63 = vpop.f32.mrb[1].mxu0  ;;  %v1768_v0 = vpop.f32.mrb[0].mxu1 }
  0xf8   :  { %v1748_v1 = vadd.f32 %v1747_v63, %v1746_v61  ;;  %v1749_v2 = vpop.f32.mrb[2].mxu0  ;;  %v1769_v3 = vpop.f32.mrb[1].mxu1 }
  0xf9   :  { %v1750_v4 = vpop.f32.mrb[3].mxu0  ;;  %v1770_v6 = vadd.f32 %v1769_v3, %v1768_v0  ;;  %v1771_v7 = vpop.f32.mrb[2].mxu1 }
  0xfa   :  { %v1206_v5 = vadd.f32 %v1748_v1, %v1600_v62  ;;  %v1772_v8 = vpop.f32.mrb[3].mxu1 }
  0xfc   :  { %v1246_v9 = vadd.f32 %v1770_v6, %v1206_v5 }
 0x116   :  { %v1790_v10 = vpop.f32.mrb[4].mxu0 }
 0x117   :  { %v1791_v11 = vpop.f32.mrb[5].mxu0  ;;  %v1812_v12 = vpop.f32.mrb[4].mxu1 }
 0x118   :  { %v1792_v13 = vadd.f32 %v1791_v11, %v1790_v10  ;;  %v1793_v14 = vpop.f32.mrb[6].mxu0  ;;  %v1813_v15 = vpop.f32.mrb[5].mxu1 }
 0x119   :  { %v1794_v16 = vpop.f32.mrb[7].mxu0  ;;  %v1814_v18 = vadd.f32 %v1813_v15, %v1812_v12  ;;  %v1815_v19 = vpop.f32.mrb[6].mxu1 }
 0x11a   :  { %v1286_v17 = vadd.f32 %v1792_v13, %v1246_v9  ;;  %v1816_v20 = vpop.f32.mrb[7].mxu1 }
 0x11c   :  { %v1326_v21 = vadd.f32 %v1814_v18, %v1286_v17 }
 0x136   :  { %v1834_v22 = vpop.f32.mrb[8].mxu0 }
 0x137   :  { %v1835_v23 = vpop.f32.mrb[9].mxu0 }
 0x138   :  { %v1856_v24 = vpop.f32.mrb[8].mxu1  ;;  %v1836_v25 = vadd.f32 %v1835_v23, %v1834_v22  ;;  %v1837_v26 = vpop.f32.mrb[10].mxu0 }
 0x139   :  { %v1857_v27 = vpop.f32.mrb[9].mxu1  ;;  %v1838_v28 = vpop.f32.mrb[11].mxu0 }
 0x13a   :  { %v1366_v29 = vadd.f32 %v1836_v25, %v1326_v21  ;;  %v1858_v30 = vadd.f32 %v1857_v27, %v1856_v24  ;;  %v1859_v31 = vpop.f32.mrb[10].mxu1 }
 0x13b   :  { %v1860_v32 = vpop.f32.mrb[11].mxu1 }
 0x13c   :  { %v1406_v33 = vadd.f32 %v1858_v30, %v1366_v29 }
 0x156   :  { %v1878_v34 = vpop.f32.mrb[12].mxu0 }
 0x157   :  { %v1879_v35 = vpop.f32.mrb[13].mxu0 }
 0x158   :  { %v1900_v36 = vpop.f32.mrb[12].mxu1  ;;  %v1880_v41 = vadd.f32 %v1879_v35, %v1878_v34  ;;  %v1881_v37 = vpop.f32.mrb[14].mxu0 }
 0x159   :  { %v1901_v38 = vpop.f32.mrb[13].mxu1  ;;  %v1882_v39 = vpop.f32.mrb[15].mxu0 }
 0x15a   :  { %v1446_v40 = vadd.f32 %v1880_v41, %v1406_v33  ;;  %v1902_v42 = vadd.f32 %v1901_v38, %v1900_v36  ;;  %v1903_v43 = vpop.f32.mrb[14].mxu1 }
 0x15b   :  { %v1904_v44 = vpop.f32.mrb[15].mxu1 }
 0x15c   :  { %v1486_v45 = vadd.f32 %v1902_v42, %v1446_v40 }
 0x15e   :  { %v1491_v46 = vmax.f32 %v1486_v45, 0.0 }
 0x160   :  { %1956 = vmatmul.mubr.f32.vlgmr.msra.gmra.mrb[16].mxu0 %v1491_v46 }
 0x233   :  { %v1581_v48 = vpop.f32.mrb[16].mxu0 }
 0x234   :  { %v1582_v49 = vadd.f32 %v1729_v47, %v1581_v48  ;;  %v1957_v50 = vpop.f32.mrb[17].mxu0 }
 0x236   :  { %1585 = vst [vmem:[#allocation2] sm:$0x3] %v1582_v49 }
 0x237   :  { %2128 = shalt.err (!%p2125_p4)
}
 0x238   :  { %s2129_s10 = scalar_lea.hbm %s2661_s5, 32 }
 0x239   :  { %p2130_p5 = scmp.ne.s32.totalorder %s2661_s5, %s2129_s10  ;;  %p2133_p6 = scmp.lt.u32.totalorder %s2129_s10, %s2661_s5 }
 0x23b   :  { %p2135_p7 = pnand %p2133_p6, %p2130_p5 }
 0x23d   :  { %2138 = shalt.err (!%p2135_p7)
}
 0x23e   :  { %1595 = dma.vmem_to_hbm [thread:$0]  %s1593_s6, 32, %s2661_s5, [#allocation3]  }
 0x23f   :  { %2139 = dma.done.wait [#allocation3], 32  }
 0x240   :  { %2140 = vsyncadd [#allocation3], 4294967264 }
 0x241   :  { %1599 = vsyncpa [#allocation3], 1 }

// kernel: _lambda_.6
= control target key start
LH: loop header
LB: loop body
LE: loop exit
PB: predicated region body
PF: predicated region fallthrough
CT: control target
= control target key end

     0   :  { %vm55_vm0 = vsmask.f32 3328  ;;  %vm56_vm1 = vsmask.f32 7440  ;;  %vm1193_vm2 = vcmask 1041408   ;;  %vm1194_vm3 = vcmask 1045508   ;;  %s5088_s1 = inlined_call_operand.vmem [shape: bf16[9,256,256], index: 1, kind: input, shape index: {}]   ;;  %s5089_s0 = inlined_call_operand.vmem [shape: bf16[2,24,256], index: 0, kind: input, shape index: {}]   ;;  %s5090_s2 = inlined_call_operand.vmem [shape: f32[1,256], index: 2, kind: input, shape index: {}]   ;;  %s5091_s3 = inlined_call_operand.vmem [shape: f32[1,256], index: 3, kind: input, shape index: {}]   ;;  %s5092_s4 = inlined_call_operand.vmem [shape: bf16[2,16,128], index: 4, kind: output, shape index: {}]  }
   0x1   :  { %v3398_v0 = vld [vmem:[%s5088_s1 + $0x104] ss:$8 sps:$4 sm:$0xff]   ;;  %v3402_v2 = vld [vmem:[%s5088_s1 + $0x100] ss:$8 sps:$4 sm:$0xff]   ;;  %v3404_v4 = vld [vmem:[%s5088_s1 + $0x114] ss:$8 sps:$4 sm:$0xff]  }
   0x2   :  { %v3400_v1 = vld [vmem:[%s5088_s1 + $0x404] ss:$8 sps:$4 sm:$0xff]   ;;  %315 = vmatprep.subr.bf16.mxu1 %v3398_v0  ;;  %v3403_v3 = vld [vmem:[%s5088_s1 + $0x400] ss:$8 sps:$4 sm:$0xff]   ;;  %v3406_v5 = vld [vmem:[%s5088_s1 + $0x414] ss:$8 sps:$4 sm:$0xff]  }
   0x3   :  { %1419 = vmatprep.subr.bf16.mxu0 %v3400_v1  ;;  %316 = vmatpush1.bf16.msra.mxu1 %v3402_v2  ;;  %v3408_v6 = vld [vmem:[%s5088_s1 + $0x110] ss:$8 sps:$4 sm:$0xff]   ;;  %v3410_v8 = vld [vmem:[%s5088_s1 + $0x124] ss:$8 sps:$4 sm:$0xff]   ;;  %v3414_v10 = vld [vmem:[%s5088_s1 + $0x120] ss:$8 sps:$4 sm:$0xff]  }
   0x4   :  { %1420 = vmatpush1.bf16.msra.mxu0 %v3403_v3  ;;  %317 = vmatprep.subr.bf16.mxu1 %v3404_v4  ;;  %v3409_v7 = vld [vmem:[%s5088_s1 + $0x410] ss:$8 sps:$4 sm:$0xff]   ;;  %v3412_v9 = vld [vmem:[%s5088_s1 + $0x424] ss:$8 sps:$4 sm:$0xff]   ;;  %v3415_v11 = vld [vmem:[%s5088_s1 + $0x420] ss:$8 sps:$4 sm:$0xff]  }
   0x5   :  { %1421 = vmatprep.subr.bf16.mxu0 %v3406_v5  ;;  %v3416_v12 = vld [vmem:[%s5088_s1 + $0x134] ss:$8 sps:$4 sm:$0xff]   ;;  %v3420_v14 = vld [vmem:[%s5088_s1 + $0x130] ss:$8 sps:$4 sm:$0xff]   ;;  %v3422_v16 = vld [vmem:[%s5088_s1 + $0x144] ss:$8 sps:$4 sm:$0xff]  }
   0x6   :  { %v3418_v13 = vld [vmem:[%s5088_s1 + $0x434] ss:$8 sps:$4 sm:$0xff]   ;;  %v3421_v15 = vld [vmem:[%s5088_s1 + $0x430] ss:$8 sps:$4 sm:$0xff]   ;;  %v3424_v17 = vld [vmem:[%s5088_s1 + $0x444] ss:$8 sps:$4 sm:$0xff]  }
   0x7   :  { %318 = vmatpush1.bf16.msra.mxu1 %v3408_v6  ;;  %v3426_v18 = vld [vmem:[%s5088_s1 + $0x140] ss:$8 sps:$4 sm:$0xff]   ;;  %v3428_v20 = vld [vmem:[%s5088_s1 + $0x154] ss:$8 sps:$4 sm:$0xff]   ;;  %v3432_v22 = vld [vmem:[%s5088_s1 + $0x150] ss:$8 sps:$4 sm:$0xff]  }
   0x8   :  { %1422 = vmatpush1.bf16.msra.mxu0 %v3409_v7  ;;  %319 = vmatprep.subr.bf16.mxu1 %v3410_v8  ;;  %v3427_v19 = vld [vmem:[%s5088_s1 + $0x440] ss:$8 sps:$4 sm:$0xff]   ;;  %v3430_v21 = vld [vmem:[%s5088_s1 + $0x454] ss:$8 sps:$4 sm:$0xff]   ;;  %v3433_v23 = vld [vmem:[%s5088_s1 + $0x450] ss:$8 sps:$4 sm:$0xff]  }
   0x9   :  { %1423 = vmatprep.subr.bf16.mxu0 %v3412_v9  ;;  %v3434_v24 = vld [vmem:[%s5088_s1 + $0x164] ss:$8 sps:$4 sm:$0xff]   ;;  %v3438_v26 = vld [vmem:[%s5088_s1 + $0x160] ss:$8 sps:$4 sm:$0xff]   ;;  %v3440_v28 = vld [vmem:[%s5088_s1 + $0x174] ss:$8 sps:$4 sm:$0xff]  }
   0xa   :  { %v3436_v25 = vld [vmem:[%s5088_s1 + $0x464] ss:$8 sps:$4 sm:$0xff]   ;;  %v3439_v27 = vld [vmem:[%s5088_s1 + $0x460] ss:$8 sps:$4 sm:$0xff]   ;;  %v3442_v29 = vld [vmem:[%s5088_s1 + $0x474] ss:$8 sps:$4 sm:$0xff]  }
   0xb   :  { %320 = vmatpush1.bf16.msra.mxu1 %v3414_v10  ;;  %v3444_v30 = vld [vmem:[%s5088_s1 + $0x170] ss:$8 sps:$4 sm:$0xff]   ;;  %v3446_v32 = vld [vmem:[%s5088_s1 + $0x184] ss:$8 sps:$4 sm:$0xff]   ;;  %v3450_v34 = vld [vmem:[%s5088_s1 + $0x180] ss:$8 sps:$4 sm:$0xff]  }
   0xc   :  { %1424 = vmatpush1.bf16.msra.mxu0 %v3415_v11  ;;  %321 = vmatprep.subr.bf16.mxu1 %v3416_v12  ;;  %v3445_v31 = vld [vmem:[%s5088_s1 + $0x470] ss:$8 sps:$4 sm:$0xff]   ;;  %v3448_v33 = vld [vmem:[%s5088_s1 + $0x484] ss:$8 sps:$4 sm:$0xff]   ;;  %v3451_v35 = vld [vmem:[%s5088_s1 + $0x480] ss:$8 sps:$4 sm:$0xff]  }
   0xd   :  { %1425 = vmatprep.subr.bf16.mxu0 %v3418_v13  ;;  %v3452_v36 = vld [vmem:[%s5088_s1 + $0x194] ss:$8 sps:$4 sm:$0xff]   ;;  %v3456_v38 = vld [vmem:[%s5088_s1 + $0x190] ss:$8 sps:$4 sm:$0xff]   ;;  %v3458_v40 = vld [vmem:[%s5088_s1 + $0x1a4] ss:$8 sps:$4 sm:$0xff]  }
   0xe   :  { %v3454_v37 = vld [vmem:[%s5088_s1 + $0x494] ss:$8 sps:$4 sm:$0xff]   ;;  %v3457_v39 = vld [vmem:[%s5088_s1 + $0x490] ss:$8 sps:$4 sm:$0xff]   ;;  %v3460_v41 = vld [vmem:[%s5088_s1 + $0x4a4] ss:$8 sps:$4 sm:$0xff]  }
   0xf   :  { %322 = vmatpush1.bf16.msra.mxu1 %v3420_v14  ;;  %v3462_v42 = vld [vmem:[%s5088_s1 + $0x1a0] ss:$8 sps:$4 sm:$0xff]   ;;  %v3464_v44 = vld [vmem:[%s5088_s1 + $0x1b4] ss:$8 sps:$4 sm:$0xff]   ;;  %v3468_v46 = vld [vmem:[%s5088_s1 + $0x1b0] ss:$8 sps:$4 sm:$0xff]  }
  0x10   :  { %1426 = vmatpush1.bf16.msra.mxu0 %v3421_v15  ;;  %323 = vmatprep.subr.bf16.mxu1 %v3422_v16  ;;  %v3463_v43 = vld [vmem:[%s5088_s1 + $0x4a0] ss:$8 sps:$4 sm:$0xff]   ;;  %v3466_v45 = vld [vmem:[%s5088_s1 + $0x4b4] ss:$8 sps:$4 sm:$0xff]   ;;  %v3469_v47 = vld [vmem:[%s5088_s1 + $0x4b0] ss:$8 sps:$4 sm:$0xff]  }
  0x11   :  { %1427 = vmatprep.subr.bf16.mxu0 %v3424_v17  ;;  %v4014_v48 = vld [vmem:[%s5089_s0] sm:$0xff]  ;;  %v4019_v49 = vld [vmem:[%s5089_s0 + $0x8] sm:$0xff]  ;;  %v4024_v50 = vld [vmem:[%s5089_s0 + $0x10] sm:$0xff]  ;;  %vm1480_vm6 = vsmask.f32 1280  ;;  %vm603_vm9 = vcmask 1042432  }
  0x12   :  { %v4027_v51 = vshrl.u32 %v4014_v48, 16  ;;  %v4030_v52 = vshll.u32 %v4014_v48, 16  ;;  %v2937_v53 = vrot.slane %v4014_v48, 10  ;;  %v4034_v54 = vshll.u32 %v4019_v49, 16  ;;  %vm4043_vm4 = vmor %vm1193_vm2, %vm1194_vm3  ;;  %v3470_v59 = vld [vmem:[%s5088_s1 + $0x1c4] ss:$8 sps:$4 sm:$0xff]  }
  0x13   :  { %324 = vmatpush1.bf16.msra.mxu1 %v3426_v18  ;;  %v4037_v55 = vshrl.u32 %v4019_v49, 16  ;;  %v4040_v56 = vshll.u32 %v4024_v50, 16  ;;  %v1198_v58 = vrot.slane %v4019_v49, 6  ;;  %v3472_v60 = vld [vmem:[%s5088_s1 + $0x4c4] ss:$8 sps:$4 sm:$0xff]   ;;  %v1201_v6 = vrot.slane %v4024_v50, 6  ;;  %vm4072_vm5 = vmor %vm55_vm0, %vm56_vm1 }
  0x14   :  { %1428 = vmatpush1.bf16.msra.mxu0 %v3427_v19  ;;  %325 = vmatprep.subr.bf16.mxu1 %v3428_v20  ;;  %v61_v61 = vrot.slane %v4027_v51, 4  ;;  %v64_v62 = vrot.slane %v4030_v52, 5  ;;  %v70_v63 = vrot.slane %v4034_v54, 5  ;;  %v3474_v1 = vld [vmem:[%s5088_s1 + $0x1c0] ss:$8 sps:$4 sm:$0xff]   ;;  %vm604_vm10 = vcmask 1046532  }
  0x15   :  { %1429 = vmatprep.subr.bf16.mxu0 %v3430_v21  ;;  %v74_v0 = vrot.slane %v4037_v55, 4  ;;  %v3475_v2 = vld [vmem:[%s5088_s1 + $0x4c0] ss:$8 sps:$4 sm:$0xff]   ;;  %v1199_v4 = vsel %vm4043_vm4, %v2937_v53, %v1198_v58  ;;  %v1200_v5 = vrot.slane %v1198_v58, 4  ;;  %v3476_v7 = vld [vmem:[%s5088_s1 + $0x1d4] ss:$8 sps:$4 sm:$0xff]   ;;  %vm4423_vm13 = vmor %vm603_vm9, %vm604_vm10 }
  0x16   :  { %v65_v3 = vor.u32 %v64_v62, %v61_v61  ;;  %v80_v10 = vrot.slane %v4040_v56, 5  ;;  %v3478_v11 = vld [vmem:[%s5088_s1 + $0x4d4] ss:$8 sps:$4 sm:$0xff]   ;;  %v3480_v16 = vld [vmem:[%s5088_s1 + $0x1d0] ss:$8 sps:$4 sm:$0xff]   ;;  %v4164_v53 = vshrl.u32 %v4024_v50, 16 }
  0x17   :  { %326 = vmatpush1.bf16.msra.mxu1 %v3432_v22  ;;  %v75_v9 = vor.u32 %v74_v0, %v70_v63  ;;  %v1202_v13 = vsel %vm4043_vm4, %v1200_v5, %v1201_v6  ;;  %v3481_v18 = vld [vmem:[%s5088_s1 + $0x4d0] ss:$8 sps:$4 sm:$0xff]   ;;  %v3482_v19 = vld [vmem:[%s5088_s1 + $0x1e4] ss:$8 sps:$4 sm:$0xff]   ;;  %v1487_v62 = vrot.slane %v4037_v55, 6  ;;  %vm1779_vm11 = vcmask 1040384  }
  0x18   :  { %1430 = vmatpush1.bf16.msra.mxu0 %v3433_v23  ;;  %327 = vmatprep.subr.bf16.mxu1 %v3434_v24  ;;  %v66_v12 = vrot.slane %v65_v3, 4  ;;  %v2972_v15 = vcombine.high %v1199_v4, %v1202_v13  ;;  %v3484_v21 = vld [vmem:[%s5088_s1 + $0x4e4] ss:$8 sps:$4 sm:$0xff]   ;;  %v3486_v23 = vld [vmem:[%s5088_s1 + $0x1e0] ss:$8 sps:$4 sm:$0xff]   ;;  %vm1780_vm12 = vcmask 1044484  }
  0x19   :  { %1431 = vmatprep.subr.bf16.mxu0 %v3436_v25  ;;  %v76_v14 = vrot.slane %v75_v9, 4  ;;  %v3487_v24 = vld [vmem:[%s5088_s1 + $0x4e0] ss:$8 sps:$4 sm:$0xff]   ;;  %v3488_v25 = vld [vmem:[%s5088_s1 + $0x1f4] ss:$8 sps:$4 sm:$0xff]   ;;  %vm4430_vm14 = vmor %vm1779_vm11, %vm1780_vm12 }
  0x1a   :  { %v71_v17 = vsel %vm4072_vm5, %v66_v12, %v70_v63  ;;  %1451 = vmatprep.mubr.bf16.mxu0 %v2972_v15  ;;  %v3515_v58 = vld [vmem:[%s5088_s1 + $0x530] ss:$8 sps:$4 sm:$0xff]   ;;  %v1488_v63 = vrot.slane %v4034_v54, 7  ;;  %v3518_v0 = vld [vmem:[%s5088_s1 + $0x40] ss:$8 sps:$4 sm:$0xff]  }
  0x1b   :  { %328 = vmatpush1.bf16.msra.mxu1 %v3438_v26  ;;  %v81_v20 = vsel %vm4072_vm5, %v76_v14, %v80_v10  ;;  %v3490_v26 = vld [vmem:[%s5088_s1 + $0x4f4] ss:$8 sps:$4 sm:$0xff]   ;;  %vm1481_vm7 = vsmask.f32 5392  ;;  %v3524_v6 = vld [vmem:[%s5088_s1 + $0x50] ss:$8 sps:$4 sm:$0xff]  }
  0x1c   :  { %1432 = vmatpush1.bf16.msra.mxu0 %v3439_v27  ;;  %329 = vmatprep.subr.bf16.mxu1 %v3440_v28  ;;  %v2728_v22 = vcombine.high %v71_v17, %v81_v20  ;;  %v3492_v27 = vld [vmem:[%s5088_s1 + $0x1f0] ss:$8 sps:$4 sm:$0xff]   ;;  %v3526_v3 = vld [vmem:[%s5088_s1 + $0x54] ss:$8 sps:$4 sm:$0xff]   ;;  %v4205_v10 = vld [vmem:[%s5089_s0 + $0x20] sm:$0xff]  ;;  %v1489_v12 = vor.u32 %v1488_v63, %v1487_v62  ;;  %v2764_v63 = vcombine.high %v4014_v48, %v4019_v49 }
  0x1d   :  { %1433 = vmatprep.subr.bf16.mxu0 %v3442_v29  ;;  %v3493_v28 = vld [vmem:[%s5088_s1 + $0x4f0] ss:$8 sps:$4 sm:$0xff]   ;;  %v3496_v29 = vld [vmem:[%s5088_s1 + $0x4] ss:$8 sps:$4 sm:$0xff]   ;;  %v3529_v5 = vld [vmem:[%s5088_s1 + $0x554] ss:$8 sps:$4 sm:$0xff]  }
  0x1e   :  { %347 = vmatprep.mubr.bf16.mxu1 %v2728_v22  ;;  %v4200_v9 = vld [vmem:[%s5089_s0 + $0x18] sm:$0xff]  ;;  %vm4242_vm8 = vmor %vm1480_vm6, %vm1481_vm7  ;;  %v3544_v8 = vld [vmem:[%s5088_s1 + $0x84] ss:$8 sps:$4 sm:$0xff]   ;;  %vm890_vm15 = vsmask.f32 2304 }
  0x1f   :  { %330 = vmatpush1.bf16.msra.mxu1 %v3444_v30  ;;  %v3499_v30 = vld [vmem:[%s5088_s1 + $0x504] ss:$8 sps:$4 sm:$0xff]   ;;  %v4213_v14 = vshrl.u32 %v4200_v9, 16  ;;  %v4216_v15 = vshll.u32 %v4200_v9, 16  ;;  %v3536_v57 = vld [vmem:[%s5088_s1 + $0x70] ss:$8 sps:$4 sm:$0xff]  }
  0x20   :  { %1434 = vmatpush1.bf16.msra.mxu0 %v3445_v31  ;;  %331 = vmatprep.subr.bf16.mxu1 %v3446_v32  ;;  %v2727_v31 = vcombine.low %v71_v17, %v81_v20  ;;  %v3494_v32 = vld [vmem:[%s5088_s1] ss:$8 sps:$4 sm:$0xff]   ;;  %v4222_v17 = vshrl.u32 %v4205_v10, 16  ;;  %v3547_v62 = vld [vmem:[%s5088_s1 + $0x584] ss:$8 sps:$4 sm:$0xff]  }
  0x21   :  { %1435 = vmatprep.subr.bf16.mxu0 %v3448_v33  ;;  %v2971_v33 = vcombine.low %v1199_v4, %v1202_v13  ;;  %v1493_v4 = vrot.slane %v4040_v56, 7  ;;  %v4210_v13 = vld [vmem:[%s5089_s0 + $0x28] sm:$0xff]  ;;  %v85_v22 = vrot.slane %v4213_v14, 4  ;;  %vm891_vm0 = vsmask.f32 6416 }
  0x22   :  { %v4231_v20 = vshll.u32 %v4210_v13, 16  ;;  %vm2066_vm1 = vsmask.f32 256  ;;  %vm2067_vm2 = vsmask.f32 4368  ;;  %vm4622_vm3 = vmor %vm890_vm15, %vm891_vm0 }
  0x23   :  { %332 = vmatpush1.bf16.msra.mxu1 %v3450_v34  ;;  %v3497_v34 = vld [vmem:[%s5088_s1 + $0x500] ss:$8 sps:$4 sm:$0xff]  }
  0x24   :  { %1436 = vmatpush1.bf16.msra.mxu0 %v3451_v35  ;;  %333 = vmatprep.subr.bf16.mxu1 %v3452_v36  ;;  %v3502_v35 = vld [vmem:[%s5088_s1 + $0x14] ss:$8 sps:$4 sm:$0xff]  }
  0x25   :  { %1437 = vmatprep.subr.bf16.mxu0 %v3454_v37  ;;  %v3505_v36 = vld [vmem:[%s5088_s1 + $0x514] ss:$8 sps:$4 sm:$0xff]   ;;  %v3500_v37 = vld [vmem:[%s5088_s1 + $0x10] ss:$8 sps:$4 sm:$0xff]  }
  0x27   :  { %334 = vmatpush1.bf16.msra.mxu1 %v3456_v38  ;;  %v3503_v38 = vld [vmem:[%s5088_s1 + $0x510] ss:$8 sps:$4 sm:$0xff]  }
  0x28   :  { %1438 = vmatpush1.bf16.msra.mxu0 %v3457_v39  ;;  %335 = vmatprep.subr.bf16.mxu1 %v3458_v40  ;;  %v3508_v39 = vld [vmem:[%s5088_s1 + $0x24] ss:$8 sps:$4 sm:$0xff]  }
  0x29   :  { %1439 = vmatprep.subr.bf16.mxu0 %v3460_v41  ;;  %v3511_v40 = vld [vmem:[%s5088_s1 + $0x524] ss:$8 sps:$4 sm:$0xff]   ;;  %v3506_v41 = vld [vmem:[%s5088_s1 + $0x20] ss:$8 sps:$4 sm:$0xff]  }
  0x2b   :  { %336 = vmatpush1.bf16.msra.mxu1 %v3462_v42  ;;  %v3509_v42 = vld [vmem:[%s5088_s1 + $0x520] ss:$8 sps:$4 sm:$0xff]  }
  0x2c   :  { %1440 = vmatpush1.bf16.msra.mxu0 %v3463_v43  ;;  %337 = vmatprep.subr.bf16.mxu1 %v3464_v44  ;;  %v3514_v43 = vld [vmem:[%s5088_s1 + $0x34] ss:$8 sps:$4 sm:$0xff]  }
  0x2d   :  { %1441 = vmatprep.subr.bf16.mxu0 %v3466_v45  ;;  %v3517_v44 = vld [vmem:[%s5088_s1 + $0x534] ss:$8 sps:$4 sm:$0xff]   ;;  %v1483_v45 = vrot.slane %v4027_v51, 6 }
  0x2f   :  { %338 = vmatpush1.bf16.msra.mxu1 %v3468_v46  ;;  %v1484_v46 = vrot.slane %v4030_v52, 7 }
  0x30   :  { %1442 = vmatpush1.bf16.msra.mxu0 %v3469_v47  ;;  %339 = vmatprep.subr.bf16.mxu1 %v3470_v59  ;;  %v3512_v47 = vld [vmem:[%s5088_s1 + $0x30] ss:$8 sps:$4 sm:$0xff]   ;;  %v3520_v59 = vld [vmem:[%s5088_s1 + $0x44] ss:$8 sps:$4 sm:$0xff]  }
  0x31   :  { %1443 = vmatprep.subr.bf16.mxu0 %v3472_v60  ;;  %v3523_v60 = vld [vmem:[%s5088_s1 + $0x544] ss:$8 sps:$4 sm:$0xff]   ;;  %v1485_v61 = vor.u32 %v1484_v46, %v1483_v45 }
  0x33   :  { %340 = vmatpush1.bf16.msra.mxu1 %v3474_v1  ;;  %v1492_v1 = vrot.slane %v4164_v53, 6 }
  0x34   :  { %1444 = vmatpush1.bf16.msra.mxu0 %v3475_v2  ;;  %341 = vmatprep.subr.bf16.mxu1 %v3476_v7  ;;  %v3521_v2 = vld [vmem:[%s5088_s1 + $0x540] ss:$8 sps:$4 sm:$0xff]   ;;  %v3527_v7 = vld [vmem:[%s5088_s1 + $0x550] ss:$8 sps:$4 sm:$0xff]  }
  0x35   :  { %1445 = vmatprep.subr.bf16.mxu0 %v3478_v11  ;;  %v1486_v11 = vrot.slane %v1485_v61, 4 }
  0x37   :  { %342 = vmatpush1.bf16.msra.mxu1 %v3480_v16  ;;  %v4219_v16 = vshll.u32 %v4205_v10, 16 }
  0x38   :  { %1446 = vmatpush1.bf16.msra.mxu0 %v3481_v18  ;;  %343 = vmatprep.subr.bf16.mxu1 %v3482_v19  ;;  %v3532_v18 = vld [vmem:[%s5088_s1 + $0x64] ss:$8 sps:$4 sm:$0xff]  }
  0x39   :  { %1447 = vmatprep.subr.bf16.mxu0 %v3484_v21  ;;  %v3535_v19 = vld [vmem:[%s5088_s1 + $0x564] ss:$8 sps:$4 sm:$0xff]   ;;  %v1494_v21 = vor.u32 %v1493_v4, %v1492_v1  ;;  %v3542_v1 = vld [vmem:[%s5088_s1 + $0x80] ss:$8 sps:$4 sm:$0xff]   ;;  %v3553_v4 = vld [vmem:[%s5088_s1 + $0x594] ss:$8 sps:$4 sm:$0xff]  }
  0x3b   :  { %344 = vmatpush1.bf16.msra.mxu1 %v3486_v23  ;;  %v88_v23 = vrot.slane %v4216_v15, 5 }
  0x3c   :  { %1448 = vmatpush1.bf16.msra.mxu0 %v3487_v24  ;;  %345 = vmatprep.subr.bf16.mxu1 %v3488_v25  ;;  %v94_v24 = vrot.slane %v4219_v16, 5  ;;  %v98_v25 = vrot.slane %v4222_v17, 4 }
  0x3d   :  { %1449 = vmatprep.subr.bf16.mxu0 %v3490_v26  ;;  %v2938_v26 = vrot.slane %v4200_v9, 10 }
  0x3f   :  { %346 = vmatpush1.bf16.msra.mxu1 %v3492_v27  ;;  %v1205_v27 = vrot.slane %v4205_v10, 6 }
  0x40   :  { %1450 = vmatpush1.bf16.msra.mxu0 %v3493_v28  ;;  %548 = vmatprep.subr.bf16.mxu1 %v3496_v29  ;;  %v1208_v28 = vrot.slane %v4210_v13, 6  ;;  %v3603_v29 = vld [vmem:[%s5088_s1 + $0x614] ss:$8 sps:$4 sm:$0xff]  }
  0x41   :  { %1718 = vmatprep.subr.bf16.mxu0 %v3499_v30  ;;  %v1491_v30 = vrot.slane %v1489_v12, 4 }
  0x42   :  { %348 = vmatmul.mubr.bf16.vlgmr.msra.gmra.mrb[0].mxu1 %v2727_v31  ;;  %v3530_v31 = vld [vmem:[%s5088_s1 + $0x60] ss:$8 sps:$4 sm:$0xff]  }
  0x43   :  { %1452 = vmatmul.mubr.bf16.vlgmr.msra.gmra.mrb[0].mxu0 %v2971_v33  ;;  %549 = vmatpush1.bf16.msra.mxu1 %v3494_v32  ;;  %v89_v32 = vor.u32 %v88_v23, %v85_v22  ;;  %v99_v33 = vor.u32 %v98_v25, %v94_v24  ;;  %v3560_v22 = vld [vmem:[%s5088_s1 + $0xb0] ss:$8 sps:$4 sm:$0xff]   ;;  %v3571_v25 = vld [vmem:[%s5088_s1 + $0x5c4] ss:$8 sps:$4 sm:$0xff]  }
  0x44   :  { %1719 = vmatpush1.bf16.msra.mxu0 %v3497_v34  ;;  %550 = vmatprep.subr.bf16.mxu1 %v3502_v35  ;;  %v104_v34 = vrot.slane %v4231_v20, 5  ;;  %v3533_v35 = vld [vmem:[%s5088_s1 + $0x560] ss:$8 sps:$4 sm:$0xff]   ;;  %v3563_v23 = vld [vmem:[%s5088_s1 + $0x5b0] ss:$8 sps:$4 sm:$0xff]  }
  0x45   :  { %1720 = vmatprep.subr.bf16.mxu0 %v3505_v36  ;;  %v3538_v36 = vld [vmem:[%s5088_s1 + $0x74] ss:$8 sps:$4 sm:$0xff]  }
  0x47   :  { %551 = vmatpush1.bf16.msra.mxu1 %v3500_v37  ;;  %v1206_v37 = vsel %vm4043_vm4, %v2938_v26, %v1205_v27  ;;  %v3566_v26 = vld [vmem:[%s5088_s1 + $0xc0] ss:$8 sps:$4 sm:$0xff]  }
  0x48   :  { %1721 = vmatpush1.bf16.msra.mxu0 %v3503_v38  ;;  %552 = vmatprep.subr.bf16.mxu1 %v3508_v39  ;;  %v1207_v38 = vrot.slane %v1205_v27, 4  ;;  %v3541_v39 = vld [vmem:[%s5088_s1 + $0x574] ss:$8 sps:$4 sm:$0xff]   ;;  %v3569_v27 = vld [vmem:[%s5088_s1 + $0x5c0] ss:$8 sps:$4 sm:$0xff]  }
  0x49   :  { %1722 = vmatprep.subr.bf16.mxu0 %v3511_v40  ;;  %v90_v40 = vrot.slane %v89_v32, 4  ;;  %v1496_v32 = vrot.slane %v4213_v14, 6 }
  0x4b   :  { %553 = vmatpush1.bf16.msra.mxu1 %v3506_v41  ;;  %v100_v41 = vrot.slane %v99_v33, 4  ;;  %v95_v45 = vsel %vm4072_vm5, %v90_v40, %v94_v24  ;;  %v3568_v24 = vld [vmem:[%s5088_s1 + $0xc4] ss:$8 sps:$4 sm:$0xff]   ;;  %v1497_v33 = vrot.slane %v4216_v15, 7 }
  0x4c   :  { %1723 = vmatpush1.bf16.msra.mxu0 %v3509_v42  ;;  %554 = vmatprep.subr.bf16.mxu1 %v3514_v43  ;;  %v1209_v42 = vsel %vm4043_vm4, %v1207_v38, %v1208_v28  ;;  %v4265_v43 = vsel %vm4242_vm8, %v1486_v11, %v1489_v12  ;;  %v3559_v11 = vld [vmem:[%s5088_s1 + $0x5a4] ss:$8 sps:$4 sm:$0xff]   ;;  %v3554_v12 = vld [vmem:[%s5088_s1 + $0xa0] ss:$8 sps:$4 sm:$0xff]   ;;  %v3574_v28 = vld [vmem:[%s5088_s1 + $0xd4] ss:$8 sps:$4 sm:$0xff]  }
  0x4d   :  { %1724 = vmatprep.subr.bf16.mxu0 %v3517_v44  ;;  %v4269_v44 = vsel %vm4242_vm8, %v1491_v30, %v1494_v21  ;;  %v105_v46 = vsel %vm4072_vm5, %v100_v41, %v104_v34  ;;  %v3565_v21 = vld [vmem:[%s5088_s1 + $0x5b4] ss:$8 sps:$4 sm:$0xff]   ;;  %v1500_v34 = vrot.slane %v4222_v17, 6  ;;  %v3580_v38 = vld [vmem:[%s5088_s1 + $0xe4] ss:$8 sps:$4 sm:$0xff]   ;;  %v1498_v40 = vor.u32 %v1497_v33, %v1496_v32  ;;  %vm4638_vm4 = vmor %vm2066_vm1, %vm2067_vm2 }
  0x4e   :  { %v2729_v61 = vcombine.low %v95_v45, %v105_v46  ;;  %v3577_v30 = vld [vmem:[%s5088_s1 + $0x5d4] ss:$8 sps:$4 sm:$0xff]  }
  0x4f   :  { %555 = vmatpush1.bf16.msra.mxu1 %v3512_v47  ;;  %v2974_v47 = vcombine.high %v1206_v37, %v1209_v42 }
  0x50   :  { %1725 = vmatpush1.bf16.msra.mxu0 %v3515_v58  ;;  %556 = vmatprep.subr.bf16.mxu1 %v3520_v59  ;;  %v2973_v58 = vcombine.low %v1206_v37, %v1209_v42  ;;  %v3539_v59 = vld [vmem:[%s5088_s1 + $0x570] ss:$8 sps:$4 sm:$0xff]  }
  0x51   :  { %1726 = vmatprep.subr.bf16.mxu0 %v3523_v60  ;;  %v2730_v60 = vcombine.high %v95_v45, %v105_v46  ;;  %1461 = vmatprep.mubr.bf16.mxu0 %v2974_v47  ;;  %v3575_v37 = vld [vmem:[%s5088_s1 + $0x5d0] ss:$8 sps:$4 sm:$0xff]   ;;  %v1506_v45 = vrot.slane %v4231_v20, 7  ;;  %v3578_v46 = vld [vmem:[%s5088_s1 + $0xe0] ss:$8 sps:$4 sm:$0xff]  }
  0x52   :  { %1462 = vmatmul.mubr.bf16.gmra.mrb[4].mxu0 %v2973_v58  ;;  %v3581_v47 = vld [vmem:[%s5088_s1 + $0x5e0] ss:$8 sps:$4 sm:$0xff]   ;;  %v3586_v58 = vld [vmem:[%s5088_s1 + $0xf4] ss:$8 sps:$4 sm:$0xff]  }
  0x53   :  { %557 = vmatpush1.bf16.msra.mxu1 %v3518_v0  ;;  %357 = vmatprep.mubr.bf16.mxu1 %v2730_v60  ;;  %v3040_v0 = vcombine.high %v4265_v43, %v4269_v44 }
  0x54   :  { %1727 = vmatpush1.bf16.msra.mxu0 %v3521_v2  ;;  %558 = vmatprep.subr.bf16.mxu1 %v3526_v3  ;;  %v3545_v2 = vld [vmem:[%s5088_s1 + $0x580] ss:$8 sps:$4 sm:$0xff]   ;;  %v3550_v3 = vld [vmem:[%s5088_s1 + $0x94] ss:$8 sps:$4 sm:$0xff]  }
  0x55   :  { %1728 = vmatprep.subr.bf16.mxu0 %v3529_v5  ;;  %358 = vmatmul.mubr.bf16.gmra.mrb[4].mxu1 %v2729_v61  ;;  %v3548_v5 = vld [vmem:[%s5088_s1 + $0x90] ss:$8 sps:$4 sm:$0xff]  }
  0x56   :  { %580 = vmatprep.mubr.bf16.mxu1 %v2764_v63  ;;  %1750 = vmatprep.mubr.bf16.mxu0 %v3040_v0  ;;  %v3593_v63 = vld [vmem:[%s5088_s1 + $0x204] ss:$8 sps:$4 sm:$0xff]  }
  0x57   :  { %559 = vmatpush1.bf16.msra.mxu1 %v3524_v6  ;;  %v3551_v6 = vld [vmem:[%s5088_s1 + $0x590] ss:$8 sps:$4 sm:$0xff]   ;;  %v3596_v0 = vld [vmem:[%s5088_s1 + $0x604] ss:$8 sps:$4 sm:$0xff]  }
  0x58   :  { %1729 = vmatpush1.bf16.msra.mxu0 %v3527_v7  ;;  %560 = vmatprep.subr.bf16.mxu1 %v3532_v18  ;;  %v3556_v7 = vld [vmem:[%s5088_s1 + $0xa4] ss:$8 sps:$4 sm:$0xff]   ;;  %v3557_v18 = vld [vmem:[%s5088_s1 + $0x5a0] ss:$8 sps:$4 sm:$0xff]  }
  0x59   :  { %1730 = vmatprep.subr.bf16.mxu0 %v3535_v19  ;;  %v3562_v19 = vld [vmem:[%s5088_s1 + $0xb4] ss:$8 sps:$4 sm:$0xff]  }
  0x5b   :  { %561 = vmatpush1.bf16.msra.mxu1 %v3530_v31  ;;  %v4352_v31 = vshrl.u32 %v4210_v13, 16 }
  0x5c   :  { %1731 = vmatpush1.bf16.msra.mxu0 %v3533_v35  ;;  %562 = vmatprep.subr.bf16.mxu1 %v3538_v36  ;;  %v1501_v35 = vrot.slane %v4219_v16, 7  ;;  %v3572_v36 = vld [vmem:[%s5088_s1 + $0xd0] ss:$8 sps:$4 sm:$0xff]  }
  0x5d   :  { %1732 = vmatprep.subr.bf16.mxu0 %v3541_v39  ;;  %v3583_v39 = vld [vmem:[%s5088_s1 + $0x5e4] ss:$8 sps:$4 sm:$0xff]   ;;  %v1505_v42 = vrot.slane %v4352_v31, 6 }
  0x5e   :  { %v1502_v41 = vor.u32 %v1501_v35, %v1500_v34  ;;  %v908_v34 = vrot.slane %v4213_v14, 5 }
  0x5f   :  { %563 = vmatpush1.bf16.msra.mxu1 %v3536_v57  ;;  %v3589_v57 = vld [vmem:[%s5088_s1 + $0x5f4] ss:$8 sps:$4 sm:$0xff]   ;;  %v1507_v61 = vor.u32 %v1506_v45, %v1505_v42 }
  0x60   :  { %1733 = vmatpush1.bf16.msra.mxu0 %v3539_v59  ;;  %564 = vmatprep.subr.bf16.mxu1 %v3544_v8  ;;  %v1499_v59 = vrot.slane %v1498_v40, 4  ;;  %v1504_v60 = vrot.slane %v1502_v41, 4  ;;  %v3584_v8 = vld [vmem:[%s5088_s1 + $0xf0] ss:$8 sps:$4 sm:$0xff]   ;;  %v3607_v40 = vld [vmem:[%s5088_s1 + $0x620] ss:$8 sps:$4 sm:$0xff]  }
  0x61   :  { %1734 = vmatprep.subr.bf16.mxu0 %v3547_v62  ;;  %v3587_v62 = vld [vmem:[%s5088_s1 + $0x5f0] ss:$8 sps:$4 sm:$0xff]   ;;  %v3615_v42 = vld [vmem:[%s5088_s1 + $0x634] ss:$8 sps:$4 sm:$0xff]  }
  0x63   :  { %565 = vmatpush1.bf16.msra.mxu1 %v3542_v1  ;;  %v2763_v1 = vcombine.low %v4014_v48, %v4019_v49 }
  0x64   :  { %1735 = vmatpush1.bf16.msra.mxu0 %v3545_v2  ;;  %566 = vmatprep.subr.bf16.mxu1 %v3550_v3  ;;  %v608_v2 = vrot.slane %v4019_v49, 5  ;;  %v3039_v3 = vcombine.low %v4265_v43, %v4269_v44  ;;  %v3594_v43 = vld [vmem:[%s5088_s1 + $0x600] ss:$8 sps:$4 sm:$0xff]  }
  0x65   :  { %1736 = vmatprep.subr.bf16.mxu0 %v3553_v4  ;;  %v1784_v4 = vrot.slane %v4019_v49, 7  ;;  %v3600_v49 = vld [vmem:[%s5088_s1 + $0x214] ss:$8 sps:$4 sm:$0xff]  }
  0x66   :  { %v610_v44 = vrot.slane %v608_v2, 4 }
  0x67   :  { %567 = vmatpush1.bf16.msra.mxu1 %v3548_v5  ;;  %v1503_v5 = vsel %vm4242_vm8, %v1499_v59, %v1502_v41  ;;  %v913_v41 = vrot.slane %v4219_v16, 6  ;;  %v920_v59 = vrot.slane %v4231_v20, 6 }
  0x68   :  { %1737 = vmatpush1.bf16.msra.mxu0 %v3551_v6  ;;  %568 = vmatprep.subr.bf16.mxu1 %v3556_v7  ;;  %v1508_v6 = vsel %vm4242_vm8, %v1504_v60, %v1507_v61  ;;  %v2799_v7 = vrot.slane %v4014_v48, 9  ;;  %v2080_v60 = vrot.slane %v4222_v17, 7  ;;  %v3610_v61 = vld [vmem:[%s5088_s1 + $0x230] ss:$8 sps:$4 sm:$0xff]  }
  0x69   :  { %1738 = vmatprep.subr.bf16.mxu0 %v3559_v11  ;;  %v3591_v11 = vld [vmem:[%s5088_s1 + $0x200] ss:$8 sps:$4 sm:$0xff]   ;;  %v3041_v35 = vcombine.low %v1503_v5, %v1508_v6 }
  0x6b   :  { %569 = vmatpush1.bf16.msra.mxu1 %v3554_v12  ;;  %v2766_v12 = vcombine.high %v4200_v9, %v4205_v10 }
  0x6c   :  { %1739 = vmatpush1.bf16.msra.mxu0 %v3557_v18  ;;  %570 = vmatprep.subr.bf16.mxu1 %v3562_v19  ;;  %v3042_v18 = vcombine.high %v1503_v5, %v1508_v6  ;;  %v3622_v6 = vld [vmem:[%s5088_s1 + $0x250] ss:$8 sps:$4 sm:$0xff]  }
  0x6d   :  { %1740 = vmatprep.subr.bf16.mxu0 %v3565_v21  ;;  %v611_v21 = vrot.slane %v4024_v50, 5 }
  0x6f   :  { %571 = vmatpush1.bf16.msra.mxu1 %v3560_v22  ;;  %v3075_v22 = vrot.slane %v4014_v48, 11  ;;  %v3601_v48 = vld [vmem:[%s5088_s1 + $0x610] ss:$8 sps:$4 sm:$0xff]   ;;  %v4455_v32 = vsel %vm4423_vm13, %v610_v44, %v611_v21  ;;  %v3639_v44 = vld [vmem:[%s5088_s1 + $0x674] ss:$8 sps:$4 sm:$0xff]  }
  0x70   :  { %1741 = vmatpush1.bf16.msra.mxu0 %v3563_v23  ;;  %572 = vmatprep.subr.bf16.mxu1 %v3568_v24  ;;  %v1786_v24 = vrot.slane %v1784_v4, 4  ;;  %v3642_v21 = vld [vmem:[%s5088_s1 + $0x284] ss:$8 sps:$4 sm:$0xff]  }
  0x71   :  { %1742 = vmatprep.subr.bf16.mxu0 %v3571_v25  ;;  %v1787_v25 = vrot.slane %v4024_v50, 7  ;;  %v3609_v50 = vld [vmem:[%s5088_s1 + $0x624] ss:$8 sps:$4 sm:$0xff]   ;;  %v4459_v33 = vsel %vm4430_vm14, %v3075_v22, %v1784_v4  ;;  %v3619_v4 = vld [vmem:[%s5088_s1 + $0x640] ss:$8 sps:$4 sm:$0xff]  }
  0x72   :  { %v3645_v22 = vld [vmem:[%s5088_s1 + $0x684] ss:$8 sps:$4 sm:$0xff]  }
  0x73   :  { %573 = vmatpush1.bf16.msra.mxu1 %v3566_v26  ;;  %v3598_v26 = vld [vmem:[%s5088_s1 + $0x210] ss:$8 sps:$4 sm:$0xff]  }
  0x74   :  { %1743 = vmatpush1.bf16.msra.mxu0 %v3569_v27  ;;  %574 = vmatprep.subr.bf16.mxu1 %v3574_v28  ;;  %v3606_v27 = vld [vmem:[%s5088_s1 + $0x224] ss:$8 sps:$4 sm:$0xff]   ;;  %v2765_v28 = vcombine.low %v4200_v9, %v4205_v10 }
  0x75   :  { %1744 = vmatprep.subr.bf16.mxu0 %v3577_v30  ;;  %v4451_v30 = vsel %vm4423_vm13, %v2799_v7, %v608_v2  ;;  %v2084_v2 = vrot.slane %v4352_v31, 7  ;;  %v3630_v7 = vld [vmem:[%s5088_s1 + $0x264] ss:$8 sps:$4 sm:$0xff]  }
  0x77   :  { %575 = vmatpush1.bf16.msra.mxu1 %v3572_v36  ;;  %v4464_v36 = vsel %vm4430_vm14, %v1786_v24, %v1787_v25  ;;  %v4519_v5 = vor.u32 %v2084_v2, %v4231_v20  ;;  %v3625_v20 = vld [vmem:[%s5088_s1 + $0x650] ss:$8 sps:$4 sm:$0xff]   ;;  %v3640_v24 = vld [vmem:[%s5088_s1 + $0x280] ss:$8 sps:$4 sm:$0xff]  }
  0x78   :  { %1745 = vmatpush1.bf16.msra.mxu0 %v3575_v37  ;;  %576 = vmatprep.subr.bf16.mxu1 %v3580_v38  ;;  %v909_v37 = vrot.slane %v4216_v15, 6  ;;  %v912_v38 = vrot.slane %v4222_v17, 5  ;;  %v3612_v15 = vld [vmem:[%s5088_s1 + $0x234] ss:$8 sps:$4 sm:$0xff]   ;;  %v3643_v25 = vld [vmem:[%s5088_s1 + $0x680] ss:$8 sps:$4 sm:$0xff]  }
  0x79   :  { %1746 = vmatprep.subr.bf16.mxu0 %v3583_v39  ;;  %v3604_v39 = vld [vmem:[%s5088_s1 + $0x220] ss:$8 sps:$4 sm:$0xff]  }
  0x7a   :  { %v4481_v45 = vor.u32 %v909_v37, %v908_v34  ;;  %v3657_v34 = vld [vmem:[%s5088_s1 + $0x6a4] ss:$8 sps:$4 sm:$0xff]   ;;  %v3655_v37 = vld [vmem:[%s5088_s1 + $0x6a0] ss:$8 sps:$4 sm:$0xff]  }
  0x7b   :  { %577 = vmatpush1.bf16.msra.mxu1 %v3578_v46  ;;  %v919_v46 = vrot.slane %v4352_v31, 5  ;;  %v3627_v31 = vld [vmem:[%s5088_s1 + $0x654] ss:$8 sps:$4 sm:$0xff]  }
  0x7c   :  { %1747 = vmatpush1.bf16.msra.mxu0 %v3581_v47  ;;  %578 = vmatprep.subr.bf16.mxu1 %v3586_v58  ;;  %v2834_v47 = vcombine.high %v4451_v30, %v4455_v32  ;;  %v3110_v58 = vcombine.high %v4459_v33, %v4464_v36 }
  0x7d   :  { %1748 = vmatprep.subr.bf16.mxu0 %v3589_v57  ;;  %v4488_v57 = vor.u32 %v913_v41, %v912_v38  ;;  %v3660_v38 = vld [vmem:[%s5088_s1 + $0x2b4] ss:$8 sps:$4 sm:$0xff]   ;;  %v3661_v41 = vld [vmem:[%s5088_s1 + $0x6b0] ss:$8 sps:$4 sm:$0xff]  }
  0x7f   :  { %579 = vmatpush1.bf16.msra.mxu1 %v3584_v8  ;;  %v3613_v8 = vld [vmem:[%s5088_s1 + $0x630] ss:$8 sps:$4 sm:$0xff]  }
  0x80   :  { %1749 = vmatpush1.bf16.msra.mxu0 %v3587_v62  ;;  %829 = vmatprep.subr.bf16.mxu1 %v3593_v63  ;;  %v4498_v62 = vor.u32 %v920_v59, %v919_v46  ;;  %v3618_v63 = vld [vmem:[%s5088_s1 + $0x244] ss:$8 sps:$4 sm:$0xff]   ;;  %v911_v46 = vrot.slane %v4481_v45, 4  ;;  %v3146_v59 = vrot.slane %v4213_v14, 11  ;;  %v3675_v14 = vld [vmem:[%s5088_s1 + $0x6d4] ss:$8 sps:$4 sm:$0xff]  }
  0x81   :  { %2005 = vmatprep.subr.bf16.mxu0 %v3596_v0  ;;  %v3621_v0 = vld [vmem:[%s5088_s1 + $0x644] ss:$8 sps:$4 sm:$0xff]   ;;  %v3705_v45 = vld [vmem:[%s5088_s1 + $0x720] ss:$8 sps:$4 sm:$0xff]  }
  0x82   :  { %581 = vmatmul.mubr.bf16.vlgmr.msra.gmra.mrb[0].mxu1 %v2763_v1  ;;  %v4509_v1 = vor.u32 %v2080_v60, %v4219_v16  ;;  %v3624_v16 = vld [vmem:[%s5088_s1 + $0x254] ss:$8 sps:$4 sm:$0xff]   ;;  %v4635_v17 = vsel %vm4622_vm3, %v911_v46, %v4488_v57 }
  0x83   :  { %1751 = vmatmul.mubr.bf16.vlgmr.msra.gmra.mrb[0].mxu0 %v3039_v3  ;;  %830 = vmatpush1.bf16.msra.mxu1 %v3591_v11  ;;  %v3616_v3 = vld [vmem:[%s5088_s1 + $0x240] ss:$8 sps:$4 sm:$0xff]   ;;  %v3633_v11 = vld [vmem:[%s5088_s1 + $0x664] ss:$8 sps:$4 sm:$0xff]  }
  0x84   :  { %2006 = vmatpush1.bf16.msra.mxu0 %v3594_v43  ;;  %831 = vmatprep.subr.bf16.mxu1 %v3600_v49  ;;  %v3628_v43 = vld [vmem:[%s5088_s1 + $0x260] ss:$8 sps:$4 sm:$0xff]   ;;  %v4650_v2 = vsel %vm4638_vm4, %v3146_v59, %v4509_v1 }
  0x85   :  { %2007 = vmatprep.subr.bf16.mxu0 %v3603_v29  ;;  %590 = vmatprep.mubr.bf16.mxu1 %v2766_v12  ;;  %v3631_v49 = vld [vmem:[%s5088_s1 + $0x660] ss:$8 sps:$4 sm:$0xff]   ;;  %v3636_v29 = vld [vmem:[%s5088_s1 + $0x274] ss:$8 sps:$4 sm:$0xff]   ;;  %v3634_v12 = vld [vmem:[%s5088_s1 + $0x270] ss:$8 sps:$4 sm:$0xff]  }
  0x86   :  { %1760 = vmatprep.mubr.bf16.mxu0 %v3042_v18  ;;  %v3637_v18 = vld [vmem:[%s5088_s1 + $0x670] ss:$8 sps:$4 sm:$0xff]  }
  0x87   :  { %832 = vmatpush1.bf16.msra.mxu1 %v3598_v26  ;;  %v3648_v26 = vld [vmem:[%s5088_s1 + $0x294] ss:$8 sps:$4 sm:$0xff]  }
  0x88   :  { %2008 = vmatpush1.bf16.msra.mxu0 %v3601_v48  ;;  %833 = vmatprep.subr.bf16.mxu1 %v3606_v27  ;;  %v3651_v48 = vld [vmem:[%s5088_s1 + $0x694] ss:$8 sps:$4 sm:$0xff]   ;;  %v3646_v27 = vld [vmem:[%s5088_s1 + $0x290] ss:$8 sps:$4 sm:$0xff]  }
  0x89   :  { %2009 = vmatprep.subr.bf16.mxu0 %v3609_v50  ;;  %v3649_v50 = vld [vmem:[%s5088_s1 + $0x690] ss:$8 sps:$4 sm:$0xff]  }
  0x8a   :  { %591 = vmatmul.mubr.bf16.gmra.mrb[4].mxu1 %v2765_v28  ;;  %v3654_v28 = vld [vmem:[%s5088_s1 + $0x2a4] ss:$8 sps:$4 sm:$0xff]  }
  0x8b   :  { %1761 = vmatmul.mubr.bf16.gmra.mrb[4].mxu0 %v3041_v35  ;;  %834 = vmatpush1.bf16.msra.mxu1 %v3604_v39  ;;  %v3652_v35 = vld [vmem:[%s5088_s1 + $0x2a0] ss:$8 sps:$4 sm:$0xff]   ;;  %v3663_v39 = vld [vmem:[%s5088_s1 + $0x6b4] ss:$8 sps:$4 sm:$0xff]  }
  0x8c   :  { %2010 = vmatpush1.bf16.msra.mxu0 %v3607_v40  ;;  %835 = vmatprep.subr.bf16.mxu1 %v3612_v15  ;;  %v3658_v40 = vld [vmem:[%s5088_s1 + $0x2b0] ss:$8 sps:$4 sm:$0xff]   ;;  %v3666_v15 = vld [vmem:[%s5088_s1 + $0x2c4] ss:$8 sps:$4 sm:$0xff]  }
  0x8d   :  { %2011 = vmatprep.subr.bf16.mxu0 %v3615_v42  ;;  %861 = vmatprep.mubr.bf16.mxu1 %v2834_v47  ;;  %v3669_v42 = vld [vmem:[%s5088_s1 + $0x6c4] ss:$8 sps:$4 sm:$0xff]   ;;  %v3664_v47 = vld [vmem:[%s5088_s1 + $0x2c0] ss:$8 sps:$4 sm:$0xff]  }
  0x8e   :  { %2037 = vmatprep.mubr.bf16.mxu0 %v3110_v58  ;;  %v916_v58 = vrot.slane %v4488_v57, 4 }
  0x8f   :  { %836 = vmatpush1.bf16.msra.mxu1 %v3610_v61  ;;  %v2083_v61 = vrot.slane %v2080_v60, 4  ;;  %v3713_v60 = vld [vmem:[%s5088_s1 + $0x734] ss:$8 sps:$4 sm:$0xff]  }
  0x90   :  { %2012 = vmatpush1.bf16.msra.mxu0 %v3613_v8  ;;  %837 = vmatprep.subr.bf16.mxu1 %v3618_v63  ;;  %v3667_v8 = vld [vmem:[%s5088_s1 + $0x6c0] ss:$8 sps:$4 sm:$0xff]   ;;  %v3672_v63 = vld [vmem:[%s5088_s1 + $0x2d4] ss:$8 sps:$4 sm:$0xff]  }
  0x91   :  { %2013 = vmatprep.subr.bf16.mxu0 %v3621_v0  ;;  %v4645_v0 = vsel %vm4622_vm3, %v916_v58, %v4498_v62  ;;  %v4655_v57 = vsel %vm4638_vm4, %v2083_v61, %v4519_v5  ;;  %v3679_v5 = vld [vmem:[%s5088_s1 + $0x2e4] ss:$8 sps:$4 sm:$0xff]   ;;  %v3145_v58 = vrot.slane %v4027_v51, 11 }
  0x92   :  { %v2904_v62 = vcombine.high %v4635_v17, %v4645_v0  ;;  %v3182_v1 = vcombine.high %v4650_v2, %v4655_v57 }
  0x93   :  { %838 = vmatpush1.bf16.msra.mxu1 %v3616_v3  ;;  %v3670_v3 = vld [vmem:[%s5088_s1 + $0x2d0] ss:$8 sps:$4 sm:$0xff]  }
  0x94   :  { %2014 = vmatpush1.bf16.msra.mxu0 %v3619_v4  ;;  %839 = vmatprep.subr.bf16.mxu1 %v3624_v16  ;;  %v3673_v4 = vld [vmem:[%s5088_s1 + $0x6d0] ss:$8 sps:$4 sm:$0xff]   ;;  %v615_v16 = vrot.slane %v4205_v10, 5 }
  0x95   :  { %2015 = vmatprep.subr.bf16.mxu0 %v3627_v31  ;;  %v2903_v31 = vcombine.low %v4635_v17, %v4645_v0  ;;  %v3798_v17 = vld [vmem:[%s5088_s1 + $0x840] ss:$8 sps:$4 sm:$0xff]   ;;  %v3803_v0 = vld [vmem:[%s5088_s1 + $0x854] ss:$8 sps:$4 sm:$0xff]  }
  0x97   :  { %840 = vmatpush1.bf16.msra.mxu1 %v3622_v6  ;;  %v3181_v6 = vcombine.low %v4650_v2, %v4655_v57  ;;  %v3801_v2 = vld [vmem:[%s5088_s1 + $0x850] ss:$8 sps:$4 sm:$0xff]   ;;  %v3806_v57 = vld [vmem:[%s5088_s1 + $0x864] ss:$8 sps:$4 sm:$0xff]  }
  0x98   :  { %2016 = vmatpush1.bf16.msra.mxu0 %v3625_v20  ;;  %841 = vmatprep.subr.bf16.mxu1 %v3630_v7  ;;  %v3682_v20 = vld [vmem:[%s5088_s1 + $0x6e4] ss:$8 sps:$4 sm:$0xff]   ;;  %v1791_v7 = vrot.slane %v4205_v10, 7  ;;  %v3689_v10 = vld [vmem:[%s5088_s1 + $0x6f4] ss:$8 sps:$4 sm:$0xff]  }
  0x99   :  { %2017 = vmatprep.subr.bf16.mxu0 %v3633_v11  ;;  %v3677_v11 = vld [vmem:[%s5088_s1 + $0x2e0] ss:$8 sps:$4 sm:$0xff]  }
  0x9b   :  { %842 = vmatpush1.bf16.msra.mxu1 %v3628_v43  ;;  %v3680_v43 = vld [vmem:[%s5088_s1 + $0x6e0] ss:$8 sps:$4 sm:$0xff]  }
  0x9c   :  { %2018 = vmatpush1.bf16.msra.mxu0 %v3631_v49  ;;  %843 = vmatprep.subr.bf16.mxu1 %v3636_v29  ;;  %v2800_v49 = vrot.slane %v4200_v9, 9  ;;  %v3686_v29 = vld [vmem:[%s5088_s1 + $0x2f4] ss:$8 sps:$4 sm:$0xff]  }
  0x9d   :  { %2019 = vmatprep.subr.bf16.mxu0 %v3639_v44  ;;  %v617_v44 = vrot.slane %v615_v16, 4 }
  0x9f   :  { %844 = vmatpush1.bf16.msra.mxu1 %v3634_v12  ;;  %v618_v12 = vrot.slane %v4210_v13, 5 }
  0xa0   :  { %2020 = vmatpush1.bf16.msra.mxu0 %v3637_v18  ;;  %845 = vmatprep.subr.bf16.mxu1 %v3642_v21  ;;  %v3076_v18 = vrot.slane %v4200_v9, 11  ;;  %v1793_v21 = vrot.slane %v1791_v7, 4  ;;  %v2833_v9 = vcombine.low %v4451_v30, %v4455_v32  ;;  %v904_v32 = vrot.slane %v4164_v53, 5 }
  0xa1   :  { %2021 = vmatprep.subr.bf16.mxu0 %v3645_v22  ;;  %v1794_v22 = vrot.slane %v4210_v13, 7  ;;  %v3109_v13 = vcombine.low %v4459_v33, %v4464_v36  ;;  %v3690_v33 = vld [vmem:[%s5088_s1 + $0x300] ss:$8 sps:$4 sm:$0xff]  }
  0xa2   :  { %v3693_v36 = vld [vmem:[%s5088_s1 + $0x700] ss:$8 sps:$4 sm:$0xff]  }
  0xa3   :  { %846 = vmatpush1.bf16.msra.mxu1 %v3640_v24  ;;  %v893_v24 = vrot.slane %v4027_v51, 5  ;;  %v1795_v19 = vsel %vm4430_vm14, %v1793_v21, %v1794_v22  ;;  %v3704_v51 = vld [vmem:[%s5088_s1 + $0x324] ss:$8 sps:$4 sm:$0xff]   ;;  %v3717_v21 = vld [vmem:[%s5088_s1 + $0x740] ss:$8 sps:$4 sm:$0xff]  }
  0xa4   :  { %2022 = vmatpush1.bf16.msra.mxu0 %v3643_v25  ;;  %847 = vmatprep.subr.bf16.mxu1 %v3648_v26  ;;  %v894_v25 = vrot.slane %v4030_v52, 6  ;;  %v897_v26 = vrot.slane %v4037_v55, 5  ;;  %v3692_v52 = vld [vmem:[%s5088_s1 + $0x304] ss:$8 sps:$4 sm:$0xff]   ;;  %v3722_v22 = vld [vmem:[%s5088_s1 + $0x354] ss:$8 sps:$4 sm:$0xff]  }
  0xa5   :  { %2023 = vmatprep.subr.bf16.mxu0 %v3651_v48  ;;  %v3684_v48 = vld [vmem:[%s5088_s1 + $0x2f0] ss:$8 sps:$4 sm:$0xff]  }
  0xa6   :  { %v895_v30 = vor.u32 %v894_v25, %v893_v24  ;;  %v3725_v24 = vld [vmem:[%s5088_s1 + $0x754] ss:$8 sps:$4 sm:$0xff]   ;;  %v3720_v25 = vld [vmem:[%s5088_s1 + $0x350] ss:$8 sps:$4 sm:$0xff]  }
  0xa7   :  { %848 = vmatpush1.bf16.msra.mxu1 %v3646_v27  ;;  %v3687_v27 = vld [vmem:[%s5088_s1 + $0x6f0] ss:$8 sps:$4 sm:$0xff]  }
  0xa8   :  { %2024 = vmatpush1.bf16.msra.mxu0 %v3649_v50  ;;  %849 = vmatprep.subr.bf16.mxu1 %v3654_v28  ;;  %v898_v50 = vrot.slane %v4034_v54, 6  ;;  %v3695_v28 = vld [vmem:[%s5088_s1 + $0x704] ss:$8 sps:$4 sm:$0xff]  }
  0xa9   :  { %2025 = vmatprep.subr.bf16.mxu0 %v3657_v34  ;;  %v616_v34 = vsel %vm4423_vm13, %v2800_v49, %v615_v16 }
  0xab   :  { %850 = vmatpush1.bf16.msra.mxu1 %v3652_v35  ;;  %v619_v35 = vsel %vm4423_vm13, %v617_v44, %v618_v12  ;;  %v3711_v44 = vld [vmem:[%s5088_s1 + $0x730] ss:$8 sps:$4 sm:$0xff]   ;;  %v3716_v12 = vld [vmem:[%s5088_s1 + $0x344] ss:$8 sps:$4 sm:$0xff]  }
  0xac   :  { %2026 = vmatpush1.bf16.msra.mxu0 %v3655_v37  ;;  %851 = vmatprep.subr.bf16.mxu1 %v3660_v38  ;;  %v905_v37 = vrot.slane %v4040_v56, 6  ;;  %v2071_v38 = vrot.slane %v4037_v55, 7  ;;  %v3698_v55 = vld [vmem:[%s5088_s1 + $0x314] ss:$8 sps:$4 sm:$0xff]  }
  0xad   :  { %2027 = vmatprep.subr.bf16.mxu0 %v3663_v39  ;;  %v1792_v39 = vsel %vm4430_vm14, %v3076_v18, %v1791_v7  ;;  %v3702_v7 = vld [vmem:[%s5088_s1 + $0x320] ss:$8 sps:$4 sm:$0xff]  }
  0xae   :  { %v3112_v46 = vcombine.high %v1792_v39, %v1795_v19  ;;  %v906_v23 = vor.u32 %v905_v37, %v904_v32  ;;  %v2072_v61 = vor.u32 %v2071_v38, %v4034_v54  ;;  %v2835_v54 = vcombine.low %v616_v34, %v619_v35  ;;  %v3714_v18 = vld [vmem:[%s5088_s1 + $0x340] ss:$8 sps:$4 sm:$0xff]  }
  0xaf   :  { %852 = vmatpush1.bf16.msra.mxu1 %v3658_v40  ;;  %v899_v40 = vor.u32 %v898_v50, %v897_v26  ;;  %v3723_v26 = vld [vmem:[%s5088_s1 + $0x750] ss:$8 sps:$4 sm:$0xff]   ;;  %v3726_v50 = vld [vmem:[%s5088_s1 + $0x360] ss:$8 sps:$4 sm:$0xff]  }
  0xb0   :  { %2028 = vmatpush1.bf16.msra.mxu0 %v3661_v41  ;;  %853 = vmatprep.subr.bf16.mxu1 %v3666_v15  ;;  %v2075_v41 = vrot.slane %v4164_v53, 7  ;;  %v3701_v15 = vld [vmem:[%s5088_s1 + $0x714] ss:$8 sps:$4 sm:$0xff]   ;;  %v3696_v53 = vld [vmem:[%s5088_s1 + $0x310] ss:$8 sps:$4 sm:$0xff]   ;;  %v4764_v16 = vsel %vm4638_vm4, %v3145_v58, %v2072_v61 }
  0xb1   :  { %2029 = vmatprep.subr.bf16.mxu0 %v3669_v42  ;;  %v2836_v42 = vcombine.high %v616_v34, %v619_v35  ;;  %v901_v59 = vrot.slane %v899_v40, 4  ;;  %v3735_v34 = vld [vmem:[%s5088_s1 + $0x770] ss:$8 sps:$4 sm:$0xff]   ;;  %v3740_v35 = vld [vmem:[%s5088_s1 + $0x384] ss:$8 sps:$4 sm:$0xff]  }
  0xb2   :  { %v3738_v32 = vld [vmem:[%s5088_s1 + $0x380] ss:$8 sps:$4 sm:$0xff]   ;;  %v3767_v58 = vld [vmem:[%s5088_s1 + $0x7c4] ss:$8 sps:$4 sm:$0xff]   ;;  %v3770_v61 = vld [vmem:[%s5088_s1 + $0x3d4] ss:$8 sps:$4 sm:$0xff]  }
  0xb3   :  { %854 = vmatpush1.bf16.msra.mxu1 %v3664_v47  ;;  %v896_v47 = vrot.slane %v895_v30, 4  ;;  %v3743_v30 = vld [vmem:[%s5088_s1 + $0x784] ss:$8 sps:$4 sm:$0xff]   ;;  %v3741_v37 = vld [vmem:[%s5088_s1 + $0x780] ss:$8 sps:$4 sm:$0xff]  }
  0xb4   :  { %2030 = vmatpush1.bf16.msra.mxu0 %v3667_v8  ;;  %855 = vmatprep.subr.bf16.mxu1 %v3672_v63  ;;  %v2074_v8 = vrot.slane %v2071_v38, 4  ;;  %v2076_v63 = vor.u32 %v2075_v41, %v4040_v56  ;;  %v3111_v56 = vcombine.low %v1792_v39, %v1795_v19  ;;  %v3746_v38 = vld [vmem:[%s5088_s1 + $0x394] ss:$8 sps:$4 sm:$0xff]   ;;  %v3747_v39 = vld [vmem:[%s5088_s1 + $0x790] ss:$8 sps:$4 sm:$0xff]  }
  0xb5   :  { %2031 = vmatprep.subr.bf16.mxu0 %v3675_v14  ;;  %v3699_v14 = vld [vmem:[%s5088_s1 + $0x710] ss:$8 sps:$4 sm:$0xff]   ;;  %v3752_v19 = vld [vmem:[%s5088_s1 + $0x3a4] ss:$8 sps:$4 sm:$0xff]   ;;  %v3750_v41 = vld [vmem:[%s5088_s1 + $0x3a0] ss:$8 sps:$4 sm:$0xff]  }
  0xb7   :  { %856 = vmatpush1.bf16.msra.mxu1 %v3670_v3  ;;  %v3707_v3 = vld [vmem:[%s5088_s1 + $0x724] ss:$8 sps:$4 sm:$0xff]  }
  0xb8   :  { %2032 = vmatpush1.bf16.msra.mxu0 %v3673_v4  ;;  %857 = vmatprep.subr.bf16.mxu1 %v3679_v5  ;;  %v4756_v4 = vsel %vm4622_vm3, %v896_v47, %v899_v40  ;;  %v4760_v5 = vsel %vm4622_vm3, %v901_v59, %v906_v23  ;;  %v3755_v40 = vld [vmem:[%s5088_s1 + $0x7a4] ss:$8 sps:$4 sm:$0xff]   ;;  %v3759_v47 = vld [vmem:[%s5088_s1 + $0x7b0] ss:$8 sps:$4 sm:$0xff]   ;;  %v3765_v59 = vld [vmem:[%s5088_s1 + $0x7c0] ss:$8 sps:$4 sm:$0xff]  }
  0xb9   :  { %2033 = vmatprep.subr.bf16.mxu0 %v3682_v20  ;;  %v4768_v20 = vsel %vm4638_vm4, %v2074_v8, %v2076_v63  ;;  %v3764_v23 = vld [vmem:[%s5088_s1 + $0x3c4] ss:$8 sps:$4 sm:$0xff]   ;;  %v3773_v8 = vld [vmem:[%s5088_s1 + $0x7d4] ss:$8 sps:$4 sm:$0xff]   ;;  %v3768_v63 = vld [vmem:[%s5088_s1 + $0x3d0] ss:$8 sps:$4 sm:$0xff]  }
  0xba   :  { %v3180_v49 = vcombine.high %v4764_v16, %v4768_v20 }
  0xbb   :  { %858 = vmatpush1.bf16.msra.mxu1 %v3677_v11  ;;  %v3710_v11 = vld [vmem:[%s5088_s1 + $0x334] ss:$8 sps:$4 sm:$0xff]  }
  0xbc   :  { %2034 = vmatpush1.bf16.msra.mxu0 %v3680_v43  ;;  %859 = vmatprep.subr.bf16.mxu1 %v3686_v29  ;;  %v2902_v43 = vcombine.high %v4756_v4, %v4760_v5  ;;  %v3708_v29 = vld [vmem:[%s5088_s1 + $0x330] ss:$8 sps:$4 sm:$0xff]  }
  0xbd   :  { %2035 = vmatprep.subr.bf16.mxu0 %v3689_v10  ;;  %v3719_v10 = vld [vmem:[%s5088_s1 + $0x744] ss:$8 sps:$4 sm:$0xff]  }
  0xbf   :  { %860 = vmatpush1.bf16.msra.mxu1 %v3684_v48  ;;  %v3728_v48 = vld [vmem:[%s5088_s1 + $0x364] ss:$8 sps:$4 sm:$0xff]  }
  0xc0   :  { %2036 = vmatpush1.bf16.msra.mxu0 %v3687_v27  ;;  %1132 = vmatprep.subr.bf16.mxu1 %v3692_v52  ;;  %v3731_v27 = vld [vmem:[%s5088_s1 + $0x764] ss:$8 sps:$4 sm:$0xff]   ;;  %v3734_v52 = vld [vmem:[%s5088_s1 + $0x374] ss:$8 sps:$4 sm:$0xff]  }
  0xc1   :  { %2296 = vmatprep.subr.bf16.mxu0 %v3695_v28  ;;  %v3732_v28 = vld [vmem:[%s5088_s1 + $0x370] ss:$8 sps:$4 sm:$0xff]  }
  0xc2   :  { %862 = vmatmul.mubr.bf16.vlgmr.msra.gmra.mrb[0].mxu1 %v2833_v9  ;;  %v3729_v9 = vld [vmem:[%s5088_s1 + $0x760] ss:$8 sps:$4 sm:$0xff]  }
  0xc3   :  { %2038 = vmatmul.mubr.bf16.vlgmr.msra.gmra.mrb[0].mxu0 %v3109_v13  ;;  %1133 = vmatpush1.bf16.msra.mxu1 %v3690_v33  ;;  %v3737_v13 = vld [vmem:[%s5088_s1 + $0x774] ss:$8 sps:$4 sm:$0xff]  }
  0xc4   :  { %2297 = vmatpush1.bf16.msra.mxu0 %v3693_v36  ;;  %1134 = vmatprep.subr.bf16.mxu1 %v3698_v55  ;;  %v3749_v33 = vld [vmem:[%s5088_s1 + $0x794] ss:$8 sps:$4 sm:$0xff]   ;;  %v3744_v36 = vld [vmem:[%s5088_s1 + $0x390] ss:$8 sps:$4 sm:$0xff]   ;;  %v3753_v55 = vld [vmem:[%s5088_s1 + $0x7a0] ss:$8 sps:$4 sm:$0xff]  }
  0xc5   :  { %2298 = vmatprep.subr.bf16.mxu0 %v3701_v15  ;;  %871 = vmatprep.mubr.bf16.mxu1 %v2836_v42  ;;  %v3758_v15 = vld [vmem:[%s5088_s1 + $0x3b4] ss:$8 sps:$4 sm:$0xff]  }
  0xc6   :  { %2047 = vmatprep.mubr.bf16.mxu0 %v3112_v46  ;;  %v3761_v42 = vld [vmem:[%s5088_s1 + $0x7b4] ss:$8 sps:$4 sm:$0xff]   ;;  %v3756_v46 = vld [vmem:[%s5088_s1 + $0x3b0] ss:$8 sps:$4 sm:$0xff]  }
  0xc7   :  { %1135 = vmatpush1.bf16.msra.mxu1 %v3696_v53  ;;  %v3762_v53 = vld [vmem:[%s5088_s1 + $0x3c0] ss:$8 sps:$4 sm:$0xff]  }
  0xc8   :  { %2299 = vmatpush1.bf16.msra.mxu0 %v3699_v14  ;;  %1136 = vmatprep.subr.bf16.mxu1 %v3704_v51  ;;  %v3771_v14 = vld [vmem:[%s5088_s1 + $0x7d0] ss:$8 sps:$4 sm:$0xff]   ;;  %v3776_v51 = vld [vmem:[%s5088_s1 + $0x3e4] ss:$8 sps:$4 sm:$0xff]  }
  0xc9   :  { %2300 = vmatprep.subr.bf16.mxu0 %v3707_v3  ;;  %v3779_v3 = vld [vmem:[%s5088_s1 + $0x7e4] ss:$8 sps:$4 sm:$0xff]  }
  0xca   :  { %872 = vmatmul.mubr.bf16.gmra.mrb[4].mxu1 %v2835_v54  ;;  %v3774_v54 = vld [vmem:[%s5088_s1 + $0x3e0] ss:$8 sps:$4 sm:$0xff]  }
  0xcb   :  { %2048 = vmatmul.mubr.bf16.gmra.mrb[4].mxu0 %v3111_v56  ;;  %1137 = vmatpush1.bf16.msra.mxu1 %v3702_v7  ;;  %v3777_v56 = vld [vmem:[%s5088_s1 + $0x7e0] ss:$8 sps:$4 sm:$0xff]   ;;  %v3782_v7 = vld [vmem:[%s5088_s1 + $0x3f4] ss:$8 sps:$4 sm:$0xff]  }
  0xcc   :  { %2301 = vmatpush1.bf16.msra.mxu0 %v3705_v45  ;;  %1138 = vmatprep.subr.bf16.mxu1 %v3710_v11  ;;  %v3785_v45 = vld [vmem:[%s5088_s1 + $0x7f4] ss:$8 sps:$4 sm:$0xff]   ;;  %v3780_v11 = vld [vmem:[%s5088_s1 + $0x3f0] ss:$8 sps:$4 sm:$0xff]  }
  0xcd   :  { %2302 = vmatprep.subr.bf16.mxu0 %v3713_v60  ;;  %1164 = vmatprep.mubr.bf16.mxu1 %v2902_v43  ;;  %v3783_v60 = vld [vmem:[%s5088_s1 + $0x7f0] ss:$8 sps:$4 sm:$0xff]   ;;  %v3788_v43 = vld [vmem:[%s5088_s1 + $0x804] ss:$8 sps:$4 sm:$0xff]  }
  0xce   :  { %2328 = vmatprep.mubr.bf16.mxu0 %v3180_v49  ;;  %v2901_v49 = vcombine.low %v4756_v4, %v4760_v5  ;;  %v3789_v4 = vld [vmem:[%s5088_s1 + $0x810] ss:$8 sps:$4 sm:$0xff]   ;;  %v3794_v5 = vld [vmem:[%s5088_s1 + $0x824] ss:$8 sps:$4 sm:$0xff]  }
  0xcf   :  { %1139 = vmatpush1.bf16.msra.mxu1 %v3708_v29  ;;  %v3179_v29 = vcombine.low %v4764_v16, %v4768_v20  ;;  %v3792_v16 = vld [vmem:[%s5088_s1 + $0x820] ss:$8 sps:$4 sm:$0xff]   ;;  %v3797_v20 = vld [vmem:[%s5088_s1 + $0x834] ss:$8 sps:$4 sm:$0xff]  }
  0xd0   :  { %2303 = vmatpush1.bf16.msra.mxu0 %v3711_v44  ;;  %1140 = vmatprep.subr.bf16.mxu1 %v3716_v12  ;;  %v3786_v44 = vld [vmem:[%s5088_s1 + $0x800] ss:$8 sps:$4 sm:$0xff]   ;;  %v3791_v12 = vld [vmem:[%s5088_s1 + $0x814] ss:$8 sps:$4 sm:$0xff]  }
  0xd1   :  { %2304 = vmatprep.subr.bf16.mxu0 %v3719_v10 }
  0xd3   :  { %1141 = vmatpush1.bf16.msra.mxu1 %v3714_v18  ;;  %v4982_v18 = vld [vmem:[%s5089_s0 + $0x20] sm:$0xff] }
  0xd4   :  { %2305 = vmatpush1.bf16.msra.mxu0 %v3717_v21  ;;  %1142 = vmatprep.subr.bf16.mxu1 %v3722_v22  ;;  %v4987_v21 = vld [vmem:[%s5089_s0 + $0x28] sm:$0xff] }
  0xd5   :  { %2306 = vmatprep.subr.bf16.mxu0 %v3725_v24  ;;  %v3250_v22 = vcombine.high %v4982_v18, %v4987_v21  ;;  %v3795_v24 = vld [vmem:[%s5088_s1 + $0x830] ss:$8 sps:$4 sm:$0xff]  }
  0xd7   :  { %1143 = vmatpush1.bf16.msra.mxu1 %v3720_v25  ;;  %v3800_v25 = vld [vmem:[%s5088_s1 + $0x844] ss:$8 sps:$4 sm:$0xff]  }
  0xd8   :  { %2307 = vmatpush1.bf16.msra.mxu0 %v3723_v26  ;;  %1144 = vmatprep.subr.bf16.mxu1 %v3728_v48  ;;  %v3807_v26 = vld [vmem:[%s5088_s1 + $0x870] ss:$8 sps:$4 sm:$0xff]   ;;  %v3812_v48 = vld [vmem:[%s5088_s1 + $0x884] ss:$8 sps:$4 sm:$0xff]  }
  0xd9   :  { %2308 = vmatprep.subr.bf16.mxu0 %v3731_v27  ;;  %v3810_v27 = vld [vmem:[%s5088_s1 + $0x880] ss:$8 sps:$4 sm:$0xff]  }
  0xdb   :  { %1145 = vmatpush1.bf16.msra.mxu1 %v3726_v50  ;;  %v3815_v50 = vld [vmem:[%s5088_s1 + $0x894] ss:$8 sps:$4 sm:$0xff]  }
  0xdc   :  { %2309 = vmatpush1.bf16.msra.mxu0 %v3729_v9  ;;  %1146 = vmatprep.subr.bf16.mxu1 %v3734_v52  ;;  %v3813_v9 = vld [vmem:[%s5088_s1 + $0x890] ss:$8 sps:$4 sm:$0xff]   ;;  %v3818_v52 = vld [vmem:[%s5088_s1 + $0x8a4] ss:$8 sps:$4 sm:$0xff]  }
  0xdd   :  { %2310 = vmatprep.subr.bf16.mxu0 %v3737_v13  ;;  %v3816_v13 = vld [vmem:[%s5088_s1 + $0x8a0] ss:$8 sps:$4 sm:$0xff]  }
  0xdf   :  { %1147 = vmatpush1.bf16.msra.mxu1 %v3732_v28  ;;  %v3821_v28 = vld [vmem:[%s5088_s1 + $0x8b4] ss:$8 sps:$4 sm:$0xff]  }
  0xe0   :  { %2311 = vmatpush1.bf16.msra.mxu0 %v3735_v34  ;;  %1148 = vmatprep.subr.bf16.mxu1 %v3740_v35  ;;  %v3819_v34 = vld [vmem:[%s5088_s1 + $0x8b0] ss:$8 sps:$4 sm:$0xff]   ;;  %v3824_v35 = vld [vmem:[%s5088_s1 + $0x8c4] ss:$8 sps:$4 sm:$0xff]  }
  0xe1   :  { %2312 = vmatprep.subr.bf16.mxu0 %v3743_v30  ;;  %v3822_v30 = vld [vmem:[%s5088_s1 + $0x8c0] ss:$8 sps:$4 sm:$0xff]  }
  0xe3   :  { %1149 = vmatpush1.bf16.msra.mxu1 %v3738_v32  ;;  %v3827_v32 = vld [vmem:[%s5088_s1 + $0x8d4] ss:$8 sps:$4 sm:$0xff]  }
  0xe4   :  { %2313 = vmatpush1.bf16.msra.mxu0 %v3741_v37  ;;  %1150 = vmatprep.subr.bf16.mxu1 %v3746_v38  ;;  %v3825_v37 = vld [vmem:[%s5088_s1 + $0x8d0] ss:$8 sps:$4 sm:$0xff]   ;;  %v3830_v38 = vld [vmem:[%s5088_s1 + $0x8e4] ss:$8 sps:$4 sm:$0xff]  }
  0xe5   :  { %2314 = vmatprep.subr.bf16.mxu0 %v3749_v33  ;;  %v3828_v33 = vld [vmem:[%s5088_s1 + $0x8e0] ss:$8 sps:$4 sm:$0xff]  }
  0xe7   :  { %1151 = vmatpush1.bf16.msra.mxu1 %v3744_v36  ;;  %v3833_v36 = vld [vmem:[%s5088_s1 + $0x8f4] ss:$8 sps:$4 sm:$0xff]  }
  0xe8   :  { %2315 = vmatpush1.bf16.msra.mxu0 %v3747_v39  ;;  %1152 = vmatprep.subr.bf16.mxu1 %v3752_v19  ;;  %v3831_v39 = vld [vmem:[%s5088_s1 + $0x8f0] ss:$8 sps:$4 sm:$0xff]  }
  0xe9   :  { %2316 = vmatprep.subr.bf16.mxu0 %v3755_v40  ;;  %v3249_v40 = vcombine.low %v4982_v18, %v4987_v21 }
  0xeb   :  { %1153 = vmatpush1.bf16.msra.mxu1 %v3750_v41 }
  0xec   :  { %2317 = vmatpush1.bf16.msra.mxu0 %v3753_v55  ;;  %1154 = vmatprep.subr.bf16.mxu1 %v3758_v15 }
  0xed   :  { %2318 = vmatprep.subr.bf16.mxu0 %v3761_v42 }
  0xef   :  { %1155 = vmatpush1.bf16.msra.mxu1 %v3756_v46 }
  0xf0   :  { %2319 = vmatpush1.bf16.msra.mxu0 %v3759_v47  ;;  %1156 = vmatprep.subr.bf16.mxu1 %v3764_v23 }
  0xf1   :  { %2320 = vmatprep.subr.bf16.mxu0 %v3767_v58 }
  0xf3   :  { %1157 = vmatpush1.bf16.msra.mxu1 %v3762_v53 }
  0xf4   :  { %2321 = vmatpush1.bf16.msra.mxu0 %v3765_v59  ;;  %1158 = vmatprep.subr.bf16.mxu1 %v3770_v61 }
  0xf5   :  { %2322 = vmatprep.subr.bf16.mxu0 %v3773_v8 }
  0xf7   :  { %1159 = vmatpush1.bf16.msra.mxu1 %v3768_v63 }
  0xf8   :  { %2323 = vmatpush1.bf16.msra.mxu0 %v3771_v14  ;;  %1160 = vmatprep.subr.bf16.mxu1 %v3776_v51 }
  0xf9   :  { %2324 = vmatprep.subr.bf16.mxu0 %v3779_v3 }
  0xfb   :  { %1161 = vmatpush1.bf16.msra.mxu1 %v3774_v54  ;;  %v2625_v54 = vlaneseq }
  0xfc   :  { %2325 = vmatpush1.bf16.msra.mxu0 %v3777_v56  ;;  %1162 = vmatprep.subr.bf16.mxu1 %v3782_v7 }
  0xfd   :  { %2326 = vmatprep.subr.bf16.mxu0 %v3785_v45  ;;  %v2626_v56 = vshrl.u32 %v2625_v54, 7  ;;  %v2623_v45 = vld [vmem:[%s5090_s2] sm:$0x3] }
  0xff   :  { %1163 = vmatpush1.bf16.msra.mxu1 %v3780_v11  ;;  %v2627_v7 = vsub.s32 0, %v2626_v56  ;;  %v2631_v11 = vsub.s32 1, %v2626_v56 }
 0x100   :  { %2327 = vmatpush1.bf16.msra.mxu0 %v3783_v60  ;;  %3302 = vmatprep.subr.bf16.mxu1 %v3788_v43  ;;  %v2643_v60 = vld [vmem:[%s5091_s3] sm:$0x3] }
 0x101   :  { %2562 = vmatprep.subr.bf16.mxu0 %v3788_v43  ;;  %v2628_v43 = vrot.slane %v2623_v45, %v2627_v7 }
 0x102   :  { %1165 = vmatmul.mubr.bf16.vlgmr.msra.gmra.mrb[0].mxu1 %v2901_v49 }
 0x103   :  { %2329 = vmatmul.mubr.bf16.vlgmr.msra.gmra.mrb[0].mxu0 %v3179_v29  ;;  %3318 = vmatpush1.bf16.msra.mxu1 %v3786_v44 }
 0x104   :  { %2563 = vmatpush1.bf16.msra.mxu0 %v3786_v44  ;;  %3303 = vmatprep.subr.bf16.mxu1 %v3791_v12  ;;  %v2632_v44 = vrot.slane %v2623_v45, %v2631_v11 }
 0x105   :  { %2564 = vmatprep.subr.bf16.mxu0 %v3791_v12  ;;  %1174 = vmatprep.mubr.bf16.mxu1 %v2904_v62  ;;  %v4970_v62 = vld [vmem:[%s5089_s0 + $0x8] sm:$0xff] }
 0x106   :  { %2338 = vmatprep.mubr.bf16.mxu0 %v3182_v1  ;;  %v4975_v1 = vld [vmem:[%s5089_s0 + $0x10] sm:$0xff] }
 0x107   :  { %3319 = vmatpush1.bf16.msra.mxu1 %v3789_v4  ;;  %v3248_v10 = vcombine.high %v4970_v62, %v4975_v1  ;;  %v3247_v19 = vcombine.low %v4970_v62, %v4975_v1  ;;  %v2652_v1 = vrot.slane %v2643_v60, %v2631_v11 }
 0x108   :  { %2565 = vmatpush1.bf16.msra.mxu0 %v3789_v4  ;;  %3304 = vmatprep.subr.bf16.mxu1 %v3794_v5  ;;  %v2648_v4 = vrot.slane %v2643_v60, %v2627_v7 }
 0x109   :  { %2566 = vmatprep.subr.bf16.mxu0 %v3794_v5 }
 0x10a   :  { %1175 = vmatmul.mubr.bf16.gmra.mrb[4].mxu1 %v2903_v31  ;;  %v3804_v31 = vld [vmem:[%s5088_s1 + $0x860] ss:$8 sps:$4 sm:$0xff]  }
 0x10b   :  { %2339 = vmatmul.mubr.bf16.gmra.mrb[4].mxu0 %v3181_v6  ;;  %3320 = vmatpush1.bf16.msra.mxu1 %v3792_v16  ;;  %v3809_v6 = vld [vmem:[%s5088_s1 + $0x874] ss:$8 sps:$4 sm:$0xff]  }
 0x10c   :  { %2567 = vmatpush1.bf16.msra.mxu0 %v3792_v16  ;;  %3305 = vmatprep.subr.bf16.mxu1 %v3797_v20 }
 0x10d   :  { %2568 = vmatprep.subr.bf16.mxu0 %v3797_v20  ;;  %2594 = vmatprep.mubr.bf16.mxu0 %v3248_v10 }
 0x10e   :  { %2604 = vmatprep.mubr.bf16.mxu1 %v3250_v22 }
 0x10f   :  { %3321 = vmatpush1.bf16.msra.mxu1 %v3795_v24 }
 0x110   :  { %2569 = vmatpush1.bf16.msra.mxu0 %v3795_v24  ;;  %3306 = vmatprep.subr.bf16.mxu1 %v3800_v25 }
 0x111   :  { %2570 = vmatprep.subr.bf16.mxu0 %v3800_v25 }
 0x113   :  { %3322 = vmatpush1.bf16.msra.mxu1 %v3798_v17 }
 0x114   :  { %2571 = vmatpush1.bf16.msra.mxu0 %v3798_v17  ;;  %3307 = vmatprep.subr.bf16.mxu1 %v3803_v0 }
 0x115   :  { %2572 = vmatprep.subr.bf16.mxu0 %v3803_v0 }
 0x117   :  { %3323 = vmatpush1.bf16.msra.mxu1 %v3801_v2 }
 0x118   :  { %2573 = vmatpush1.bf16.msra.mxu0 %v3801_v2  ;;  %3308 = vmatprep.subr.bf16.mxu1 %v3806_v57 }
 0x119   :  { %2574 = vmatprep.subr.bf16.mxu0 %v3806_v57 }
 0x11b   :  { %3324 = vmatpush1.bf16.msra.mxu1 %v3804_v31 }
 0x11c   :  { %2575 = vmatpush1.bf16.msra.mxu0 %v3804_v31  ;;  %3309 = vmatprep.subr.bf16.mxu1 %v3809_v6 }
 0x11d   :  { %2576 = vmatprep.subr.bf16.mxu0 %v3809_v6 }
 0x11f   :  { %3325 = vmatpush1.bf16.msra.mxu1 %v3807_v26 }
 0x120   :  { %2577 = vmatpush1.bf16.msra.mxu0 %v3807_v26  ;;  %3310 = vmatprep.subr.bf16.mxu1 %v3812_v48 }
 0x121   :  { %2578 = vmatprep.subr.bf16.mxu0 %v3812_v48 }
 0x123   :  { %3326 = vmatpush1.bf16.msra.mxu1 %v3810_v27 }
 0x124   :  { %2579 = vmatpush1.bf16.msra.mxu0 %v3810_v27  ;;  %3311 = vmatprep.subr.bf16.mxu1 %v3815_v50 }
 0x125   :  { %2580 = vmatprep.subr.bf16.mxu0 %v3815_v50 }
 0x127   :  { %3327 = vmatpush1.bf16.msra.mxu1 %v3813_v9 }
 0x128   :  { %2581 = vmatpush1.bf16.msra.mxu0 %v3813_v9  ;;  %3312 = vmatprep.subr.bf16.mxu1 %v3818_v52 }
 0x129   :  { %2582 = vmatprep.subr.bf16.mxu0 %v3818_v52 }
 0x12b   :  { %3328 = vmatpush1.bf16.msra.mxu1 %v3816_v13 }
 0x12c   :  { %2583 = vmatpush1.bf16.msra.mxu0 %v3816_v13  ;;  %3313 = vmatprep.subr.bf16.mxu1 %v3821_v28 }
 0x12d   :  { %2584 = vmatprep.subr.bf16.mxu0 %v3821_v28 }
 0x12f   :  { %3329 = vmatpush1.bf16.msra.mxu1 %v3819_v34 }
 0x130   :  { %2585 = vmatpush1.bf16.msra.mxu0 %v3819_v34  ;;  %3314 = vmatprep.subr.bf16.mxu1 %v3824_v35 }
 0x131   :  { %2586 = vmatprep.subr.bf16.mxu0 %v3824_v35 }
 0x133   :  { %3330 = vmatpush1.bf16.msra.mxu1 %v3822_v30 }
 0x134   :  { %2587 = vmatpush1.bf16.msra.mxu0 %v3822_v30  ;;  %3315 = vmatprep.subr.bf16.mxu1 %v3827_v32 }
 0x135   :  { %2588 = vmatprep.subr.bf16.mxu0 %v3827_v32 }
 0x137   :  { %3331 = vmatpush1.bf16.msra.mxu1 %v3825_v37 }
 0x138   :  { %2589 = vmatpush1.bf16.msra.mxu0 %v3825_v37  ;;  %3316 = vmatprep.subr.bf16.mxu1 %v3830_v38 }
 0x139   :  { %2590 = vmatprep.subr.bf16.mxu0 %v3830_v38 }
 0x13b   :  { %3332 = vmatpush1.bf16.msra.mxu1 %v3828_v33 }
 0x13c   :  { %2591 = vmatpush1.bf16.msra.mxu0 %v3828_v33  ;;  %3317 = vmatprep.subr.bf16.mxu1 %v3833_v36 }
 0x13d   :  { %2592 = vmatprep.subr.bf16.mxu0 %v3833_v36 }
 0x13f   :  { %3333 = vmatpush1.bf16.msra.mxu1 %v3831_v39 }
 0x140   :  { %2593 = vmatpush1.bf16.msra.mxu0 %v3831_v39 }
 0x142   :  { %2605 = vmatmul.mubr.bf16.vlgmr.msra.gmra.mrb[8].mxu1 %v3249_v40 }
 0x143   :  { %2595 = vmatmul.mubr.bf16.vlgmr.msra.gmra.mrb[0].mxu0 %v3247_v19 }
 0x1d5   :  { %v1166_v41 = vpop.f32.mrb[0].mxu1 }
 0x1d6   :  { %v1168_v55 = vpop.f32.mrb[1].mxu1 }
 0x1d7   :  { %v1170_v15 = vpop.f32.mrb[2].mxu1 }
 0x1d8   :  { %v1172_v42 = vpop.f32.mrb[3].mxu1 }
 0x1dd   :  { %v1176_v46 = vpop.f32.mrb[4].mxu1 }
 0x1de   :  { %v2340_v47 = vpop.f32.mrb[4].mxu0  ;;  %v1178_v58 = vpop.f32.mrb[5].mxu1 }
 0x1df   :  { %v3338_v23 = vadd.f32 %v2340_v47, %v1176_v46  ;;  %v2342_v53 = vpop.f32.mrb[5].mxu0  ;;  %v1180_v61 = vpop.f32.mrb[6].mxu1 }
 0x1e0   :  { %v3340_v59 = vadd.f32 %v2342_v53, %v1178_v58  ;;  %v2344_v8 = vpop.f32.mrb[6].mxu0  ;;  %v1182_v14 = vpop.f32.mrb[7].mxu1 }
 0x1e1   :  { %v3342_v63 = vadd.f32 %v2344_v8, %v1180_v61  ;;  %v2346_v51 = vpop.f32.mrb[7].mxu0 }
 0x1e2   :  { %v3344_v3 = vadd.f32 %v2346_v51, %v1182_v14 }
 0x215   :  { %v2606_v29 = vpop.f32.mrb[8].mxu1 }
 0x216   :  { %v2596_v49 = vpop.f32.mrb[0].mxu0  ;;  %v3339_v5 = vadd.f32 %v3338_v23, %v2606_v29  ;;  %v2608_v20 = vpop.f32.mrb[9].mxu1 }
 0x217   :  { %v3334_v12 = vadd.f32 %v2596_v49, %v1166_v41  ;;  %v2598_v16 = vpop.f32.mrb[1].mxu0  ;;  %v3341_v10 = vadd.f32 %v3340_v59, %v2608_v20  ;;  %v2610_v21 = vpop.f32.mrb[10].mxu1 }
 0x218   :  { %v3335_v62 = vadd.f32 %v2598_v16, %v1168_v55  ;;  %v2600_v18 = vpop.f32.mrb[2].mxu0  ;;  %v2639_v24 = vmul.f32 %v3339_v5, %v2628_v43  ;;  %v3343_v17 = vadd.f32 %v3342_v63, %v2610_v21  ;;  %v2612_v2 = vpop.f32.mrb[11].mxu1 }
 0x219   :  { %v2635_v22 = vmul.f32 %v3334_v12, %v2628_v43  ;;  %v3336_v25 = vadd.f32 %v2600_v18, %v1170_v15  ;;  %v2602_v0 = vpop.f32.mrb[3].mxu0  ;;  %v2640_v31 = vmul.f32 %v3341_v10, %v2632_v44  ;;  %v3345_v26 = vadd.f32 %v3344_v3, %v2612_v2 }
 0x21a   :  { %v2636_v57 = vmul.f32 %v3335_v62, %v2632_v44  ;;  %v3337_v6 = vadd.f32 %v2602_v0, %v1172_v42  ;;  %v2659_v27 = vadd.f32 %v2648_v4, %v2639_v24  ;;  %v2641_v9 = vmul.f32 %v3343_v17, %v2628_v43 }
 0x21b   :  { %v2655_v48 = vadd.f32 %v2648_v4, %v2635_v22  ;;  %v2637_v50 = vmul.f32 %v3336_v25, %v2628_v43  ;;  %v2660_v13 = vadd.f32 %v2652_v1, %v2640_v31  ;;  %v2642_v34 = vmul.f32 %v3345_v26, %v2632_v44 }
 0x21c   :  { %v2656_v52 = vadd.f32 %v2652_v1, %v2636_v57  ;;  %v2638_v28 = vmul.f32 %v3337_v6, %v2632_v44  ;;  %v2661_v30 = vadd.f32 %v2648_v4, %v2641_v9 }
 0x21d   :  { %v2657_v35 = vadd.f32 %v2648_v4, %v2637_v50  ;;  %v2665_v37 = vmax.f32 %v2659_v27, %v2660_v13  ;;  %v2662_v33 = vadd.f32 %v2652_v1, %v2642_v34 }
 0x21e   :  { %v2663_v32 = vmax.f32 %v2655_v48, %v2656_v52  ;;  %v2658_v38 = vadd.f32 %v2652_v1, %v2638_v28 }
 0x21f   :  { %v2666_v39 = vmax.f32 %v2661_v30, %v2662_v33  ;;  %v2669_v40 = vmax.f32 %v2665_v37, 0.0 }
 0x220   :  { %v2664_v36 = vmax.f32 %v2657_v35, %v2658_v38  ;;  %v2667_v19 = vmax.f32 %v2663_v32, 0.0 }
 0x221   :  { %v2670_v55 = vmax.f32 %v2666_v39, 0.0 }
 0x222   :  { %v2668_v41 = vmax.f32 %v2664_v36, 0.0 }
 0x223   :  { %v3299_v42 = vpack.c.bf16 %v2670_v55, %v2669_v40 }
 0x224   :  { %v3294_v15 = vpack.c.bf16 %v2668_v41, %v2667_v19 }
 0x225   :  { %3301 = vst [vmem:[%s5092_s4 + $0x8] sm:$0xff] %v3299_v42  }
 0x226   :  { %3295 = vst [vmem:[%s5092_s4] sm:$0xff] %v3294_v15  }

// kernel: _lambda_.5
= control target key start
LH: loop header
LB: loop body
LE: loop exit
PB: predicated region body
PF: predicated region fallthrough
CT: control target
= control target key end

     0   :  { %9 = vsyncpa [#allocation3], 0  ;;  %s8622_s0 = inlined_call_operand.vmem [shape: bf16[2,48,256], index: 0, kind: input, shape index: {}]   ;;  %s8623_s1 = inlined_call_operand.hbm [shape: bf16[17,256,256], index: 1, kind: input, shape index: {}]   ;;  %s8624_s2 = inlined_call_operand.hbm [shape: f32[1,256], index: 2, kind: input, shape index: {}]   ;;  %s8625_s3 = inlined_call_operand.hbm [shape: f32[1,256], index: 3, kind: input, shape index: {}]   ;;  %s8626_s4 = inlined_call_operand.vmem [shape: bf16[2,32,128], index: 4, kind: output, shape index: {}]  }
   0x1   :  { %10 = vsyncpa [#allocation5], 0  ;;  %s7711_s15 = smov [#allocation4]   ;;  %s7712_s17 = smov [#allocation2]  }
   0x2   :  { %s31_s16 = sshll.u32 %s7711_s15, 4  ;;  %s18_s18 = sshll.u32 %s7712_s17, 4  ;;  %s32_s16 = int_to_ptr.vmem [resolvable:$true] %s31_s16  ;;  %s7741_s18 = int_to_ptr.vmem [resolvable:$true] %s18_s18 }
   0x3   :  { %s7641_s21 = scalar_lea.hbm %s8624_s2, 32 }
   0x4   :  { %p7642_p0 = scmp.ne.s32.totalorder %s8624_s2, %s7641_s21  ;;  %p7645_p1 = scmp.lt.u32.totalorder %s7641_s21, %s8624_s2 }
   0x6   :  { %p7647_p2 = pnand %p7645_p1, %p7642_p0 }
   0x8   :  { %7650 = shalt.err (!%p7647_p2)
}
   0x9   :  { %s7651_s26 = scalar_lea.vmem %s32_s16, 32  ;;  %p7656_p4 = scmp.lt.s32.totalorder %s32_s16, %s32_s16 }
   0xa   :  { %p7652_p3 = scmp.ne.s32.totalorder %s32_s16, %s7651_s26  ;;  %p7657_p5 = scmp.lt.s32.totalorder %s7651_s26, %s7651_s26 }
   0xc   :  { %p7658_p6 = por %p7657_p5, %p7656_p4 }
   0xe   :  { %p7659_p7 = pnand %p7658_p6, %p7652_p3 }
  0x10   :  { %7662 = shalt.err (!%p7659_p7)
}
  0x11   :  { %34 = dma.hbm_to_vmem [thread:$0]  %s8624_s2, 32, %s32_s16, [#allocation5]  }
  0x12   :  { %s7663_s5 = scalar_lea.hbm %s8623_s1, 69632 }
  0x13   :  { %p7664_p8 = scmp.ne.s32.totalorder %s8623_s1, %s7663_s5  ;;  %p7667_p9 = scmp.lt.u32.totalorder %s7663_s5, %s8623_s1 }
  0x15   :  { %p7669_p10 = pnand %p7667_p9, %p7664_p8 }
  0x17   :  { %7672 = shalt.err (!%p7669_p10)
}
  0x18   :  { %s7673_s10 = scalar_lea.vmem %s7741_s18, 69632  ;;  %p7678_p12 = scmp.lt.s32.totalorder %s7741_s18, %s7741_s18 }
  0x19   :  { %p7674_p11 = scmp.ne.s32.totalorder %s7741_s18, %s7673_s10  ;;  %p7679_p13 = scmp.lt.s32.totalorder %s7673_s10, %s7673_s10 }
  0x1b   :  { %p7680_p0 = por %p7679_p13, %p7678_p12 }
  0x1d   :  { %p7681_p1 = pnand %p7680_p0, %p7674_p11 }
  0x1f   :  { %7684 = shalt.err (!%p7681_p1)
}
  0x20   :  { %s7713_s2 = smov 128   ;;  %s7714_s11 = smov 8  }
  0x21   :  { %24 = dma.hbm_to_vmem [thread:$0]  %s8623_s1, 69632, %s7741_s18, [#allocation3], %s7713_s2, %s7713_s2, %s7714_s11  }
  0x22   :  { %s7715_s14 = smov [#allocation6]   ;;  %s7685_s19 = scalar_lea.hbm %s8625_s3, 32 }
  0x23   :  { %s41_s15 = sshll.u32 %s7715_s14, 4  ;;  %p7686_p2 = scmp.ne.s32.totalorder %s8625_s3, %s7685_s19  ;;  %s42_s15 = int_to_ptr.vmem [resolvable:$true] %s41_s15 }
  0x24   :  { %p7689_p3 = scmp.lt.u32.totalorder %s7685_s19, %s8625_s3 }
  0x26   :  { %p7691_p4 = pnand %p7689_p3, %p7686_p2 }
  0x28   :  { %7694 = shalt.err (!%p7691_p4)
}
  0x29   :  { %s7695_s24 = scalar_lea.vmem %s42_s15, 32  ;;  %p7700_p6 = scmp.lt.s32.totalorder %s42_s15, %s42_s15 }
  0x2a   :  { %p7696_p5 = scmp.ne.s32.totalorder %s42_s15, %s7695_s24  ;;  %p7701_p7 = scmp.lt.s32.totalorder %s7695_s24, %s7695_s24 }
  0x2c   :  { %p7702_p8 = por %p7701_p7, %p7700_p6 }
  0x2e   :  { %p7703_p9 = pnand %p7702_p8, %p7696_p5 }
  0x30   :  { %7706 = shalt.err (!%p7703_p9)
}
  0x31   :  { %44 = dma.hbm_to_vmem [thread:$0]  %s8625_s3, 32, %s42_s15, [#allocation5]  }
  0x32   :  { %7707 = dma.done.wait [#allocation3], 69632  }
  0x33   :  { %7708 = vsyncadd [#allocation3], 4294897664 }
  0x34   :  { %7709 = dma.done.wait [#allocation5], 64  }
  0x35   :  { %7710 = vsyncadd [#allocation5], 4294967232  ;;  %v6784_v0 = vld [vmem:[#allocation2 + $0x104] ss:$8 sps:$4 sm:$0xff]   ;;  %v6788_v2 = vld [vmem:[#allocation2 + $0x100] ss:$8 sps:$4 sm:$0xff]  }
  0x36   :  { %v6786_v1 = vld [vmem:[#allocation2 + $0x804] ss:$8 sps:$4 sm:$0xff]   ;;  %414 = vmatprep.subr.bf16.mxu1 %v6784_v0  ;;  %v6789_v3 = vld [vmem:[#allocation2 + $0x800] ss:$8 sps:$4 sm:$0xff]   ;;  %v6790_v4 = vld [vmem:[#allocation2 + $0x114] ss:$8 sps:$4 sm:$0xff]  }
  0x37   :  { %3085 = vmatprep.subr.bf16.mxu0 %v6786_v1  ;;  %415 = vmatpush1.bf16.msra.mxu1 %v6788_v2  ;;  %v6792_v5 = vld [vmem:[#allocation2 + $0x814] ss:$8 sps:$4 sm:$0xff]   ;;  %v6794_v6 = vld [vmem:[#allocation2 + $0x110] ss:$8 sps:$4 sm:$0xff]   ;;  %v6796_v8 = vld [vmem:[#allocation2 + $0x124] ss:$8 sps:$4 sm:$0xff]  }
  0x38   :  { %3086 = vmatpush1.bf16.msra.mxu0 %v6789_v3  ;;  %416 = vmatprep.subr.bf16.mxu1 %v6790_v4  ;;  %v6795_v7 = vld [vmem:[#allocation2 + $0x810] ss:$8 sps:$4 sm:$0xff]   ;;  %v6798_v9 = vld [vmem:[#allocation2 + $0x824] ss:$8 sps:$4 sm:$0xff]   ;;  %v6800_v10 = vld [vmem:[#allocation2 + $0x120] ss:$8 sps:$4 sm:$0xff]  }
  0x39   :  { %3087 = vmatprep.subr.bf16.mxu0 %v6792_v5  ;;  %v6801_v11 = vld [vmem:[#allocation2 + $0x820] ss:$8 sps:$4 sm:$0xff]   ;;  %v6802_v12 = vld [vmem:[#allocation2 + $0x134] ss:$8 sps:$4 sm:$0xff]   ;;  %v6806_v14 = vld [vmem:[#allocation2 + $0x130] ss:$8 sps:$4 sm:$0xff]  }
  0x3a   :  { %v6804_v13 = vld [vmem:[#allocation2 + $0x834] ss:$8 sps:$4 sm:$0xff]   ;;  %v6807_v15 = vld [vmem:[#allocation2 + $0x830] ss:$8 sps:$4 sm:$0xff]   ;;  %v6808_v16 = vld [vmem:[#allocation2 + $0x144] ss:$8 sps:$4 sm:$0xff]  }
  0x3b   :  { %417 = vmatpush1.bf16.msra.mxu1 %v6794_v6  ;;  %v6810_v17 = vld [vmem:[#allocation2 + $0x844] ss:$8 sps:$4 sm:$0xff]   ;;  %v6812_v18 = vld [vmem:[#allocation2 + $0x140] ss:$8 sps:$4 sm:$0xff]   ;;  %v6814_v20 = vld [vmem:[#allocation2 + $0x154] ss:$8 sps:$4 sm:$0xff]  }
  0x3c   :  { %3088 = vmatpush1.bf16.msra.mxu0 %v6795_v7  ;;  %418 = vmatprep.subr.bf16.mxu1 %v6796_v8  ;;  %v6813_v19 = vld [vmem:[#allocation2 + $0x840] ss:$8 sps:$4 sm:$0xff]   ;;  %v6816_v21 = vld [vmem:[#allocation2 + $0x854] ss:$8 sps:$4 sm:$0xff]   ;;  %v6818_v22 = vld [vmem:[#allocation2 + $0x150] ss:$8 sps:$4 sm:$0xff]  }
  0x3d   :  { %3089 = vmatprep.subr.bf16.mxu0 %v6798_v9  ;;  %v6819_v23 = vld [vmem:[#allocation2 + $0x850] ss:$8 sps:$4 sm:$0xff]   ;;  %v6820_v24 = vld [vmem:[#allocation2 + $0x164] ss:$8 sps:$4 sm:$0xff]   ;;  %v6824_v26 = vld [vmem:[#allocation2 + $0x160] ss:$8 sps:$4 sm:$0xff]  }
  0x3e   :  { %v6822_v25 = vld [vmem:[#allocation2 + $0x864] ss:$8 sps:$4 sm:$0xff]   ;;  %v6825_v27 = vld [vmem:[#allocation2 + $0x860] ss:$8 sps:$4 sm:$0xff]   ;;  %v6826_v28 = vld [vmem:[#allocation2 + $0x174] ss:$8 sps:$4 sm:$0xff]  }
  0x3f   :  { %419 = vmatpush1.bf16.msra.mxu1 %v6800_v10  ;;  %v6828_v29 = vld [vmem:[#allocation2 + $0x874] ss:$8 sps:$4 sm:$0xff]   ;;  %v6830_v30 = vld [vmem:[#allocation2 + $0x170] ss:$8 sps:$4 sm:$0xff]   ;;  %v6832_v32 = vld [vmem:[#allocation2 + $0x184] ss:$8 sps:$4 sm:$0xff]  }
  0x40   :  { %3090 = vmatpush1.bf16.msra.mxu0 %v6801_v11  ;;  %420 = vmatprep.subr.bf16.mxu1 %v6802_v12  ;;  %v6831_v31 = vld [vmem:[#allocation2 + $0x870] ss:$8 sps:$4 sm:$0xff]   ;;  %v6834_v33 = vld [vmem:[#allocation2 + $0x884] ss:$8 sps:$4 sm:$0xff]   ;;  %v6836_v34 = vld [vmem:[#allocation2 + $0x180] ss:$8 sps:$4 sm:$0xff]  }
  0x41   :  { %3091 = vmatprep.subr.bf16.mxu0 %v6804_v13  ;;  %v6837_v35 = vld [vmem:[#allocation2 + $0x880] ss:$8 sps:$4 sm:$0xff]   ;;  %v6838_v36 = vld [vmem:[#allocation2 + $0x194] ss:$8 sps:$4 sm:$0xff]   ;;  %v6842_v38 = vld [vmem:[#allocation2 + $0x190] ss:$8 sps:$4 sm:$0xff]  }
  0x42   :  { %v6840_v37 = vld [vmem:[#allocation2 + $0x894] ss:$8 sps:$4 sm:$0xff]   ;;  %v6843_v39 = vld [vmem:[#allocation2 + $0x890] ss:$8 sps:$4 sm:$0xff]   ;;  %v6844_v40 = vld [vmem:[#allocation2 + $0x1a4] ss:$8 sps:$4 sm:$0xff]  }
  0x43   :  { %421 = vmatpush1.bf16.msra.mxu1 %v6806_v14  ;;  %v6846_v41 = vld [vmem:[#allocation2 + $0x8a4] ss:$8 sps:$4 sm:$0xff]   ;;  %v6848_v42 = vld [vmem:[#allocation2 + $0x1a0] ss:$8 sps:$4 sm:$0xff]   ;;  %v6850_v44 = vld [vmem:[#allocation2 + $0x1b4] ss:$8 sps:$4 sm:$0xff]  }
  0x44   :  { %3092 = vmatpush1.bf16.msra.mxu0 %v6807_v15  ;;  %422 = vmatprep.subr.bf16.mxu1 %v6808_v16  ;;  %v6849_v43 = vld [vmem:[#allocation2 + $0x8a0] ss:$8 sps:$4 sm:$0xff]   ;;  %vm98_vm0 = vsmask.f32 3328  ;;  %v6852_v45 = vld [vmem:[#allocation2 + $0x8b4] ss:$8 sps:$4 sm:$0xff]  }
  0x45   :  { %3093 = vmatprep.subr.bf16.mxu0 %v6810_v17  ;;  %vm99_vm1 = vsmask.f32 7440  ;;  %v6854_v46 = vld [vmem:[#allocation2 + $0x1b0] ss:$8 sps:$4 sm:$0xff]   ;;  %v7787_v48 = vld [vmem:[%s8622_s0] sm:$0xff]  ;;  %v7792_v50 = vld [vmem:[%s8622_s0 + $0x8] sm:$0xff] }
  0x46   :  { %v6855_v47 = vld [vmem:[#allocation2 + $0x8b0] ss:$8 sps:$4 sm:$0xff]   ;;  %v6856_v49 = vld [vmem:[#allocation2 + $0x1c4] ss:$8 sps:$4 sm:$0xff]   ;;  %v7800_v52 = vshrl.u32 %v7787_v48, 16  ;;  %v7803_v53 = vshll.u32 %v7787_v48, 16  ;;  %vm7820_vm2 = vmor %vm98_vm0, %vm99_vm1 }
  0x47   :  { %423 = vmatpush1.bf16.msra.mxu1 %v6812_v18  ;;  %v7797_v51 = vld [vmem:[%s8622_s0 + $0x10] sm:$0xff]  ;;  %v7806_v54 = vshll.u32 %v7792_v50, 16  ;;  %v7809_v55 = vshrl.u32 %v7792_v50, 16  ;;  %v6858_v57 = vld [vmem:[#allocation2 + $0x8c4] ss:$8 sps:$4 sm:$0xff]   ;;  %vm762_vm3 = vcmask 1042432  }
  0x48   :  { %3094 = vmatpush1.bf16.msra.mxu0 %v6813_v19  ;;  %424 = vmatprep.subr.bf16.mxu1 %v6814_v20  ;;  %v7812_v56 = vshll.u32 %v7797_v51, 16  ;;  %v104_v58 = vrot.slane %v7800_v52, 4  ;;  %v107_v59 = vrot.slane %v7803_v53, 5  ;;  %v6097_v60 = vcombine.high %v7792_v50, %v7797_v51  ;;  %v6860_v0 = vld [vmem:[#allocation2 + $0x1c0] ss:$8 sps:$4 sm:$0xff]   ;;  %v7837_v20 = vld [vmem:[%s8622_s0 + $0x18] sm:$0xff] }
  0x49   :  { %3095 = vmatprep.subr.bf16.mxu0 %v6816_v21  ;;  %v113_v62 = vrot.slane %v7806_v54, 5  ;;  %v117_v63 = vrot.slane %v7809_v55, 4  ;;  %v6861_v1 = vld [vmem:[#allocation2 + $0x8c0] ss:$8 sps:$4 sm:$0xff]   ;;  %v6862_v3 = vld [vmem:[#allocation2 + $0x1d4] ss:$8 sps:$4 sm:$0xff]  }
  0x4a   :  { %v108_v2 = vor.u32 %v107_v59, %v104_v58  ;;  %3117 = vmatprep.mubr.bf16.mxu0 %v6097_v60  ;;  %v123_v5 = vrot.slane %v7812_v56, 5  ;;  %v6864_v6 = vld [vmem:[#allocation2 + $0x8d4] ss:$8 sps:$4 sm:$0xff]   ;;  %v6866_v9 = vld [vmem:[#allocation2 + $0x1d0] ss:$8 sps:$4 sm:$0xff]   ;;  %vm763_vm4 = vcmask 1046532  }
  0x4b   :  { %425 = vmatpush1.bf16.msra.mxu1 %v6818_v22  ;;  %v118_v4 = vor.u32 %v117_v63, %v113_v62  ;;  %v6867_v11 = vld [vmem:[#allocation2 + $0x8d0] ss:$8 sps:$4 sm:$0xff]   ;;  %v6868_v13 = vld [vmem:[#allocation2 + $0x1e4] ss:$8 sps:$4 sm:$0xff]   ;;  %v6872_v16 = vld [vmem:[#allocation2 + $0x1e0] ss:$8 sps:$4 sm:$0xff]  }
  0x4c   :  { %3096 = vmatpush1.bf16.msra.mxu0 %v6819_v23  ;;  %426 = vmatprep.subr.bf16.mxu1 %v6820_v24  ;;  %v109_v7 = vrot.slane %v108_v2, 4  ;;  %v6870_v14 = vld [vmem:[#allocation2 + $0x8e4] ss:$8 sps:$4 sm:$0xff]   ;;  %v6873_v17 = vld [vmem:[#allocation2 + $0x8e0] ss:$8 sps:$4 sm:$0xff]   ;;  %v7840_v22 = vshrl.u32 %v7797_v51, 16  ;;  %vm8042_vm5 = vmor %vm762_vm3, %vm763_vm4 }
  0x4d   :  { %3097 = vmatprep.subr.bf16.mxu0 %v6822_v25  ;;  %v119_v8 = vrot.slane %v118_v4, 4  ;;  %v6874_v18 = vld [vmem:[#allocation2 + $0x1f4] ss:$8 sps:$4 sm:$0xff]   ;;  %v6878_v21 = vld [vmem:[#allocation2 + $0x1f0] ss:$8 sps:$4 sm:$0xff]   ;;  %v7843_v24 = vshll.u32 %v7837_v20, 16 }
  0x4e   :  { %v114_v10 = vsel %vm7820_vm2, %v109_v7, %v113_v62  ;;  %v6876_v19 = vld [vmem:[#allocation2 + $0x8f4] ss:$8 sps:$4 sm:$0xff]   ;;  %v6879_v23 = vld [vmem:[#allocation2 + $0x8f0] ss:$8 sps:$4 sm:$0xff]   ;;  %v6882_v25 = vld [vmem:[#allocation2 + $0x4] ss:$8 sps:$4 sm:$0xff]  }
  0x4f   :  { %427 = vmatpush1.bf16.msra.mxu1 %v6824_v26  ;;  %v7831_v12 = vsel %vm7820_vm2, %v119_v8, %v123_v5  ;;  %v6886_v26 = vld [vmem:[#allocation2 + $0x904] ss:$8 sps:$4 sm:$0xff]   ;;  %v5848_v61 = vrot.slane %v7787_v48, 9  ;;  %vm1105_vm6 = vsmask.f32 2304  ;;  %vm1472_vm9 = vcmask 1041408  }
  0x50   :  { %3098 = vmatpush1.bf16.msra.mxu0 %v6825_v27  ;;  %428 = vmatprep.subr.bf16.mxu1 %v6826_v28  ;;  %v5769_v15 = vcombine.high %v114_v10, %v7831_v12  ;;  %v7846_v27 = vshrl.u32 %v7837_v20, 16  ;;  %v127_v28 = vrot.slane %v7840_v22, 4  ;;  %v6908_v2 = vld [vmem:[#allocation2 + $0x44] ss:$8 sps:$4 sm:$0xff]   ;;  %vm1106_vm7 = vsmask.f32 6416 }
  0x51   :  { %3099 = vmatprep.subr.bf16.mxu0 %v6828_v29  ;;  %v5768_v29 = vcombine.low %v114_v10, %v7831_v12  ;;  %v7889_v10 = vld [vmem:[%s8622_s0 + $0x38] sm:$0xff]  ;;  %vm8122_vm8 = vmor %vm1105_vm6, %vm1106_vm7  ;;  %vm1473_vm10 = vcmask 1045508   ;;  %vm1815_vm12 = vsmask.f32 1280  ;;  %vm1816_vm13 = vsmask.f32 5392 }
  0x52   :  { %446 = vmatprep.mubr.bf16.mxu1 %v5769_v15  ;;  %v7903_v15 = vshll.u32 %v7889_v10, 16  ;;  %vm8219_vm11 = vmor %vm1472_vm9, %vm1473_vm10  ;;  %vm2178_vm15 = vcmask 1040384   ;;  %vm2179_vm0 = vcmask 1044484   ;;  %vm2522_vm3 = vsmask.f32 4368 }
  0x53   :  { %429 = vmatpush1.bf16.msra.mxu1 %v6830_v30  ;;  %v6880_v30 = vld [vmem:[#allocation2] ss:$8 sps:$4 sm:$0xff]   ;;  %vm8317_vm14 = vmor %vm1815_vm12, %vm1816_vm13 }
  0x54   :  { %3100 = vmatpush1.bf16.msra.mxu0 %v6831_v31  ;;  %430 = vmatprep.subr.bf16.mxu1 %v6832_v32  ;;  %v6096_v31 = vcombine.low %v7792_v50, %v7797_v51  ;;  %v133_v32 = vrot.slane %v7843_v24, 5  ;;  %vm8398_vm1 = vmor %vm2178_vm15, %vm2179_vm0 }
  0x55   :  { %3101 = vmatprep.subr.bf16.mxu0 %v6834_v33  ;;  %v6884_v33 = vld [vmem:[#allocation2 + $0x900] ss:$8 sps:$4 sm:$0xff]  }
  0x57   :  { %431 = vmatpush1.bf16.msra.mxu1 %v6836_v34  ;;  %v6890_v34 = vld [vmem:[#allocation2 + $0x14] ss:$8 sps:$4 sm:$0xff]  }
  0x58   :  { %3102 = vmatpush1.bf16.msra.mxu0 %v6837_v35  ;;  %432 = vmatprep.subr.bf16.mxu1 %v6838_v36  ;;  %v6893_v35 = vld [vmem:[#allocation2 + $0x914] ss:$8 sps:$4 sm:$0xff]   ;;  %v137_v36 = vrot.slane %v7846_v27, 4 }
  0x59   :  { %3103 = vmatprep.subr.bf16.mxu0 %v6840_v37  ;;  %v128_v37 = vor.u32 %v127_v28, %v123_v5  ;;  %v6906_v5 = vld [vmem:[#allocation2 + $0x40] ss:$8 sps:$4 sm:$0xff]  }
  0x5b   :  { %433 = vmatpush1.bf16.msra.mxu1 %v6842_v38  ;;  %v6888_v38 = vld [vmem:[#allocation2 + $0x10] ss:$8 sps:$4 sm:$0xff]  }
  0x5c   :  { %3104 = vmatpush1.bf16.msra.mxu0 %v6843_v39  ;;  %434 = vmatprep.subr.bf16.mxu1 %v6844_v40  ;;  %v6891_v39 = vld [vmem:[#allocation2 + $0x910] ss:$8 sps:$4 sm:$0xff]   ;;  %v6896_v40 = vld [vmem:[#allocation2 + $0x24] ss:$8 sps:$4 sm:$0xff]  }
  0x5d   :  { %3105 = vmatprep.subr.bf16.mxu0 %v6846_v41  ;;  %v6899_v41 = vld [vmem:[#allocation2 + $0x924] ss:$8 sps:$4 sm:$0xff]  }
  0x5f   :  { %435 = vmatpush1.bf16.msra.mxu1 %v6848_v42  ;;  %v138_v42 = vor.u32 %v137_v36, %v133_v32  ;;  %v6920_v36 = vld [vmem:[#allocation2 + $0x64] ss:$8 sps:$4 sm:$0xff]  }
  0x60   :  { %3106 = vmatpush1.bf16.msra.mxu0 %v6849_v43  ;;  %436 = vmatprep.subr.bf16.mxu1 %v6850_v44  ;;  %v6894_v43 = vld [vmem:[#allocation2 + $0x20] ss:$8 sps:$4 sm:$0xff]   ;;  %v129_v44 = vrot.slane %v128_v37, 4  ;;  %v6923_v37 = vld [vmem:[#allocation2 + $0x964] ss:$8 sps:$4 sm:$0xff]  }
  0x61   :  { %3107 = vmatprep.subr.bf16.mxu0 %v6852_v45  ;;  %v6897_v45 = vld [vmem:[#allocation2 + $0x920] ss:$8 sps:$4 sm:$0xff]  }
  0x62   :  { %v7868_v62 = vsel %vm7820_vm2, %v129_v44, %v133_v32 }
  0x63   :  { %437 = vmatpush1.bf16.msra.mxu1 %v6854_v46  ;;  %v6902_v46 = vld [vmem:[#allocation2 + $0x34] ss:$8 sps:$4 sm:$0xff]  }
  0x64   :  { %3108 = vmatpush1.bf16.msra.mxu0 %v6855_v47  ;;  %438 = vmatprep.subr.bf16.mxu1 %v6856_v49  ;;  %v7857_v47 = vld [vmem:[%s8622_s0 + $0x20] sm:$0xff]  ;;  %v6905_v49 = vld [vmem:[#allocation2 + $0x934] ss:$8 sps:$4 sm:$0xff]  }
  0x65   :  { %3109 = vmatprep.subr.bf16.mxu0 %v6858_v57  ;;  %v139_v57 = vrot.slane %v138_v42, 4  ;;  %v7860_v58 = vshll.u32 %v7857_v47, 16  ;;  %v6099_v59 = vcombine.high %v7837_v20, %v7857_v47  ;;  %v6098_v60 = vcombine.low %v7837_v20, %v7857_v47 }
  0x67   :  { %439 = vmatpush1.bf16.msra.mxu1 %v6860_v0  ;;  %v143_v63 = vrot.slane %v7860_v58, 5  ;;  %v6900_v0 = vld [vmem:[#allocation2 + $0x30] ss:$8 sps:$4 sm:$0xff]  }
  0x68   :  { %3110 = vmatpush1.bf16.msra.mxu0 %v6861_v1  ;;  %440 = vmatprep.subr.bf16.mxu1 %v6862_v3  ;;  %v6903_v1 = vld [vmem:[#allocation2 + $0x930] ss:$8 sps:$4 sm:$0xff]   ;;  %v6911_v3 = vld [vmem:[#allocation2 + $0x944] ss:$8 sps:$4 sm:$0xff]  }
  0x69   :  { %3111 = vmatprep.subr.bf16.mxu0 %v6864_v6  ;;  %v7875_v4 = vsel %vm7820_vm2, %v139_v57, %v143_v63  ;;  %v6909_v6 = vld [vmem:[#allocation2 + $0x940] ss:$8 sps:$4 sm:$0xff]  }
  0x6a   :  { %v5771_v7 = vcombine.high %v7868_v62, %v7875_v4  ;;  %v5770_v8 = vcombine.low %v7868_v62, %v7875_v4 }
  0x6b   :  { %441 = vmatpush1.bf16.msra.mxu1 %v6866_v9  ;;  %v7884_v9 = vld [vmem:[%s8622_s0 + $0x30] sm:$0xff] }
  0x6c   :  { %3112 = vmatpush1.bf16.msra.mxu0 %v6867_v11  ;;  %442 = vmatprep.subr.bf16.mxu1 %v6868_v13  ;;  %v7894_v11 = vld [vmem:[%s8622_s0 + $0x40] sm:$0xff]  ;;  %v7897_v13 = vshrl.u32 %v7884_v9, 16 }
  0x6d   :  { %3113 = vmatprep.subr.bf16.mxu0 %v6870_v14  ;;  %v7900_v14 = vshll.u32 %v7884_v9, 16 }
  0x6f   :  { %443 = vmatpush1.bf16.msra.mxu1 %v6872_v16  ;;  %v7906_v16 = vshrl.u32 %v7889_v10, 16 }
  0x70   :  { %3114 = vmatpush1.bf16.msra.mxu0 %v6873_v17  ;;  %444 = vmatprep.subr.bf16.mxu1 %v6874_v18  ;;  %v6914_v17 = vld [vmem:[#allocation2 + $0x54] ss:$8 sps:$4 sm:$0xff]  }
  0x71   :  { %3115 = vmatprep.subr.bf16.mxu0 %v6876_v19  ;;  %v6917_v18 = vld [vmem:[#allocation2 + $0x954] ss:$8 sps:$4 sm:$0xff]   ;;  %v7909_v19 = vshll.u32 %v7894_v11, 16  ;;  %v161_v28 = vrot.slane %v7906_v16, 4 }
  0x73   :  { %445 = vmatpush1.bf16.msra.mxu1 %v6878_v21  ;;  %v6101_v21 = vcombine.high %v7889_v10, %v7894_v11 }
  0x74   :  { %3116 = vmatpush1.bf16.msra.mxu0 %v6879_v23  ;;  %687 = vmatprep.subr.bf16.mxu1 %v6882_v25  ;;  %v148_v23 = vrot.slane %v7897_v13, 4  ;;  %v151_v25 = vrot.slane %v7900_v14, 5 }
  0x75   :  { %3403 = vmatprep.subr.bf16.mxu0 %v6886_v26  ;;  %v157_v26 = vrot.slane %v7903_v15, 5 }
  0x76   :  { %447 = vmatmul.mubr.bf16.vlgmr.msra.gmra.mrb[0].mxu1 %v5768_v29  ;;  %v6912_v29 = vld [vmem:[#allocation2 + $0x50] ss:$8 sps:$4 sm:$0xff]   ;;  %v152_v32 = vor.u32 %v151_v25, %v148_v23  ;;  %v6137_v25 = vcombine.high %v7831_v12, %v7868_v62 }
  0x77   :  { %3118 = vmatmul.mubr.bf16.vlgmr.msra.gmra.mrb[0].mxu0 %v6096_v31  ;;  %688 = vmatpush1.bf16.msra.mxu1 %v6880_v30  ;;  %v6100_v30 = vcombine.low %v7889_v10, %v7894_v11  ;;  %v6915_v31 = vld [vmem:[#allocation2 + $0x950] ss:$8 sps:$4 sm:$0xff]  }
  0x78   :  { %3404 = vmatpush1.bf16.msra.mxu0 %v6884_v33  ;;  %689 = vmatprep.subr.bf16.mxu1 %v6890_v34  ;;  %v162_v33 = vor.u32 %v161_v28, %v157_v26  ;;  %v167_v34 = vrot.slane %v7909_v19, 5  ;;  %v6924_v23 = vld [vmem:[#allocation2 + $0x70] ss:$8 sps:$4 sm:$0xff]   ;;  %v6932_v28 = vld [vmem:[#allocation2 + $0x84] ss:$8 sps:$4 sm:$0xff]  }
  0x79   :  { %3405 = vmatprep.subr.bf16.mxu0 %v6893_v35  ;;  %3127 = vmatprep.mubr.bf16.mxu0 %v6099_v59  ;;  %v7921_v35 = vshrl.u32 %v7894_v11, 16 }
  0x7a   :  { %456 = vmatprep.mubr.bf16.mxu1 %v5771_v7  ;;  %v6929_v7 = vld [vmem:[#allocation2 + $0x974] ss:$8 sps:$4 sm:$0xff]  }
  0x7b   :  { %690 = vmatpush1.bf16.msra.mxu1 %v6888_v38  ;;  %v153_v38 = vrot.slane %v152_v32, 4  ;;  %v171_v42 = vrot.slane %v7921_v35, 4 }
  0x7c   :  { %3406 = vmatpush1.bf16.msra.mxu0 %v6891_v39  ;;  %691 = vmatprep.subr.bf16.mxu1 %v6896_v40  ;;  %v163_v39 = vrot.slane %v162_v33, 4  ;;  %v7926_v40 = vld [vmem:[%s8622_s0 + $0x48] sm:$0xff] }
  0x7d   :  { %3407 = vmatprep.subr.bf16.mxu0 %v6899_v41  ;;  %v7931_v41 = vld [vmem:[%s8622_s0 + $0x50] sm:$0xff]  ;;  %v7938_v44 = vshrl.u32 %v7926_v40, 16  ;;  %v158_v57 = vsel %vm7820_vm2, %v153_v38, %v157_v26  ;;  %v6930_v33 = vld [vmem:[#allocation2 + $0x80] ss:$8 sps:$4 sm:$0xff]  }
  0x7e   :  { %457 = vmatmul.mubr.bf16.gmra.mrb[4].mxu1 %v5770_v8  ;;  %v7949_v59 = vsel %vm7820_vm2, %v163_v39, %v167_v34  ;;  %v6927_v26 = vld [vmem:[#allocation2 + $0x970] ss:$8 sps:$4 sm:$0xff]   ;;  %v6938_v38 = vld [vmem:[#allocation2 + $0x94] ss:$8 sps:$4 sm:$0xff]  }
  0x7f   :  { %692 = vmatpush1.bf16.msra.mxu1 %v6894_v43  ;;  %3128 = vmatmul.mubr.bf16.gmra.mrb[4].mxu0 %v6098_v60  ;;  %v7935_v43 = vshll.u32 %v7926_v40, 16  ;;  %v172_v60 = vor.u32 %v171_v42, %v167_v34  ;;  %v6941_v39 = vld [vmem:[#allocation2 + $0x994] ss:$8 sps:$4 sm:$0xff]   ;;  %v5809_v42 = vcombine.high %v7787_v48, %v7792_v50 }
  0x80   :  { %3408 = vmatpush1.bf16.msra.mxu0 %v6897_v45  ;;  %693 = vmatprep.subr.bf16.mxu1 %v6902_v46  ;;  %v7941_v45 = vshll.u32 %v7931_v41, 16  ;;  %v6103_v46 = vcombine.high %v7926_v40, %v7931_v41 }
  0x81   :  { %3409 = vmatprep.subr.bf16.mxu0 %v6905_v49  ;;  %3137 = vmatprep.mubr.bf16.mxu0 %v6101_v21  ;;  %v6918_v49 = vld [vmem:[#allocation2 + $0x60] ss:$8 sps:$4 sm:$0xff]   ;;  %v173_v8 = vrot.slane %v172_v60, 4  ;;  %v6102_v21 = vcombine.low %v7926_v40, %v7931_v41  ;;  %v6948_v60 = vld [vmem:[#allocation2 + $0x9a4] ss:$8 sps:$4 sm:$0xff]  }
  0x83   :  { %694 = vmatpush1.bf16.msra.mxu1 %v6900_v0  ;;  %v6921_v0 = vld [vmem:[#allocation2 + $0x960] ss:$8 sps:$4 sm:$0xff]  }
  0x84   :  { %3410 = vmatpush1.bf16.msra.mxu0 %v6903_v1  ;;  %695 = vmatprep.subr.bf16.mxu1 %v6908_v2  ;;  %v6926_v1 = vld [vmem:[#allocation2 + $0x74] ss:$8 sps:$4 sm:$0xff]   ;;  %v5773_v2 = vcombine.high %v158_v57, %v7949_v59 }
  0x85   :  { %3411 = vmatprep.subr.bf16.mxu0 %v6911_v3  ;;  %v5772_v3 = vcombine.low %v158_v57, %v7949_v59  ;;  %v6944_v57 = vld [vmem:[#allocation2 + $0xa4] ss:$8 sps:$4 sm:$0xff]  }
  0x86   :  { %466 = vmatprep.mubr.bf16.mxu1 %v5773_v2  ;;  %v6952_v2 = vld [vmem:[#allocation2 + $0xb4] ss:$8 sps:$4 sm:$0xff]  }
  0x87   :  { %696 = vmatpush1.bf16.msra.mxu1 %v6906_v5  ;;  %3138 = vmatmul.mubr.bf16.gmra.mrb[8].mxu0 %v6100_v30  ;;  %v177_v5 = vrot.slane %v7935_v43, 5 }
  0x88   :  { %3412 = vmatpush1.bf16.msra.mxu0 %v6909_v6  ;;  %697 = vmatprep.subr.bf16.mxu1 %v6914_v17  ;;  %v181_v6 = vrot.slane %v7938_v44, 4 }
  0x89   :  { %3413 = vmatprep.subr.bf16.mxu0 %v6917_v18  ;;  %v187_v18 = vrot.slane %v7941_v45, 5  ;;  %3147 = vmatprep.mubr.bf16.mxu0 %v6103_v46  ;;  %v6936_v46 = vld [vmem:[#allocation2 + $0x90] ss:$8 sps:$4 sm:$0xff]  }
  0x8a   :  { %v182_v17 = vor.u32 %v181_v6, %v177_v5  ;;  %467 = vmatmul.mubr.bf16.gmra.mrb[8].mxu1 %v5772_v3  ;;  %v6955_v3 = vld [vmem:[#allocation2 + $0x9b4] ss:$8 sps:$4 sm:$0xff]   ;;  %v6953_v6 = vld [vmem:[#allocation2 + $0x9b0] ss:$8 sps:$4 sm:$0xff]  }
  0x8b   :  { %698 = vmatpush1.bf16.msra.mxu1 %v6912_v29  ;;  %v7962_v29 = vsel %vm7820_vm2, %v173_v8, %v177_v5  ;;  %v6950_v5 = vld [vmem:[#allocation2 + $0xb0] ss:$8 sps:$4 sm:$0xff]   ;;  %v6962_v8 = vld [vmem:[#allocation2 + $0x9c4] ss:$8 sps:$4 sm:$0xff]  }
  0x8c   :  { %3414 = vmatpush1.bf16.msra.mxu0 %v6915_v31  ;;  %699 = vmatprep.subr.bf16.mxu1 %v6920_v36  ;;  %v183_v30 = vrot.slane %v182_v17, 4  ;;  %v6935_v31 = vld [vmem:[#allocation2 + $0x984] ss:$8 sps:$4 sm:$0xff]   ;;  %v7977_v17 = vshrl.u32 %v7857_v47, 16 }
  0x8d   :  { %3415 = vmatprep.subr.bf16.mxu0 %v6923_v37  ;;  %v6933_v37 = vld [vmem:[#allocation2 + $0x980] ss:$8 sps:$4 sm:$0xff]  }
  0x8e   :  { %v7968_v32 = vsel %vm7820_vm2, %v183_v30, %v187_v18  ;;  %v6964_v30 = vld [vmem:[#allocation2 + $0xd0] ss:$8 sps:$4 sm:$0xff]  }
  0x8f   :  { %700 = vmatpush1.bf16.msra.mxu1 %v6918_v49  ;;  %3148 = vmatmul.mubr.bf16.gmra.mrb[12].mxu0 %v6102_v21  ;;  %v5775_v34 = vcombine.high %v7962_v29, %v7968_v32  ;;  %v5774_v36 = vcombine.low %v7962_v29, %v7968_v32  ;;  %v6939_v49 = vld [vmem:[#allocation2 + $0x990] ss:$8 sps:$4 sm:$0xff]   ;;  %v6956_v21 = vld [vmem:[#allocation2 + $0xc0] ss:$8 sps:$4 sm:$0xff]  }
  0x90   :  { %3416 = vmatpush1.bf16.msra.mxu0 %v6921_v0  ;;  %701 = vmatprep.subr.bf16.mxu1 %v6926_v1  ;;  %v6942_v0 = vld [vmem:[#allocation2 + $0xa0] ss:$8 sps:$4 sm:$0xff]  }
  0x91   :  { %3417 = vmatprep.subr.bf16.mxu0 %v6929_v7  ;;  %3435 = vmatprep.mubr.bf16.mxu0 %v6137_v25  ;;  %v6946_v1 = vld [vmem:[#allocation2 + $0x9a0] ss:$8 sps:$4 sm:$0xff]   ;;  %v6958_v7 = vld [vmem:[#allocation2 + $0xc4] ss:$8 sps:$4 sm:$0xff]   ;;  %v6966_v25 = vld [vmem:[#allocation2 + $0xd4] ss:$8 sps:$4 sm:$0xff]  }
  0x92   :  { %476 = vmatprep.mubr.bf16.mxu1 %v5775_v34  ;;  %v6976_v34 = vld [vmem:[#allocation2 + $0x9e4] ss:$8 sps:$4 sm:$0xff]  }
  0x93   :  { %702 = vmatpush1.bf16.msra.mxu1 %v6924_v23  ;;  %v6960_v23 = vld [vmem:[#allocation2 + $0x9c0] ss:$8 sps:$4 sm:$0xff]  }
  0x94   :  { %3418 = vmatpush1.bf16.msra.mxu0 %v6927_v26  ;;  %703 = vmatprep.subr.bf16.mxu1 %v6932_v28  ;;  %v6969_v26 = vld [vmem:[#allocation2 + $0x9d4] ss:$8 sps:$4 sm:$0xff]   ;;  %v3174_v28 = vrot.slane %v7977_v17, 4 }
  0x95   :  { %3419 = vmatprep.subr.bf16.mxu0 %v6935_v31  ;;  %477 = vmatmul.mubr.bf16.gmra.mrb[12].mxu1 %v5774_v36  ;;  %v6967_v31 = vld [vmem:[#allocation2 + $0x9d0] ss:$8 sps:$4 sm:$0xff]  }
  0x96   :  { %719 = vmatprep.mubr.bf16.mxu1 %v5809_v42  ;;  %v3175_v36 = vor.u32 %v3174_v28, %v143_v63  ;;  %v6980_v42 = vld [vmem:[#allocation2 + $0xf4] ss:$8 sps:$4 sm:$0xff]   ;;  %v6995_v28 = vld [vmem:[#allocation2 + $0xa10] ss:$8 sps:$4 sm:$0xff]  }
  0x97   :  { %704 = vmatpush1.bf16.msra.mxu1 %v6930_v33  ;;  %v6972_v33 = vld [vmem:[#allocation2 + $0xe4] ss:$8 sps:$4 sm:$0xff]  }
  0x98   :  { %3420 = vmatpush1.bf16.msra.mxu0 %v6933_v37  ;;  %705 = vmatprep.subr.bf16.mxu1 %v6938_v38  ;;  %v6970_v37 = vld [vmem:[#allocation2 + $0xe0] ss:$8 sps:$4 sm:$0xff]  }
  0x99   :  { %3421 = vmatprep.subr.bf16.mxu0 %v6941_v39  ;;  %v6974_v38 = vld [vmem:[#allocation2 + $0x9e0] ss:$8 sps:$4 sm:$0xff]  }
  0x9a   :  { %v7985_v39 = vld [vmem:[%s8622_s0 + $0x28] sm:$0xff] }
  0x9b   :  { %706 = vmatpush1.bf16.msra.mxu1 %v6936_v46  ;;  %v7988_v46 = vshll.u32 %v7985_v39, 16 }
  0x9c   :  { %3422 = vmatpush1.bf16.msra.mxu0 %v6939_v49  ;;  %707 = vmatprep.subr.bf16.mxu1 %v6944_v57  ;;  %v6983_v49 = vld [vmem:[#allocation2 + $0x9f4] ss:$8 sps:$4 sm:$0xff]   ;;  %v3176_v57 = vrot.slane %v3175_v36, 4  ;;  %v6998_v36 = vld [vmem:[#allocation2 + $0x220] ss:$8 sps:$4 sm:$0xff]  }
  0x9d   :  { %3423 = vmatprep.subr.bf16.mxu0 %v6948_v60  ;;  %v6978_v60 = vld [vmem:[#allocation2 + $0xf0] ss:$8 sps:$4 sm:$0xff]   ;;  %v3180_v63 = vrot.slane %v7988_v46, 5 }
  0x9f   :  { %708 = vmatpush1.bf16.msra.mxu1 %v6942_v0  ;;  %v6981_v0 = vld [vmem:[#allocation2 + $0x9f0] ss:$8 sps:$4 sm:$0xff]  }
  0xa0   :  { %3424 = vmatpush1.bf16.msra.mxu0 %v6946_v1  ;;  %709 = vmatprep.subr.bf16.mxu1 %v6952_v2  ;;  %v6987_v1 = vld [vmem:[#allocation2 + $0x204] ss:$8 sps:$4 sm:$0xff]  }
  0xa1   :  { %3425 = vmatprep.subr.bf16.mxu0 %v6955_v3  ;;  %v6990_v2 = vld [vmem:[#allocation2 + $0xa04] ss:$8 sps:$4 sm:$0xff]   ;;  %v6136_v3 = vcombine.low %v7831_v12, %v7868_v62  ;;  %v8002_v12 = vcombine.high %v7797_v51, %v7837_v20 }
  0xa3   :  { %710 = vmatpush1.bf16.msra.mxu1 %v6950_v5  ;;  %v6985_v5 = vld [vmem:[#allocation2 + $0x200] ss:$8 sps:$4 sm:$0xff]  }
  0xa4   :  { %3426 = vmatpush1.bf16.msra.mxu0 %v6953_v6  ;;  %711 = vmatprep.subr.bf16.mxu1 %v6958_v7  ;;  %v6988_v6 = vld [vmem:[#allocation2 + $0xa00] ss:$8 sps:$4 sm:$0xff]   ;;  %v5808_v7 = vcombine.low %v7787_v48, %v7792_v50 }
  0xa5   :  { %3427 = vmatprep.subr.bf16.mxu0 %v6962_v8  ;;  %v3181_v8 = vsel %vm7820_vm2, %v3176_v57, %v3180_v63  ;;  %v7001_v57 = vld [vmem:[#allocation2 + $0xa20] ss:$8 sps:$4 sm:$0xff]   ;;  %v5813_v63 = vcombine.high %v7884_v9, %v7889_v10 }
  0xa6   :  { %v6139_v62 = vcombine.high %v7875_v4, %v3181_v8 }
  0xa7   :  { %712 = vmatpush1.bf16.msra.mxu1 %v6956_v21  ;;  %v7998_v21 = vshrl.u32 %v7931_v41, 16 }
  0xa8   :  { %3428 = vmatpush1.bf16.msra.mxu0 %v6960_v23  ;;  %713 = vmatprep.subr.bf16.mxu1 %v6966_v25  ;;  %v6994_v23 = vld [vmem:[#allocation2 + $0x214] ss:$8 sps:$4 sm:$0xff]  }
  0xa9   :  { %3429 = vmatprep.subr.bf16.mxu0 %v6969_v26  ;;  %v6997_v25 = vld [vmem:[#allocation2 + $0xa14] ss:$8 sps:$4 sm:$0xff]   ;;  %v6992_v26 = vld [vmem:[#allocation2 + $0x210] ss:$8 sps:$4 sm:$0xff]  }
  0xab   :  { %714 = vmatpush1.bf16.msra.mxu1 %v6964_v30  ;;  %v3182_v30 = vrot.slane %v7998_v21, 4 }
  0xac   :  { %3430 = vmatpush1.bf16.msra.mxu0 %v6967_v31  ;;  %715 = vmatprep.subr.bf16.mxu1 %v6972_v33  ;;  %v8009_v31 = vld [vmem:[%s8622_s0 + $0x58] sm:$0xff]  ;;  %v7000_v33 = vld [vmem:[#allocation2 + $0x224] ss:$8 sps:$4 sm:$0xff]  }
  0xad   :  { %3431 = vmatprep.subr.bf16.mxu0 %v6976_v34  ;;  %v7003_v34 = vld [vmem:[#allocation2 + $0xa24] ss:$8 sps:$4 sm:$0xff]  }
  0xaf   :  { %716 = vmatpush1.bf16.msra.mxu1 %v6970_v37  ;;  %v8014_v37 = vcombine.low %v7797_v51, %v7837_v20 }
  0xb0   :  { %3432 = vmatpush1.bf16.msra.mxu0 %v6974_v38  ;;  %717 = vmatprep.subr.bf16.mxu1 %v6980_v42  ;;  %v6138_v38 = vcombine.low %v7875_v4, %v3181_v8  ;;  %v3183_v42 = vor.u32 %v3182_v30, %v187_v18  ;;  %v7004_v4 = vld [vmem:[#allocation2 + $0x230] ss:$8 sps:$4 sm:$0xff]   ;;  %v770_v8 = vrot.slane %v7797_v51, 5  ;;  %v7018_v30 = vld [vmem:[#allocation2 + $0x254] ss:$8 sps:$4 sm:$0xff]   ;;  %v8038_v51 = vcombine.high %v7894_v11, %v7926_v40 }
  0xb1   :  { %3433 = vmatprep.subr.bf16.mxu0 %v6983_v49  ;;  %v8020_v49 = vshll.u32 %v8009_v31, 16 }
  0xb2   :  { %v3184_v18 = vrot.slane %v3183_v42, 4  ;;  %v7024_v42 = vld [vmem:[#allocation2 + $0x264] ss:$8 sps:$4 sm:$0xff]  }
  0xb3   :  { %718 = vmatpush1.bf16.msra.mxu1 %v6978_v60  ;;  %v7006_v60 = vld [vmem:[#allocation2 + $0x234] ss:$8 sps:$4 sm:$0xff]  }
  0xb4   :  { %3434 = vmatpush1.bf16.msra.mxu0 %v6981_v0  ;;  %1016 = vmatprep.subr.bf16.mxu1 %v6987_v1  ;;  %v7009_v0 = vld [vmem:[#allocation2 + $0xa34] ss:$8 sps:$4 sm:$0xff]   ;;  %v6141_v1 = vcombine.high %v7949_v59, %v7962_v29 }
  0xb5   :  { %3713 = vmatprep.subr.bf16.mxu0 %v6990_v2  ;;  %v3188_v2 = vrot.slane %v8020_v49, 5 }
  0xb6   :  { %720 = vmatmul.mubr.bf16.vlgmr.msra.gmra.mrb[0].mxu1 %v5808_v7  ;;  %v767_v7 = vrot.slane %v7792_v50, 5  ;;  %v7021_v50 = vld [vmem:[#allocation2 + $0xa54] ss:$8 sps:$4 sm:$0xff]  }
  0xb7   :  { %3436 = vmatmul.mubr.bf16.vlgmr.msra.gmra.mrb[0].mxu0 %v6136_v3  ;;  %1017 = vmatpush1.bf16.msra.mxu1 %v6985_v5  ;;  %v7007_v3 = vld [vmem:[#allocation2 + $0xa30] ss:$8 sps:$4 sm:$0xff]   ;;  %v7012_v5 = vld [vmem:[#allocation2 + $0x244] ss:$8 sps:$4 sm:$0xff]  }
  0xb8   :  { %3714 = vmatpush1.bf16.msra.mxu0 %v6988_v6  ;;  %1018 = vmatprep.subr.bf16.mxu1 %v6994_v23  ;;  %v7015_v6 = vld [vmem:[#allocation2 + $0xa44] ss:$8 sps:$4 sm:$0xff]   ;;  %v7010_v23 = vld [vmem:[#allocation2 + $0x240] ss:$8 sps:$4 sm:$0xff]   ;;  %v8051_v48 = vsel %vm8042_vm5, %v5848_v61, %v767_v7 }
  0xb9   :  { %3715 = vmatprep.subr.bf16.mxu0 %v6997_v25  ;;  %729 = vmatprep.mubr.bf16.mxu1 %v8002_v12  ;;  %v5812_v25 = vcombine.low %v7884_v9, %v7889_v10  ;;  %v7052_v61 = vld [vmem:[#allocation2 + $0xaa4] ss:$8 sps:$4 sm:$0xff]  }
  0xba   :  { %3445 = vmatprep.mubr.bf16.mxu0 %v6139_v62  ;;  %v3189_v62 = vsel %vm7820_vm2, %v3184_v18, %v3188_v2  ;;  %v7025_v18 = vld [vmem:[#allocation2 + $0xa60] ss:$8 sps:$4 sm:$0xff]   ;;  %v7030_v2 = vld [vmem:[#allocation2 + $0x274] ss:$8 sps:$4 sm:$0xff]   ;;  %vm2521_vm2 = vsmask.f32 256 }
  0xbb   :  { %1019 = vmatpush1.bf16.msra.mxu1 %v6992_v26  ;;  %v6140_v26 = vcombine.low %v7949_v59, %v7962_v29  ;;  %v6143_v9 = vcombine.high %v7968_v32, %v3189_v62  ;;  %v769_v29 = vrot.slane %v767_v7, 4  ;;  %v7031_v7 = vld [vmem:[#allocation2 + $0xa70] ss:$8 sps:$4 sm:$0xff]   ;;  %vm8477_vm4 = vmor %vm2521_vm2, %vm2522_vm3 }
  0xbc   :  { %3716 = vmatpush1.bf16.msra.mxu0 %v6995_v28  ;;  %1020 = vmatprep.subr.bf16.mxu1 %v7000_v33  ;;  %v7013_v28 = vld [vmem:[#allocation2 + $0xa40] ss:$8 sps:$4 sm:$0xff]   ;;  %v7016_v33 = vld [vmem:[#allocation2 + $0x250] ss:$8 sps:$4 sm:$0xff]  }
  0xbd   :  { %3717 = vmatprep.subr.bf16.mxu0 %v7003_v34  ;;  %v772_v34 = vrot.slane %v770_v8, 4 }
  0xbe   :  { %730 = vmatmul.mubr.bf16.gmra.mrb[4].mxu1 %v8014_v37 }
  0xbf   :  { %3446 = vmatmul.mubr.bf16.gmra.mrb[4].mxu0 %v6138_v38  ;;  %1021 = vmatpush1.bf16.msra.mxu1 %v6998_v36  ;;  %v773_v36 = vrot.slane %v7837_v20, 5  ;;  %v7019_v38 = vld [vmem:[#allocation2 + $0xa50] ss:$8 sps:$4 sm:$0xff]  }
  0xc0   :  { %3718 = vmatpush1.bf16.msra.mxu0 %v7001_v57  ;;  %1022 = vmatprep.subr.bf16.mxu1 %v7006_v60  ;;  %v7027_v57 = vld [vmem:[#allocation2 + $0xa64] ss:$8 sps:$4 sm:$0xff]   ;;  %v7022_v60 = vld [vmem:[#allocation2 + $0x260] ss:$8 sps:$4 sm:$0xff]  }
  0xc1   :  { %3719 = vmatprep.subr.bf16.mxu0 %v7009_v0  ;;  %739 = vmatprep.mubr.bf16.mxu1 %v5813_v63  ;;  %v8055_v0 = vcombine.low %v7894_v11, %v7926_v40  ;;  %v6142_v63 = vcombine.low %v7968_v32, %v3189_v62  ;;  %v7042_v62 = vld [vmem:[#allocation2 + $0x294] ss:$8 sps:$4 sm:$0xff]  }
  0xc2   :  { %3455 = vmatprep.mubr.bf16.mxu0 %v6141_v1  ;;  %v8060_v1 = vsel %vm8042_vm5, %v769_v29, %v770_v8  ;;  %v7036_v8 = vld [vmem:[#allocation2 + $0x284] ss:$8 sps:$4 sm:$0xff]   ;;  %v7047_v29 = vld [vmem:[#allocation2 + $0x2a0] ss:$8 sps:$4 sm:$0xff]  }
  0xc3   :  { %1023 = vmatpush1.bf16.msra.mxu1 %v7004_v4  ;;  %v8066_v4 = vsel %vm8042_vm5, %v772_v34, %v773_v36  ;;  %v5851_v32 = vcombine.high %v8051_v48, %v8060_v1  ;;  %v7056_v34 = vld [vmem:[#allocation2 + $0x2b4] ss:$8 sps:$4 sm:$0xff]   ;;  %v5850_v20 = vcombine.low %v8051_v48, %v8060_v1 }
  0xc4   :  { %3720 = vmatpush1.bf16.msra.mxu0 %v7007_v3  ;;  %1024 = vmatprep.subr.bf16.mxu1 %v7012_v5  ;;  %v7033_v3 = vld [vmem:[#allocation2 + $0xa74] ss:$8 sps:$4 sm:$0xff]   ;;  %v6177_v5 = vcombine.high %v8060_v1, %v8066_v4 }
  0xc5   :  { %3721 = vmatprep.subr.bf16.mxu0 %v7015_v6  ;;  %v7028_v6 = vld [vmem:[#allocation2 + $0x270] ss:$8 sps:$4 sm:$0xff]  }
  0xc6   :  { %740 = vmatmul.mubr.bf16.gmra.mrb[8].mxu1 %v5812_v25  ;;  %v7034_v25 = vld [vmem:[#allocation2 + $0x280] ss:$8 sps:$4 sm:$0xff]  }
  0xc7   :  { %3456 = vmatmul.mubr.bf16.gmra.mrb[8].mxu0 %v6140_v26  ;;  %1025 = vmatpush1.bf16.msra.mxu1 %v7010_v23  ;;  %v7039_v23 = vld [vmem:[#allocation2 + $0xa84] ss:$8 sps:$4 sm:$0xff]   ;;  %v7037_v26 = vld [vmem:[#allocation2 + $0xa80] ss:$8 sps:$4 sm:$0xff]  }
  0xc8   :  { %3722 = vmatpush1.bf16.msra.mxu0 %v7013_v28  ;;  %1026 = vmatprep.subr.bf16.mxu1 %v7018_v30  ;;  %v7045_v28 = vld [vmem:[#allocation2 + $0xa94] ss:$8 sps:$4 sm:$0xff]   ;;  %v7040_v30 = vld [vmem:[#allocation2 + $0x290] ss:$8 sps:$4 sm:$0xff]  }
  0xc9   :  { %3723 = vmatprep.subr.bf16.mxu0 %v7021_v50  ;;  %749 = vmatprep.mubr.bf16.mxu1 %v8038_v51  ;;  %v7043_v50 = vld [vmem:[#allocation2 + $0xa90] ss:$8 sps:$4 sm:$0xff]  }
  0xca   :  { %3465 = vmatprep.mubr.bf16.mxu0 %v6143_v9  ;;  %v7049_v9 = vld [vmem:[#allocation2 + $0x2a4] ss:$8 sps:$4 sm:$0xff]  }
  0xcb   :  { %1027 = vmatpush1.bf16.msra.mxu1 %v7016_v33  ;;  %v7050_v33 = vld [vmem:[#allocation2 + $0xaa0] ss:$8 sps:$4 sm:$0xff]  }
  0xcc   :  { %3724 = vmatpush1.bf16.msra.mxu0 %v7019_v38  ;;  %1028 = vmatprep.subr.bf16.mxu1 %v7024_v42  ;;  %v7059_v38 = vld [vmem:[#allocation2 + $0xab4] ss:$8 sps:$4 sm:$0xff]   ;;  %v7054_v42 = vld [vmem:[#allocation2 + $0x2b0] ss:$8 sps:$4 sm:$0xff]  }
  0xcd   :  { %3725 = vmatprep.subr.bf16.mxu0 %v7027_v57  ;;  %v7057_v57 = vld [vmem:[#allocation2 + $0xab0] ss:$8 sps:$4 sm:$0xff]  }
  0xce   :  { %750 = vmatmul.mubr.bf16.gmra.mrb[12].mxu1 %v8055_v0 }
  0xcf   :  { %3466 = vmatmul.mubr.bf16.gmra.mrb[12].mxu0 %v6142_v63  ;;  %1029 = vmatpush1.bf16.msra.mxu1 %v7022_v60  ;;  %v7063_v60 = vld [vmem:[#allocation2 + $0x2c4] ss:$8 sps:$4 sm:$0xff]  }
  0xd0   :  { %3726 = vmatpush1.bf16.msra.mxu0 %v7025_v18  ;;  %1030 = vmatprep.subr.bf16.mxu1 %v7030_v2  ;;  %v7066_v63 = vld [vmem:[#allocation2 + $0xac4] ss:$8 sps:$4 sm:$0xff]   ;;  %v7061_v18 = vld [vmem:[#allocation2 + $0x2c0] ss:$8 sps:$4 sm:$0xff]  }
  0xd1   :  { %3727 = vmatprep.subr.bf16.mxu0 %v7033_v3  ;;  %1048 = vmatprep.mubr.bf16.mxu1 %v5851_v32  ;;  %v7064_v2 = vld [vmem:[#allocation2 + $0xac0] ss:$8 sps:$4 sm:$0xff]   ;;  %v7070_v3 = vld [vmem:[#allocation2 + $0x2d4] ss:$8 sps:$4 sm:$0xff]  }
  0xd2   :  { %3745 = vmatprep.mubr.bf16.mxu0 %v6177_v5  ;;  %v7073_v32 = vld [vmem:[#allocation2 + $0xad4] ss:$8 sps:$4 sm:$0xff]   ;;  %v7068_v5 = vld [vmem:[#allocation2 + $0x2d0] ss:$8 sps:$4 sm:$0xff]  }
  0xd3   :  { %1031 = vmatpush1.bf16.msra.mxu1 %v7028_v6  ;;  %v7071_v6 = vld [vmem:[#allocation2 + $0xad0] ss:$8 sps:$4 sm:$0xff]  }
  0xd4   :  { %3728 = vmatpush1.bf16.msra.mxu0 %v7031_v7  ;;  %1032 = vmatprep.subr.bf16.mxu1 %v7036_v8  ;;  %v7077_v7 = vld [vmem:[#allocation2 + $0x2e4] ss:$8 sps:$4 sm:$0xff]  }
  0xd5   :  { %3729 = vmatprep.subr.bf16.mxu0 %v7039_v23  ;;  %v7080_v8 = vld [vmem:[#allocation2 + $0xae4] ss:$8 sps:$4 sm:$0xff]   ;;  %v776_v23 = vrot.slane %v7857_v47, 5 }
  0xd6   :  { %v7090_v47 = vld [vmem:[#allocation2 + $0x304] ss:$8 sps:$4 sm:$0xff]  }
  0xd7   :  { %1033 = vmatpush1.bf16.msra.mxu1 %v7034_v25  ;;  %v7075_v25 = vld [vmem:[#allocation2 + $0x2e0] ss:$8 sps:$4 sm:$0xff]  }
  0xd8   :  { %3730 = vmatpush1.bf16.msra.mxu0 %v7037_v26  ;;  %1034 = vmatprep.subr.bf16.mxu1 %v7042_v62  ;;  %v7078_v26 = vld [vmem:[#allocation2 + $0xae0] ss:$8 sps:$4 sm:$0xff]   ;;  %v7084_v62 = vld [vmem:[#allocation2 + $0x2f4] ss:$8 sps:$4 sm:$0xff]  }
  0xd9   :  { %3731 = vmatprep.subr.bf16.mxu0 %v7045_v28  ;;  %v7087_v28 = vld [vmem:[#allocation2 + $0xaf4] ss:$8 sps:$4 sm:$0xff]  }
  0xdb   :  { %1035 = vmatpush1.bf16.msra.mxu1 %v7040_v30  ;;  %v775_v30 = vrot.slane %v773_v36, 4 }
  0xdc   :  { %3732 = vmatpush1.bf16.msra.mxu0 %v7043_v50  ;;  %1036 = vmatprep.subr.bf16.mxu1 %v7049_v9  ;;  %v3494_v50 = vrot.slane %v776_v23, 4  ;;  %v3495_v9 = vrot.slane %v7985_v39, 5  ;;  %v6176_v39 = vcombine.low %v8060_v1, %v8066_v4 }
  0xdd   :  { %3733 = vmatprep.subr.bf16.mxu0 %v7052_v61  ;;  %v7082_v61 = vld [vmem:[#allocation2 + $0x2f0] ss:$8 sps:$4 sm:$0xff]  }
  0xde   :  { %v3496_v36 = vsel %vm8042_vm5, %v3494_v50, %v3495_v9  ;;  %v7103_v50 = vld [vmem:[#allocation2 + $0xb20] ss:$8 sps:$4 sm:$0xff]   ;;  %v7108_v9 = vld [vmem:[#allocation2 + $0x334] ss:$8 sps:$4 sm:$0xff]  }
  0xdf   :  { %1037 = vmatpush1.bf16.msra.mxu1 %v7047_v29  ;;  %v7085_v29 = vld [vmem:[#allocation2 + $0xaf0] ss:$8 sps:$4 sm:$0xff]  }
  0xe0   :  { %3734 = vmatpush1.bf16.msra.mxu0 %v7050_v33  ;;  %1038 = vmatprep.subr.bf16.mxu1 %v7056_v34  ;;  %v7093_v33 = vld [vmem:[#allocation2 + $0xb04] ss:$8 sps:$4 sm:$0xff]   ;;  %v777_v34 = vsel %vm8042_vm5, %v775_v30, %v776_v23  ;;  %v7100_v30 = vld [vmem:[#allocation2 + $0x320] ss:$8 sps:$4 sm:$0xff]  }
  0xe1   :  { %3735 = vmatprep.subr.bf16.mxu0 %v7059_v38  ;;  %v780_v38 = vrot.slane %v7889_v10, 5  ;;  %v5853_v10 = vcombine.high %v8066_v4, %v777_v34 }
  0xe3   :  { %1039 = vmatpush1.bf16.msra.mxu1 %v7054_v42  ;;  %v783_v42 = vrot.slane %v7894_v11, 5  ;;  %v7620_v11 = vld [vmem:[%s8622_s0 + $0x30] sm:$0xff]  ;;  %v782_v1 = vrot.slane %v780_v38, 4 }
  0xe4   :  { %3736 = vmatpush1.bf16.msra.mxu0 %v7057_v57  ;;  %1040 = vmatprep.subr.bf16.mxu1 %v7063_v60  ;;  %v7088_v57 = vld [vmem:[#allocation2 + $0x300] ss:$8 sps:$4 sm:$0xff]   ;;  %v5849_v48 = vrot.slane %v7620_v11, 9 }
  0xe5   :  { %3737 = vmatprep.subr.bf16.mxu0 %v7066_v63  ;;  %v7091_v60 = vld [vmem:[#allocation2 + $0xb00] ss:$8 sps:$4 sm:$0xff]   ;;  %v7096_v63 = vld [vmem:[#allocation2 + $0x314] ss:$8 sps:$4 sm:$0xff]  }
  0xe6   :  { %v781_v23 = vsel %vm8042_vm5, %v5849_v48, %v780_v38  ;;  %v1108_v38 = vrot.slane %v7800_v52, 5 }
  0xe7   :  { %1041 = vmatpush1.bf16.msra.mxu1 %v7061_v18  ;;  %v7099_v18 = vld [vmem:[#allocation2 + $0xb14] ss:$8 sps:$4 sm:$0xff]  }
  0xe8   :  { %3738 = vmatpush1.bf16.msra.mxu0 %v7064_v2  ;;  %1042 = vmatprep.subr.bf16.mxu1 %v7070_v3  ;;  %v6179_v2 = vcombine.high %v777_v34, %v3496_v36  ;;  %v785_v3 = vrot.slane %v783_v42, 4 }
  0xe9   :  { %3739 = vmatprep.subr.bf16.mxu0 %v7073_v32  ;;  %v786_v32 = vrot.slane %v7926_v40, 5 }
  0xeb   :  { %1043 = vmatpush1.bf16.msra.mxu1 %v7068_v5  ;;  %v7094_v5 = vld [vmem:[#allocation2 + $0x310] ss:$8 sps:$4 sm:$0xff]   ;;  %v8098_v40 = vsel %vm8042_vm5, %v785_v3, %v786_v32 }
  0xec   :  { %3740 = vmatpush1.bf16.msra.mxu0 %v7071_v6  ;;  %1044 = vmatprep.subr.bf16.mxu1 %v7077_v7  ;;  %v7097_v6 = vld [vmem:[#allocation2 + $0xb10] ss:$8 sps:$4 sm:$0xff]   ;;  %v7102_v7 = vld [vmem:[#allocation2 + $0x324] ss:$8 sps:$4 sm:$0xff]  }
  0xed   :  { %3741 = vmatprep.subr.bf16.mxu0 %v7080_v8  ;;  %v7105_v8 = vld [vmem:[#allocation2 + $0xb24] ss:$8 sps:$4 sm:$0xff]  }
  0xef   :  { %1045 = vmatpush1.bf16.msra.mxu1 %v7075_v25  ;;  %v784_v25 = vsel %vm8042_vm5, %v782_v1, %v783_v42  ;;  %v1109_v42 = vrot.slane %v7803_v53, 6  ;;  %v1122_v1 = vrot.slane %v7846_v27, 5 }
  0xf0   :  { %3742 = vmatpush1.bf16.msra.mxu0 %v7078_v26  ;;  %1046 = vmatprep.subr.bf16.mxu1 %v7084_v62  ;;  %v5852_v26 = vcombine.low %v8066_v4, %v777_v34  ;;  %v6178_v62 = vcombine.low %v777_v34, %v3496_v36  ;;  %v1112_v4 = vrot.slane %v7809_v55, 5  ;;  %v1118_v36 = vrot.slane %v7812_v56, 6 }
  0xf1   :  { %3743 = vmatprep.subr.bf16.mxu0 %v7087_v28  ;;  %v789_v28 = vrot.slane %v7931_v41, 5  ;;  %v1113_v41 = vrot.slane %v7806_v54, 6  ;;  %v6180_v11 = vcombine.low %v784_v25, %v8098_v40 }
  0xf3   :  { %1047 = vmatpush1.bf16.msra.mxu1 %v7082_v61  ;;  %v7111_v61 = vld [vmem:[#allocation2 + $0xb34] ss:$8 sps:$4 sm:$0xff]   ;;  %v3497_v34 = vrot.slane %v789_v28, 4 }
  0xf4   :  { %3744 = vmatpush1.bf16.msra.mxu0 %v7085_v29  ;;  %1383 = vmatprep.subr.bf16.mxu1 %v7090_v47  ;;  %v5855_v29 = vcombine.high %v781_v23, %v784_v25  ;;  %v6181_v47 = vcombine.high %v784_v25, %v8098_v40 }
  0xf5   :  { %4029 = vmatprep.subr.bf16.mxu0 %v7093_v33  ;;  %v788_v33 = vrot.slane %v786_v32, 4 }
  0xf6   :  { %1049 = vmatmul.mubr.bf16.vlgmr.msra.gmra.mrb[0].mxu1 %v5850_v20  ;;  %v3498_v20 = vrot.slane %v8009_v31, 5  ;;  %v1110_v31 = vor.u32 %v1109_v42, %v1108_v38 }
  0xf7   :  { %3746 = vmatmul.mubr.bf16.vlgmr.msra.gmra.mrb[0].mxu0 %v6176_v39  ;;  %1384 = vmatpush1.bf16.msra.mxu1 %v7088_v57  ;;  %v1117_v39 = vrot.slane %v7840_v22, 5  ;;  %v7106_v57 = vld [vmem:[#allocation2 + $0x330] ss:$8 sps:$4 sm:$0xff]   ;;  %v790_v48 = vsel %vm8042_vm5, %v788_v33, %v789_v28 }
  0xf8   :  { %4030 = vmatpush1.bf16.msra.mxu0 %v7091_v60  ;;  %1385 = vmatprep.subr.bf16.mxu1 %v7096_v63  ;;  %v7109_v60 = vld [vmem:[#allocation2 + $0xb30] ss:$8 sps:$4 sm:$0xff]   ;;  %v7114_v63 = vld [vmem:[#allocation2 + $0x344] ss:$8 sps:$4 sm:$0xff]   ;;  %v3499_v3 = vsel %vm8042_vm5, %v3497_v34, %v3498_v20  ;;  %v5856_v33 = vcombine.low %v8098_v40, %v790_v48  ;;  %v7124_v34 = vld [vmem:[#allocation2 + $0x360] ss:$8 sps:$4 sm:$0xff]  }
  0xf9   :  { %4031 = vmatprep.subr.bf16.mxu0 %v7099_v18  ;;  %1058 = vmatprep.mubr.bf16.mxu1 %v5853_v10  ;;  %v7117_v18 = vld [vmem:[#allocation2 + $0xb44] ss:$8 sps:$4 sm:$0xff]   ;;  %v5854_v10 = vcombine.low %v781_v23, %v784_v25  ;;  %v1119_v32 = vor.u32 %v1118_v36, %v1117_v39  ;;  %v7123_v23 = vld [vmem:[#allocation2 + $0xb54] ss:$8 sps:$4 sm:$0xff]   ;;  %v5857_v25 = vcombine.high %v8098_v40, %v790_v48  ;;  %v7118_v28 = vld [vmem:[#allocation2 + $0x350] ss:$8 sps:$4 sm:$0xff]  }
  0xfa   :  { %3755 = vmatprep.mubr.bf16.mxu0 %v6179_v2  ;;  %v1114_v2 = vor.u32 %v1113_v41, %v1112_v4  ;;  %v6182_v38 = vcombine.low %v790_v48, %v3499_v3  ;;  %v7127_v20 = vld [vmem:[#allocation2 + $0xb60] ss:$8 sps:$4 sm:$0xff]   ;;  %v7132_v40 = vld [vmem:[#allocation2 + $0x374] ss:$8 sps:$4 sm:$0xff]  }
  0xfb   :  { %1386 = vmatpush1.bf16.msra.mxu1 %v7094_v5  ;;  %v1123_v5 = vrot.slane %v7843_v24, 6  ;;  %v7135_v39 = vld [vmem:[#allocation2 + $0xb74] ss:$8 sps:$4 sm:$0xff]  }
  0xfc   :  { %4032 = vmatpush1.bf16.msra.mxu0 %v7097_v6  ;;  %1387 = vmatprep.subr.bf16.mxu1 %v7102_v7  ;;  %v7112_v6 = vld [vmem:[#allocation2 + $0x340] ss:$8 sps:$4 sm:$0xff]   ;;  %v1116_v59 = vrot.slane %v1114_v2, 4 }
  0xfd   :  { %4033 = vmatprep.subr.bf16.mxu0 %v7105_v8  ;;  %v7115_v7 = vld [vmem:[#allocation2 + $0xb40] ss:$8 sps:$4 sm:$0xff]   ;;  %v7120_v8 = vld [vmem:[#allocation2 + $0x354] ss:$8 sps:$4 sm:$0xff]  }
  0xfe   :  { %1059 = vmatmul.mubr.bf16.gmra.mrb[4].mxu1 %v5852_v26  ;;  %v6183_v26 = vcombine.high %v790_v48, %v3499_v3  ;;  %v8133_v4 = vsel %vm8122_vm8, %v1116_v59, %v1119_v32  ;;  %v7139_v48 = vld [vmem:[#allocation2 + $0xb80] ss:$8 sps:$4 sm:$0xff]   ;;  %v7145_v3 = vld [vmem:[#allocation2 + $0xb90] ss:$8 sps:$4 sm:$0xff]  }
  0xff   :  { %3756 = vmatmul.mubr.bf16.gmra.mrb[4].mxu0 %v6178_v62  ;;  %1388 = vmatpush1.bf16.msra.mxu1 %v7100_v30  ;;  %v1111_v62 = vrot.slane %v1110_v31, 4  ;;  %v1121_v30 = vrot.slane %v1119_v32, 4  ;;  %v7144_v31 = vld [vmem:[#allocation2 + $0x394] ss:$8 sps:$4 sm:$0xff]   ;;  %v7150_v32 = vld [vmem:[#allocation2 + $0x3a4] ss:$8 sps:$4 sm:$0xff]  }
 0x100   :  { %4034 = vmatpush1.bf16.msra.mxu0 %v7103_v50  ;;  %1389 = vmatprep.subr.bf16.mxu1 %v7108_v9  ;;  %v8118_v50 = vor.u32 %v1123_v5, %v1122_v1  ;;  %v7121_v9 = vld [vmem:[#allocation2 + $0xb50] ss:$8 sps:$4 sm:$0xff]   ;;  %v7153_v5 = vld [vmem:[#allocation2 + $0xba4] ss:$8 sps:$4 sm:$0xff]   ;;  %v7160_v59 = vld [vmem:[#allocation2 + $0x3c0] ss:$8 sps:$4 sm:$0xff]  }
 0x101   :  { %4035 = vmatprep.subr.bf16.mxu0 %v7111_v61  ;;  %1068 = vmatprep.mubr.bf16.mxu1 %v5855_v29  ;;  %v7126_v29 = vld [vmem:[#allocation2 + $0x364] ss:$8 sps:$4 sm:$0xff]   ;;  %v8129_v42 = vsel %vm8122_vm8, %v1111_v62, %v1114_v2  ;;  %v7147_v2 = vld [vmem:[#allocation2 + $0xb94] ss:$8 sps:$4 sm:$0xff]   ;;  %v7142_v1 = vld [vmem:[#allocation2 + $0x390] ss:$8 sps:$4 sm:$0xff]  }
 0x102   :  { %3765 = vmatprep.mubr.bf16.mxu0 %v6181_v47  ;;  %v7129_v47 = vld [vmem:[#allocation2 + $0xb64] ss:$8 sps:$4 sm:$0xff]   ;;  %v8138_v41 = vsel %vm8122_vm8, %v1121_v30, %v8118_v50  ;;  %v5891_v36 = vcombine.high %v8129_v42, %v8133_v4  ;;  %v7163_v30 = vld [vmem:[#allocation2 + $0xbc0] ss:$8 sps:$4 sm:$0xff]  }
 0x103   :  { %1390 = vmatpush1.bf16.msra.mxu1 %v7106_v57  ;;  %v6217_v57 = vcombine.high %v8133_v4, %v8138_v41  ;;  %v7162_v62 = vld [vmem:[#allocation2 + $0x3c4] ss:$8 sps:$4 sm:$0xff]  }
 0x104   :  { %4036 = vmatpush1.bf16.msra.mxu0 %v7109_v60  ;;  %1391 = vmatprep.subr.bf16.mxu1 %v7114_v63  ;;  %v7130_v60 = vld [vmem:[#allocation2 + $0x370] ss:$8 sps:$4 sm:$0xff]  }
 0x105   :  { %4037 = vmatprep.subr.bf16.mxu0 %v7117_v18  ;;  %v7133_v63 = vld [vmem:[#allocation2 + $0xb70] ss:$8 sps:$4 sm:$0xff]   ;;  %v7138_v18 = vld [vmem:[#allocation2 + $0x384] ss:$8 sps:$4 sm:$0xff]  }
 0x106   :  { %1069 = vmatmul.mubr.bf16.gmra.mrb[8].mxu1 %v5854_v10  ;;  %v7141_v10 = vld [vmem:[#allocation2 + $0xb84] ss:$8 sps:$4 sm:$0xff]  }
 0x107   :  { %3766 = vmatmul.mubr.bf16.gmra.mrb[8].mxu0 %v6180_v11  ;;  %1392 = vmatpush1.bf16.msra.mxu1 %v7112_v6  ;;  %v7136_v11 = vld [vmem:[#allocation2 + $0x380] ss:$8 sps:$4 sm:$0xff]  }
 0x108   :  { %4038 = vmatpush1.bf16.msra.mxu0 %v7115_v7  ;;  %1393 = vmatprep.subr.bf16.mxu1 %v7120_v8  ;;  %v7148_v6 = vld [vmem:[#allocation2 + $0x3a0] ss:$8 sps:$4 sm:$0xff]   ;;  %v7156_v8 = vld [vmem:[#allocation2 + $0x3b4] ss:$8 sps:$4 sm:$0xff]  }
 0x109   :  { %4039 = vmatprep.subr.bf16.mxu0 %v7123_v23  ;;  %1078 = vmatprep.mubr.bf16.mxu1 %v5857_v25  ;;  %v7151_v7 = vld [vmem:[#allocation2 + $0xba0] ss:$8 sps:$4 sm:$0xff]   ;;  %v7159_v23 = vld [vmem:[#allocation2 + $0xbb4] ss:$8 sps:$4 sm:$0xff]   ;;  %v7154_v25 = vld [vmem:[#allocation2 + $0x3b0] ss:$8 sps:$4 sm:$0xff]  }
 0x10a   :  { %3775 = vmatprep.mubr.bf16.mxu0 %v6183_v26  ;;  %v7157_v26 = vld [vmem:[#allocation2 + $0xbb0] ss:$8 sps:$4 sm:$0xff]  }
 0x10b   :  { %1394 = vmatpush1.bf16.msra.mxu1 %v7118_v28  ;;  %v7165_v28 = vld [vmem:[#allocation2 + $0xbc4] ss:$8 sps:$4 sm:$0xff]  }
 0x10c   :  { %4040 = vmatpush1.bf16.msra.mxu0 %v7121_v9  ;;  %1395 = vmatprep.subr.bf16.mxu1 %v7126_v29  ;;  %v7168_v9 = vld [vmem:[#allocation2 + $0x3d4] ss:$8 sps:$4 sm:$0xff]  }
 0x10d   :  { %4041 = vmatprep.subr.bf16.mxu0 %v7129_v47  ;;  %v7171_v29 = vld [vmem:[#allocation2 + $0xbd4] ss:$8 sps:$4 sm:$0xff]   ;;  %v7166_v47 = vld [vmem:[#allocation2 + $0x3d0] ss:$8 sps:$4 sm:$0xff]  }
 0x10e   :  { %1079 = vmatmul.mubr.bf16.gmra.mrb[12].mxu1 %v5856_v33  ;;  %v1129_v33 = vrot.slane %v7977_v17, 5 }
 0x10f   :  { %3776 = vmatmul.mubr.bf16.gmra.mrb[12].mxu0 %v6182_v38  ;;  %1396 = vmatpush1.bf16.msra.mxu1 %v7124_v34  ;;  %v1130_v38 = vrot.slane %v7860_v58, 6  ;;  %v8149_v34 = vld [vmem:[%s8622_s0 + $0x28] sm:$0xff] }
 0x110   :  { %4042 = vmatpush1.bf16.msra.mxu0 %v7127_v20  ;;  %1397 = vmatprep.subr.bf16.mxu1 %v7132_v40  ;;  %v8152_v20 = vshrl.u32 %v8149_v34, 16  ;;  %v7169_v40 = vld [vmem:[#allocation2 + $0xbd0] ss:$8 sps:$4 sm:$0xff]  }
 0x111   :  { %4043 = vmatprep.subr.bf16.mxu0 %v7135_v39  ;;  %1415 = vmatprep.mubr.bf16.mxu1 %v5891_v36  ;;  %v7174_v39 = vld [vmem:[#allocation2 + $0x3e4] ss:$8 sps:$4 sm:$0xff]  }
 0x112   :  { %4061 = vmatprep.mubr.bf16.mxu0 %v6217_v57  ;;  %v7177_v36 = vld [vmem:[#allocation2 + $0xbe4] ss:$8 sps:$4 sm:$0xff]   ;;  %v7172_v57 = vld [vmem:[#allocation2 + $0x3e0] ss:$8 sps:$4 sm:$0xff]  }
 0x113   :  { %1398 = vmatpush1.bf16.msra.mxu1 %v7130_v60  ;;  %v1131_v60 = vor.u32 %v1130_v38, %v1129_v33  ;;  %v6216_v33 = vcombine.low %v8133_v4, %v8138_v41 }
 0x114   :  { %4044 = vmatpush1.bf16.msra.mxu0 %v7133_v63  ;;  %1399 = vmatprep.subr.bf16.mxu1 %v7138_v18  ;;  %v3805_v63 = vrot.slane %v8152_v20, 5  ;;  %v3806_v18 = vrot.slane %v7988_v46, 6 }
 0x115   :  { %4045 = vmatprep.subr.bf16.mxu0 %v7141_v10  ;;  %v7175_v10 = vld [vmem:[#allocation2 + $0xbe0] ss:$8 sps:$4 sm:$0xff]  }
 0x117   :  { %1400 = vmatpush1.bf16.msra.mxu1 %v7136_v11  ;;  %v7180_v11 = vld [vmem:[#allocation2 + $0x3f4] ss:$8 sps:$4 sm:$0xff]  }
 0x118   :  { %4046 = vmatpush1.bf16.msra.mxu0 %v7139_v48  ;;  %1401 = vmatprep.subr.bf16.mxu1 %v7144_v31  ;;  %v7183_v48 = vld [vmem:[#allocation2 + $0xbf4] ss:$8 sps:$4 sm:$0xff]   ;;  %v1133_v31 = vrot.slane %v7897_v13, 5 }
 0x119   :  { %4047 = vmatprep.subr.bf16.mxu0 %v7147_v2  ;;  %v1134_v2 = vrot.slane %v7900_v14, 6 }
 0x11b   :  { %1402 = vmatpush1.bf16.msra.mxu1 %v7142_v1  ;;  %v1137_v1 = vrot.slane %v7906_v16, 5 }
 0x11c   :  { %4048 = vmatpush1.bf16.msra.mxu0 %v7145_v3  ;;  %1403 = vmatprep.subr.bf16.mxu1 %v7150_v32  ;;  %v1138_v3 = vrot.slane %v7903_v15, 6  ;;  %v1142_v32 = vrot.slane %v7921_v35, 5 }
 0x11d   :  { %4049 = vmatprep.subr.bf16.mxu0 %v7153_v5  ;;  %v1143_v5 = vrot.slane %v7909_v19, 6 }
 0x11f   :  { %1404 = vmatpush1.bf16.msra.mxu1 %v7148_v6  ;;  %v7178_v6 = vld [vmem:[#allocation2 + $0x3f0] ss:$8 sps:$4 sm:$0xff]  }
 0x120   :  { %4050 = vmatpush1.bf16.msra.mxu0 %v7151_v7  ;;  %1405 = vmatprep.subr.bf16.mxu1 %v7156_v8  ;;  %v1126_v7 = vrot.slane %v8118_v50, 4  ;;  %v3802_v8 = vrot.slane %v1131_v60, 4  ;;  %v7184_v50 = vld [vmem:[#allocation2 + $0x400] ss:$8 sps:$4 sm:$0xff]  }
 0x121   :  { %4051 = vmatprep.subr.bf16.mxu0 %v7159_v23  ;;  %v3807_v23 = vor.u32 %v3806_v18, %v3805_v63 }
 0x122   :  { %v1132_v38 = vsel %vm8122_vm8, %v1126_v7, %v1131_v60 }
 0x123   :  { %1406 = vmatpush1.bf16.msra.mxu1 %v7154_v25  ;;  %v7181_v25 = vld [vmem:[#allocation2 + $0xbf0] ss:$8 sps:$4 sm:$0xff]  }
 0x124   :  { %4052 = vmatpush1.bf16.msra.mxu0 %v7157_v26  ;;  %1407 = vmatprep.subr.bf16.mxu1 %v7162_v62  ;;  %v7186_v26 = vld [vmem:[#allocation2 + $0x404] ss:$8 sps:$4 sm:$0xff]  }
 0x125   :  { %4053 = vmatprep.subr.bf16.mxu0 %v7165_v28  ;;  %v7189_v62 = vld [vmem:[#allocation2 + $0xc04] ss:$8 sps:$4 sm:$0xff]   ;;  %v1135_v28 = vor.u32 %v1134_v2, %v1133_v31  ;;  %v1155_v31 = vrot.slane %v7941_v45, 6  ;;  %v8179_v2 = vld [vmem:[%s8622_s0 + $0x58] sm:$0xff] }
 0x127   :  { %1408 = vmatpush1.bf16.msra.mxu1 %v7160_v59  ;;  %v1139_v59 = vor.u32 %v1138_v3, %v1137_v1  ;;  %v1136_v63 = vrot.slane %v1135_v28, 4  ;;  %v8182_v1 = vshrl.u32 %v8179_v2, 16  ;;  %v7193_v3 = vld [vmem:[#allocation2 + $0xc10] ss:$8 sps:$4 sm:$0xff]  }
 0x128   :  { %4054 = vmatpush1.bf16.msra.mxu0 %v7163_v30  ;;  %1409 = vmatprep.subr.bf16.mxu1 %v7168_v9  ;;  %v1144_v30 = vor.u32 %v1143_v5, %v1142_v32  ;;  %v1147_v9 = vrot.slane %v7938_v44, 5  ;;  %v7198_v32 = vld [vmem:[#allocation2 + $0x424] ss:$8 sps:$4 sm:$0xff]  }
 0x129   :  { %4055 = vmatprep.subr.bf16.mxu0 %v7171_v29  ;;  %v1148_v29 = vrot.slane %v7935_v43, 6  ;;  %v7201_v5 = vld [vmem:[#allocation2 + $0xc24] ss:$8 sps:$4 sm:$0xff]  }
 0x12b   :  { %1410 = vmatpush1.bf16.msra.mxu1 %v7166_v47  ;;  %v5890_v47 = vcombine.low %v8129_v42, %v8133_v4  ;;  %v5893_v42 = vcombine.high %v8138_v41, %v1132_v38  ;;  %v7190_v4 = vld [vmem:[#allocation2 + $0x410] ss:$8 sps:$4 sm:$0xff]   ;;  %v1149_v60 = vor.u32 %v1148_v29, %v1147_v9  ;;  %v3812_v9 = vrot.slane %v8182_v1, 5  ;;  %v7204_v29 = vld [vmem:[#allocation2 + $0x434] ss:$8 sps:$4 sm:$0xff]  }
 0x12c   :  { %4056 = vmatpush1.bf16.msra.mxu0 %v7169_v40  ;;  %1411 = vmatprep.subr.bf16.mxu1 %v7174_v39  ;;  %v3808_v40 = vsel %vm8122_vm8, %v3802_v8, %v3807_v23  ;;  %v7187_v39 = vld [vmem:[#allocation2 + $0xc00] ss:$8 sps:$4 sm:$0xff]   ;;  %v1140_v8 = vsel %vm8122_vm8, %v1136_v63, %v1139_v59 }
 0x12d   :  { %4057 = vmatprep.subr.bf16.mxu0 %v7177_v36  ;;  %v7192_v36 = vld [vmem:[#allocation2 + $0x414] ss:$8 sps:$4 sm:$0xff]   ;;  %v6219_v18 = vcombine.high %v1132_v38, %v3808_v40  ;;  %v6218_v7 = vcombine.low %v1132_v38, %v3808_v40 }
 0x12f   :  { %1412 = vmatpush1.bf16.msra.mxu1 %v7172_v57  ;;  %v7195_v57 = vld [vmem:[#allocation2 + $0xc14] ss:$8 sps:$4 sm:$0xff]  }
 0x130   :  { %4058 = vmatpush1.bf16.msra.mxu0 %v7175_v10  ;;  %1413 = vmatprep.subr.bf16.mxu1 %v7180_v11  ;;  %v1141_v10 = vrot.slane %v1139_v59, 4  ;;  %v1146_v11 = vrot.slane %v1144_v30, 4  ;;  %v7207_v59 = vld [vmem:[#allocation2 + $0xc34] ss:$8 sps:$4 sm:$0xff]  }
 0x131   :  { %4059 = vmatprep.subr.bf16.mxu0 %v7183_v48  ;;  %v1154_v48 = vrot.slane %v7998_v21, 5 }
 0x132   :  { %v1145_v23 = vsel %vm8122_vm8, %v1141_v10, %v1144_v30  ;;  %v7624_v10 = vld [vmem:[%s8622_s0 + $0x10] sm:$0xff] }
 0x133   :  { %1414 = vmatpush1.bf16.msra.mxu1 %v7178_v6  ;;  %v5892_v6 = vcombine.low %v8138_v41, %v1132_v38  ;;  %v1156_v28 = vor.u32 %v1155_v31, %v1154_v48  ;;  %v3813_v41 = vrot.slane %v8020_v49, 6  ;;  %v7205_v38 = vld [vmem:[#allocation2 + $0xc30] ss:$8 sps:$4 sm:$0xff]   ;;  %v5894_v48 = vcombine.low %v1140_v8, %v1145_v23 }
 0x134   :  { %4060 = vmatpush1.bf16.msra.mxu0 %v7181_v25  ;;  %1726 = vmatprep.subr.bf16.mxu1 %v7186_v26  ;;  %v7196_v25 = vld [vmem:[#allocation2 + $0x420] ss:$8 sps:$4 sm:$0xff]  }
 0x135   :  { %4337 = vmatprep.subr.bf16.mxu0 %v7189_v62  ;;  %v7199_v26 = vld [vmem:[#allocation2 + $0xc20] ss:$8 sps:$4 sm:$0xff]   ;;  %v8191_v62 = vsel %vm8122_vm8, %v1146_v11, %v1149_v60  ;;  %v3809_v40 = vrot.slane %v1156_v28, 4  ;;  %v1480_v11 = vrot.slane %v7624_v10, 6  ;;  %v7229_v10 = vld [vmem:[#allocation2 + $0xc70] ss:$8 sps:$4 sm:$0xff]  }
 0x136   :  { %1416 = vmatmul.mubr.bf16.vlgmr.msra.gmra.mrb[0].mxu1 %v5890_v47  ;;  %v5895_v47 = vcombine.high %v1140_v8, %v1145_v23  ;;  %v6221_v30 = vcombine.high %v1145_v23, %v8191_v62  ;;  %v6220_v31 = vcombine.low %v1145_v23, %v8191_v62  ;;  %v7625_v8 = vld [vmem:[%s8622_s0] sm:$0xff] }
 0x137   :  { %4062 = vmatmul.mubr.bf16.vlgmr.msra.gmra.mrb[0].mxu0 %v6216_v33  ;;  %1727 = vmatpush1.bf16.msra.mxu1 %v7184_v50  ;;  %v1151_v50 = vrot.slane %v1149_v60, 4  ;;  %v7202_v33 = vld [vmem:[#allocation2 + $0x430] ss:$8 sps:$4 sm:$0xff]   ;;  %v7211_v60 = vld [vmem:[#allocation2 + $0xc40] ss:$8 sps:$4 sm:$0xff]   ;;  %v5930_v23 = vrot.slane %v7625_v8, 10 }
 0x138   :  { %4338 = vmatpush1.bf16.msra.mxu0 %v7187_v39  ;;  %1728 = vmatprep.subr.bf16.mxu1 %v7192_v36  ;;  %v3814_v39 = vor.u32 %v3813_v41, %v3812_v9  ;;  %v7210_v36 = vld [vmem:[#allocation2 + $0x444] ss:$8 sps:$4 sm:$0xff]   ;;  %v1482_v61 = vrot.slane %v1480_v11, 4  ;;  %v8214_v41 = vld [vmem:[%s8622_s0 + $0x18] sm:$0xff]  ;;  %v7247_v8 = vld [vmem:[#allocation2 + $0xca0] ss:$8 sps:$4 sm:$0xff]  }
 0x139   :  { %4339 = vmatprep.subr.bf16.mxu0 %v7195_v57  ;;  %1425 = vmatprep.mubr.bf16.mxu1 %v5893_v42  ;;  %v7213_v57 = vld [vmem:[#allocation2 + $0xc44] ss:$8 sps:$4 sm:$0xff]   ;;  %v1157_v63 = vsel %vm8122_vm8, %v1151_v50, %v1156_v28  ;;  %v7217_v28 = vld [vmem:[#allocation2 + $0xc50] ss:$8 sps:$4 sm:$0xff]   ;;  %v7220_v50 = vld [vmem:[#allocation2 + $0x460] ss:$8 sps:$4 sm:$0xff]  }
 0x13a   :  { %4071 = vmatprep.mubr.bf16.mxu0 %v6219_v18  ;;  %v7623_v42 = vld [vmem:[%s8622_s0 + $0x8] sm:$0xff] }
 0x13b   :  { %1729 = vmatpush1.bf16.msra.mxu1 %v7190_v4  ;;  %v1477_v18 = vrot.slane %v7623_v42, 6  ;;  %v7208_v4 = vld [vmem:[#allocation2 + $0x440] ss:$8 sps:$4 sm:$0xff]   ;;  %v7222_v9 = vld [vmem:[#allocation2 + $0x464] ss:$8 sps:$4 sm:$0xff]  }
 0x13c   :  { %4340 = vmatpush1.bf16.msra.mxu0 %v7193_v3  ;;  %1730 = vmatprep.subr.bf16.mxu1 %v7198_v32  ;;  %v3815_v3 = vsel %vm8122_vm8, %v3809_v40, %v3814_v39  ;;  %v7216_v32 = vld [vmem:[#allocation2 + $0x454] ss:$8 sps:$4 sm:$0xff]  }
 0x13d   :  { %4341 = vmatprep.subr.bf16.mxu0 %v7201_v5  ;;  %v7219_v5 = vld [vmem:[#allocation2 + $0xc54] ss:$8 sps:$4 sm:$0xff]   ;;  %v8226_v40 = vsel %vm8219_vm11, %v5930_v23, %v1477_v18 }
 0x13e   :  { %1426 = vmatmul.mubr.bf16.gmra.mrb[4].mxu1 %v5892_v6  ;;  %v5897_v6 = vcombine.high %v8191_v62, %v1157_v63  ;;  %v7252_v23 = vld [vmem:[#allocation2 + $0x4b4] ss:$8 sps:$4 sm:$0xff]  }
 0x13f   :  { %4072 = vmatmul.mubr.bf16.gmra.mrb[4].mxu0 %v6218_v7  ;;  %1731 = vmatpush1.bf16.msra.mxu1 %v7196_v25  ;;  %v7214_v7 = vld [vmem:[#allocation2 + $0x450] ss:$8 sps:$4 sm:$0xff]   ;;  %v6223_v25 = vcombine.high %v1157_v63, %v3815_v3 }
 0x140   :  { %4342 = vmatpush1.bf16.msra.mxu0 %v7199_v26  ;;  %1732 = vmatprep.subr.bf16.mxu1 %v7204_v29  ;;  %v1479_v26 = vrot.slane %v1477_v18, 4  ;;  %v1483_v29 = vrot.slane %v8214_v41, 6  ;;  %v7226_v18 = vld [vmem:[#allocation2 + $0x470] ss:$8 sps:$4 sm:$0xff]  }
 0x141   :  { %4343 = vmatprep.subr.bf16.mxu0 %v7207_v59  ;;  %1435 = vmatprep.mubr.bf16.mxu1 %v5895_v47  ;;  %v7225_v47 = vld [vmem:[#allocation2 + $0xc64] ss:$8 sps:$4 sm:$0xff]  }
 0x142   :  { %4081 = vmatprep.mubr.bf16.mxu0 %v6221_v30  ;;  %v5896_v30 = vcombine.low %v8191_v62, %v1157_v63  ;;  %v8230_v39 = vsel %vm8219_vm11, %v1479_v26, %v1480_v11  ;;  %v7228_v62 = vld [vmem:[#allocation2 + $0x474] ss:$8 sps:$4 sm:$0xff]   ;;  %v7234_v11 = vld [vmem:[#allocation2 + $0x484] ss:$8 sps:$4 sm:$0xff]  }
 0x143   :  { %1733 = vmatpush1.bf16.msra.mxu1 %v7202_v33  ;;  %v7223_v33 = vld [vmem:[#allocation2 + $0xc60] ss:$8 sps:$4 sm:$0xff]   ;;  %v7255_v26 = vld [vmem:[#allocation2 + $0xcb4] ss:$8 sps:$4 sm:$0xff]  }
 0x144   :  { %4344 = vmatpush1.bf16.msra.mxu0 %v7205_v38  ;;  %1734 = vmatprep.subr.bf16.mxu1 %v7210_v36  ;;  %v6222_v38 = vcombine.low %v1157_v63, %v3815_v3  ;;  %v8236_v36 = vsel %vm8219_vm11, %v1482_v61, %v1483_v29  ;;  %v5933_v63 = vcombine.high %v8226_v40, %v8230_v39  ;;  %v7243_v3 = vld [vmem:[#allocation2 + $0xc94] ss:$8 sps:$4 sm:$0xff]   ;;  %v7250_v61 = vld [vmem:[#allocation2 + $0x4b0] ss:$8 sps:$4 sm:$0xff]  }
 0x145   :  { %4345 = vmatprep.subr.bf16.mxu0 %v7213_v57  ;;  %v7231_v57 = vld [vmem:[#allocation2 + $0xc74] ss:$8 sps:$4 sm:$0xff]   ;;  %v6257_v42 = vcombine.high %v8230_v39, %v8236_v36 }
 0x146   :  { %1436 = vmatmul.mubr.bf16.gmra.mrb[8].mxu1 %v5894_v48  ;;  %v7235_v48 = vld [vmem:[#allocation2 + $0xc80] ss:$8 sps:$4 sm:$0xff]  }
 0x147   :  { %4082 = vmatmul.mubr.bf16.gmra.mrb[8].mxu0 %v6220_v31  ;;  %1735 = vmatpush1.bf16.msra.mxu1 %v7208_v4  ;;  %v7237_v4 = vld [vmem:[#allocation2 + $0xc84] ss:$8 sps:$4 sm:$0xff]   ;;  %v7240_v31 = vld [vmem:[#allocation2 + $0x494] ss:$8 sps:$4 sm:$0xff]  }
 0x148   :  { %4346 = vmatpush1.bf16.msra.mxu0 %v7211_v60  ;;  %1736 = vmatprep.subr.bf16.mxu1 %v7216_v32  ;;  %v7232_v60 = vld [vmem:[#allocation2 + $0x480] ss:$8 sps:$4 sm:$0xff]   ;;  %v7238_v32 = vld [vmem:[#allocation2 + $0x490] ss:$8 sps:$4 sm:$0xff]  }
 0x149   :  { %4347 = vmatprep.subr.bf16.mxu0 %v7219_v5  ;;  %1445 = vmatprep.mubr.bf16.mxu1 %v5897_v6  ;;  %v7241_v5 = vld [vmem:[#allocation2 + $0xc90] ss:$8 sps:$4 sm:$0xff]   ;;  %v7246_v6 = vld [vmem:[#allocation2 + $0x4a4] ss:$8 sps:$4 sm:$0xff]  }
 0x14a   :  { %4091 = vmatprep.mubr.bf16.mxu0 %v6223_v25  ;;  %v7244_v25 = vld [vmem:[#allocation2 + $0x4a0] ss:$8 sps:$4 sm:$0xff]  }
 0x14b   :  { %1737 = vmatpush1.bf16.msra.mxu1 %v7214_v7  ;;  %v7249_v7 = vld [vmem:[#allocation2 + $0xca4] ss:$8 sps:$4 sm:$0xff]  }
 0x14c   :  { %4348 = vmatpush1.bf16.msra.mxu0 %v7217_v28  ;;  %1738 = vmatprep.subr.bf16.mxu1 %v7222_v9  ;;  %v7253_v28 = vld [vmem:[#allocation2 + $0xcb0] ss:$8 sps:$4 sm:$0xff]   ;;  %v7258_v9 = vld [vmem:[#allocation2 + $0x4c4] ss:$8 sps:$4 sm:$0xff]  }
 0x14d   :  { %4349 = vmatprep.subr.bf16.mxu0 %v7225_v47  ;;  %v7261_v47 = vld [vmem:[#allocation2 + $0xcc4] ss:$8 sps:$4 sm:$0xff]  }
 0x14e   :  { %1446 = vmatmul.mubr.bf16.gmra.mrb[12].mxu1 %v5896_v30  ;;  %v7256_v30 = vld [vmem:[#allocation2 + $0x4c0] ss:$8 sps:$4 sm:$0xff]  }
 0x14f   :  { %4092 = vmatmul.mubr.bf16.gmra.mrb[12].mxu0 %v6222_v38  ;;  %1739 = vmatpush1.bf16.msra.mxu1 %v7220_v50  ;;  %v7259_v50 = vld [vmem:[#allocation2 + $0xcc0] ss:$8 sps:$4 sm:$0xff]   ;;  %v7267_v38 = vld [vmem:[#allocation2 + $0xcd4] ss:$8 sps:$4 sm:$0xff]  }
 0x150   :  { %4350 = vmatpush1.bf16.msra.mxu0 %v7223_v33  ;;  %1740 = vmatprep.subr.bf16.mxu1 %v7228_v62  ;;  %v7264_v33 = vld [vmem:[#allocation2 + $0x4d4] ss:$8 sps:$4 sm:$0xff]   ;;  %v7262_v62 = vld [vmem:[#allocation2 + $0x4d0] ss:$8 sps:$4 sm:$0xff]  }
 0x151   :  { %4351 = vmatprep.subr.bf16.mxu0 %v7231_v57  ;;  %1758 = vmatprep.mubr.bf16.mxu1 %v5933_v63  ;;  %v7265_v57 = vld [vmem:[#allocation2 + $0xcd0] ss:$8 sps:$4 sm:$0xff]   ;;  %v7270_v63 = vld [vmem:[#allocation2 + $0x4e4] ss:$8 sps:$4 sm:$0xff]  }
 0x152   :  { %4369 = vmatprep.mubr.bf16.mxu0 %v6257_v42  ;;  %v7273_v42 = vld [vmem:[#allocation2 + $0xce4] ss:$8 sps:$4 sm:$0xff]  }
 0x153   :  { %1741 = vmatpush1.bf16.msra.mxu1 %v7226_v18  ;;  %v8245_v18 = vld [vmem:[%s8622_s0 + $0x20] sm:$0xff] }
 0x154   :  { %4352 = vmatpush1.bf16.msra.mxu0 %v7229_v10  ;;  %1742 = vmatprep.subr.bf16.mxu1 %v7234_v11  ;;  %v1486_v10 = vrot.slane %v8245_v18, 6  ;;  %v7268_v11 = vld [vmem:[#allocation2 + $0x4e0] ss:$8 sps:$4 sm:$0xff]  }
 0x155   :  { %4353 = vmatprep.subr.bf16.mxu0 %v7237_v4  ;;  %v7271_v4 = vld [vmem:[#allocation2 + $0xce0] ss:$8 sps:$4 sm:$0xff]  }
 0x157   :  { %1743 = vmatpush1.bf16.msra.mxu1 %v7232_v60  ;;  %v7276_v60 = vld [vmem:[#allocation2 + $0x4f4] ss:$8 sps:$4 sm:$0xff]  }
 0x158   :  { %4354 = vmatpush1.bf16.msra.mxu0 %v7235_v48  ;;  %1744 = vmatprep.subr.bf16.mxu1 %v7240_v31  ;;  %v7279_v48 = vld [vmem:[#allocation2 + $0xcf4] ss:$8 sps:$4 sm:$0xff]   ;;  %v1485_v31 = vrot.slane %v1483_v29, 4 }
 0x159   :  { %4355 = vmatprep.subr.bf16.mxu0 %v7243_v3  ;;  %v4118_v3 = vrot.slane %v1486_v10, 4 }
 0x15a   :  { %v1487_v29 = vsel %vm8219_vm11, %v1485_v31, %v1486_v10  ;;  %v7286_v10 = vld [vmem:[#allocation2 + $0x510] ss:$8 sps:$4 sm:$0xff]  }
 0x15b   :  { %1745 = vmatpush1.bf16.msra.mxu1 %v7238_v32  ;;  %v4119_v32 = vrot.slane %v8149_v34, 6  ;;  %v6256_v34 = vcombine.low %v8230_v39, %v8236_v36 }
 0x15c   :  { %4356 = vmatpush1.bf16.msra.mxu0 %v7241_v5  ;;  %1746 = vmatprep.subr.bf16.mxu1 %v7246_v6  ;;  %v7274_v5 = vld [vmem:[#allocation2 + $0x4f0] ss:$8 sps:$4 sm:$0xff]  }
 0x15d   :  { %4357 = vmatprep.subr.bf16.mxu0 %v7249_v7  ;;  %v7277_v6 = vld [vmem:[#allocation2 + $0xcf0] ss:$8 sps:$4 sm:$0xff]   ;;  %v7282_v7 = vld [vmem:[#allocation2 + $0x504] ss:$8 sps:$4 sm:$0xff]  }
 0x15f   :  { %1747 = vmatpush1.bf16.msra.mxu1 %v7244_v25  ;;  %v7285_v25 = vld [vmem:[#allocation2 + $0xd04] ss:$8 sps:$4 sm:$0xff]  }
 0x160   :  { %4358 = vmatpush1.bf16.msra.mxu0 %v7247_v8  ;;  %1748 = vmatprep.subr.bf16.mxu1 %v7252_v23  ;;  %v5932_v8 = vcombine.low %v8226_v40, %v8230_v39  ;;  %v8256_v23 = vld [vmem:[%s8622_s0 + $0x38] sm:$0xff]  ;;  %v8268_v40 = vld [vmem:[%s8622_s0 + $0x40] sm:$0xff] }
 0x161   :  { %4359 = vmatprep.subr.bf16.mxu0 %v7255_v26  ;;  %v1490_v41 = vrot.slane %v8256_v23, 6  ;;  %v4120_v26 = vsel %vm8219_vm11, %v4118_v3, %v4119_v32  ;;  %v7288_v39 = vld [vmem:[#allocation2 + $0x514] ss:$8 sps:$4 sm:$0xff]   ;;  %v7292_v3 = vld [vmem:[#allocation2 + $0x520] ss:$8 sps:$4 sm:$0xff]  }
 0x163   :  { %1749 = vmatpush1.bf16.msra.mxu1 %v7250_v61  ;;  %v1493_v61 = vrot.slane %v8268_v40, 6 }
 0x164   :  { %4360 = vmatpush1.bf16.msra.mxu0 %v7253_v28  ;;  %1750 = vmatprep.subr.bf16.mxu1 %v7258_v9  ;;  %v7280_v28 = vld [vmem:[#allocation2 + $0x500] ss:$8 sps:$4 sm:$0xff]  }
 0x165   :  { %4361 = vmatprep.subr.bf16.mxu0 %v7261_v47  ;;  %v7283_v9 = vld [vmem:[#allocation2 + $0xd00] ss:$8 sps:$4 sm:$0xff]   ;;  %v7291_v47 = vld [vmem:[#allocation2 + $0xd14] ss:$8 sps:$4 sm:$0xff]  }
 0x167   :  { %1751 = vmatpush1.bf16.msra.mxu1 %v7256_v30  ;;  %v5935_v30 = vcombine.high %v8236_v36, %v1487_v29 }
 0x168   :  { %4362 = vmatpush1.bf16.msra.mxu0 %v7259_v50  ;;  %1752 = vmatprep.subr.bf16.mxu1 %v7264_v33  ;;  %v6259_v50 = vcombine.high %v1487_v29, %v4120_v26  ;;  %v8275_v33 = vld [vmem:[%s8622_s0 + $0x30] sm:$0xff] }
 0x169   :  { %4363 = vmatprep.subr.bf16.mxu0 %v7267_v38  ;;  %v5931_v38 = vrot.slane %v8275_v33, 10 }
 0x16b   :  { %1753 = vmatpush1.bf16.msra.mxu1 %v7262_v62  ;;  %v1492_v62 = vrot.slane %v1490_v41, 4  ;;  %v1491_v32 = vsel %vm8219_vm11, %v5931_v38, %v1490_v41  ;;  %v1828_v38 = vrot.slane %v7812_v56, 7 }
 0x16c   :  { %4364 = vmatpush1.bf16.msra.mxu0 %v7265_v57  ;;  %1754 = vmatprep.subr.bf16.mxu1 %v7270_v63  ;;  %v1495_v57 = vrot.slane %v1493_v61, 4  ;;  %v8281_v63 = vld [vmem:[%s8622_s0 + $0x48] sm:$0xff] }
 0x16d   :  { %4365 = vmatprep.subr.bf16.mxu0 %v7273_v42  ;;  %v1496_v42 = vrot.slane %v8281_v63, 6 }
 0x16f   :  { %1755 = vmatpush1.bf16.msra.mxu1 %v7268_v11  ;;  %v7289_v11 = vld [vmem:[#allocation2 + $0xd10] ss:$8 sps:$4 sm:$0xff]  }
 0x170   :  { %4366 = vmatpush1.bf16.msra.mxu0 %v7271_v4  ;;  %1756 = vmatprep.subr.bf16.mxu1 %v7276_v60  ;;  %v7294_v4 = vld [vmem:[#allocation2 + $0x524] ss:$8 sps:$4 sm:$0xff]  }
 0x171   :  { %4367 = vmatprep.subr.bf16.mxu0 %v7279_v48  ;;  %v7297_v60 = vld [vmem:[#allocation2 + $0xd24] ss:$8 sps:$4 sm:$0xff]   ;;  %v8287_v48 = vld [vmem:[%s8622_s0 + $0x50] sm:$0xff] }
 0x172   :  { %v1499_v31 = vrot.slane %v8287_v48, 6 }
 0x173   :  { %1757 = vmatpush1.bf16.msra.mxu1 %v7274_v5  ;;  %v1494_v5 = vsel %vm8219_vm11, %v1492_v62, %v1493_v61  ;;  %v7298_v62 = vld [vmem:[#allocation2 + $0x530] ss:$8 sps:$4 sm:$0xff]  }
 0x174   :  { %4368 = vmatpush1.bf16.msra.mxu0 %v7277_v6  ;;  %2089 = vmatprep.subr.bf16.mxu1 %v7282_v7  ;;  %v5934_v6 = vcombine.low %v8236_v36, %v1487_v29  ;;  %v6258_v7 = vcombine.low %v1487_v29, %v4120_v26  ;;  %v4121_v41 = vrot.slane %v1499_v31, 4  ;;  %v1818_v36 = vrot.slane %v7800_v52, 6 }
 0x175   :  { %4649 = vmatprep.subr.bf16.mxu0 %v7285_v25  ;;  %v8297_v25 = vsel %vm8219_vm11, %v1495_v57, %v1496_v42  ;;  %v1819_v29 = vrot.slane %v7803_v53, 7  ;;  %v1822_v26 = vrot.slane %v7809_v55, 6  ;;  %v7306_v57 = vld [vmem:[#allocation2 + $0x544] ss:$8 sps:$4 sm:$0xff]  }
 0x176   :  { %1759 = vmatmul.mubr.bf16.vlgmr.msra.gmra.mrb[0].mxu1 %v5932_v8  ;;  %v7295_v8 = vld [vmem:[#allocation2 + $0xd20] ss:$8 sps:$4 sm:$0xff]   ;;  %v6261_v61 = vcombine.high %v1494_v5, %v8297_v25  ;;  %v6260_v53 = vcombine.low %v1494_v5, %v8297_v25 }
 0x177   :  { %4370 = vmatmul.mubr.bf16.vlgmr.msra.gmra.mrb[0].mxu0 %v6256_v34  ;;  %2090 = vmatpush1.bf16.msra.mxu1 %v7280_v28  ;;  %v7300_v34 = vld [vmem:[#allocation2 + $0x534] ss:$8 sps:$4 sm:$0xff]  }
 0x178   :  { %4650 = vmatpush1.bf16.msra.mxu0 %v7283_v9  ;;  %2091 = vmatprep.subr.bf16.mxu1 %v7288_v39  ;;  %v7303_v28 = vld [vmem:[#allocation2 + $0xd34] ss:$8 sps:$4 sm:$0xff]   ;;  %v5937_v9 = vcombine.high %v1491_v32, %v1494_v5  ;;  %v1498_v39 = vrot.slane %v1496_v42, 4  ;;  %v7309_v42 = vld [vmem:[#allocation2 + $0xd44] ss:$8 sps:$4 sm:$0xff]  }
 0x179   :  { %4651 = vmatprep.subr.bf16.mxu0 %v7291_v47  ;;  %1768 = vmatprep.mubr.bf16.mxu1 %v5935_v30  ;;  %v4122_v47 = vrot.slane %v8179_v2, 6  ;;  %v1823_v30 = vrot.slane %v7806_v54, 7  ;;  %v7301_v2 = vld [vmem:[#allocation2 + $0xd30] ss:$8 sps:$4 sm:$0xff]  }
 0x17a   :  { %4379 = vmatprep.mubr.bf16.mxu0 %v6259_v50  ;;  %v1827_v50 = vrot.slane %v7840_v22, 6 }
 0x17b   :  { %2092 = vmatpush1.bf16.msra.mxu1 %v7286_v10  ;;  %v5936_v10 = vcombine.low %v1491_v32, %v1494_v5  ;;  %v7312_v32 = vld [vmem:[#allocation2 + $0x554] ss:$8 sps:$4 sm:$0xff]  }
 0x17c   :  { %4652 = vmatpush1.bf16.msra.mxu0 %v7289_v11  ;;  %2093 = vmatprep.subr.bf16.mxu1 %v7294_v4  ;;  %v7304_v11 = vld [vmem:[#allocation2 + $0x540] ss:$8 sps:$4 sm:$0xff]   ;;  %v7315_v5 = vld [vmem:[#allocation2 + $0xd54] ss:$8 sps:$4 sm:$0xff]  }
 0x17d   :  { %4653 = vmatprep.subr.bf16.mxu0 %v7297_v60  ;;  %v7307_v4 = vld [vmem:[#allocation2 + $0xd40] ss:$8 sps:$4 sm:$0xff]   ;;  %v1500_v60 = vsel %vm8219_vm11, %v1498_v39, %v1499_v31 }
 0x17e   :  { %1769 = vmatmul.mubr.bf16.gmra.mrb[4].mxu1 %v5934_v6  ;;  %v1820_v6 = vor.u32 %v1819_v29, %v1818_v36  ;;  %v5939_v31 = vcombine.high %v8297_v25, %v1500_v60  ;;  %v7313_v36 = vld [vmem:[#allocation2 + $0xd50] ss:$8 sps:$4 sm:$0xff]  }
 0x17f   :  { %4380 = vmatmul.mubr.bf16.gmra.mrb[4].mxu0 %v6258_v7  ;;  %2094 = vmatpush1.bf16.msra.mxu1 %v7292_v3  ;;  %v4123_v3 = vsel %vm8219_vm11, %v4121_v41, %v4122_v47  ;;  %v1824_v7 = vor.u32 %v1823_v30, %v1822_v26  ;;  %v7318_v26 = vld [vmem:[#allocation2 + $0x564] ss:$8 sps:$4 sm:$0xff]  }
 0x180   :  { %4654 = vmatpush1.bf16.msra.mxu0 %v7295_v8  ;;  %2095 = vmatprep.subr.bf16.mxu1 %v7300_v34  ;;  %v1829_v8 = vor.u32 %v1828_v38, %v1827_v50  ;;  %v1832_v34 = vrot.slane %v7846_v27, 6  ;;  %v6263_v59 = vcombine.high %v1500_v60, %v4123_v3  ;;  %v1821_v39 = vrot.slane %v1820_v6, 4  ;;  %v7321_v30 = vld [vmem:[#allocation2 + $0xd64] ss:$8 sps:$4 sm:$0xff]  }
 0x181   :  { %4655 = vmatprep.subr.bf16.mxu0 %v7303_v28  ;;  %1778 = vmatprep.mubr.bf16.mxu1 %v5937_v9  ;;  %v1833_v28 = vrot.slane %v7843_v24, 7  ;;  %v7310_v9 = vld [vmem:[#allocation2 + $0x550] ss:$8 sps:$4 sm:$0xff]   ;;  %v1826_v41 = vrot.slane %v1824_v7, 4  ;;  %v5938_v50 = vcombine.low %v8297_v25, %v1500_v60  ;;  %v6262_v38 = vcombine.low %v1500_v60, %v4123_v3  ;;  %v7324_v25 = vld [vmem:[#allocation2 + $0x574] ss:$8 sps:$4 sm:$0xff]  }
 0x182   :  { %4389 = vmatprep.mubr.bf16.mxu0 %v6261_v61  ;;  %v1831_v47 = vrot.slane %v1829_v8, 4  ;;  %v7322_v60 = vld [vmem:[#allocation2 + $0x570] ss:$8 sps:$4 sm:$0xff]   ;;  %v7330_v6 = vld [vmem:[#allocation2 + $0x584] ss:$8 sps:$4 sm:$0xff]  }
 0x183   :  { %2096 = vmatpush1.bf16.msra.mxu1 %v7298_v62  ;;  %v8315_v61 = vor.u32 %v1833_v28, %v1832_v34  ;;  %v8324_v62 = vsel %vm8317_vm14, %v1821_v39, %v1824_v7  ;;  %v7325_v3 = vld [vmem:[#allocation2 + $0xd70] ss:$8 sps:$4 sm:$0xff]   ;;  %v7333_v7 = vld [vmem:[#allocation2 + $0xd84] ss:$8 sps:$4 sm:$0xff]   ;;  %v7331_v34 = vld [vmem:[#allocation2 + $0xd80] ss:$8 sps:$4 sm:$0xff]  }
 0x184   :  { %4656 = vmatpush1.bf16.msra.mxu0 %v7301_v2  ;;  %2097 = vmatprep.subr.bf16.mxu1 %v7306_v57  ;;  %v8328_v2 = vsel %vm8317_vm14, %v1826_v41, %v1829_v8  ;;  %v7328_v8 = vld [vmem:[#allocation2 + $0x580] ss:$8 sps:$4 sm:$0xff]   ;;  %v7336_v28 = vld [vmem:[#allocation2 + $0x594] ss:$8 sps:$4 sm:$0xff]  }
 0x185   :  { %4657 = vmatprep.subr.bf16.mxu0 %v7309_v42  ;;  %v8333_v57 = vsel %vm8317_vm14, %v1831_v47, %v8315_v61  ;;  %v7316_v42 = vld [vmem:[#allocation2 + $0x560] ss:$8 sps:$4 sm:$0xff]   ;;  %v7348_v47 = vld [vmem:[#allocation2 + $0x5b4] ss:$8 sps:$4 sm:$0xff]  }
 0x186   :  { %1779 = vmatmul.mubr.bf16.gmra.mrb[8].mxu1 %v5936_v10  ;;  %v7319_v10 = vld [vmem:[#allocation2 + $0xd60] ss:$8 sps:$4 sm:$0xff]  }
 0x187   :  { %4390 = vmatmul.mubr.bf16.gmra.mrb[8].mxu0 %v6260_v53  ;;  %2098 = vmatpush1.bf16.msra.mxu1 %v7304_v11  ;;  %v7327_v53 = vld [vmem:[#allocation2 + $0xd74] ss:$8 sps:$4 sm:$0xff]   ;;  %v5973_v11 = vcombine.high %v8324_v62, %v8328_v2  ;;  %v7340_v39 = vld [vmem:[#allocation2 + $0x5a0] ss:$8 sps:$4 sm:$0xff]  }
 0x188   :  { %4658 = vmatpush1.bf16.msra.mxu0 %v7307_v4  ;;  %2099 = vmatprep.subr.bf16.mxu1 %v7312_v32  ;;  %v6297_v4 = vcombine.high %v8328_v2, %v8333_v57  ;;  %v7339_v32 = vld [vmem:[#allocation2 + $0xd94] ss:$8 sps:$4 sm:$0xff]   ;;  %v7343_v41 = vld [vmem:[#allocation2 + $0xda0] ss:$8 sps:$4 sm:$0xff]  }
 0x189   :  { %4659 = vmatprep.subr.bf16.mxu0 %v7315_v5  ;;  %1788 = vmatprep.mubr.bf16.mxu1 %v5939_v31  ;;  %v7334_v5 = vld [vmem:[#allocation2 + $0x590] ss:$8 sps:$4 sm:$0xff]   ;;  %v7342_v31 = vld [vmem:[#allocation2 + $0x5a4] ss:$8 sps:$4 sm:$0xff]  }
 0x18a   :  { %4399 = vmatprep.mubr.bf16.mxu0 %v6263_v59  ;;  %v7345_v59 = vld [vmem:[#allocation2 + $0xda4] ss:$8 sps:$4 sm:$0xff]  }
 0x18b   :  { %2100 = vmatpush1.bf16.msra.mxu1 %v7310_v9  ;;  %v7337_v9 = vld [vmem:[#allocation2 + $0xd90] ss:$8 sps:$4 sm:$0xff]  }
 0x18c   :  { %4660 = vmatpush1.bf16.msra.mxu0 %v7313_v36  ;;  %2101 = vmatprep.subr.bf16.mxu1 %v7318_v26  ;;  %v7351_v36 = vld [vmem:[#allocation2 + $0xdb4] ss:$8 sps:$4 sm:$0xff]   ;;  %v7346_v26 = vld [vmem:[#allocation2 + $0x5b0] ss:$8 sps:$4 sm:$0xff]  }
 0x18d   :  { %4661 = vmatprep.subr.bf16.mxu0 %v7321_v30  ;;  %v7349_v30 = vld [vmem:[#allocation2 + $0xdb0] ss:$8 sps:$4 sm:$0xff]  }
 0x18e   :  { %1789 = vmatmul.mubr.bf16.gmra.mrb[12].mxu1 %v5938_v50  ;;  %v7354_v50 = vld [vmem:[#allocation2 + $0x5c4] ss:$8 sps:$4 sm:$0xff]  }
 0x18f   :  { %4400 = vmatmul.mubr.bf16.gmra.mrb[12].mxu0 %v6262_v38  ;;  %2102 = vmatpush1.bf16.msra.mxu1 %v7316_v42  ;;  %v7357_v38 = vld [vmem:[#allocation2 + $0xdc4] ss:$8 sps:$4 sm:$0xff]   ;;  %v7352_v42 = vld [vmem:[#allocation2 + $0x5c0] ss:$8 sps:$4 sm:$0xff]  }
 0x190   :  { %4662 = vmatpush1.bf16.msra.mxu0 %v7319_v10  ;;  %2103 = vmatprep.subr.bf16.mxu1 %v7324_v25  ;;  %v7355_v10 = vld [vmem:[#allocation2 + $0xdc0] ss:$8 sps:$4 sm:$0xff]   ;;  %v7360_v25 = vld [vmem:[#allocation2 + $0x5d4] ss:$8 sps:$4 sm:$0xff]  }
 0x191   :  { %4663 = vmatprep.subr.bf16.mxu0 %v7327_v53  ;;  %2121 = vmatprep.mubr.bf16.mxu1 %v5973_v11  ;;  %v7363_v53 = vld [vmem:[#allocation2 + $0xdd4] ss:$8 sps:$4 sm:$0xff]   ;;  %v1837_v11 = vrot.slane %v7977_v17, 6 }
 0x192   :  { %4681 = vmatprep.mubr.bf16.mxu0 %v6297_v4  ;;  %v1838_v4 = vrot.slane %v7860_v58, 7 }
 0x193   :  { %2104 = vmatpush1.bf16.msra.mxu1 %v7322_v60  ;;  %v7358_v60 = vld [vmem:[#allocation2 + $0x5d0] ss:$8 sps:$4 sm:$0xff]  }
 0x194   :  { %4664 = vmatpush1.bf16.msra.mxu0 %v7325_v3  ;;  %2105 = vmatprep.subr.bf16.mxu1 %v7330_v6  ;;  %v7361_v3 = vld [vmem:[#allocation2 + $0xdd0] ss:$8 sps:$4 sm:$0xff]   ;;  %v7366_v6 = vld [vmem:[#allocation2 + $0x5e4] ss:$8 sps:$4 sm:$0xff]  }
 0x195   :  { %4665 = vmatprep.subr.bf16.mxu0 %v7333_v7  ;;  %v7369_v7 = vld [vmem:[#allocation2 + $0xde4] ss:$8 sps:$4 sm:$0xff]  }
 0x197   :  { %2106 = vmatpush1.bf16.msra.mxu1 %v7328_v8  ;;  %v1839_v8 = vor.u32 %v1838_v4, %v1837_v11 }
 0x198   :  { %4666 = vmatpush1.bf16.msra.mxu0 %v7331_v34  ;;  %2107 = vmatprep.subr.bf16.mxu1 %v7336_v28  ;;  %v4427_v34 = vrot.slane %v8152_v20, 6  ;;  %v4428_v28 = vrot.slane %v7988_v46, 7 }
 0x199   :  { %4667 = vmatprep.subr.bf16.mxu0 %v7339_v32  ;;  %v7364_v32 = vld [vmem:[#allocation2 + $0x5e0] ss:$8 sps:$4 sm:$0xff]  }
 0x19b   :  { %2108 = vmatpush1.bf16.msra.mxu1 %v7334_v5  ;;  %v7367_v5 = vld [vmem:[#allocation2 + $0xde0] ss:$8 sps:$4 sm:$0xff]  }
 0x19c   :  { %4668 = vmatpush1.bf16.msra.mxu0 %v7337_v9  ;;  %2109 = vmatprep.subr.bf16.mxu1 %v7342_v31  ;;  %v7372_v9 = vld [vmem:[#allocation2 + $0x5f4] ss:$8 sps:$4 sm:$0xff]  }
 0x19d   :  { %4669 = vmatprep.subr.bf16.mxu0 %v7345_v59  ;;  %v7375_v31 = vld [vmem:[#allocation2 + $0xdf4] ss:$8 sps:$4 sm:$0xff]   ;;  %v1836_v59 = vrot.slane %v8315_v61, 4  ;;  %v5972_v61 = vcombine.low %v8324_v62, %v8328_v2  ;;  %v7376_v62 = vld [vmem:[#allocation2 + $0x600] ss:$8 sps:$4 sm:$0xff]  }
 0x19f   :  { %2110 = vmatpush1.bf16.msra.mxu1 %v7340_v39  ;;  %v1841_v39 = vrot.slane %v7897_v13, 6  ;;  %v1840_v11 = vsel %vm8317_vm14, %v1836_v59, %v1839_v8 }
 0x1a0   :  { %4670 = vmatpush1.bf16.msra.mxu0 %v7343_v41  ;;  %2111 = vmatprep.subr.bf16.mxu1 %v7348_v47  ;;  %v1842_v41 = vrot.slane %v7900_v14, 7  ;;  %v1845_v47 = vrot.slane %v7906_v16, 6  ;;  %v7378_v14 = vld [vmem:[#allocation2 + $0x604] ss:$8 sps:$4 sm:$0xff]  }
 0x1a1   :  { %4671 = vmatprep.subr.bf16.mxu0 %v7351_v36  ;;  %v1846_v36 = vrot.slane %v7903_v15, 7 }
 0x1a2   :  { %v1843_v4 = vor.u32 %v1842_v41, %v1841_v39  ;;  %v1860_v41 = vrot.slane %v7998_v21, 6 }
 0x1a3   :  { %2112 = vmatpush1.bf16.msra.mxu1 %v7346_v26  ;;  %v4426_v26 = vrot.slane %v1839_v8, 4  ;;  %v5975_v8 = vcombine.high %v8333_v57, %v1840_v11 }
 0x1a4   :  { %4672 = vmatpush1.bf16.msra.mxu0 %v7349_v30  ;;  %2113 = vmatprep.subr.bf16.mxu1 %v7354_v50  ;;  %v4429_v30 = vor.u32 %v4428_v28, %v4427_v34  ;;  %v1850_v50 = vrot.slane %v7921_v35, 6  ;;  %v1856_v34 = vrot.slane %v7935_v43, 7  ;;  %v7379_v28 = vld [vmem:[#allocation2 + $0xe00] ss:$8 sps:$4 sm:$0xff]  }
 0x1a5   :  { %4673 = vmatprep.subr.bf16.mxu0 %v7357_v38  ;;  %v1851_v38 = vrot.slane %v7909_v19, 7 }
 0x1a7   :  { %2114 = vmatpush1.bf16.msra.mxu1 %v7352_v42  ;;  %v7370_v42 = vld [vmem:[#allocation2 + $0x5f0] ss:$8 sps:$4 sm:$0xff]  }
 0x1a8   :  { %4674 = vmatpush1.bf16.msra.mxu0 %v7355_v10  ;;  %2115 = vmatprep.subr.bf16.mxu1 %v7360_v25  ;;  %v7373_v10 = vld [vmem:[#allocation2 + $0xdf0] ss:$8 sps:$4 sm:$0xff]   ;;  %v7381_v25 = vld [vmem:[#allocation2 + $0xe04] ss:$8 sps:$4 sm:$0xff]  }
 0x1a9   :  { %4675 = vmatprep.subr.bf16.mxu0 %v7363_v53  ;;  %v6296_v53 = vcombine.low %v8328_v2, %v8333_v57  ;;  %v7384_v2 = vld [vmem:[#allocation2 + $0x614] ss:$8 sps:$4 sm:$0xff]  }
 0x1ab   :  { %2116 = vmatpush1.bf16.msra.mxu1 %v7358_v60  ;;  %v1847_v60 = vor.u32 %v1846_v36, %v1845_v47  ;;  %v1861_v47 = vrot.slane %v7941_v45, 7  ;;  %v7382_v36 = vld [vmem:[#allocation2 + $0x610] ss:$8 sps:$4 sm:$0xff]  }
 0x1ac   :  { %4676 = vmatpush1.bf16.msra.mxu0 %v7361_v3  ;;  %2117 = vmatprep.subr.bf16.mxu1 %v7366_v6  ;;  %v4430_v3 = vsel %vm8317_vm14, %v4426_v26, %v4429_v30  ;;  %v1852_v6 = vor.u32 %v1851_v38, %v1850_v50  ;;  %v7385_v26 = vld [vmem:[#allocation2 + $0xe10] ss:$8 sps:$4 sm:$0xff]   ;;  %v7390_v30 = vld [vmem:[#allocation2 + $0x624] ss:$8 sps:$4 sm:$0xff]   ;;  %v5974_v38 = vcombine.low %v8333_v57, %v1840_v11  ;;  %v7388_v57 = vld [vmem:[#allocation2 + $0x620] ss:$8 sps:$4 sm:$0xff]  }
 0x1ad   :  { %4677 = vmatprep.subr.bf16.mxu0 %v7369_v7  ;;  %v1855_v7 = vrot.slane %v7938_v44, 6  ;;  %v7393_v50 = vld [vmem:[#allocation2 + $0xe24] ss:$8 sps:$4 sm:$0xff]  }
 0x1ae   :  { %v1854_v59 = vrot.slane %v1852_v6, 4 }
 0x1af   :  { %2118 = vmatpush1.bf16.msra.mxu1 %v7364_v32  ;;  %v7387_v32 = vld [vmem:[#allocation2 + $0xe14] ss:$8 sps:$4 sm:$0xff]   ;;  %v1857_v39 = vor.u32 %v1856_v34, %v1855_v7  ;;  %v7391_v7 = vld [vmem:[#allocation2 + $0xe20] ss:$8 sps:$4 sm:$0xff]  }
 0x1b0   :  { %4678 = vmatpush1.bf16.msra.mxu0 %v7367_v5  ;;  %2119 = vmatprep.subr.bf16.mxu1 %v7372_v9  ;;  %v6299_v5 = vcombine.high %v1840_v11, %v4430_v3  ;;  %v1844_v9 = vrot.slane %v1843_v4, 4  ;;  %v4433_v4 = vrot.slane %v8020_v49, 7 }
 0x1b1   :  { %4679 = vmatprep.subr.bf16.mxu0 %v7375_v31  ;;  %v1849_v31 = vrot.slane %v1847_v60, 4  ;;  %v1859_v34 = vrot.slane %v1857_v39, 4 }
 0x1b3   :  { %2120 = vmatpush1.bf16.msra.mxu1 %v7370_v42  ;;  %v6298_v42 = vcombine.low %v1840_v11, %v4430_v3  ;;  %v7396_v11 = vld [vmem:[#allocation2 + $0x634] ss:$8 sps:$4 sm:$0xff]  }
 0x1b4   :  { %4680 = vmatpush1.bf16.msra.mxu0 %v7373_v10  ;;  %2432 = vmatprep.subr.bf16.mxu1 %v7378_v14  ;;  %v1848_v10 = vsel %vm8317_vm14, %v1844_v9, %v1847_v60  ;;  %v8370_v14 = vsel %vm8317_vm14, %v1854_v59, %v1857_v39  ;;  %v7399_v60 = vld [vmem:[#allocation2 + $0xe34] ss:$8 sps:$4 sm:$0xff]  }
 0x1b5   :  { %4957 = vmatprep.subr.bf16.mxu0 %v7381_v25  ;;  %v1862_v25 = vor.u32 %v1861_v47, %v1860_v41  ;;  %v7633_v41 = vld [vmem:[%s8622_s0 + $0x8] sm:$0xff] }
 0x1b6   :  { %2122 = vmatmul.mubr.bf16.vlgmr.msra.gmra.mrb[0].mxu1 %v5972_v61  ;;  %v1853_v61 = vsel %vm8317_vm14, %v1849_v31, %v1852_v6  ;;  %v2183_v47 = vrot.slane %v7633_v41, 7  ;;  %v7418_v41 = vld [vmem:[#allocation2 + $0x670] ss:$8 sps:$4 sm:$0xff]  }
 0x1b7   :  { %4682 = vmatmul.mubr.bf16.vlgmr.msra.gmra.mrb[0].mxu0 %v6296_v53  ;;  %2433 = vmatpush1.bf16.msra.mxu1 %v7376_v62  ;;  %v4432_v53 = vrot.slane %v8182_v1, 6  ;;  %v5977_v3 = vcombine.high %v1848_v10, %v1853_v61  ;;  %v6301_v6 = vcombine.high %v1853_v61, %v8370_v14  ;;  %v4431_v62 = vrot.slane %v1862_v25, 4 }
 0x1b8   :  { %4958 = vmatpush1.bf16.msra.mxu0 %v7379_v28  ;;  %2434 = vmatprep.subr.bf16.mxu1 %v7384_v2  ;;  %v7394_v2 = vld [vmem:[#allocation2 + $0x630] ss:$8 sps:$4 sm:$0xff]   ;;  %v5976_v9 = vcombine.low %v1848_v10, %v1853_v61  ;;  %v6300_v31 = vcombine.low %v1853_v61, %v8370_v14  ;;  %v1863_v59 = vsel %vm8317_vm14, %v1859_v34, %v1862_v25  ;;  %v7635_v61 = vld [vmem:[%s8622_s0] sm:$0xff] }
 0x1b9   :  { %4959 = vmatprep.subr.bf16.mxu0 %v7387_v32  ;;  %2131 = vmatprep.mubr.bf16.mxu1 %v5975_v8  ;;  %v4434_v28 = vor.u32 %v4433_v4, %v4432_v53  ;;  %v7397_v32 = vld [vmem:[#allocation2 + $0xe30] ss:$8 sps:$4 sm:$0xff]   ;;  %v7402_v8 = vld [vmem:[#allocation2 + $0x644] ss:$8 sps:$4 sm:$0xff]   ;;  %v5979_v29 = vcombine.high %v8370_v14, %v1863_v59  ;;  %v6012_v25 = vrot.slane %v7635_v61, 11  ;;  %v2185_v53 = vrot.slane %v2183_v47, 4 }
 0x1ba   :  { %4691 = vmatprep.mubr.bf16.mxu0 %v6299_v5  ;;  %v7405_v5 = vld [vmem:[#allocation2 + $0xe44] ss:$8 sps:$4 sm:$0xff]  }
 0x1bb   :  { %2435 = vmatpush1.bf16.msra.mxu1 %v7382_v36  ;;  %v4435_v39 = vsel %vm8317_vm14, %v4431_v62, %v4434_v28  ;;  %v7634_v36 = vld [vmem:[%s8622_s0 + $0x10] sm:$0xff]  ;;  %v7417_v34 = vld [vmem:[#allocation2 + $0xe64] ss:$8 sps:$4 sm:$0xff]   ;;  %v5978_v62 = vcombine.low %v8370_v14, %v1863_v59 }
 0x1bc   :  { %4960 = vmatpush1.bf16.msra.mxu0 %v7385_v26  ;;  %2436 = vmatprep.subr.bf16.mxu1 %v7390_v30  ;;  %v2186_v26 = vrot.slane %v7634_v36, 7  ;;  %v7400_v30 = vld [vmem:[#allocation2 + $0x640] ss:$8 sps:$4 sm:$0xff]   ;;  %v6303_v10 = vcombine.high %v1863_v59, %v4435_v39  ;;  %v6302_v28 = vcombine.low %v1863_v59, %v4435_v39  ;;  %v7420_v14 = vld [vmem:[#allocation2 + $0x674] ss:$8 sps:$4 sm:$0xff]  }
 0x1bd   :  { %4961 = vmatprep.subr.bf16.mxu0 %v7393_v50  ;;  %v7403_v50 = vld [vmem:[#allocation2 + $0xe40] ss:$8 sps:$4 sm:$0xff]   ;;  %v7426_v36 = vld [vmem:[#allocation2 + $0x684] ss:$8 sps:$4 sm:$0xff]  }
 0x1be   :  { %2132 = vmatmul.mubr.bf16.gmra.mrb[4].mxu1 %v5974_v38  ;;  %v7408_v38 = vld [vmem:[#allocation2 + $0x654] ss:$8 sps:$4 sm:$0xff]   ;;  %v2188_v4 = vrot.slane %v2186_v26, 4  ;;  %v7438_v61 = vld [vmem:[#allocation2 + $0x6a4] ss:$8 sps:$4 sm:$0xff]  }
 0x1bf   :  { %4692 = vmatmul.mubr.bf16.gmra.mrb[4].mxu0 %v6298_v42  ;;  %2437 = vmatpush1.bf16.msra.mxu1 %v7388_v57  ;;  %v7411_v42 = vld [vmem:[#allocation2 + $0xe54] ss:$8 sps:$4 sm:$0xff]  }
 0x1c0   :  { %4962 = vmatpush1.bf16.msra.mxu0 %v7391_v7  ;;  %2438 = vmatprep.subr.bf16.mxu1 %v7396_v11  ;;  %v8393_v57 = vld [vmem:[%s8622_s0 + $0x18] sm:$0xff] }
 0x1c1   :  { %4963 = vmatprep.subr.bf16.mxu0 %v7399_v60  ;;  %2141 = vmatprep.mubr.bf16.mxu1 %v5977_v3  ;;  %v2189_v7 = vrot.slane %v8393_v57, 7  ;;  %v7406_v11 = vld [vmem:[#allocation2 + $0x650] ss:$8 sps:$4 sm:$0xff]  }
 0x1c2   :  { %4701 = vmatprep.mubr.bf16.mxu0 %v6301_v6  ;;  %v7409_v60 = vld [vmem:[#allocation2 + $0xe50] ss:$8 sps:$4 sm:$0xff]   ;;  %v7414_v6 = vld [vmem:[#allocation2 + $0x664] ss:$8 sps:$4 sm:$0xff]  }
 0x1c3   :  { %2439 = vmatpush1.bf16.msra.mxu1 %v7394_v2  ;;  %v8405_v2 = vsel %vm8398_vm1, %v6012_v25, %v2183_v47  ;;  %v7421_v47 = vld [vmem:[#allocation2 + $0xe70] ss:$8 sps:$4 sm:$0xff]   ;;  %v7441_v25 = vld [vmem:[#allocation2 + $0xea4] ss:$8 sps:$4 sm:$0xff]  }
 0x1c4   :  { %4964 = vmatpush1.bf16.msra.mxu0 %v7397_v32  ;;  %2440 = vmatprep.subr.bf16.mxu1 %v7402_v8  ;;  %v8409_v32 = vsel %vm8398_vm1, %v2185_v53, %v2186_v26  ;;  %v8415_v8 = vsel %vm8398_vm1, %v2188_v4, %v2189_v7  ;;  %v7429_v26 = vld [vmem:[#allocation2 + $0xe84] ss:$8 sps:$4 sm:$0xff]   ;;  %v7436_v53 = vld [vmem:[#allocation2 + $0x6a0] ss:$8 sps:$4 sm:$0xff]  }
 0x1c5   :  { %4965 = vmatprep.subr.bf16.mxu0 %v7405_v5  ;;  %v7412_v5 = vld [vmem:[#allocation2 + $0x660] ss:$8 sps:$4 sm:$0xff]   ;;  %v6015_v59 = vcombine.high %v8405_v2, %v8409_v32  ;;  %v6337_v39 = vcombine.high %v8409_v32, %v8415_v8  ;;  %v6014_v57 = vcombine.low %v8405_v2, %v8409_v32  ;;  %v7480_v2 = vld [vmem:[#allocation2 + $0x714] ss:$8 sps:$4 sm:$0xff]  }
 0x1c6   :  { %2142 = vmatmul.mubr.bf16.gmra.mrb[8].mxu1 %v5976_v9  ;;  %v7415_v9 = vld [vmem:[#allocation2 + $0xe60] ss:$8 sps:$4 sm:$0xff]  }
 0x1c7   :  { %4702 = vmatmul.mubr.bf16.gmra.mrb[8].mxu0 %v6300_v31  ;;  %2441 = vmatpush1.bf16.msra.mxu1 %v7400_v30  ;;  %v7423_v31 = vld [vmem:[#allocation2 + $0xe74] ss:$8 sps:$4 sm:$0xff]   ;;  %v7424_v30 = vld [vmem:[#allocation2 + $0x680] ss:$8 sps:$4 sm:$0xff]  }
 0x1c8   :  { %4966 = vmatpush1.bf16.msra.mxu0 %v7403_v50  ;;  %2442 = vmatprep.subr.bf16.mxu1 %v7408_v38  ;;  %v7427_v50 = vld [vmem:[#allocation2 + $0xe80] ss:$8 sps:$4 sm:$0xff]   ;;  %v7432_v38 = vld [vmem:[#allocation2 + $0x694] ss:$8 sps:$4 sm:$0xff]  }
 0x1c9   :  { %4967 = vmatprep.subr.bf16.mxu0 %v7411_v42  ;;  %2151 = vmatprep.mubr.bf16.mxu1 %v5979_v29  ;;  %v7435_v42 = vld [vmem:[#allocation2 + $0xe94] ss:$8 sps:$4 sm:$0xff]   ;;  %v7430_v29 = vld [vmem:[#allocation2 + $0x690] ss:$8 sps:$4 sm:$0xff]   ;;  %v7439_v4 = vld [vmem:[#allocation2 + $0xea0] ss:$8 sps:$4 sm:$0xff]  }
 0x1ca   :  { %4711 = vmatprep.mubr.bf16.mxu0 %v6303_v10  ;;  %v7433_v10 = vld [vmem:[#allocation2 + $0xe90] ss:$8 sps:$4 sm:$0xff]  }
 0x1cb   :  { %2443 = vmatpush1.bf16.msra.mxu1 %v7406_v11  ;;  %v7444_v11 = vld [vmem:[#allocation2 + $0x6b4] ss:$8 sps:$4 sm:$0xff]  }
 0x1cc   :  { %4968 = vmatpush1.bf16.msra.mxu0 %v7409_v60  ;;  %2444 = vmatprep.subr.bf16.mxu1 %v7414_v6  ;;  %v7447_v60 = vld [vmem:[#allocation2 + $0xeb4] ss:$8 sps:$4 sm:$0xff]   ;;  %v7442_v6 = vld [vmem:[#allocation2 + $0x6b0] ss:$8 sps:$4 sm:$0xff]  }
 0x1cd   :  { %4969 = vmatprep.subr.bf16.mxu0 %v7417_v34  ;;  %v7445_v34 = vld [vmem:[#allocation2 + $0xeb0] ss:$8 sps:$4 sm:$0xff]  }
 0x1ce   :  { %2152 = vmatmul.mubr.bf16.gmra.mrb[12].mxu1 %v5978_v62  ;;  %v7450_v62 = vld [vmem:[#allocation2 + $0x6c4] ss:$8 sps:$4 sm:$0xff]  }
 0x1cf   :  { %4712 = vmatmul.mubr.bf16.gmra.mrb[12].mxu0 %v6302_v28  ;;  %2445 = vmatpush1.bf16.msra.mxu1 %v7412_v5  ;;  %v7453_v28 = vld [vmem:[#allocation2 + $0xec4] ss:$8 sps:$4 sm:$0xff]   ;;  %v7448_v5 = vld [vmem:[#allocation2 + $0x6c0] ss:$8 sps:$4 sm:$0xff]  }
 0x1d0   :  { %4970 = vmatpush1.bf16.msra.mxu0 %v7415_v9  ;;  %2446 = vmatprep.subr.bf16.mxu1 %v7420_v14  ;;  %v7451_v9 = vld [vmem:[#allocation2 + $0xec0] ss:$8 sps:$4 sm:$0xff]   ;;  %v7456_v14 = vld [vmem:[#allocation2 + $0x6d4] ss:$8 sps:$4 sm:$0xff]  }
 0x1d1   :  { %4971 = vmatprep.subr.bf16.mxu0 %v7423_v31  ;;  %2464 = vmatprep.mubr.bf16.mxu1 %v6015_v59  ;;  %v7459_v31 = vld [vmem:[#allocation2 + $0xed4] ss:$8 sps:$4 sm:$0xff]   ;;  %v7454_v59 = vld [vmem:[#allocation2 + $0x6d0] ss:$8 sps:$4 sm:$0xff]  }
 0x1d2   :  { %4989 = vmatprep.mubr.bf16.mxu0 %v6337_v39  ;;  %v7457_v39 = vld [vmem:[#allocation2 + $0xed0] ss:$8 sps:$4 sm:$0xff]  }
 0x1d3   :  { %2447 = vmatpush1.bf16.msra.mxu1 %v7418_v41  ;;  %v7462_v41 = vld [vmem:[#allocation2 + $0x6e4] ss:$8 sps:$4 sm:$0xff]  }
 0x1d4   :  { %4972 = vmatpush1.bf16.msra.mxu0 %v7421_v47  ;;  %2448 = vmatprep.subr.bf16.mxu1 %v7426_v36  ;;  %v7465_v47 = vld [vmem:[#allocation2 + $0xee4] ss:$8 sps:$4 sm:$0xff]   ;;  %v2192_v36 = vrot.slane %v8245_v18, 7  ;;  %v7466_v18 = vld [vmem:[#allocation2 + $0x6f0] ss:$8 sps:$4 sm:$0xff]  }
 0x1d5   :  { %4973 = vmatprep.subr.bf16.mxu0 %v7429_v26  ;;  %v7460_v26 = vld [vmem:[#allocation2 + $0x6e0] ss:$8 sps:$4 sm:$0xff]  }
 0x1d7   :  { %2449 = vmatpush1.bf16.msra.mxu1 %v7424_v30  ;;  %v7463_v30 = vld [vmem:[#allocation2 + $0xee0] ss:$8 sps:$4 sm:$0xff]  }
 0x1d8   :  { %4974 = vmatpush1.bf16.msra.mxu0 %v7427_v50  ;;  %2450 = vmatprep.subr.bf16.mxu1 %v7432_v38  ;;  %v7468_v50 = vld [vmem:[#allocation2 + $0x6f4] ss:$8 sps:$4 sm:$0xff]  }
 0x1d9   :  { %4975 = vmatprep.subr.bf16.mxu0 %v7435_v42  ;;  %v7471_v38 = vld [vmem:[#allocation2 + $0xef4] ss:$8 sps:$4 sm:$0xff]   ;;  %v2191_v42 = vrot.slane %v2189_v7, 4  ;;  %v6336_v7 = vcombine.low %v8409_v32, %v8415_v8 }
 0x1db   :  { %2451 = vmatpush1.bf16.msra.mxu1 %v7430_v29  ;;  %v4738_v29 = vrot.slane %v2192_v36, 4 }
 0x1dc   :  { %4976 = vmatpush1.bf16.msra.mxu0 %v7433_v10  ;;  %2452 = vmatprep.subr.bf16.mxu1 %v7438_v61  ;;  %v8427_v10 = vld [vmem:[%s8622_s0 + $0x28] sm:$0xff] }
 0x1dd   :  { %4977 = vmatprep.subr.bf16.mxu0 %v7441_v25  ;;  %v4739_v61 = vrot.slane %v8427_v10, 7  ;;  %v7469_v25 = vld [vmem:[#allocation2 + $0xef0] ss:$8 sps:$4 sm:$0xff]  }
 0x1df   :  { %2453 = vmatpush1.bf16.msra.mxu1 %v7436_v53  ;;  %v7474_v53 = vld [vmem:[#allocation2 + $0x704] ss:$8 sps:$4 sm:$0xff]  }
 0x1e0   :  { %4978 = vmatpush1.bf16.msra.mxu0 %v7439_v4  ;;  %2454 = vmatprep.subr.bf16.mxu1 %v7444_v11  ;;  %v7477_v4 = vld [vmem:[#allocation2 + $0xf04] ss:$8 sps:$4 sm:$0xff]   ;;  %v2193_v11 = vsel %vm8398_vm1, %v2191_v42, %v2192_v36  ;;  %v7487_v42 = vld [vmem:[#allocation2 + $0xf20] ss:$8 sps:$4 sm:$0xff]  }
 0x1e1   :  { %4979 = vmatprep.subr.bf16.mxu0 %v7447_v60  ;;  %v4740_v60 = vsel %vm8398_vm1, %v4738_v29, %v4739_v61  ;;  %v6017_v32 = vcombine.high %v8415_v8, %v2193_v11  ;;  %v6016_v36 = vcombine.low %v8415_v8, %v2193_v11  ;;  %v7492_v8 = vld [vmem:[#allocation2 + $0x734] ss:$8 sps:$4 sm:$0xff]  }
 0x1e2   :  { %v7495_v29 = vld [vmem:[#allocation2 + $0xf34] ss:$8 sps:$4 sm:$0xff]  }
 0x1e3   :  { %2455 = vmatpush1.bf16.msra.mxu1 %v7442_v6  ;;  %v2196_v6 = vrot.slane %v8256_v23, 7  ;;  %v2202_v23 = vrot.slane %v8281_v63, 7 }
 0x1e4   :  { %4980 = vmatpush1.bf16.msra.mxu0 %v7445_v34  ;;  %2456 = vmatprep.subr.bf16.mxu1 %v7450_v62  ;;  %v2199_v34 = vrot.slane %v8268_v40, 7  ;;  %v7472_v62 = vld [vmem:[#allocation2 + $0x700] ss:$8 sps:$4 sm:$0xff]   ;;  %v7478_v40 = vld [vmem:[#allocation2 + $0x710] ss:$8 sps:$4 sm:$0xff]  }
 0x1e5   :  { %4981 = vmatprep.subr.bf16.mxu0 %v7453_v28  ;;  %v7475_v28 = vld [vmem:[#allocation2 + $0xf00] ss:$8 sps:$4 sm:$0xff]  }
 0x1e7   :  { %2457 = vmatpush1.bf16.msra.mxu1 %v7448_v5  ;;  %v7483_v5 = vld [vmem:[#allocation2 + $0xf14] ss:$8 sps:$4 sm:$0xff]  }
 0x1e8   :  { %4982 = vmatpush1.bf16.msra.mxu0 %v7451_v9  ;;  %2458 = vmatprep.subr.bf16.mxu1 %v7456_v14  ;;  %v6339_v9 = vcombine.high %v2193_v11, %v4740_v60  ;;  %v6013_v14 = vrot.slane %v8275_v33, 11 }
 0x1e9   :  { %4983 = vmatprep.subr.bf16.mxu0 %v7459_v31  ;;  %v2198_v31 = vrot.slane %v2196_v6, 4 }
 0x1ea   :  { %v2197_v33 = vsel %vm8398_vm1, %v6013_v14, %v2196_v6  ;;  %v7499_v14 = vld [vmem:[#allocation2 + $0xf40] ss:$8 sps:$4 sm:$0xff]  }
 0x1eb   :  { %2459 = vmatpush1.bf16.msra.mxu1 %v7454_v59  ;;  %v2201_v59 = vrot.slane %v2199_v34, 4 }
 0x1ec   :  { %4984 = vmatpush1.bf16.msra.mxu0 %v7457_v39  ;;  %2460 = vmatprep.subr.bf16.mxu1 %v7462_v41  ;;  %v7481_v39 = vld [vmem:[#allocation2 + $0xf10] ss:$8 sps:$4 sm:$0xff]   ;;  %v7486_v41 = vld [vmem:[#allocation2 + $0x724] ss:$8 sps:$4 sm:$0xff]  }
 0x1ed   :  { %4985 = vmatprep.subr.bf16.mxu0 %v7465_v47  ;;  %v7489_v47 = vld [vmem:[#allocation2 + $0xf24] ss:$8 sps:$4 sm:$0xff]   ;;  %v8450_v63 = vsel %vm8398_vm1, %v2201_v59, %v2202_v23 }
 0x1ef   :  { %2461 = vmatpush1.bf16.msra.mxu1 %v7460_v26  ;;  %v6338_v26 = vcombine.low %v2193_v11, %v4740_v60  ;;  %v7498_v11 = vld [vmem:[#allocation2 + $0x744] ss:$8 sps:$4 sm:$0xff]  }
 0x1f0   :  { %4986 = vmatpush1.bf16.msra.mxu0 %v7463_v30  ;;  %2462 = vmatprep.subr.bf16.mxu1 %v7468_v50  ;;  %v2200_v30 = vsel %vm8398_vm1, %v2198_v31, %v2199_v34  ;;  %v2205_v50 = vrot.slane %v8287_v48, 7  ;;  %v7501_v60 = vld [vmem:[#allocation2 + $0xf44] ss:$8 sps:$4 sm:$0xff]   ;;  %v2526_v34 = vrot.slane %v7809_v55, 7  ;;  %v7504_v31 = vld [vmem:[#allocation2 + $0x754] ss:$8 sps:$4 sm:$0xff]  }
 0x1f1   :  { %4987 = vmatprep.subr.bf16.mxu0 %v7471_v38  ;;  %v7484_v38 = vld [vmem:[#allocation2 + $0x720] ss:$8 sps:$4 sm:$0xff]   ;;  %v6019_v61 = vcombine.high %v2197_v33, %v2200_v30  ;;  %v6018_v6 = vcombine.low %v2197_v33, %v2200_v30  ;;  %v7507_v55 = vld [vmem:[#allocation2 + $0xf54] ss:$8 sps:$4 sm:$0xff]  }
 0x1f3   :  { %2463 = vmatpush1.bf16.msra.mxu1 %v7466_v18  ;;  %v6341_v18 = vcombine.high %v2200_v30, %v8450_v63 }
 0x1f4   :  { %4988 = vmatpush1.bf16.msra.mxu0 %v7469_v25  ;;  %2783 = vmatprep.subr.bf16.mxu1 %v7474_v53  ;;  %v2204_v25 = vrot.slane %v2202_v23, 4  ;;  %v4741_v53 = vrot.slane %v2205_v50, 4  ;;  %v2527_v23 = vor.u32 %v2526_v34, %v7806_v54 }
 0x1f5   :  { %5267 = vmatprep.subr.bf16.mxu0 %v7477_v4  ;;  %v8457_v4 = vld [vmem:[%s8622_s0 + $0x58] sm:$0xff] }
 0x1f6   :  { %2465 = vmatmul.mubr.bf16.vlgmr.msra.gmra.mrb[0].mxu1 %v6014_v57  ;;  %v4742_v48 = vrot.slane %v8457_v4, 7  ;;  %v7490_v57 = vld [vmem:[#allocation2 + $0x730] ss:$8 sps:$4 sm:$0xff]  }
 0x1f7   :  { %4990 = vmatmul.mubr.bf16.vlgmr.msra.gmra.mrb[0].mxu0 %v6336_v7  ;;  %2784 = vmatpush1.bf16.msra.mxu1 %v7472_v62  ;;  %v7493_v7 = vld [vmem:[#allocation2 + $0xf30] ss:$8 sps:$4 sm:$0xff]   ;;  %v2530_v62 = vrot.slane %v7840_v22, 7 }
 0x1f8   :  { %5268 = vmatpush1.bf16.msra.mxu0 %v7475_v28  ;;  %2785 = vmatprep.subr.bf16.mxu1 %v7480_v2  ;;  %v6340_v28 = vcombine.low %v2200_v30, %v8450_v63  ;;  %v2206_v2 = vsel %vm8398_vm1, %v2204_v25, %v2205_v50  ;;  %v7514_v25 = vld [vmem:[#allocation2 + $0x770] ss:$8 sps:$4 sm:$0xff]  }
 0x1f9   :  { %5269 = vmatprep.subr.bf16.mxu0 %v7483_v5  ;;  %2474 = vmatprep.mubr.bf16.mxu1 %v6017_v32  ;;  %v4743_v5 = vsel %vm8398_vm1, %v4741_v53, %v4742_v48  ;;  %v2534_v32 = vrot.slane %v7846_v27, 7  ;;  %v6021_v22 = vcombine.high %v8450_v63, %v2206_v2  ;;  %v2531_v3 = vor.u32 %v2530_v62, %v7812_v56  ;;  %v7510_v56 = vld [vmem:[#allocation2 + $0x764] ss:$8 sps:$4 sm:$0xff]   ;;  %v7517_v53 = vld [vmem:[#allocation2 + $0xf70] ss:$8 sps:$4 sm:$0xff]  }
 0x1fa   :  { %4999 = vmatprep.mubr.bf16.mxu0 %v6339_v9  ;;  %v7496_v9 = vld [vmem:[#allocation2 + $0x740] ss:$8 sps:$4 sm:$0xff]   ;;  %v6343_v59 = vcombine.high %v2206_v2, %v4743_v5  ;;  %v6020_v33 = vcombine.low %v8450_v63, %v2206_v2  ;;  %v6342_v30 = vcombine.low %v2206_v2, %v4743_v5  ;;  %v7516_v63 = vld [vmem:[#allocation2 + $0x774] ss:$8 sps:$4 sm:$0xff]   ;;  %v7522_v48 = vld [vmem:[#allocation2 + $0x784] ss:$8 sps:$4 sm:$0xff]  }
 0x1fb   :  { %2786 = vmatpush1.bf16.msra.mxu1 %v7478_v40  ;;  %v6054_v40 = vrot.slane %v7800_v52, 11  ;;  %v7513_v52 = vld [vmem:[#allocation2 + $0xf64] ss:$8 sps:$4 sm:$0xff]   ;;  %v7532_v5 = vld [vmem:[#allocation2 + $0x7a0] ss:$8 sps:$4 sm:$0xff]   ;;  %v2543_v27 = vrot.slane %v7906_v16, 7 }
 0x1fc   :  { %5270 = vmatpush1.bf16.msra.mxu0 %v7481_v39  ;;  %2787 = vmatprep.subr.bf16.mxu1 %v7486_v41  ;;  %v2529_v39 = vrot.slane %v2526_v34, 4  ;;  %v2533_v41 = vrot.slane %v2530_v62, 4  ;;  %v7526_v34 = vld [vmem:[#allocation2 + $0x790] ss:$8 sps:$4 sm:$0xff]   ;;  %v7537_v2 = vld [vmem:[#allocation2 + $0xfa4] ss:$8 sps:$4 sm:$0xff]  }
 0x1fd   :  { %5271 = vmatprep.subr.bf16.mxu0 %v7489_v47  ;;  %v2535_v47 = vor.u32 %v2534_v32, %v7843_v24  ;;  %v8484_v24 = vsel %vm8477_vm4, %v6054_v40, %v2527_v23  ;;  %v7529_v62 = vld [vmem:[#allocation2 + $0xf90] ss:$8 sps:$4 sm:$0xff]   ;;  %v7549_v23 = vld [vmem:[#allocation2 + $0xfc4] ss:$8 sps:$4 sm:$0xff]   ;;  %v7547_v40 = vld [vmem:[#allocation2 + $0xfc0] ss:$8 sps:$4 sm:$0xff]  }
 0x1fe   :  { %2475 = vmatmul.mubr.bf16.gmra.mrb[4].mxu1 %v6016_v36  ;;  %v7502_v36 = vld [vmem:[#allocation2 + $0x750] ss:$8 sps:$4 sm:$0xff]   ;;  %v8488_v50 = vsel %vm8477_vm4, %v2529_v39, %v2531_v3  ;;  %v7544_v3 = vld [vmem:[#allocation2 + $0x7c0] ss:$8 sps:$4 sm:$0xff]   ;;  %v7552_v39 = vld [vmem:[#allocation2 + $0x7d4] ss:$8 sps:$4 sm:$0xff]  }
 0x1ff   :  { %5000 = vmatmul.mubr.bf16.gmra.mrb[4].mxu0 %v6338_v26  ;;  %2788 = vmatpush1.bf16.msra.mxu1 %v7484_v38  ;;  %v7505_v26 = vld [vmem:[#allocation2 + $0xf50] ss:$8 sps:$4 sm:$0xff]   ;;  %v8492_v38 = vsel %vm8477_vm4, %v2533_v41, %v2535_v47  ;;  %v7555_v41 = vld [vmem:[#allocation2 + $0xfd4] ss:$8 sps:$4 sm:$0xff]   ;;  %v6055_v16 = vrot.slane %v7897_v13, 11 }
 0x200   :  { %5272 = vmatpush1.bf16.msra.mxu0 %v7487_v42  ;;  %2789 = vmatprep.subr.bf16.mxu1 %v7492_v8  ;;  %v7508_v42 = vld [vmem:[#allocation2 + $0x760] ss:$8 sps:$4 sm:$0xff]   ;;  %v7550_v47 = vld [vmem:[#allocation2 + $0x7d0] ss:$8 sps:$4 sm:$0xff]  }
 0x201   :  { %5273 = vmatprep.subr.bf16.mxu0 %v7495_v29  ;;  %2484 = vmatprep.mubr.bf16.mxu1 %v6019_v61  ;;  %v7511_v8 = vld [vmem:[#allocation2 + $0xf60] ss:$8 sps:$4 sm:$0xff]   ;;  %v7519_v29 = vld [vmem:[#allocation2 + $0xf74] ss:$8 sps:$4 sm:$0xff]   ;;  %v6057_v61 = vcombine.high %v8484_v24, %v8488_v50 }
 0x202   :  { %5009 = vmatprep.mubr.bf16.mxu0 %v6341_v18  ;;  %v6377_v18 = vcombine.high %v8488_v50, %v8492_v38 }
 0x203   :  { %2790 = vmatpush1.bf16.msra.mxu1 %v7490_v57  ;;  %v7525_v57 = vld [vmem:[#allocation2 + $0xf84] ss:$8 sps:$4 sm:$0xff]  }
 0x204   :  { %5274 = vmatpush1.bf16.msra.mxu0 %v7493_v7  ;;  %2791 = vmatprep.subr.bf16.mxu1 %v7498_v11  ;;  %v7520_v7 = vld [vmem:[#allocation2 + $0x780] ss:$8 sps:$4 sm:$0xff]  }
 0x205   :  { %5275 = vmatprep.subr.bf16.mxu0 %v7501_v60  ;;  %v7523_v11 = vld [vmem:[#allocation2 + $0xf80] ss:$8 sps:$4 sm:$0xff]   ;;  %v7528_v60 = vld [vmem:[#allocation2 + $0x794] ss:$8 sps:$4 sm:$0xff]  }
 0x206   :  { %2485 = vmatmul.mubr.bf16.gmra.mrb[8].mxu1 %v6018_v6  ;;  %v7531_v6 = vld [vmem:[#allocation2 + $0xf94] ss:$8 sps:$4 sm:$0xff]  }
 0x207   :  { %5010 = vmatmul.mubr.bf16.gmra.mrb[8].mxu0 %v6340_v28  ;;  %2792 = vmatpush1.bf16.msra.mxu1 %v7496_v9  ;;  %v7534_v28 = vld [vmem:[#allocation2 + $0x7a4] ss:$8 sps:$4 sm:$0xff]   ;;  %v7535_v9 = vld [vmem:[#allocation2 + $0xfa0] ss:$8 sps:$4 sm:$0xff]  }
 0x208   :  { %5276 = vmatpush1.bf16.msra.mxu0 %v7499_v14  ;;  %2793 = vmatprep.subr.bf16.mxu1 %v7504_v31  ;;  %v7540_v14 = vld [vmem:[#allocation2 + $0x7b4] ss:$8 sps:$4 sm:$0xff]  }
 0x209   :  { %5277 = vmatprep.subr.bf16.mxu0 %v7507_v55  ;;  %2494 = vmatprep.mubr.bf16.mxu1 %v6021_v22  ;;  %v7543_v31 = vld [vmem:[#allocation2 + $0xfb4] ss:$8 sps:$4 sm:$0xff]   ;;  %v7538_v55 = vld [vmem:[#allocation2 + $0x7b0] ss:$8 sps:$4 sm:$0xff]  }
 0x20a   :  { %5019 = vmatprep.mubr.bf16.mxu0 %v6343_v59  ;;  %v7541_v22 = vld [vmem:[#allocation2 + $0xfb0] ss:$8 sps:$4 sm:$0xff]   ;;  %v7546_v59 = vld [vmem:[#allocation2 + $0x7c4] ss:$8 sps:$4 sm:$0xff]  }
 0x20b   :  { %2794 = vmatpush1.bf16.msra.mxu1 %v7502_v36  ;;  %v7553_v36 = vld [vmem:[#allocation2 + $0xfd0] ss:$8 sps:$4 sm:$0xff]  }
 0x20c   :  { %5278 = vmatpush1.bf16.msra.mxu0 %v7505_v26  ;;  %2795 = vmatprep.subr.bf16.mxu1 %v7510_v56  ;;  %v7558_v26 = vld [vmem:[#allocation2 + $0x7e4] ss:$8 sps:$4 sm:$0xff]  }
 0x20d   :  { %5279 = vmatprep.subr.bf16.mxu0 %v7513_v52  ;;  %v7561_v56 = vld [vmem:[#allocation2 + $0xfe4] ss:$8 sps:$4 sm:$0xff]   ;;  %v2538_v52 = vrot.slane %v7977_v17, 7  ;;  %v7562_v17 = vld [vmem:[#allocation2 + $0x7f0] ss:$8 sps:$4 sm:$0xff]  }
 0x20e   :  { %2495 = vmatmul.mubr.bf16.gmra.mrb[12].mxu1 %v6020_v33  ;;  %v5047_v33 = vrot.slane %v8152_v20, 7  ;;  %v7565_v20 = vld [vmem:[#allocation2 + $0xff0] ss:$8 sps:$4 sm:$0xff]  }
 0x20f   :  { %5020 = vmatmul.mubr.bf16.gmra.mrb[12].mxu0 %v6342_v30  ;;  %2796 = vmatpush1.bf16.msra.mxu1 %v7508_v42  ;;  %v7556_v30 = vld [vmem:[#allocation2 + $0x7e0] ss:$8 sps:$4 sm:$0xff]  }
 0x210   :  { %5280 = vmatpush1.bf16.msra.mxu0 %v7511_v8  ;;  %2797 = vmatprep.subr.bf16.mxu1 %v7516_v63  ;;  %v7559_v42 = vld [vmem:[#allocation2 + $0xfe0] ss:$8 sps:$4 sm:$0xff]   ;;  %v7564_v8 = vld [vmem:[#allocation2 + $0x7f4] ss:$8 sps:$4 sm:$0xff]  }
 0x211   :  { %5281 = vmatprep.subr.bf16.mxu0 %v7519_v29  ;;  %2815 = vmatprep.mubr.bf16.mxu1 %v6057_v61  ;;  %v7567_v63 = vld [vmem:[#allocation2 + $0xff4] ss:$8 sps:$4 sm:$0xff]   ;;  %v2537_v29 = vrot.slane %v2534_v32, 4  ;;  %v2539_v61 = vor.u32 %v2538_v52, %v7860_v58  ;;  %v2547_v32 = vrot.slane %v7921_v35, 7 }
 0x212   :  { %5299 = vmatprep.mubr.bf16.mxu0 %v6377_v18  ;;  %v5046_v18 = vrot.slane %v2538_v52, 4  ;;  %v7583_v52 = vld [vmem:[#allocation2 + $0x1050] ss:$8 sps:$4 sm:$0xff]  }
 0x213   :  { %2798 = vmatpush1.bf16.msra.mxu1 %v7514_v25  ;;  %v5048_v25 = vor.u32 %v5047_v33, %v7988_v46  ;;  %v2540_v58 = vsel %vm8477_vm4, %v2537_v29, %v2539_v61  ;;  %v2548_v35 = vor.u32 %v2547_v32, %v7909_v19  ;;  %v7588_v33 = vld [vmem:[#allocation2 + $0x1064] ss:$8 sps:$4 sm:$0xff]   ;;  %v7592_v61 = vld [vmem:[#allocation2 + $0x1080] ss:$8 sps:$4 sm:$0xff]  }
 0x214   :  { %5282 = vmatpush1.bf16.msra.mxu0 %v7517_v53  ;;  %2799 = vmatprep.subr.bf16.mxu1 %v7522_v48  ;;  %v7570_v53 = vld [vmem:[#allocation2 + $0x1004] ss:$8 sps:$4 sm:$0xff]   ;;  %v6056_v48 = vcombine.low %v8484_v24, %v8488_v50  ;;  %v7573_v24 = vld [vmem:[#allocation2 + $0x1014] ss:$8 sps:$4 sm:$0xff]   ;;  %v6058_v13 = vcombine.low %v8492_v38, %v2540_v58 }
 0x215   :  { %5283 = vmatprep.subr.bf16.mxu0 %v7525_v57  ;;  %v6376_v57 = vcombine.low %v8488_v50, %v8492_v38  ;;  %v5049_v46 = vsel %vm8477_vm4, %v5046_v18, %v5048_v25  ;;  %v6059_v50 = vcombine.high %v8492_v38, %v2540_v58  ;;  %v7579_v38 = vld [vmem:[#allocation2 + $0x1034] ss:$8 sps:$4 sm:$0xff]   ;;  %v7594_v29 = vld [vmem:[#allocation2 + $0x1084] ss:$8 sps:$4 sm:$0xff]   ;;  %v7595_v25 = vld [vmem:[#allocation2 + $0x1090] ss:$8 sps:$4 sm:$0xff]  }
 0x216   :  { %v7597_v18 = vld [vmem:[#allocation2 + $0x1094] ss:$8 sps:$4 sm:$0xff]  }
 0x217   :  { %2800 = vmatpush1.bf16.msra.mxu1 %v7520_v7  ;;  %v2551_v7 = vrot.slane %v7938_v44, 7 }
 0x218   :  { %5284 = vmatpush1.bf16.msra.mxu0 %v7523_v11  ;;  %2801 = vmatprep.subr.bf16.mxu1 %v7528_v60  ;;  %v7568_v11 = vld [vmem:[#allocation2 + $0x1000] ss:$8 sps:$4 sm:$0xff]   ;;  %v6379_v60 = vcombine.high %v2540_v58, %v5049_v46 }
 0x219   :  { %5285 = vmatprep.subr.bf16.mxu0 %v7531_v6  ;;  %v2544_v6 = vor.u32 %v2543_v27, %v7903_v15  ;;  %v2552_v44 = vor.u32 %v2551_v7, %v7935_v43 }
 0x21b   :  { %2802 = vmatpush1.bf16.msra.mxu1 %v7526_v34  ;;  %v2546_v34 = vrot.slane %v2543_v27, 4  ;;  %v2545_v15 = vsel %vm8477_vm4, %v6055_v16, %v2544_v6  ;;  %v7607_v27 = vld [vmem:[#allocation2 + $0x10d0] ss:$8 sps:$4 sm:$0xff]  }
 0x21c   :  { %5286 = vmatpush1.bf16.msra.mxu0 %v7529_v62  ;;  %2803 = vmatprep.subr.bf16.mxu1 %v7534_v28  ;;  %v2550_v62 = vrot.slane %v2547_v32, 4  ;;  %v7571_v28 = vld [vmem:[#allocation2 + $0x1010] ss:$8 sps:$4 sm:$0xff]   ;;  %v7615_v32 = vld [vmem:[#allocation2 + $0x10f4] ss:$8 sps:$4 sm:$0xff]  }
 0x21d   :  { %5287 = vmatprep.subr.bf16.mxu0 %v7537_v2  ;;  %v7576_v2 = vld [vmem:[#allocation2 + $0x1024] ss:$8 sps:$4 sm:$0xff]   ;;  %v2549_v19 = vsel %vm8477_vm4, %v2546_v34, %v2548_v35 }
 0x21e   :  { %v2553_v43 = vsel %vm8477_vm4, %v2550_v62, %v2552_v44 }
 0x21f   :  { %2804 = vmatpush1.bf16.msra.mxu1 %v7532_v5  ;;  %v6378_v5 = vcombine.low %v2540_v58, %v5049_v46  ;;  %v7612_v58 = vld [vmem:[#allocation2 + $0x10e4] ss:$8 sps:$4 sm:$0xff]   ;;  %v7610_v46 = vld [vmem:[#allocation2 + $0x10e0] ss:$8 sps:$4 sm:$0xff]  }
 0x220   :  { %5288 = vmatpush1.bf16.msra.mxu0 %v7535_v9  ;;  %2805 = vmatprep.subr.bf16.mxu1 %v7540_v14  ;;  %v2555_v9 = vrot.slane %v7998_v21, 7  ;;  %v5051_v14 = vrot.slane %v8182_v1, 7  ;;  %v7577_v21 = vld [vmem:[#allocation2 + $0x1030] ss:$8 sps:$4 sm:$0xff]   ;;  %v7582_v1 = vld [vmem:[#allocation2 + $0x1044] ss:$8 sps:$4 sm:$0xff]  }
 0x221   :  { %5289 = vmatprep.subr.bf16.mxu0 %v7543_v31  ;;  %v7574_v31 = vld [vmem:[#allocation2 + $0x1020] ss:$8 sps:$4 sm:$0xff]  }
 0x223   :  { %2806 = vmatpush1.bf16.msra.mxu1 %v7538_v55  ;;  %v6061_v55 = vcombine.high %v2545_v15, %v2549_v19 }
 0x224   :  { %5290 = vmatpush1.bf16.msra.mxu0 %v7541_v22  ;;  %2807 = vmatprep.subr.bf16.mxu1 %v7546_v59  ;;  %v6381_v22 = vcombine.high %v2549_v19, %v2553_v43  ;;  %v2554_v59 = vrot.slane %v2551_v7, 4  ;;  %v7613_v7 = vld [vmem:[#allocation2 + $0x10f0] ss:$8 sps:$4 sm:$0xff]  }
 0x225   :  { %5291 = vmatprep.subr.bf16.mxu0 %v7549_v23  ;;  %v2556_v23 = vor.u32 %v2555_v9, %v7941_v45  ;;  %v7580_v45 = vld [vmem:[#allocation2 + $0x1040] ss:$8 sps:$4 sm:$0xff]  }
 0x227   :  { %2808 = vmatpush1.bf16.msra.mxu1 %v7544_v3  ;;  %v5050_v3 = vrot.slane %v2555_v9, 4 }
 0x228   :  { %5292 = vmatpush1.bf16.msra.mxu0 %v7547_v40  ;;  %2809 = vmatprep.subr.bf16.mxu1 %v7552_v39  ;;  %v5052_v40 = vor.u32 %v5051_v14, %v8020_v49  ;;  %v6060_v39 = vcombine.low %v2545_v15, %v2549_v19  ;;  %v7585_v49 = vld [vmem:[#allocation2 + $0x1054] ss:$8 sps:$4 sm:$0xff]  }
 0x229   :  { %5293 = vmatprep.subr.bf16.mxu0 %v7555_v41  ;;  %v6380_v41 = vcombine.low %v2549_v19, %v2553_v43 }
 0x22b   :  { %2810 = vmatpush1.bf16.msra.mxu1 %v7550_v47  ;;  %v2557_v47 = vsel %vm8477_vm4, %v2554_v59, %v2556_v23 }
 0x22c   :  { %5294 = vmatpush1.bf16.msra.mxu0 %v7553_v36  ;;  %2811 = vmatprep.subr.bf16.mxu1 %v7558_v26  ;;  %v5053_v36 = vsel %vm8477_vm4, %v5050_v3, %v5052_v40  ;;  %v6063_v26 = vcombine.high %v2553_v43, %v2557_v47  ;;  %v6062_v54 = vcombine.low %v2553_v43, %v2557_v47 }
 0x22d   :  { %5295 = vmatprep.subr.bf16.mxu0 %v7561_v56  ;;  %v6383_v56 = vcombine.high %v2557_v47, %v5053_v36 }
 0x22f   :  { %2812 = vmatpush1.bf16.msra.mxu1 %v7556_v30  ;;  %v6382_v30 = vcombine.low %v2557_v47, %v5053_v36 }
 0x230   :  { %5296 = vmatpush1.bf16.msra.mxu0 %v7559_v42  ;;  %2813 = vmatprep.subr.bf16.mxu1 %v7564_v8  ;;  %v7586_v42 = vld [vmem:[#allocation2 + $0x1060] ss:$8 sps:$4 sm:$0xff]   ;;  %v7591_v8 = vld [vmem:[#allocation2 + $0x1074] ss:$8 sps:$4 sm:$0xff]  }
 0x231   :  { %5297 = vmatprep.subr.bf16.mxu0 %v7567_v63  ;;  %v7589_v63 = vld [vmem:[#allocation2 + $0x1070] ss:$8 sps:$4 sm:$0xff]  }
 0x233   :  { %2814 = vmatpush1.bf16.msra.mxu1 %v7562_v17  ;;  %v7600_v17 = vld [vmem:[#allocation2 + $0x10a4] ss:$8 sps:$4 sm:$0xff]  }
 0x234   :  { %5298 = vmatpush1.bf16.msra.mxu0 %v7565_v20  ;;  %6491 = vmatprep.subr.bf16.mxu1 %v7570_v53  ;;  %v7598_v20 = vld [vmem:[#allocation2 + $0x10a0] ss:$8 sps:$4 sm:$0xff]  }
 0x235   :  { %5561 = vmatprep.subr.bf16.mxu0 %v7570_v53  ;;  %v7606_v53 = vld [vmem:[#allocation2 + $0x10c4] ss:$8 sps:$4 sm:$0xff]  }
 0x236   :  { %2816 = vmatmul.mubr.bf16.vlgmr.msra.gmra.mrb[0].mxu1 %v6056_v48  ;;  %v7604_v48 = vld [vmem:[#allocation2 + $0x10c0] ss:$8 sps:$4 sm:$0xff]  }
 0x237   :  { %5300 = vmatmul.mubr.bf16.vlgmr.msra.gmra.mrb[0].mxu0 %v6376_v57  ;;  %6507 = vmatpush1.bf16.msra.mxu1 %v7568_v11  ;;  %v7609_v57 = vld [vmem:[#allocation2 + $0x10d4] ss:$8 sps:$4 sm:$0xff]  }
 0x238   :  { %5562 = vmatpush1.bf16.msra.mxu0 %v7568_v11  ;;  %6492 = vmatprep.subr.bf16.mxu1 %v7573_v24  ;;  %v7639_v11 = vld [vmem:[%s8622_s0 + $0x20] sm:$0xff] }
 0x239   :  { %5563 = vmatprep.subr.bf16.mxu0 %v7573_v24  ;;  %2825 = vmatprep.mubr.bf16.mxu1 %v6059_v50  ;;  %v6417_v24 = vcombine.high %v7639_v11, %v8427_v10  ;;  %v7640_v50 = vld [vmem:[%s8622_s0 + $0x50] sm:$0xff]  ;;  %v6416_v16 = vcombine.low %v7639_v11, %v8427_v10 }
 0x23a   :  { %5309 = vmatprep.mubr.bf16.mxu0 %v6379_v60  ;;  %v6419_v60 = vcombine.high %v7640_v50, %v8457_v4  ;;  %v6418_v6 = vcombine.low %v7640_v50, %v8457_v4 }
 0x23b   :  { %6508 = vmatpush1.bf16.msra.mxu1 %v7571_v28 }
 0x23c   :  { %5564 = vmatpush1.bf16.msra.mxu0 %v7571_v28  ;;  %6493 = vmatprep.subr.bf16.mxu1 %v7576_v2 }
 0x23d   :  { %5565 = vmatprep.subr.bf16.mxu0 %v7576_v2 }
 0x23e   :  { %2826 = vmatmul.mubr.bf16.gmra.mrb[4].mxu1 %v6058_v13 }
 0x23f   :  { %5310 = vmatmul.mubr.bf16.gmra.mrb[4].mxu0 %v6378_v5  ;;  %6509 = vmatpush1.bf16.msra.mxu1 %v7574_v31 }
 0x240   :  { %5566 = vmatpush1.bf16.msra.mxu0 %v7574_v31  ;;  %6494 = vmatprep.subr.bf16.mxu1 %v7579_v38 }
 0x241   :  { %5567 = vmatprep.subr.bf16.mxu0 %v7579_v38  ;;  %2835 = vmatprep.mubr.bf16.mxu1 %v6061_v55 }
 0x242   :  { %5319 = vmatprep.mubr.bf16.mxu0 %v6381_v22 }
 0x243   :  { %6510 = vmatpush1.bf16.msra.mxu1 %v7577_v21 }
 0x244   :  { %5568 = vmatpush1.bf16.msra.mxu0 %v7577_v21  ;;  %6495 = vmatprep.subr.bf16.mxu1 %v7582_v1 }
 0x245   :  { %5569 = vmatprep.subr.bf16.mxu0 %v7582_v1 }
 0x246   :  { %2836 = vmatmul.mubr.bf16.gmra.mrb[8].mxu1 %v6060_v39 }
 0x247   :  { %5320 = vmatmul.mubr.bf16.gmra.mrb[8].mxu0 %v6380_v41  ;;  %6511 = vmatpush1.bf16.msra.mxu1 %v7580_v45 }
 0x248   :  { %5570 = vmatpush1.bf16.msra.mxu0 %v7580_v45  ;;  %6496 = vmatprep.subr.bf16.mxu1 %v7585_v49 }
 0x249   :  { %5571 = vmatprep.subr.bf16.mxu0 %v7585_v49  ;;  %2845 = vmatprep.mubr.bf16.mxu1 %v6063_v26  ;;  %v5652_v49 = vlaneseq }
 0x24a   :  { %5329 = vmatprep.mubr.bf16.mxu0 %v6383_v56 }
 0x24b   :  { %6512 = vmatpush1.bf16.msra.mxu1 %v7583_v52  ;;  %v5653_v26 = vshrl.u32 %v5652_v49, 7 }
 0x24c   :  { %5572 = vmatpush1.bf16.msra.mxu0 %v7583_v52  ;;  %6497 = vmatprep.subr.bf16.mxu1 %v7588_v33  ;;  %v5650_v52 = vld [vmem:[#allocation4] sm:$0x3] }
 0x24d   :  { %5573 = vmatprep.subr.bf16.mxu0 %v7588_v33  ;;  %v5654_v56 = vsub.s32 0, %v5653_v26  ;;  %v5658_v33 = vsub.s32 1, %v5653_v26 }
 0x24e   :  { %2846 = vmatmul.mubr.bf16.gmra.mrb[12].mxu1 %v6062_v54  ;;  %v5678_v54 = vld [vmem:[#allocation6] sm:$0x3] }
 0x24f   :  { %5330 = vmatmul.mubr.bf16.gmra.mrb[12].mxu0 %v6382_v30  ;;  %6513 = vmatpush1.bf16.msra.mxu1 %v7586_v42  ;;  %v8563_v30 = vrot.slane %v5650_v52, %v5654_v56 }
 0x250   :  { %5574 = vmatpush1.bf16.msra.mxu0 %v7586_v42  ;;  %6498 = vmatprep.subr.bf16.mxu1 %v7591_v8 }
 0x251   :  { %5575 = vmatprep.subr.bf16.mxu0 %v7591_v8  ;;  %5593 = vmatprep.mubr.bf16.mxu0 %v8002_v12  ;;  %v7603_v12 = vld [vmem:[#allocation2 + $0x10b4] ss:$8 sps:$4 sm:$0xff]  }
 0x252   :  { %5613 = vmatprep.mubr.bf16.mxu1 %v8038_v51  ;;  %v7601_v51 = vld [vmem:[#allocation2 + $0x10b0] ss:$8 sps:$4 sm:$0xff]  }
 0x253   :  { %6514 = vmatpush1.bf16.msra.mxu1 %v7589_v63 }
 0x254   :  { %5576 = vmatpush1.bf16.msra.mxu0 %v7589_v63  ;;  %6499 = vmatprep.subr.bf16.mxu1 %v7594_v29  ;;  %v8565_v63 = vrot.slane %v5650_v52, %v5658_v33 }
 0x255   :  { %5577 = vmatprep.subr.bf16.mxu0 %v7594_v29 }
 0x257   :  { %6515 = vmatpush1.bf16.msra.mxu1 %v7592_v61 }
 0x258   :  { %5578 = vmatpush1.bf16.msra.mxu0 %v7592_v61  ;;  %6500 = vmatprep.subr.bf16.mxu1 %v7597_v18  ;;  %v8567_v61 = vrot.slane %v5678_v54, %v5654_v56 }
 0x259   :  { %5579 = vmatprep.subr.bf16.mxu0 %v7597_v18 }
 0x25b   :  { %6516 = vmatpush1.bf16.msra.mxu1 %v7595_v25 }
 0x25c   :  { %5580 = vmatpush1.bf16.msra.mxu0 %v7595_v25  ;;  %6501 = vmatprep.subr.bf16.mxu1 %v7600_v17 }
 0x25d   :  { %5581 = vmatprep.subr.bf16.mxu0 %v7600_v17 }
 0x25f   :  { %6517 = vmatpush1.bf16.msra.mxu1 %v7598_v20 }
 0x260   :  { %5582 = vmatpush1.bf16.msra.mxu0 %v7598_v20  ;;  %6502 = vmatprep.subr.bf16.mxu1 %v7603_v12 }
 0x261   :  { %5583 = vmatprep.subr.bf16.mxu0 %v7603_v12  ;;  %v8569_v12 = vrot.slane %v5678_v54, %v5658_v33 }
 0x263   :  { %6518 = vmatpush1.bf16.msra.mxu1 %v7601_v51 }
 0x264   :  { %5584 = vmatpush1.bf16.msra.mxu0 %v7601_v51  ;;  %6503 = vmatprep.subr.bf16.mxu1 %v7606_v53 }
 0x265   :  { %5585 = vmatprep.subr.bf16.mxu0 %v7606_v53 }
 0x267   :  { %6519 = vmatpush1.bf16.msra.mxu1 %v7604_v48 }
 0x268   :  { %5586 = vmatpush1.bf16.msra.mxu0 %v7604_v48  ;;  %6504 = vmatprep.subr.bf16.mxu1 %v7609_v57 }
 0x269   :  { %5587 = vmatprep.subr.bf16.mxu0 %v7609_v57 }
 0x26b   :  { %6520 = vmatpush1.bf16.msra.mxu1 %v7607_v27 }
 0x26c   :  { %5588 = vmatpush1.bf16.msra.mxu0 %v7607_v27  ;;  %6505 = vmatprep.subr.bf16.mxu1 %v7612_v58 }
 0x26d   :  { %5589 = vmatprep.subr.bf16.mxu0 %v7612_v58 }
 0x26f   :  { %6521 = vmatpush1.bf16.msra.mxu1 %v7610_v46 }
 0x270   :  { %5590 = vmatpush1.bf16.msra.mxu0 %v7610_v46  ;;  %6506 = vmatprep.subr.bf16.mxu1 %v7615_v32 }
 0x271   :  { %5591 = vmatprep.subr.bf16.mxu0 %v7615_v32 }
 0x273   :  { %6522 = vmatpush1.bf16.msra.mxu1 %v7613_v7 }
 0x274   :  { %5592 = vmatpush1.bf16.msra.mxu0 %v7613_v7 }
 0x276   :  { %5614 = vmatmul.mubr.bf16.vlgmr.msra.gmra.mrb[16].mxu1 %v8055_v0 }
 0x277   :  { %5594 = vmatmul.mubr.bf16.vlgmr.msra.gmra.mrb[0].mxu0 %v8014_v37  ;;  %5623 = vmatprep.mubr.bf16.mxu1 %v6419_v60 }
 0x278   :  { %5603 = vmatprep.mubr.bf16.mxu0 %v6417_v24 }
 0x27e   :  { %5624 = vmatmul.mubr.bf16.gmra.mrb[20].mxu1 %v6418_v6 }
 0x27f   :  { %5604 = vmatmul.mubr.bf16.gmra.mrb[4].mxu0 %v6416_v16 }
 0x309   :  { %v2817_v34 = vpop.f32.mrb[0].mxu1 }
 0x30a   :  { %v2819_v35 = vpop.f32.mrb[1].mxu1 }
 0x30b   :  { %v2821_v62 = vpop.f32.mrb[2].mxu1 }
 0x30c   :  { %v2823_v44 = vpop.f32.mrb[3].mxu1 }
 0x311   :  { %v8549_v28 = vpop.f32.mrb[4].mxu1 }
 0x312   :  { %v8551_v2 = vpop.f32.mrb[5].mxu1 }
 0x313   :  { %v8553_v13 = vpop.f32.mrb[6].mxu1 }
 0x314   :  { %v8555_v37 = vpop.f32.mrb[7].mxu1 }
 0x319   :  { %v2837_v0 = vpop.f32.mrb[8].mxu1 }
 0x31a   :  { %v5321_v5 = vpop.f32.mrb[8].mxu0  ;;  %v2839_v10 = vpop.f32.mrb[9].mxu1 }
 0x31b   :  { %v6531_v15 = vadd.f32 %v5321_v5, %v2837_v0  ;;  %v5323_v19 = vpop.f32.mrb[9].mxu0  ;;  %v2841_v43 = vpop.f32.mrb[10].mxu1 }
 0x31c   :  { %v6533_v4 = vadd.f32 %v5323_v19, %v2839_v10  ;;  %v5325_v9 = vpop.f32.mrb[10].mxu0  ;;  %v2843_v31 = vpop.f32.mrb[11].mxu1 }
 0x31d   :  { %v6535_v14 = vadd.f32 %v5325_v9, %v2841_v43  ;;  %v5327_v38 = vpop.f32.mrb[11].mxu0 }
 0x31e   :  { %v6537_v55 = vadd.f32 %v5327_v38, %v2843_v31 }
 0x321   :  { %v2847_v22 = vpop.f32.mrb[12].mxu1 }
 0x322   :  { %v5331_v59 = vpop.f32.mrb[12].mxu0  ;;  %v2849_v3 = vpop.f32.mrb[13].mxu1 }
 0x323   :  { %v6539_v23 = vadd.f32 %v5331_v59, %v2847_v22  ;;  %v5333_v40 = vpop.f32.mrb[13].mxu0  ;;  %v2851_v1 = vpop.f32.mrb[14].mxu1 }
 0x324   :  { %v8557_v21 = vadd.f32 %v5333_v40, %v2849_v3  ;;  %v5335_v39 = vpop.f32.mrb[14].mxu0  ;;  %v2853_v47 = vpop.f32.mrb[15].mxu1 }
 0x325   :  { %v8559_v41 = vadd.f32 %v5335_v39, %v2851_v1  ;;  %v5337_v36 = vpop.f32.mrb[15].mxu0 }
 0x326   :  { %v8561_v45 = vadd.f32 %v5337_v36, %v2853_v47 }
 0x349   :  { %v5615_v8 = vpop.f32.mrb[16].mxu1 }
 0x34a   :  { %v5595_v42 = vpop.f32.mrb[0].mxu0  ;;  %v6532_v18 = vadd.f32 %v6531_v15, %v5615_v8  ;;  %v5617_v17 = vpop.f32.mrb[17].mxu1 }
 0x34b   :  { %v6523_v29 = vadd.f32 %v5595_v42, %v2817_v34  ;;  %v5597_v25 = vpop.f32.mrb[1].mxu0  ;;  %v6534_v51 = vadd.f32 %v6533_v4, %v5617_v17  ;;  %v5619_v48 = vpop.f32.mrb[18].mxu1 }
 0x34c   :  { %v6524_v20 = vadd.f32 %v5597_v25, %v2819_v35  ;;  %v5599_v53 = vpop.f32.mrb[2].mxu0  ;;  %v5670_v27 = vmul.f32 %v6532_v18, %v8563_v30  ;;  %v6536_v46 = vadd.f32 %v6535_v14, %v5619_v48  ;;  %v5621_v7 = vpop.f32.mrb[19].mxu1 }
 0x34d   :  { %v5662_v57 = vmul.f32 %v6523_v29, %v8563_v30  ;;  %v6525_v58 = vadd.f32 %v5599_v53, %v2821_v62  ;;  %v5601_v32 = vpop.f32.mrb[3].mxu0  ;;  %v5671_v24 = vmul.f32 %v6534_v51, %v8565_v63  ;;  %v6538_v60 = vadd.f32 %v6537_v55, %v5621_v7 }
 0x34e   :  { %v5663_v11 = vmul.f32 %v6524_v20, %v8565_v63  ;;  %v6526_v50 = vadd.f32 %v5601_v32, %v2823_v44  ;;  %v5698_v6 = vadd.f32 %v8567_v61, %v5670_v27  ;;  %v5672_v35 = vmul.f32 %v6536_v46, %v8563_v30 }
 0x34f   :  { %v5690_v16 = vadd.f32 %v8567_v61, %v5662_v57  ;;  %v5664_v34 = vmul.f32 %v6525_v58, %v8563_v30  ;;  %v5699_v62 = vadd.f32 %v8569_v12, %v5671_v24  ;;  %v5673_v15 = vmul.f32 %v6538_v60, %v8565_v63 }
 0x350   :  { %v5691_v0 = vadd.f32 %v8569_v12, %v5663_v11  ;;  %v5665_v5 = vmul.f32 %v6526_v50, %v8565_v63  ;;  %v5700_v44 = vadd.f32 %v8567_v61, %v5672_v35 }
 0x351   :  { %v5692_v10 = vadd.f32 %v8567_v61, %v5664_v34  ;;  %v5710_v4 = vmax.f32 %v5698_v6, %v5699_v62  ;;  %v5701_v9 = vadd.f32 %v8569_v12, %v5673_v15  ;;  %v5625_v31 = vpop.f32.mrb[20].mxu1 }
 0x352   :  { %v5706_v19 = vmax.f32 %v5690_v16, %v5691_v0  ;;  %v5693_v43 = vadd.f32 %v8569_v12, %v5665_v5  ;;  %v5605_v14 = vpop.f32.mrb[4].mxu0  ;;  %v6540_v55 = vadd.f32 %v6539_v23, %v5625_v31  ;;  %v5627_v59 = vpop.f32.mrb[21].mxu1 }
 0x353   :  { %v6527_v38 = vadd.f32 %v5605_v14, %v8549_v28  ;;  %v5607_v22 = vpop.f32.mrb[5].mxu0  ;;  %v5718_v40 = vmax.f32 %v5710_v4, 0.0  ;;  %v5711_v39 = vmax.f32 %v5700_v44, %v5701_v9  ;;  %v5629_v36 = vpop.f32.mrb[22].mxu1  ;;  %v6542_v52 = vadd.f32 %v8557_v21, %v5627_v59 }
 0x354   :  { %v5714_v3 = vmax.f32 %v5706_v19, 0.0  ;;  %v5707_v1 = vmax.f32 %v5692_v10, %v5693_v43  ;;  %v5609_v47 = vpop.f32.mrb[6].mxu0  ;;  %v5674_v26 = vmul.f32 %v6540_v55, %v8563_v30  ;;  %v6528_v56 = vadd.f32 %v5607_v22, %v8551_v2  ;;  %v5631_v54 = vpop.f32.mrb[23].mxu1 }
 0x355   :  { %v5666_v49 = vmul.f32 %v6527_v38, %v8563_v30  ;;  %v5611_v33 = vpop.f32.mrb[7].mxu0  ;;  %v5719_v23 = vmax.f32 %v5711_v39, 0.0  ;;  %v6529_v42 = vadd.f32 %v5609_v47, %v8553_v13  ;;  %v6544_v8 = vadd.f32 %v8559_v41, %v5629_v36 }
 0x356   :  { %v5715_v28 = vmax.f32 %v5707_v1, 0.0  ;;  %v5702_v18 = vadd.f32 %v8567_v61, %v5674_v26  ;;  %v5667_v25 = vmul.f32 %v6528_v56, %v8565_v63  ;;  %v5675_v17 = vmul.f32 %v6542_v52, %v8565_v63 }
 0x357   :  { %v5694_v29 = vadd.f32 %v8567_v61, %v5666_v49  ;;  %v6481_v2 = vpack.c.bf16 %v5719_v23, %v5718_v40  ;;  %v5668_v21 = vmul.f32 %v6529_v42, %v8563_v30  ;;  %v5676_v51 = vmul.f32 %v6544_v8, %v8563_v30 }
 0x358   :  { %v6471_v20 = vpack.c.bf16 %v5715_v28, %v5714_v3  ;;  %v5695_v53 = vadd.f32 %v8569_v12, %v5667_v25  ;;  %v5703_v13 = vadd.f32 %v8569_v12, %v5675_v17  ;;  %v6530_v41 = vadd.f32 %v5611_v33, %v8555_v37 }
 0x359   :  { %v6546_v48 = vadd.f32 %v8561_v45, %v5631_v54  ;;  %6489 = vst [vmem:[%s8626_s4 + $0x10] sm:$0xff] %v6481_v2   ;;  %v5696_v57 = vadd.f32 %v8567_v61, %v5668_v21  ;;  %v5704_v30 = vadd.f32 %v8567_v61, %v5676_v51 }
 0x35a   :  { %6472 = vst [vmem:[%s8626_s4] sm:$0xff] %v6471_v20   ;;  %v5708_v27 = vmax.f32 %v5694_v29, %v5695_v53  ;;  %v5712_v58 = vmax.f32 %v5702_v18, %v5703_v13  ;;  %v5669_v46 = vmul.f32 %v6530_v41, %v8565_v63 }
 0x35b   :  { %v5677_v37 = vmul.f32 %v6546_v48, %v8565_v63 }
 0x35c   :  { %v5697_v45 = vadd.f32 %v8569_v12, %v5669_v46  ;;  %v5716_v24 = vmax.f32 %v5708_v27, 0.0  ;;  %v5720_v50 = vmax.f32 %v5712_v58, 0.0 }
 0x35d   :  { %v5705_v32 = vadd.f32 %v8569_v12, %v5677_v37 }
 0x35e   :  { %v5709_v7 = vmax.f32 %v5696_v57, %v5697_v45 }
 0x35f   :  { %v5713_v11 = vmax.f32 %v5704_v30, %v5705_v32 }
 0x360   :  { %v5717_v60 = vmax.f32 %v5709_v7, 0.0 }
 0x361   :  { %v5721_v16 = vmax.f32 %v5713_v11, 0.0 }
 0x362   :  { %v6476_v6 = vpack.c.bf16 %v5717_v60, %v5716_v24 }
 0x363   :  { %v6486_v34 = vpack.c.bf16 %v5721_v16, %v5720_v50 }
 0x364   :  { %6488 = vst [vmem:[%s8626_s4 + $0x8] sm:$0xff] %v6476_v6  }
 0x365   :  { %6490 = vst [vmem:[%s8626_s4 + $0x18] sm:$0xff] %v6486_v34  }
 0x366   :  { %5766 = vsyncpa [#allocation3], 1 }
 0x367   :  { %5767 = vsyncpa [#allocation5], 1 }

</bundles_post_ra>
